<compile_context>
chip_gen: v5e
topology: v5e:2x2
jax: 0.10.0
libtpu: 0.0.40
codegen_flags: <defaults>
</compile_context>

<pallas_src>
import jax
import jax.numpy as jnp
from jax.experimental import pallas as pl
from jax.experimental.pallas import tpu as pltpu


def _ann_kernel(x_ref, w1, b1, w2, b2, w3, b3, w4, b4, w5, b5, o_ref):
    # Layer 1..4: matmul (f32 acc on MXU) + bias + sin (EUP); layer 5: no sin.
    h = jnp.dot(x_ref[...], w1[...], preferred_element_type=jnp.float32) + b1[...]
    h = jnp.sin(h)
    h = jnp.dot(h, w2[...], preferred_element_type=jnp.float32) + b2[...]
    h = jnp.sin(h)
    h = jnp.dot(h, w3[...], preferred_element_type=jnp.float32) + b3[...]
    h = jnp.sin(h)
    h = jnp.dot(h, w4[...], preferred_element_type=jnp.float32) + b4[...]
    h = jnp.sin(h)
    out = jnp.dot(h, w5[...], preferred_element_type=jnp.float32) + b5[...]
    o_ref[...] = out.astype(o_ref.dtype)


def ann_forward(x, params, *, max_tile_m=4096):
    """Fused forward pass of the 5-layer sin-MLP.

    params: tuple of 5 (w, b) pairs; w has shape (in_dim, out_dim), b (out_dim,).
    x: (..., in_dim) float32 (leading dims are flattened into the batch).
    """
    (w1, b1), (w2, b2), (w3, b3), (w4, b4), (w5, b5) = params
    in_dim = w1.shape[0]
    out_dim = w5.shape[1]

    lead_shape = x.shape[:-1]
    x2d = x.reshape(-1, in_dim)
    M = x2d.shape[0]
    orig_M = M

    # Tile only over the batch dimension.  Fast path (no pad, no slice):
    # a single full-extent block.  Otherwise use large multiple-of-8 row tiles.
    if M <= max_tile_m:
        tm = M               # full extent -> no (8,128) divisibility constraint
        pad = 0
    else:
        tm = max_tile_m
        pad = (-M) % tm
        if pad:
            x2d = jnp.pad(x2d, ((0, pad), (0, 0)))
        M = M + pad

    grid = (M // tm,)

    # Biases as (1, dim) rows so they broadcast cleanly inside the kernel.
    b1r, b2r, b3r, b4r, b5r = (b.reshape(1, -1) for b in (b1, b2, b3, b4, b5))

    def full(a):
        # Whole (tiny) weight / bias resident in VMEM; same block every step.
        return pl.BlockSpec(a.shape, lambda i: (0,) * a.ndim)

    out = pl.pallas_call(
        _ann_kernel,
        out_shape=jax.ShapeDtypeStruct((M, out_dim), x.dtype),
        grid=grid,
        in_specs=[
            pl.BlockSpec((tm, in_dim), lambda i: (i, 0)),
            full(w1), full(b1r),
            full(w2), full(b2r),
            full(w3), full(b3r),
            full(w4), full(b4r),
            full(w5), full(b5r),
        ],
        out_specs=pl.BlockSpec((tm, out_dim), lambda i: (i, 0)),
        compiler_params=pltpu.CompilerParams(
            dimension_semantics=("parallel",),
            vmem_limit_bytes=64 * 1024 * 1024,
        ),
    )(x2d, w1, b1r, w2, b2r, w3, b3r, w4, b4r, w5, b5r)

    if pad:
        out = out[:orig_M]
    return out.reshape(*lead_shape, out_dim)


def _ann_reference(x, params):
    h = x
    n = len(params)
    for idx, (w, b) in enumerate(params):
        h = h @ w + b
        if idx < n - 1:
            h = jnp.sin(h)
    return h


if __name__ == "__main__":
    key = jax.random.PRNGKey(0)
    in_neuron, hidden_neuron, out_neuron = 16, 32, 8
    batch = 64

    keys = jax.random.split(key, 11)
    x = jax.random.normal(keys[0], (batch, in_neuron), dtype=jnp.float32)

    def init_layer(kw, kb, fan_in, fan_out):
        bound = 1.0 / (fan_in ** 0.5)          # matches nn.Linear default init range
        w = jax.random.uniform(kw, (fan_in, fan_out), jnp.float32, -bound, bound)
        b = jax.random.uniform(kb, (fan_out,), jnp.float32, -bound, bound)
        return w, b

    params = (
        init_layer(keys[1], keys[2], in_neuron, hidden_neuron),
        init_layer(keys[3], keys[4], hidden_neuron, hidden_neuron),
        init_layer(keys[5], keys[6], hidden_neuron, hidden_neuron),
        init_layer(keys[7], keys[8], hidden_neuron, hidden_neuron),
        init_layer(keys[9], keys[10], hidden_neuron, out_neuron),
    )

    y = ann_forward(x, params)
    jax.block_until_ready(y)

    # Pure-JAX reference of the same forward pass (tolerance accounts for MXU
    # default-precision f32 matmuls vs. XLA's dot).
    y_ref = _ann_reference(x, params)
    assert y.shape == (batch, out_neuron) and y.dtype == x.dtype
    assert jnp.allclose(y, y_ref, atol=2e-2, rtol=2e-2), float(
        jnp.max(jnp.abs(y - y_ref))
    )

    print("KERNEL_OK")
</pallas_src>

<mosaic_0001>
module attributes {stable_mosaic.version = 11 : i64} {
  func.func @_ann_kernel(%arg0: i32, %arg1: memref<64x16xf32, #tpu.memory_space<vmem>>, %arg2: memref<16x32xf32, #tpu.memory_space<vmem>>, %arg3: memref<1x32xf32, #tpu.memory_space<vmem>>, %arg4: memref<32x32xf32, #tpu.memory_space<vmem>>, %arg5: memref<1x32xf32, #tpu.memory_space<vmem>>, %arg6: memref<32x32xf32, #tpu.memory_space<vmem>>, %arg7: memref<1x32xf32, #tpu.memory_space<vmem>>, %arg8: memref<32x32xf32, #tpu.memory_space<vmem>>, %arg9: memref<1x32xf32, #tpu.memory_space<vmem>>, %arg10: memref<32x8xf32, #tpu.memory_space<vmem>>, %arg11: memref<1x8xf32, #tpu.memory_space<vmem>>, %arg12: memref<64x8xf32, #tpu.memory_space<vmem>>) attributes {dimension_semantics = [#tpu.dimension_semantics<parallel>], iteration_bounds = array<i64: 1>, scalar_prefetch = 0 : i64, scratch_operands = 0 : i64, tpu.core_type = #tpu.core_type<tc>, window_params = [{transform_indices = @transform_0, window_bounds = array<i64: 64, 16>}, {pipeline_mode = #tpu.pipeline_mode<synchronous>, transform_indices = @transform_1, window_bounds = array<i64: 16, 32>}, {pipeline_mode = #tpu.pipeline_mode<synchronous>, transform_indices = @transform_2, window_bounds = array<i64: 1, 32>}, {pipeline_mode = #tpu.pipeline_mode<synchronous>, transform_indices = @transform_3, window_bounds = array<i64: 32, 32>}, {pipeline_mode = #tpu.pipeline_mode<synchronous>, transform_indices = @transform_4, window_bounds = array<i64: 1, 32>}, {pipeline_mode = #tpu.pipeline_mode<synchronous>, transform_indices = @transform_5, window_bounds = array<i64: 32, 32>}, {pipeline_mode = #tpu.pipeline_mode<synchronous>, transform_indices = @transform_6, window_bounds = array<i64: 1, 32>}, {pipeline_mode = #tpu.pipeline_mode<synchronous>, transform_indices = @transform_7, window_bounds = array<i64: 32, 32>}, {pipeline_mode = #tpu.pipeline_mode<synchronous>, transform_indices = @transform_8, window_bounds = array<i64: 1, 32>}, {pipeline_mode = #tpu.pipeline_mode<synchronous>, transform_indices = @transform_9, window_bounds = array<i64: 32, 8>}, {pipeline_mode = #tpu.pipeline_mode<synchronous>, transform_indices = @transform_10, window_bounds = array<i64: 1, 8>}, {transform_indices = @transform_11, window_bounds = array<i64: 64, 8>}]} {
    %c0 = arith.constant 0 : index
    %c0_0 = arith.constant 0 : index
    %0 = vector.load %arg1[%c0, %c0_0] : memref<64x16xf32, #tpu.memory_space<vmem>>, vector<64x16xf32>
    %c0_1 = arith.constant 0 : index
    %c0_2 = arith.constant 0 : index
    %1 = vector.load %arg2[%c0_1, %c0_2] : memref<16x32xf32, #tpu.memory_space<vmem>>, vector<16x32xf32>
    %cst = arith.constant dense<0.000000e+00> : vector<64x32xf32>
    %2 = tpu.matmul %0, %1, %cst {dimension_numbers = #tpu.dot_dimension_numbers<[1], [0], [0], [1], [0, 0, 1, 1], [], []>} : vector<64x16xf32>, vector<16x32xf32>, vector<64x32xf32> -> vector<64x32xf32>
    %c0_3 = arith.constant 0 : index
    %c0_4 = arith.constant 0 : index
    %3 = vector.load %arg3[%c0_3, %c0_4] : memref<1x32xf32, #tpu.memory_space<vmem>>, vector<1x32xf32>
    %4 = vector.broadcast %3 : vector<1x32xf32> to vector<64x32xf32>
    %5 = arith.addf %2, %4 : vector<64x32xf32>
    %6 = math.sin %5 : vector<64x32xf32>
    %c0_5 = arith.constant 0 : index
    %c0_6 = arith.constant 0 : index
    %7 = vector.load %arg4[%c0_5, %c0_6] : memref<32x32xf32, #tpu.memory_space<vmem>>, vector<32x32xf32>
    %cst_7 = arith.constant dense<0.000000e+00> : vector<64x32xf32>
    %8 = tpu.matmul %6, %7, %cst_7 {dimension_numbers = #tpu.dot_dimension_numbers<[1], [0], [0], [1], [0, 0, 1, 1], [], []>} : vector<64x32xf32>, vector<32x32xf32>, vector<64x32xf32> -> vector<64x32xf32>
    %c0_8 = arith.constant 0 : index
    %c0_9 = arith.constant 0 : index
    %9 = vector.load %arg5[%c0_8, %c0_9] : memref<1x32xf32, #tpu.memory_space<vmem>>, vector<1x32xf32>
    %10 = vector.broadcast %9 : vector<1x32xf32> to vector<64x32xf32>
    %11 = arith.addf %8, %10 : vector<64x32xf32>
    %12 = math.sin %11 : vector<64x32xf32>
    %c0_10 = arith.constant 0 : index
    %c0_11 = arith.constant 0 : index
    %13 = vector.load %arg6[%c0_10, %c0_11] : memref<32x32xf32, #tpu.memory_space<vmem>>, vector<32x32xf32>
    %cst_12 = arith.constant dense<0.000000e+00> : vector<64x32xf32>
    %14 = tpu.matmul %12, %13, %cst_12 {dimension_numbers = #tpu.dot_dimension_numbers<[1], [0], [0], [1], [0, 0, 1, 1], [], []>} : vector<64x32xf32>, vector<32x32xf32>, vector<64x32xf32> -> vector<64x32xf32>
    %c0_13 = arith.constant 0 : index
    %c0_14 = arith.constant 0 : index
    %15 = vector.load %arg7[%c0_13, %c0_14] : memref<1x32xf32, #tpu.memory_space<vmem>>, vector<1x32xf32>
    %16 = vector.broadcast %15 : vector<1x32xf32> to vector<64x32xf32>
    %17 = arith.addf %14, %16 : vector<64x32xf32>
    %18 = math.sin %17 : vector<64x32xf32>
    %c0_15 = arith.constant 0 : index
    %c0_16 = arith.constant 0 : index
    %19 = vector.load %arg8[%c0_15, %c0_16] : memref<32x32xf32, #tpu.memory_space<vmem>>, vector<32x32xf32>
    %cst_17 = arith.constant dense<0.000000e+00> : vector<64x32xf32>
    %20 = tpu.matmul %18, %19, %cst_17 {dimension_numbers = #tpu.dot_dimension_numbers<[1], [0], [0], [1], [0, 0, 1, 1], [], []>} : vector<64x32xf32>, vector<32x32xf32>, vector<64x32xf32> -> vector<64x32xf32>
    %c0_18 = arith.constant 0 : index
    %c0_19 = arith.constant 0 : index
    %21 = vector.load %arg9[%c0_18, %c0_19] : memref<1x32xf32, #tpu.memory_space<vmem>>, vector<1x32xf32>
    %22 = vector.broadcast %21 : vector<1x32xf32> to vector<64x32xf32>
    %23 = arith.addf %20, %22 : vector<64x32xf32>
    %24 = math.sin %23 : vector<64x32xf32>
    %c0_20 = arith.constant 0 : index
    %c0_21 = arith.constant 0 : index
    %25 = vector.load %arg10[%c0_20, %c0_21] : memref<32x8xf32, #tpu.memory_space<vmem>>, vector<32x8xf32>
    %cst_22 = arith.constant dense<0.000000e+00> : vector<64x8xf32>
    %26 = tpu.matmul %24, %25, %cst_22 {dimension_numbers = #tpu.dot_dimension_numbers<[1], [0], [0], [1], [0, 0, 1, 1], [], []>} : vector<64x32xf32>, vector<32x8xf32>, vector<64x8xf32> -> vector<64x8xf32>
    %c0_23 = arith.constant 0 : index
    %c0_24 = arith.constant 0 : index
    %27 = vector.load %arg11[%c0_23, %c0_24] : memref<1x8xf32, #tpu.memory_space<vmem>>, vector<1x8xf32>
    %28 = vector.broadcast %27 : vector<1x8xf32> to vector<64x8xf32>
    %29 = arith.addf %26, %28 : vector<64x8xf32>
    %c0_25 = arith.constant 0 : index
    %c0_26 = arith.constant 0 : index
    %30 = vector.load %arg12[%c0_25, %c0_26] : memref<64x8xf32, #tpu.memory_space<vmem>>, vector<64x8xf32>
    tpu.vector_store %arg12[%c0_25, %c0_26], %29 {strides = array<i32>} : memref<64x8xf32, #tpu.memory_space<vmem>>, vector<64x8xf32>,
    return
  }
  func.func @transform_0(%arg0: i32) -> (i32, i32) {
    %c0_i32 = arith.constant 0 : i32
    %c0_i32_0 = arith.constant 0 : i32
    return %arg0, %c0_i32 : i32, i32
  }
  func.func @transform_1(%arg0: i32) -> (i32, i32) {
    %c0_i32 = arith.constant 0 : i32
    %c0_i32_0 = arith.constant 0 : i32
    %c0_i32_1 = arith.constant 0 : i32
    return %c0_i32, %c0_i32_0 : i32, i32
  }
  func.func @transform_2(%arg0: i32) -> (i32, i32) {
    %c0_i32 = arith.constant 0 : i32
    %c0_i32_0 = arith.constant 0 : i32
    %c0_i32_1 = arith.constant 0 : i32
    return %c0_i32, %c0_i32_0 : i32, i32
  }
  func.func @transform_3(%arg0: i32) -> (i32, i32) {
    %c0_i32 = arith.constant 0 : i32
    %c0_i32_0 = arith.constant 0 : i32
    %c0_i32_1 = arith.constant 0 : i32
    return %c0_i32, %c0_i32_0 : i32, i32
  }
  func.func @transform_4(%arg0: i32) -> (i32, i32) {
    %c0_i32 = arith.constant 0 : i32
    %c0_i32_0 = arith.constant 0 : i32
    %c0_i32_1 = arith.constant 0 : i32
    return %c0_i32, %c0_i32_0 : i32, i32
  }
  func.func @transform_5(%arg0: i32) -> (i32, i32) {
    %c0_i32 = arith.constant 0 : i32
    %c0_i32_0 = arith.constant 0 : i32
    %c0_i32_1 = arith.constant 0 : i32
    return %c0_i32, %c0_i32_0 : i32, i32
  }
  func.func @transform_6(%arg0: i32) -> (i32, i32) {
    %c0_i32 = arith.constant 0 : i32
    %c0_i32_0 = arith.constant 0 : i32
    %c0_i32_1 = arith.constant 0 : i32
    return %c0_i32, %c0_i32_0 : i32, i32
  }
  func.func @transform_7(%arg0: i32) -> (i32, i32) {
    %c0_i32 = arith.constant 0 : i32
    %c0_i32_0 = arith.constant 0 : i32
    %c0_i32_1 = arith.constant 0 : i32
    return %c0_i32, %c0_i32_0 : i32, i32
  }
  func.func @transform_8(%arg0: i32) -> (i32, i32) {
    %c0_i32 = arith.constant 0 : i32
    %c0_i32_0 = arith.constant 0 : i32
    %c0_i32_1 = arith.constant 0 : i32
    return %c0_i32, %c0_i32_0 : i32, i32
  }
  func.func @transform_9(%arg0: i32) -> (i32, i32) {
    %c0_i32 = arith.constant 0 : i32
    %c0_i32_0 = arith.constant 0 : i32
    %c0_i32_1 = arith.constant 0 : i32
    return %c0_i32, %c0_i32_0 : i32, i32
  }
  func.func @transform_10(%arg0: i32) -> (i32, i32) {
    %c0_i32 = arith.constant 0 : i32
    %c0_i32_0 = arith.constant 0 : i32
    %c0_i32_1 = arith.constant 0 : i32
    return %c0_i32, %c0_i32_0 : i32, i32
  }
  func.func @transform_11(%arg0: i32) -> (i32, i32) {
    %c0_i32 = arith.constant 0 : i32
    %c0_i32_0 = arith.constant 0 : i32
    return %arg0, %c0_i32 : i32, i32
  }
}

</mosaic_0001>

<bundles_post_ra>
// kernel: tpu_custom_call.1
= control target key start
LH: loop header
LB: loop body
LE: loop exit
PB: predicated region body
PF: predicated region fallthrough
CT: control target
= control target key end

     0   :  { %16 = vsyncpa [#allocation3], 0  ;;  %s5584_s20 = smov [#allocation2]   ;;  %s5585_s22 = smov 128   ;;  %s10797_s0 = inlined_call_operand.vmem [shape: f32[64,16], index: 0, kind: input, shape index: {}]   ;;  %s10798_s1 = inlined_call_operand.hbm [shape: f32[16,32], index: 1, kind: input, shape index: {}]   ;;  %s10799_s2 = inlined_call_operand.vmem [shape: f32[1,32], index: 2, kind: input, shape index: {}]   ;;  %s10800_s3 = inlined_call_operand.vmem [shape: f32[32,32], index: 3, kind: input, shape index: {}]   ;;  %s10801_s4 = inlined_call_operand.vmem [shape: f32[1,32], index: 4, kind: input, shape index: {}]   ;;  %s10802_s5 = inlined_call_operand.vmem [shape: f32[32,32], index: 5, kind: input, shape index: {}]   ;;  %s10803_s6 = inlined_call_operand.vmem [shape: f32[1,32], index: 6, kind: input, shape index: {}]   ;;  %s10804_s7 = inlined_call_operand.vmem [shape: f32[32,32], index: 7, kind: input, shape index: {}]   ;;  %s10805_s8 = inlined_call_operand.vmem [shape: f32[1,32], index: 8, kind: input, shape index: {}]   ;;  %s10806_s9 = inlined_call_operand.vmem [shape: f32[32,8], index: 9, kind: input, shape index: {}]   ;;  %s10807_s10 = inlined_call_operand.vmem [shape: f32[1,8], index: 10, kind: input, shape index: {}]   ;;  %s10808_s11 = inlined_call_operand.vmem [shape: f32[64,8], index: 11, kind: output, shape index: {}]  }
   0x1   :  { %s23_s19 = sshll.u32 %s10798_s1, 4  ;;  %s25_s21 = sshll.u32 %s5584_s20, 4  ;;  %s24_s19 = int_to_ptr.hbm [resolvable:$true] %s23_s19  ;;  %s26_s21 = int_to_ptr.vmem [resolvable:$true] %s25_s21 }
   0x2   :  { %s5586_s23 = smov 8  }
   0x3   :  { %31 = dma.hbm_to_vmem [thread:$0]  %s24_s19, 256, %s26_s21, [#allocation3], %s5585_s22, %s5585_s22, %s5586_s23  }
   0x4   :  { %5582 = dma.done.wait [#allocation3], 256  }
   0x5   :  { %5583 = vsyncadd [#allocation3], 4294967040  ;;  %v63_v0 = vld [vmem:[#allocation2 + $0x8] sm:$0xff]  ;;  %v62_v1 = vld [vmem:[#allocation2] sm:$0xff]  ;;  %vm68_vm0 = vcmask 130048  }
   0x6   :  { %107 = vmatpush.msra.mxu0 %v63_v0  ;;  %5537 = vmatpush.msra.mxu1 %v63_v0  ;;  %v54_v2 = vld [vmem:[%s10797_s0] sm:$0xff]  ;;  %v56_v3 = vld [vmem:[%s10797_s0 + $0x10] sm:$0xff]  ;;  %v55_v6 = vld [vmem:[%s10797_s0 + $0x8] sm:$0xff]  ;;  %v10830_v31 = vmov 2475754826  }
   0x7   :  { %5538 = vmatpush.msra.mxu2 %v63_v0  ;;  %5539 = vmatpush.msra.mxu3 %v63_v0  ;;  %v58_v4 = vld [vmem:[%s10797_s0 + $0x20] sm:$0xff]  ;;  %v60_v5 = vld [vmem:[%s10797_s0 + $0x30] sm:$0xff]  ;;  %v57_v7 = vld [vmem:[%s10797_s0 + $0x18] sm:$0xff]  ;;  %v10828_v33 = vmov 2131351028  }
   0x8   :  { %108 = vmatpush.msra.mxu0 %v62_v1  ;;  %5540 = vmatpush.msra.mxu1 %v62_v1  ;;  %v59_v8 = vld [vmem:[%s10797_s0 + $0x28] sm:$0xff]  ;;  %v61_v9 = vld [vmem:[%s10797_s0 + $0x38] sm:$0xff]  ;;  %v5692_v10 = vld [vmem:[%s10799_s2] ss:$0 sm:$0xff]  ;;  %v10816_v36 = vmov 2102212464  }
   0x9   :  { %5541 = vmatpush.msra.mxu2 %v62_v1  ;;  %5542 = vmatpush.msra.mxu3 %v62_v1  ;;  %v10818_v39 = vmov 920167782   ;;  %v10820_v42 = vmov 1326507024   ;;  %v10826_v56 = vmov 683565275  }
   0xa   :  { %5401 = vmatmul.msk.f32.vlgmr.msra.gmra.mxu0 %vm68_vm0, %v54_v2  ;;  %5403 = vmatmul.msk.f32.vlgmr.msra.gmra.mxu1 %vm68_vm0, %v56_v3 }
   0xb   :  { %5405 = vmatmul.msk.f32.vlgmr.msra.gmra.mxu2 %vm68_vm0, %v58_v4  ;;  %5407 = vmatmul.msk.f32.vlgmr.msra.gmra.mxu3 %vm68_vm0, %v60_v5 }
  0x12   :  { %5402 = vmatmul.msk.f32.gmra.mxu0 %vm68_vm0, %v55_v6  ;;  %5404 = vmatmul.msk.f32.gmra.mxu1 %vm68_vm0, %v57_v7 }
  0x13   :  { %5406 = vmatmul.msk.f32.gmra.mxu2 %vm68_vm0, %v59_v8  ;;  %5408 = vmatmul.msk.f32.gmra.mxu3 %vm68_vm0, %v61_v9 }
  0x87   :  { %v110_v11 = vpop.f32.mrf.mxu0  ;;  %v116_v12 = vpop.f32.mrf.mxu1 }
  0x88   :  { %v5695_v13 = vadd.f32 %v5692_v10, %v110_v11  ;;  %v5698_v14 = vadd.f32 %v5692_v10, %v116_v12 }
  0x8a   :  { %11077 = vst [vmem:[#allocation5_spill] sm:$0xff] %v5698_v14  ;;  %v137_v15 = vand.u32 2139095040, %v5695_v13  ;;  %v447_v16 = vand.u32 2139095040, %v5698_v14  ;;  %v10812_v25 = vand.u32 2147483647, %v5695_v13 }
  0x8b   :  { %v10811_v28 = vand.u32 2147483647, %v5698_v14 }
  0x8c   :  { %v138_v17 = vshrl.u32 %v137_v15, 23  ;;  %v448_v19 = vshrl.u32 %v447_v16, 23  ;;  %v141_v44 = vand.u32 8388607, %v10812_v25 }
  0x8d   :  { %v451_v49 = vand.u32 8388607, %v10811_v28 }
  0x8e   :  { %v5409_v18 = vadd.s32 4294967169, %v138_v17  ;;  %v5415_v22 = vadd.s32 4294967169, %v448_v19  ;;  %v122_v24 = vpop.f32.mrf.mxu2  ;;  %v142_v53 = vor.u32 8388608, %v141_v44  ;;  %v128_v2 = vpop.f32.mrf.mxu3 }
  0x8f   :  { %v5707_v30 = vadd.f32 %v5692_v10, %v122_v24  ;;  %v452_v58 = vor.u32 8388608, %v451_v49  ;;  %v113_v4 = vpop.f32.mrf.mxu0  ;;  %v5751_v15 = vadd.f32 %v5692_v10, %v128_v2 }
  0x90   :  { %v144_v20 = vadd.s32 1, %v5409_v18  ;;  %v454_v29 = vadd.s32 1, %v5415_v22  ;;  %v5738_v0 = vshll.u32 %v142_v53, 8  ;;  %v5758_v19 = vadd.f32 %v5692_v10, %v113_v4 }
  0x91   :  { %11078 = vst [vmem:[#allocation6_spill] sm:$0xff] %v5707_v30  ;;  %v757_v50 = vand.u32 2139095040, %v5707_v30  ;;  %v5740_v3 = vshll.u32 %v452_v58, 8  ;;  %v10810_v7 = vand.u32 2147483647, %v5707_v30 }
  0x92   :  { %vm145_vm1 = vcmp.gt.s32.totalorder %v144_v20, 0  ;;  %vm455_vm3 = vcmp.gt.s32.totalorder %v454_v29, 0  ;;  %11080 = vst [vmem:[#allocation8_spill] sm:$0xff] %v5751_v15  ;;  %v183_v16 = vand.u32 65535, %v5738_v0  ;;  %v184_v17 = vshrl.u32 %v5738_v0, 16 }
  0x93   :  { %v146_v21 = vsel %vm145_vm1, %v144_v20, 0  ;;  %v456_v59 = vsel %vm455_vm3, %v454_v29, 0  ;;  %v758_v60 = vshrl.u32 %v757_v50, 23  ;;  %11079 = vst [vmem:[#allocation7_spill] sm:$0xff] %v5740_v3  ;;  %v5765_v22 = vand.u32 65535, %v5740_v3 }
  0x94   :  { %v148_v23 = vand.u32 31, %v146_v21  ;;  %v5703_v27 = vshrl.u32 %v146_v21, 5  ;;  %v458_v1 = vand.u32 31, %v456_v59  ;;  %11082 = vst [vmem:[#allocation10_spill] sm:$0xff] %v5758_v19  ;;  %v761_v29 = vand.u32 8388607, %v10810_v7 }
  0x95   :  { %v5421_v8 = vadd.s32 4294967169, %v758_v60  ;;  %v10809_v53 = vand.u32 2147483647, %v5751_v15 }
  0x96   :  { %v149_v26 = vsub.s32 32, %v148_v23  ;;  %v154_v32 = vshll.u32 %v10830_v31, %v148_v23  ;;  %v157_v35 = vshll.u32 %v10828_v33, %v148_v23  ;;  %v160_v38 = vshll.u32 %v10816_v36, %v148_v23 }
  0x97   :  { %v163_v41 = vshll.u32 %v10818_v39, %v148_v23  ;;  %vm169_vm2 = vcmp.lt.s32.totalorder %v5703_v27, 4  ;;  %vm166_vm4 = vcmp.lt.s32.totalorder %v5703_v27, 1  ;;  %vm168_vm5 = vcmp.lt.s32.totalorder %v5703_v27, 3 }
  0x98   :  { %v155_v34 = vshrl.u32 %v10828_v33, %v149_v26  ;;  %v158_v37 = vshrl.u32 %v10816_v36, %v149_v26  ;;  %v161_v40 = vshrl.u32 %v10818_v39, %v149_v26  ;;  %v164_v43 = vshrl.u32 %v10820_v42, %v149_v26 }
  0x99   :  { %v152_v51 = vshrl.u32 %v10830_v31, %v149_v26  ;;  %v151_v57 = vshll.u32 %v10826_v56, %v148_v23  ;;  %vm167_vm6 = vcmp.lt.s32.totalorder %v5703_v27, 2  ;;  %v150_v9 = vshrl.u32 %v10826_v56, %v149_v26 }
  0x9a   :  { %v156_v45 = vor.u32 %v155_v34, %v154_v32  ;;  %v159_v46 = vor.u32 %v158_v37, %v157_v35  ;;  %v162_v47 = vor.u32 %v161_v40, %v160_v38  ;;  %v165_v48 = vor.u32 %v164_v43, %v163_v41 }
  0x9b   :  { %v153_v61 = vor.u32 %v152_v51, %v151_v57  ;;  %v5755_v18 = vsub.s32 32, %v458_v1  ;;  %v5768_v23 = vshrl.u32 %v5740_v3, 16  ;;  %v764_v32 = vadd.s32 1, %v5421_v8 }
  0x9c   :  { %v179_v52 = vsel %vm169_vm2, %v165_v48, 1326507024  ;;  %v178_v54 = vsel %vm166_vm4, %v156_v45, %v159_v46  ;;  %v175_v63 = vsel %vm169_vm2, %v162_v47, 920167782  ;;  %v171_v5 = vsel %vm169_vm2, %v159_v46, 2102212464 }
  0x9d   :  { %v180_v55 = vsel %vm168_vm5, %v162_v47, %v179_v52  ;;  %v174_v11 = vsel %vm166_vm4, %v153_v61, %v156_v45  ;;  %v176_v12 = vsel %vm168_vm5, %v159_v46, %v175_v63  ;;  %11081 = vst [vmem:[#allocation9_spill] sm:$0xff] %v5755_v18  ;;  %v170_v20 = vsel %vm166_vm4, %v150_v9, %v153_v61 }
  0x9e   :  { %v181_v62 = vsel %vm167_vm6, %v178_v54, %v180_v55  ;;  %v172_v21 = vsel %vm168_vm5, %v156_v45, %v171_v5  ;;  %v177_v24 = vsel %vm167_vm6, %v174_v11, %v176_v12  ;;  %v5776_v34 = vshrl.u32 %v456_v59, 5 }
  0x9f   :  { %v186_v6 = vshrl.u32 %v181_v62, 16  ;;  %v461_v35 = vshll.u32 %v10826_v56, %v458_v1  ;;  %v464_v37 = vshll.u32 %v10830_v31, %v458_v1  ;;  %v1067_v38 = vand.u32 2139095040, %v5751_v15 }
  0xa0   :  { %v5783_v40 = vsel %vm167_vm6, %v170_v20, %v172_v21  ;;  %v185_v41 = vand.u32 65535, %v181_v62  ;;  %v462_v43 = vshrl.u32 %v10830_v31, %v5755_v18  ;;  %v465_v44 = vshrl.u32 %v10828_v33, %v5755_v18 }
  0xa1   :  { %v5772_v26 = vmul.u32 %v186_v6, %v183_v16  ;;  %v207_v45 = vand.u32 65535, %v177_v24  ;;  %v470_v46 = vshll.u32 %v10816_v36, %v458_v1  ;;  %vm765_vm7 = vcmp.gt.s32.totalorder %v764_v32, 0 }
  0xa2   :  { %v1068_v47 = vshrl.u32 %v1067_v38, 23  ;;  %v471_v49 = vshrl.u32 %v10818_v39, %v5755_v18  ;;  %v473_v27 = vshll.u32 %v10818_v39, %v458_v1  ;;  %v474_v50 = vshrl.u32 %v10820_v42, %v5755_v18 }
  0xa3   :  { %v191_v48 = vshll.u32 %v5772_v26, 16  ;;  %v208_v51 = vshrl.u32 %v177_v24, 16  ;;  %v187_v55 = vmul.u32 %v185_v41, %v183_v16  ;;  %v467_v57 = vshll.u32 %v10828_v33, %v458_v1 }
  0xa4   :  { %v5427_v54 = vadd.s32 4294967169, %v1068_v47  ;;  %v468_v58 = vshrl.u32 %v10816_v36, %v5755_v18  ;;  %v766_v59 = vsel %vm765_vm7, %v764_v32, 0  ;;  %v5802_v60 = vmul.u32 %v185_v41, %v184_v17 }
  0xa5   :  { %v190_v61 = vmul.u32 %v186_v6, %v184_v17  ;;  %v5804_v62 = vor.u32 %v462_v43, %v461_v35  ;;  %v5806_v63 = vor.u32 %v465_v44, %v464_v37  ;;  %vm195_vm8 = vc.u32 %v187_v55, %v191_v48 }
  0xa6   :  { %v5808_v2 = vmul.u32 %v207_v45, %v183_v16  ;;  %v472_v4 = vor.u32 %v471_v49, %v470_v46  ;;  %v475_v5 = vor.u32 %v474_v50, %v473_v27  ;;  %v5810_v8 = vmul.u32 %v208_v51, %v183_v16 }
  0xa7   :  { %11083 = vst [vmem:[#allocation11_spill] sm:$0xff] %v5804_v62  ;;  %vm479_vm9 = vcmp.lt.s32.totalorder %v5776_v34, 4  ;;  %v768_v1 = vand.u32 31, %v766_v59  ;;  %v1074_v9 = vadd.s32 1, %v5427_v54  ;;  %v5813_v11 = vmul.u32 %v207_v45, %v184_v17 }
  0xa8   :  { %11084 = vst [vmem:[#allocation12_spill] sm:$0xff] %v5806_v63  ;;  %v5815_v12 = vor.u32 %v468_v58, %v467_v57  ;;  %vm476_vm10 = vcmp.lt.s32.totalorder %v5776_v34, 1  ;;  %v292_v6 = vand.u32 2139095040, %v5758_v19  ;;  %v10813_v20 = vmov 0   ;;  %v119_v57 = vpop.f32.mrf.mxu1 }
  0xa9   :  { %v196_v21 = vsel %vm195_vm8, 1, %v10813_v20  ;;  %v762_v24 = vor.u32 8388608, %v761_v29  ;;  %v1071_v16 = vand.u32 8388607, %v10809_v53  ;;  %vm1075_vm11 = vcmp.gt.s32.totalorder %v1074_v9, 0 }
  0xaa   :  { %11085 = vst [vmem:[#allocation13_spill] sm:$0xff] %v5815_v12  ;;  %v5822_v32 = vmul.u32 %v208_v51, %v184_v17  ;;  %vm478_vm12 = vcmp.lt.s32.totalorder %v5776_v34, 3  ;;  %v485_v35 = vsel %vm479_vm9, %v472_v4, 920167782  ;;  %v489_v37 = vsel %vm479_vm9, %v475_v5, 1326507024 }
  0xab   :  { %v5830_v41 = vadd.s32 %v191_v48, %v187_v55  ;;  %v5832_v43 = vsub.s32 32, %v768_v1  ;;  %v1076_v29 = vsel %vm1075_vm11, %v1074_v9, 0  ;;  %v5834_v44 = vadd.s32 %v196_v21, %v190_v61 }
  0xac   :  { %v5840_v17 = vsel %vm476_vm10, %v5804_v62, %v5806_v63  ;;  %v5846_v45 = vsel %vm476_vm10, %v5806_v63, %v5815_v12  ;;  %v293_v46 = vshrl.u32 %v292_v6, 23  ;;  %v5851_v47 = vsel %vm478_vm12, %v5815_v12, %v485_v35 }
  0xad   :  { %11086 = vst [vmem:[#allocation14_spill] sm:$0xff] %v5832_v43  ;;  %v5855_v48 = vsel %vm478_vm12, %v472_v4, %v489_v37  ;;  %v5857_v49 = vshll.u32 %v762_v24, 8  ;;  %v1072_v27 = vor.u32 8388608, %v1071_v16  ;;  %v5859_v50 = vshrl.u32 %v766_v59, 5 }
  0xae   :  { %v771_v51 = vshll.u32 %v10826_v56, %v768_v1  ;;  %v1078_v54 = vand.u32 31, %v1076_v29  ;;  %v10815_v55 = vand.u32 2147483647, %v5758_v19  ;;  %v774_v58 = vshll.u32 %v10830_v31, %v768_v1 }
  0xaf   :  { %11087 = vst [vmem:[#allocation15_spill] sm:$0xff] %v5857_v49  ;;  %v777_v61 = vshll.u32 %v10828_v33, %v768_v1  ;;  %v780_v5 = vshll.u32 %v10816_v36, %v768_v1  ;;  %v781_v4 = vshrl.u32 %v10818_v39, %v5832_v43  ;;  %v772_v9 = vshrl.u32 %v10830_v31, %v5832_v43 }
  0xb0   :  { %11088 = vst [vmem:[#allocation16_spill] sm:$0xff] %v5859_v50  ;;  %v775_v59 = vshrl.u32 %v10828_v33, %v5832_v43  ;;  %v778_v6 = vshrl.u32 %v10816_v36, %v5832_v43  ;;  %v5412_v21 = vadd.s32 4294967169, %v293_v46  ;;  %v783_v24 = vshll.u32 %v10818_v39, %v768_v1 }
  0xb1   :  { %v784_v16 = vshrl.u32 %v10820_v42, %v5832_v43  ;;  %v5877_v35 = vshll.u32 %v1072_v27, 8  ;;  %v5880_v37 = vadd.f32 %v5692_v10, %v119_v57  ;;  %v5883_v53 = vand.u32 65535, %v5857_v49 }
  0xb2   :  { %v5886_v7 = vshrl.u32 %v5857_v49, 16  ;;  %v5888_v28 = vsub.s32 32, %v1078_v54  ;;  %v299_v25 = vadd.s32 1, %v5412_v21  ;;  %v782_v46 = vor.u32 %v781_v4, %v780_v5 }
  0xb3   :  { %11089 = vst [vmem:[#allocation17_spill] sm:$0xff] %v5877_v35  ;;  %vm10880_vm13 = vcmp.lt.s32.totalorder %v5859_v50, 1  ;;  %vm10879_vm14 = vcmp.lt.s32.totalorder %v5859_v50, 3  ;;  %v296_v1 = vand.u32 8388607, %v10815_v55  ;;  %v5894_v27 = vor.u32 %v772_v9, %v771_v51 }
  0xb4   :  { %11090 = vst [vmem:[#allocation18_spill] sm:$0xff] %v5880_v37  ;;  %v5896_v57 = vor.u32 %v775_v59, %v774_v58  ;;  %v5898_v52 = vor.u32 %v778_v6, %v777_v61  ;;  %vm789_vm15 = vcmp.lt.s32.totalorder %v5859_v50, 4  ;;  %v785_v20 = vor.u32 %v784_v16, %v783_v24 }
  0xb5   :  { %11091 = vst [vmem:[#allocation19_spill] sm:$0xff] %v5883_v53  ;;  %v5902_v38 = vand.u32 65535, %v5877_v35  ;;  %vm300_vm0 = vcmp.gt.s32.totalorder %v299_v25, 0  ;;  %v602_v5 = vand.u32 2139095040, %v5880_v37  ;;  %v1090_v4 = vshll.u32 %v10816_v36, %v1078_v54 }
  0xb6   :  { %11092 = vst [vmem:[#allocation20_spill] sm:$0xff] %v5886_v7  ;;  %v1091_v21 = vshrl.u32 %v10818_v39, %v5888_v28  ;;  %v1093_v51 = vshll.u32 %v10818_v39, %v1078_v54  ;;  %v1094_v58 = vshrl.u32 %v10820_v42, %v5888_v28  ;;  %v795_v61 = vsel %vm789_vm15, %v782_v46, 920167782 }
  0xb7   :  { %11093 = vst [vmem:[#allocation21_spill] sm:$0xff] %v5888_v28  ;;  %v5913_v9 = vshrl.u32 %v1076_v29, 5  ;;  %v5916_v59 = vshrl.u32 %v5877_v35, 16  ;;  %v603_v6 = vshrl.u32 %v602_v5, 23  ;;  %v1081_v24 = vshll.u32 %v10826_v56, %v1078_v54  ;;  %v125_v35 = vpop.f32.mrf.mxu2 }
  0xb8   :  { %11094 = vst [vmem:[#allocation22_spill] sm:$0xff] %v5894_v27  ;;  %v1084_v16 = vshll.u32 %v10830_v31, %v1078_v54  ;;  %v297_v55 = vor.u32 8388608, %v296_v1  ;;  %v301_v36 = vsel %vm300_vm0, %v299_v25, 0  ;;  %v1082_v39 = vshrl.u32 %v10830_v31, %v5888_v28 }
  0xb9   :  { %11095 = vst [vmem:[#allocation23_spill] sm:$0xff] %v5896_v57  ;;  %v1085_v42 = vshrl.u32 %v10828_v33, %v5888_v28  ;;  %v1087_v15 = vshll.u32 %v10828_v33, %v1078_v54  ;;  %v11100_v29 = vmov 2102212464   ;;  %v5931_v5 = vsel %vm10880_vm13, %v5894_v27, %v5896_v57 }
  0xba   :  { %11096 = vst [vmem:[#allocation24_spill] sm:$0xff] %v5898_v52  ;;  %v5937_v25 = vsel %vm10880_vm13, %v5896_v57, %v5898_v52  ;;  %v1092_v1 = vor.u32 %v1091_v21, %v1090_v4  ;;  %v1095_v56 = vor.u32 %v1094_v58, %v1093_v51  ;;  %vm10878_vm1 = vcmp.lt.s32.totalorder %v5913_v9, 4 }
  0xbb   :  { %11097 = vst [vmem:[#allocation25_spill] sm:$0xff] %v5902_v38  ;;  %v1088_v38 = vshrl.u32 %v11100_v29, %v5888_v28  ;;  %v303_v54 = vand.u32 31, %v301_v36  ;;  %v10837_v33 = vand.u32 2147483647, %v5880_v37  ;;  %v5418_v31 = vadd.s32 4294967169, %v603_v6 }
  0xbc   :  { %11098 = vst [vmem:[#allocation26_spill] sm:$0xff] %v5913_v9  ;;  %v5944_v28 = vsel %vm10879_vm14, %v5898_v52, %v795_v61  ;;  %v5948_v30 = vshll.u32 %v297_v55, 8  ;;  %v5951_v49 = vadd.f32 %v5692_v10, %v125_v35  ;;  %v5953_v4 = vor.u32 %v1082_v39, %v1081_v24 }
  0xbd   :  { %11099 = vst [vmem:[#allocation27_spill] sm:$0xff] %v5916_v59  ;;  %v799_v59 = vsel %vm789_vm15, %v785_v20, 1326507024  ;;  %v5955_v21 = vor.u32 %v1085_v42, %v1084_v16  ;;  %v5957_v51 = vor.u32 %v1088_v38, %v1087_v15  ;;  %v609_v58 = vadd.s32 1, %v5418_v31  ;;  %v131_v31 = vpop.f32.mrf.mxu3  ;;  %v1377_v15 = vld [vmem:[%s10800_s3 + $0x18] sm:$0xff]  ;;  %v1376_v38 = vld [vmem:[%s10800_s3 + $0x10] sm:$0xff] }
  0xbe   :  { %11101 = vst [vmem:[#allocation28_spill] sm:$0xff] %v5931_v5  ;;  %vm10877_vm2 = vcmp.lt.s32.totalorder %v5913_v9, 1  ;;  %vm10875_vm3 = vcmp.lt.s32.totalorder %v5913_v9, 3  ;;  %v1105_v61 = vsel %vm10878_vm1, %v1092_v1, 920167782  ;;  %v5967_v55 = vsel %vm10879_vm14, %v782_v46, %v799_v59  ;;  %1419 = vmatpush.msrb.mxu1 %v1377_v15  ;;  %v1375_v15 = vld [vmem:[%s10800_s3 + $0x8] sm:$0xff] }
  0xbf   :  { %11102 = vst [vmem:[#allocation29_spill] sm:$0xff] %v5937_v25  ;;  %v1109_v20 = vsel %vm10878_vm1, %v1095_v56, 1326507024  ;;  %v5969_v39 = vsub.s32 32, %v303_v54  ;;  %v606_v42 = vand.u32 8388607, %v10837_v33  ;;  %v5990_v6 = vsel %vm10877_vm2, %v5953_v4, %v5955_v21 }
  0xc0   :  { %11103 = vst [vmem:[#allocation30_spill] sm:$0xff] %v5944_v28  ;;  %vm610_vm4 = vcmp.gt.s32.totalorder %v609_v58, 0  ;;  %v5980_v56 = vand.u32 65535, %v5948_v30  ;;  %v5983_v35 = vshrl.u32 %v5948_v30, 16  ;;  %v912_v59 = vand.u32 2139095040, %v5951_v49  ;;  %1420 = vmatpush.msrb.mxu1 %v1376_v38 }
  0xc1   :  { %11104 = vst [vmem:[#allocation31_spill] sm:$0xff] %v5951_v49  ;;  %v611_v46 = vsel %vm610_vm4, %v609_v58, 0  ;;  %v5995_v24 = vsel %vm10875_vm3, %v5957_v51, %v1105_v61  ;;  %v6001_v16 = vsel %vm10877_vm2, %v5955_v21, %v5957_v51  ;;  %v6009_v33 = vsel %vm10875_vm3, %v1092_v1, %v1109_v20 }
  0xc2   :  { %11105 = vst [vmem:[#allocation32_spill] sm:$0xff] %v5953_v4  ;;  %v6011_v4 = vshrl.u32 %v301_v36, 5  ;;  %v913_v61 = vshrl.u32 %v912_v59, 23  ;;  %v613_v58 = vand.u32 31, %v611_v46  ;;  %v11115_v1 = vmov 683565275   ;;  %1421 = vmatpush.msrb.mxu1 %v1375_v15 }
  0xc3   :  { %11106 = vst [vmem:[#allocation33_spill] sm:$0xff] %v5955_v21  ;;  %v11114_v21 = vmov 2475754826   ;;  %v306_v20 = vshll.u32 %v11115_v1, %v303_v54  ;;  %v11116_v36 = vmov 2131351028   ;;  %v315_v37 = vshll.u32 %v11100_v29, %v303_v54 }
  0xc4   :  { %11107 = vst [vmem:[#allocation34_spill] sm:$0xff] %v5957_v51  ;;  %v307_v51 = vshrl.u32 %v11114_v21, %v5969_v39  ;;  %v310_v59 = vshrl.u32 %v11116_v36, %v5969_v39  ;;  %v11118_v38 = vmov 1326507024   ;;  %v312_v57 = vshll.u32 %v11116_v36, %v303_v54 }
  0xc5   :  { %11108 = vst [vmem:[#allocation35_spill] sm:$0xff] %v5967_v55  ;;  %v11119_v9 = vand.u32 2147483647, %v5951_v49  ;;  %v313_v52 = vshrl.u32 %v11100_v29, %v5969_v39  ;;  %vm321_vm5 = vcmp.lt.s32.totalorder %v6011_v4, 1  ;;  %v5424_v7 = vadd.s32 4294967169, %v913_v61 }
  0xc6   :  { %11109 = vst [vmem:[#allocation36_spill] sm:$0xff] %v5990_v6  ;;  %v6014_v6 = vadd.f32 %v5692_v10, %v131_v31  ;;  %v11117_v10 = vmov 920167782   ;;  %v6038_v53 = vor.u32 %v307_v51, %v306_v20  ;;  %vm324_vm6 = vcmp.lt.s32.totalorder %v6011_v4, 4 }
  0xc7   :  { %11110 = vst [vmem:[#allocation37_spill] sm:$0xff] %v5995_v24  ;;  %v1374_v24 = vld [vmem:[%s10800_s3] sm:$0xff]  ;;  %v316_v31 = vshrl.u32 %v11117_v10, %v5969_v39  ;;  %v916_v27 = vand.u32 8388607, %v11119_v9  ;;  %v318_v43 = vshll.u32 %v11117_v10, %v303_v54  ;;  %v6041_v15 = vsub.s32 32, %v613_v58 }
  0xc8   :  { %11111 = vst [vmem:[#allocation38_spill] sm:$0xff] %v6001_v16  ;;  %v607_v16 = vor.u32 8388608, %v606_v42  ;;  %v309_v42 = vshll.u32 %v11114_v21, %v303_v54  ;;  %1422 = vmatpush.msrb.mxu1 %v1374_v24  ;;  %v919_v5 = vadd.s32 1, %v5424_v7  ;;  %vm323_vm7 = vcmp.lt.s32.totalorder %v6011_v4, 3 }
  0xc9   :  { %11112 = vst [vmem:[#allocation39_spill] sm:$0xff] %v6009_v33  ;;  %v319_v33 = vshrl.u32 %v11118_v38, %v5969_v39  ;;  %v317_v9 = vor.u32 %v316_v31, %v315_v37  ;;  %v6048_v54 = vshrl.u32 %v611_v46, 5  ;;  %v917_v28 = vor.u32 8388608, %v916_v27 }
  0xca   :  { %11113 = vst [vmem:[#allocation40_spill] sm:$0xff] %v6014_v6  ;;  %v6043_v25 = vshll.u32 %v607_v16, 8  ;;  %v6045_v55 = vor.u32 %v310_v59, %v309_v42  ;;  %v1222_v51 = vand.u32 2139095040, %v6014_v6  ;;  %v616_v61 = vshll.u32 %v11115_v1, %v613_v58 }
  0xcb   :  { %11120 = vst [vmem:[#allocation41_spill] sm:$0xff] %v6041_v15  ;;  %v320_v49 = vor.u32 %v319_v33, %v318_v43  ;;  %v619_v20 = vshll.u32 %v11114_v21, %v613_v58  ;;  %v622_v16 = vshll.u32 %v11116_v36, %v613_v58  ;;  %vm920_vm8 = vcmp.gt.s32.totalorder %v919_v5, 0 }
  0xcc   :  { %11121 = vst [vmem:[#allocation42_spill] sm:$0xff] %v6043_v25  ;;  %v617_v33 = vshrl.u32 %v11114_v21, %v6041_v15  ;;  %v620_v7 = vshrl.u32 %v11116_v36, %v6041_v15  ;;  %v625_v43 = vshll.u32 %v11100_v29, %v613_v58  ;;  %v921_v37 = vsel %vm920_vm8, %v919_v5, 0 }
  0xcd   :  { %v623_v27 = vshrl.u32 %v11100_v29, %v6041_v15  ;;  %v626_v46 = vshrl.u32 %v11117_v10, %v6041_v15  ;;  %v628_v59 = vshll.u32 %v11117_v10, %v613_v58  ;;  %v629_v31 = vshrl.u32 %v11118_v38, %v6041_v15 }
  0xce   :  { %v6067_v42 = vor.u32 %v313_v52, %v312_v57  ;;  %v6070_v24 = vand.u32 65535, %v6043_v25  ;;  %v923_v50 = vand.u32 31, %v921_v37  ;;  %v1223_v14 = vshrl.u32 %v1222_v51, 23 }
  0xcf   :  { %v6076_v5 = vsel %vm321_vm5, %v6038_v53, %v6045_v55  ;;  %v330_v3 = vsel %vm324_vm6, %v317_v9, 920167782  ;;  %v334_v58 = vsel %vm324_vm6, %v320_v49, 1326507024  ;;  %v6083_v52 = vshrl.u32 %v6043_v25, 16 }
  0xd0   :  { %11122 = vst [vmem:[#allocation43_spill] sm:$0xff] %v6070_v24  ;;  %v6085_v57 = vor.u32 %v617_v33, %v616_v61  ;;  %v6087_v15 = vor.u32 %v620_v7, %v619_v20  ;;  %vm631_vm11 = vcmp.lt.s32.totalorder %v6048_v54, 1  ;;  %v6090_v51 = vshll.u32 %v917_v28, 8 }
  0xd1   :  { %11123 = vst [vmem:[#allocation44_spill] sm:$0xff] %v6083_v52  ;;  %v6092_v24 = vor.u32 %v623_v27, %v622_v16  ;;  %v627_v19 = vor.u32 %v626_v46, %v625_v43  ;;  %v630_v63 = vor.u32 %v629_v31, %v628_v59  ;;  %v11127_v62 = vand.u32 2147483647, %v6014_v6 }
  0xd2   :  { %11124 = vst [vmem:[#allocation45_spill] sm:$0xff] %v6085_v57  ;;  %v6100_v49 = vsel %vm321_vm5, %v6045_v55, %v6067_v42  ;;  %vm634_vm0 = vcmp.lt.s32.totalorder %v6048_v54, 4  ;;  %v6103_v61 = vsub.s32 32, %v923_v50  ;;  %v5430_v20 = vadd.s32 4294967169, %v1223_v14 }
  0xd3   :  { %11125 = vst [vmem:[#allocation46_spill] sm:$0xff] %v6087_v15  ;;  %v1226_v12 = vand.u32 8388607, %v11127_v62  ;;  %v6108_v28 = vsel %vm323_vm7, %v6067_v42, %v330_v3  ;;  %v6112_v16 = vsel %vm323_vm7, %v317_v9, %v334_v58  ;;  %v194_v62 = vshrl.u32 %v5802_v60, 16 }
  0xd4   :  { %11126 = vst [vmem:[#allocation47_spill] sm:$0xff] %v6090_v51  ;;  %v11129_v33 = vshll.u32 %v5802_v60, 16  ;;  %vm633_vm8 = vcmp.lt.s32.totalorder %v6048_v54, 3  ;;  %v6123_v14 = vsel %vm631_vm11, %v6085_v57, %v6087_v15  ;;  %v6126_v3 = vand.u32 65535, %v6090_v51 }
  0xd5   :  { %11128 = vst [vmem:[#allocation48_spill] sm:$0xff] %v6103_v61  ;;  %v6129_v9 = vshrl.u32 %v6090_v51, 16  ;;  %v640_v7 = vsel %vm634_vm0, %v627_v19, 920167782  ;;  %v6137_v60 = vsel %vm631_vm11, %v6087_v15, %v6092_v24  ;;  %v1227_v43 = vor.u32 8388608, %v1226_v12 }
  0xd6   :  { %vm199_vm4 = vc.u32 %v5830_v41, %v11129_v33  ;;  %11130 = vst [vmem:[#allocation49_spill] sm:$0xff] %v6123_v14  ;;  %v644_v41 = vsel %vm634_vm0, %v630_v63, 1326507024  ;;  %v926_v27 = vshll.u32 %v11115_v1, %v923_v50  ;;  %v927_v46 = vshrl.u32 %v11114_v21, %v6103_v61 }
  0xd7   :  { %11131 = vst [vmem:[#allocation50_spill] sm:$0xff] %v6126_v3  ;;  %v1229_v59 = vadd.s32 1, %v5430_v20  ;;  %v11134_v31 = vmov 0   ;;  %v6145_v33 = vshrl.u32 %v921_v37, 5  ;;  %v929_v6 = vshll.u32 %v11114_v21, %v923_v50 }
  0xd8   :  { %11132 = vst [vmem:[#allocation51_spill] sm:$0xff] %v6129_v9  ;;  %v200_v58 = vsel %vm199_vm4, 1, %v11134_v31  ;;  %v930_v51 = vshrl.u32 %v11116_v36, %v6103_v61  ;;  %v213_v9 = vshll.u32 %v5810_v8, 16  ;;  %v932_v63 = vshll.u32 %v11116_v36, %v923_v50 }
  0xd9   :  { %11133 = vst [vmem:[#allocation52_spill] sm:$0xff] %v6137_v60  ;;  %v933_v12 = vshrl.u32 %v11100_v29, %v6103_v61  ;;  %v935_v3 = vshll.u32 %v11100_v29, %v923_v50  ;;  %v936_v20 = vshrl.u32 %v11117_v10, %v6103_v61  ;;  %v6160_v37 = vsel %vm633_vm8, %v6092_v24, %v640_v7 }
  0xda   :  { %v938_v25 = vshll.u32 %v11117_v10, %v923_v50  ;;  %v939_v15 = vshrl.u32 %v11118_v38, %v6103_v61  ;;  %v202_v57 = vadd.s32 %v200_v58, %v5834_v44  ;;  %v6168_v14 = vsel %vm633_vm8, %v627_v19, %v644_v41 }
  0xdb   :  { %v6170_v52 = vor.u32 %v927_v46, %v926_v27  ;;  %vm1230_vm4 = vcmp.gt.s32.totalorder %v1229_v59, 0  ;;  %v6172_v60 = vshll.u32 %v1227_v43, 8  ;;  %v6174_v18 = vor.u32 %v930_v51, %v929_v6 }
  0xdc   :  { %v215_v7 = vshll.u32 %v5813_v11, 16  ;;  %vm217_vm3 = vc.u32 %v5808_v2, %v213_v9  ;;  %v219_v50 = vadd.s32 %v213_v9, %v5808_v2  ;;  %v6179_v61 = vor.u32 %v933_v12, %v932_v63 }
  0xdd   :  { %11135 = vst [vmem:[#allocation53_spill] sm:$0xff] %v6170_v52  ;;  %v937_v44 = vor.u32 %v936_v20, %v935_v3  ;;  %vm941_vm2 = vcmp.lt.s32.totalorder %v6145_v33, 1  ;;  %vm944_vm1 = vcmp.lt.s32.totalorder %v6145_v33, 4  ;;  %v940_v19 = vor.u32 %v939_v15, %v938_v25 }
  0xde   :  { %11136 = vst [vmem:[#allocation54_spill] sm:$0xff] %v6172_v60  ;;  %v11139_v41 = vshrl.u32 %v5772_v26, 16  ;;  %v218_v6 = vsel %vm217_vm3, 1, %v11134_v31  ;;  %vm221_vm14 = vc.u32 %v219_v50, %v215_v7  ;;  %vm10887_vm13 = vcmp.lt.s32.totalorder %v6145_v33, 3 }
  0xdf   :  { %11137 = vst [vmem:[#allocation55_spill] sm:$0xff] %v6174_v18  ;;  %v1231_v51 = vsel %vm1230_vm4, %v1229_v59, 0  ;;  %v214_v27 = vshrl.u32 %v5810_v8, 16  ;;  %v220_v2 = vadd.s32 %v218_v6, %v5822_v32  ;;  %v6193_v3 = vsel %vm941_vm2, %v6170_v52, %v6174_v18 }
  0xe0   :  { %11138 = vst [vmem:[#allocation56_spill] sm:$0xff] %v6179_v61  ;;  %v203_v43 = vadd.s32 %v202_v57, %v11139_v41  ;;  %v6196_v25 = vand.u32 65535, %v6172_v60  ;;  %v6199_v26 = vshrl.u32 %v6172_v60, 16  ;;  %v222_v15 = vsel %vm221_vm14, 1, %v11134_v31 }
  0xe1   :  { %v950_v57 = vsel %vm944_vm1, %v937_v44, 920167782  ;;  %v6208_v8 = vsel %vm941_vm2, %v6174_v18, %v6179_v61  ;;  %v6210_v32 = vshrl.u32 %v1231_v51, 5  ;;  %v224_v9 = vadd.s32 %v222_v15, %v220_v2 }
  0xe2   :  { %11140 = vst [vmem:[#allocation57_spill] sm:$0xff] %v6196_v25  ;;  %v954_v46 = vsel %vm944_vm1, %v940_v19, 1326507024  ;;  %v6214_v59 = vand.u32 31, %v1231_v51  ;;  %v6216_v58 = vadd.s32 %v203_v43, %v194_v62  ;;  %vm322_vm14 = vcmp.lt.s32.totalorder %v6011_v4, 2 }
  0xe3   :  { %11141 = vst [vmem:[#allocation58_spill] sm:$0xff] %v6199_v26  ;;  %v216_v63 = vshrl.u32 %v5813_v11, 16  ;;  %v225_v12 = vadd.s32 %v224_v9, %v214_v27  ;;  %v332_v20 = vsel %vm322_vm14, %v6076_v5, %v6108_v28  ;;  %v336_v41 = vsel %vm322_vm14, %v6100_v49, %v6112_v16 }
  0xe4   :  { %v6228_v19 = vadd.s32 %v219_v50, %v215_v7  ;;  %v340_v6 = vand.u32 65535, %v336_v41  ;;  %v341_v62 = vshrl.u32 %v336_v41, 16  ;;  %v362_v43 = vand.u32 65535, %v332_v20 }
  0xe5   :  { %v6233_v11 = vsel %vm10887_vm13, %v6179_v61, %v950_v57  ;;  %v6237_v51 = vsel %vm10887_vm13, %v937_v44, %v954_v46  ;;  %v226_v5 = vadd.s32 %v225_v12, %v216_v63  ;;  %v363_v28 = vshrl.u32 %v332_v20, 16 }
  0xe6   :  { %v6240_v27 = vsub.s32 32, %v6214_v59  ;;  %vm229_vm3 = vc.u32 %v6216_v58, %v6228_v19  ;;  %v343_v49 = vmul.u32 %v341_v62, %v5980_v56  ;;  %v344_v16 = vmul.u32 %v340_v6, %v5983_v35 }
  0xe7   :  { %v6248_v7 = vshll.u32 %v11115_v1, %v6214_v59  ;;  %v230_v50 = vadd.s32 1, %v226_v5  ;;  %v365_v44 = vmul.u32 %v363_v28, %v5980_v56  ;;  %v366_v2 = vmul.u32 %v362_v43, %v5983_v35 }
  0xe8   :  { %v326_v15 = vsel %vm324_vm6, %v6067_v42, 2102212464  ;;  %v342_v57 = vmul.u32 %v340_v6, %v5980_v56  ;;  %v345_v9 = vmul.u32 %v341_v62, %v5983_v35  ;;  %v346_v46 = vshll.u32 %v343_v49, 16 }
  0xe9   :  { %v231_v63 = vsel %vm229_vm3, %v230_v50, %v226_v5  ;;  %v348_v12 = vshll.u32 %v344_v16, 16  ;;  %v364_v20 = vmul.u32 %v362_v43, %v5980_v56  ;;  %v368_v41 = vshll.u32 %v365_v44, 16 }
  0xea   :  { %v11142_v60 = vmul.u32 %v5738_v0, %v5783_v40  ;;  %vm350_vm4 = vc.u32 %v342_v57, %v346_v46  ;;  %v352_v26 = vadd.s32 %v346_v46, %v342_v57  ;;  %v367_v18 = vmul.u32 %v363_v28, %v5983_v35 }
  0xeb   :  { %v351_v42 = vsel %vm350_vm4, 1, %v11134_v31  ;;  %v370_v52 = vshll.u32 %v366_v2, 16  ;;  %vm372_vm6 = vc.u32 %v364_v20, %v368_v41  ;;  %v374_v6 = vadd.s32 %v368_v41, %v364_v20 }
  0xec   :  { %v232_v25 = vadd.s32 %v231_v63, %v11142_v60  ;;  %v353_v61 = vadd.s32 %v351_v42, %v345_v9  ;;  %vm354_vm3 = vc.u32 %v352_v26, %v348_v12  ;;  %v373_v5 = vsel %vm372_vm6, 1, %v11134_v31 }
  0xed   :  { %v305_v56 = vshrl.u32 %v11115_v1, %v5969_v39  ;;  %v355_v0 = vsel %vm354_vm3, 1, %v11134_v31  ;;  %v375_v40 = vadd.s32 %v373_v5, %v367_v18  ;;  %vm376_vm13 = vc.u32 %v374_v6, %v370_v52  ;;  %v11154_v5 = vld [vmem:[#allocation52_spill] sm:$0xff] }
  0xee   :  { %v233_v62 = vadd.s32 536870912, %v232_v25  ;;  %v347_v35 = vshrl.u32 %v343_v49, 16  ;;  %v357_v43 = vadd.s32 %v355_v0, %v353_v61  ;;  %v377_v28 = vsel %vm376_vm13, 1, %v11134_v31 }
  0xef   :  { %v325_v50 = vsel %vm321_vm5, %v305_v56, %v6038_v53  ;;  %v327_v26 = vsel %vm323_vm7, %v6045_v55, %v326_v15  ;;  %v369_v57 = vshrl.u32 %v365_v44, 16  ;;  %v379_v39 = vadd.s32 %v377_v28, %v375_v40 }
  0xf0   :  { %v6267_v60 = vshrl.u32 %v233_v62, 30  ;;  %v349_v18 = vshrl.u32 %v344_v16, 16  ;;  %v358_v46 = vadd.s32 %v357_v43, %v347_v35  ;;  %vm477_vm4 = vcmp.lt.s32.totalorder %v5776_v34, 2 }
  0xf1   :  { %v6280_v61 = vshll.u32 %v11114_v21, %v6214_v59  ;;  %v6284_v49 = vshll.u32 %v11116_v36, %v6214_v59  ;;  %v371_v53 = vshrl.u32 %v366_v2, 16  ;;  %v380_v63 = vadd.s32 %v379_v39, %v369_v57 }
  0xf2   :  { %v235_v9 = vshll.u32 %v6267_v60, 30  ;;  %v6288_v55 = vshll.u32 %v11100_v29, %v6214_v59  ;;  %v328_v16 = vsel %vm322_vm14, %v325_v50, %v327_v26  ;;  %v6294_v15 = vadd.s32 %v358_v46, %v349_v18  ;;  %v11146_v46 = vld [vmem:[#allocation9_spill] sm:$0xff] }
  0xf3   :  { %v6296_v12 = vadd.s32 %v374_v6, %v370_v52  ;;  %v381_v20 = vadd.s32 %v380_v63, %v371_v53  ;;  %v6302_v2 = vsel %vm477_vm4, %v5840_v17, %v5851_v47  ;;  %vm136_vm13 = vcmp.lt.s32.totalorder %v5695_v13, 0 }
  0xf4   :  { %v6290_v44 = vsub.s32 %v232_v25, %v235_v9  ;;  %v491_v25 = vsel %vm477_vm4, %v5846_v45, %v5855_v48  ;;  %v6311_v4 = vshrl.u32 %v11114_v21, %v6240_v27  ;;  %v6315_v52 = vshll.u32 %v11117_v10, %v6214_v59 }
  0xf5   :  { %vm384_vm7 = vc.u32 %v6294_v15, %v6296_v12  ;;  %v385_v47 = vadd.s32 1, %v381_v20  ;;  %v495_v41 = vand.u32 65535, %v491_v25  ;;  %v496_v45 = vshrl.u32 %v491_v25, 16 }
  0xf6   :  { %vm237_vm5 = vcmp.lt.s32.totalorder %v6290_v44, 0  ;;  %v238_v17 = vsub.s32 0, %v6290_v44  ;;  %v6323_v48 = vshrl.u32 %v11116_v36, %v6240_v27  ;;  %v382_v6 = vmul.u32 %v5948_v30, %v328_v16 }
  0xf7   :  { %v518_v59 = vshrl.u32 %v6302_v2, 16  ;;  %v11143_v62 = vand.u32 2147483647, %v5695_v13  ;;  %v386_v0 = vsel %vm384_vm7, %v385_v47, %v381_v20  ;;  %v497_v40 = vmul.u32 %v495_v41, %v5765_v22 }
  0xf8   :  { %v239_v42 = vsel %vm237_vm5, %v238_v17, %v6290_v44  ;;  %v498_v35 = vmul.u32 %v496_v45, %v5765_v22  ;;  %v1243_v43 = vshrl.u32 %v11100_v29, %v6240_v27  ;;  %v6340_v30 = vshrl.u32 %v11117_v10, %v6240_v27 }
  0xf9   :  { %vm6330_vm14 = vcmp.le.f32.partialorder %v11143_v62, 0.7853982  ;;  %v240_v56 = vclz %v239_v42  ;;  %v228_v28 = vadd.s32 %v6228_v19, %v6216_v58  ;;  %v387_v50 = vadd.s32 %v386_v0, %v382_v6 }
  0xfa   :  { %v258_v57 = vsub.s32 4, %v6267_v60  ;;  %v6346_v39 = vmul.u32 %v495_v41, %v5768_v23  ;;  %v501_v9 = vshll.u32 %v498_v35, 16  ;;  %v460_v53 = vshrl.u32 %v11115_v1, %v11146_v46 }
  0xfb   :  { %v5410_v26 = vadd.s32 4294967294, %v240_v56  ;;  %v388_v18 = vadd.s32 536870912, %v387_v50  ;;  %v500_v63 = vmul.u32 %v496_v45, %v5768_v23  ;;  %v517_v16 = vand.u32 65535, %v6302_v2  ;;  %v11147_v2 = vld [vmem:[#allocation13_spill] sm:$0xff] }
  0xfc   :  { %v503_v20 = vshll.u32 %v6346_v39, 16  ;;  %vm505_vm3 = vc.u32 %v497_v40, %v501_v9  ;;  %v6354_v58 = vmul.u32 %v518_v59, %v5765_v22  ;;  %v507_v47 = vadd.s32 %v501_v9, %v497_v40 }
  0xfd   :  { %vm5411_vm6 = vcmp.lt.s32.totalorder %v5410_v26, 0  ;;  %v6356_v25 = vshrl.u32 %v388_v18, 30  ;;  %v506_v17 = vsel %vm505_vm3, 1, %v11134_v31  ;;  %v259_v45 = vsel %vm136_vm13, %v258_v57, %v6267_v60 }
  0xfe   :  { %v243_v19 = vsel %vm5411_vm6, 0, %v5410_v26  ;;  %v481_v6 = vsel %vm479_vm9, %v11147_v2, 2102212464  ;;  %v508_v56 = vadd.s32 %v506_v17, %v500_v63  ;;  %vm509_vm5 = vc.u32 %v507_v47, %v503_v20 }
  0xff   :  { %v244_v41 = vsub.s32 32, %v243_v19  ;;  %v248_v42 = vsub.s32 4294967266, %v243_v19  ;;  %v390_v62 = vshll.u32 %v6356_v25, 30  ;;  %v6367_v0 = vmul.u32 %v517_v16, %v5768_v23 }
 0x100   :  { %v245_v26 = vshll.u32 %v6290_v44, %v243_v19  ;;  %v510_v18 = vsel %vm509_vm5, 1, %v11134_v31  ;;  %v261_v60 = vsel %vm6330_vm14, 0, %v259_v45  ;;  %v519_v46 = vmul.u32 %v517_v16, %v5765_v22  ;;  %v11148_v44 = vld [vmem:[#allocation11_spill] sm:$0xff] }
 0x101   :  { %v246_v40 = vshrl.u32 %v228_v28, %v244_v41  ;;  %v249_v9 = vadd.s32 127, %v248_v42  ;;  %v6373_v57 = vsub.s32 %v387_v50, %v390_v62  ;;  %v523_v2 = vshll.u32 %v6354_v58, 16  ;;  %v11149_v41 = vld [vmem:[#allocation12_spill] sm:$0xff] }
 0x102   :  { %v6379_v63 = vshrl.u32 %v11118_v38, %v6240_v27  ;;  %v480_v28 = vsel %vm476_vm10, %v460_v53, %v11148_v44  ;;  %v512_v50 = vadd.s32 %v510_v18, %v508_v56  ;;  %v522_v47 = vmul.u32 %v518_v59, %v5768_v23  ;;  %v11150_v53 = vld [vmem:[#allocation10_spill] sm:$0xff] }
 0x103   :  { %v247_v20 = vor.u32 %v246_v40, %v245_v26  ;;  %v250_v17 = vshll.u32 %v249_v9, 23  ;;  %vm392_vm9 = vcmp.lt.s32.totalorder %v6373_v57, 0  ;;  %v393_v19 = vsub.s32 0, %v6373_v57 }
 0x104   :  { %v278_v16 = vadd.s32 3, %v261_v60  ;;  %v482_v42 = vsel %vm478_vm12, %v11149_v41, %v481_v6  ;;  %v525_v45 = vshll.u32 %v6367_v0, 16  ;;  %v502_v40 = vshrl.u32 %v498_v35, 16 }
 0x105   :  { %v251_v22 = vor.u32 4788187, %v250_v17  ;;  %v254_v62 = vcvt.s32.f32 %v247_v20  ;;  %v394_v26 = vsel %vm392_vm9, %v393_v19, %v6373_v57  ;;  %vm527_vm10 = vc.u32 %v519_v46, %v523_v2 }
 0x106   :  { %vm291_vm7 = vcmp.lt.s32.totalorder %v11150_v53, 0  ;;  %v395_v44 = vclz %v394_v26  ;;  %v528_v56 = vsel %vm527_vm10, 1, %v11134_v31  ;;  %v529_v23 = vadd.s32 %v523_v2, %v519_v46 }
 0x107   :  { %v252_v9 = vand.u32 2147483647, %v251_v22  ;;  %v6396_v59 = vor.u32 %v6311_v4, %v6248_v7  ;;  %v6400_v6 = vor.u32 %v6323_v48, %v6280_v61  ;;  %v513_v18 = vadd.s32 %v512_v50, %v502_v40 }
 0x108   :  { %v530_v60 = vadd.s32 %v528_v56, %v522_v47  ;;  %v6403_v35 = vor.u32 %v1243_v43, %v6284_v49  ;;  %v5413_v17 = vadd.s32 4294967294, %v395_v44  ;;  %vm531_vm12 = vc.u32 %v529_v23, %v525_v45 }
 0x109   :  { %v255_v20 = vmul.f32 %v254_v62, %v252_v9  ;;  %v383_v19 = vadd.s32 %v6296_v12, %v6294_v15  ;;  %v483_v46 = vsel %vm477_vm4, %v480_v28, %v482_v42  ;;  %v504_v7 = vshrl.u32 %v6346_v39, 16 }
 0x10a   :  { %v532_v4 = vsel %vm531_vm12, 1, %v11134_v31  ;;  %v6411_v48 = vand.u32 3, %v278_v16  ;;  %vm5414_vm6 = vcmp.lt.s32.totalorder %v5413_v17, 0  ;;  %v413_v43 = vsub.s32 4, %v6356_v25 }
 0x10b   :  { %v256_v61 = vxor.u32 2147483648, %v255_v20  ;;  %v534_v2 = vadd.s32 %v532_v4, %v530_v60  ;;  %v398_v49 = vsel %vm5414_vm6, 0, %v5413_v17  ;;  %v6414_v50 = vadd.s32 %v513_v18, %v504_v7 }
 0x10c   :  { %v524_v47 = vshrl.u32 %v6354_v58, 16  ;;  %v11151_v15 = vand.u32 2147483647, %v11150_v53  ;;  %v399_v39 = vsub.s32 32, %v398_v49  ;;  %v403_v28 = vsub.s32 4294967266, %v398_v49 }
 0x10d   :  { %v257_v34 = vsel %vm136_vm13, %v256_v61, %v255_v20  ;;  %vm632_vm3 = vcmp.lt.s32.totalorder %v6048_v54, 2  ;;  %v526_v58 = vshrl.u32 %v6367_v0, 16  ;;  %v6432_v16 = vadd.s32 %v529_v23, %v525_v45  ;;  %v11174_v54 = vld [vmem:[#allocation29_spill] sm:$0xff] }
 0x10e   :  { %vm6421_vm4 = vcmp.le.f32.partialorder %v11151_v15, 0.7853982  ;;  %v6429_v22 = vsel %vm6330_vm14, %v5695_v13, %v257_v34  ;;  %v535_v41 = vadd.s32 %v534_v2, %v524_v47  ;;  %v400_v62 = vshll.u32 %v6373_v57, %v398_v49  ;;  %v11155_v57 = vld [vmem:[#allocation7_spill] sm:$0xff] }
 0x10f   :  { %v262_v42 = vmul.f32 %v6429_v22, %v6429_v22  ;;  %v401_v26 = vshrl.u32 %v383_v19, %v399_v39  ;;  %v404_v40 = vadd.s32 127, %v403_v28  ;;  %v414_v9 = vsel %vm291_vm7, %v413_v43, %v6356_v25  ;;  %v11156_v49 = vld [vmem:[#allocation43_spill] sm:$0xff] }
 0x110   :  { %v536_v44 = vadd.s32 %v535_v41, %v526_v58  ;;  %vm539_vm13 = vc.u32 %v6414_v50, %v6432_v16  ;;  %v646_v0 = vsel %vm632_vm3, %v11154_v5, %v6168_v14  ;;  %v537_v60 = vmul.u32 %v11155_v57, %v483_v46  ;;  %v11157_v14 = vld [vmem:[#allocation44_spill] sm:$0xff] }
 0x111   :  { %v263_v45 = vmul.f32 -0.001358992, %v262_v42  ;;  %v270_v56 = vmul.f32 -0.00019511016, %v262_v42  ;;  %v402_v23 = vor.u32 %v401_v26, %v400_v62  ;;  %v405_v18 = vshll.u32 %v404_v40, 23  ;;  %v11158_v62 = vld [vmem:[#allocation49_spill] sm:$0xff] }
 0x112   :  { %v540_v20 = vadd.s32 1, %v536_v44  ;;  %v650_v17 = vand.u32 65535, %v646_v0  ;;  %v651_v19 = vshrl.u32 %v646_v0, 16  ;;  %v6456_v58 = vor.u32 %v6340_v30, %v6288_v55 }
 0x113   :  { %v264_v7 = vadd.f32 0.041655596, %v263_v45  ;;  %v271_v25 = vadd.f32 0.008332121, %v270_v56  ;;  %v406_v4 = vor.u32 4788187, %v405_v18  ;;  %v409_v61 = vcvt.s32.f32 %v402_v23 }
 0x114   :  { %v541_v2 = vsel %vm539_vm13, %v540_v20, %v536_v44  ;;  %v652_v43 = vmul.u32 %v650_v17, %v11156_v49  ;;  %v6449_v47 = vmul.u32 %v651_v19, %v11156_v49  ;;  %v6452_v34 = vmul.u32 %v650_v17, %v11157_v14 }
 0x115   :  { %v265_v15 = vmul.f32 %v264_v7, %v262_v42  ;;  %v272_v39 = vmul.f32 %v271_v25, %v262_v42  ;;  %v407_v28 = vand.u32 2147483647, %v406_v4  ;;  %v542_v46 = vadd.s32 %v541_v2, %v537_v60 }
 0x116   :  { %v416_v41 = vsel %vm6421_vm4, 0, %v414_v9  ;;  %v6464_v26 = vsel %vm632_vm3, %v11158_v62, %v6160_v37  ;;  %v656_v40 = vshll.u32 %v6449_v47, 16  ;;  %vm281_vm14 = vcmp.eq.s32.totalorder %v6411_v48, 0  ;;  %v11163_v62 = vld [vmem:[#allocation41_spill] sm:$0xff] }
 0x117   :  { %v266_v44 = vadd.f32 -0.4999988, %v265_v15  ;;  %v273_v5 = vadd.f32 -0.16666654, %v272_v39  ;;  %v410_v0 = vmul.f32 %v409_v61, %v407_v28  ;;  %v543_v45 = vadd.s32 536870912, %v542_v46 }
 0x118   :  { %vm284_vm5 = vcmp.eq.s32.totalorder %v6411_v48, 2  ;;  %v658_v55 = vshll.u32 %v6452_v34, 16  ;;  %vm6470_vm9 = vc.u32 %v652_v43, %v656_v40  ;;  %v662_v9 = vadd.s32 %v656_v40, %v652_v43 }
 0x119   :  { %v267_v56 = vmul.f32 %v266_v44, %v262_v42  ;;  %v274_v37 = vmul.f32 %v273_v5, %v262_v42  ;;  %vm280_vm10 = vcmp.lt.s32.totalorder %v6411_v48, 2  ;;  %v411_v23 = vxor.u32 2147483648, %v410_v0 }
 0x11a   :  { %v6475_v18 = vshrl.u32 %v543_v45, 30  ;;  %vm277_vm12 = vweird.f32 %v5695_v13  ;;  %vm1382_vm6 = vcmask 261120   ;;  %v433_v57 = vadd.s32 3, %v416_v41 }
 0x11b   :  { %v672_v60 = vand.u32 65535, %v6464_v26  ;;  %v673_v20 = vshrl.u32 %v6464_v26, 16  ;;  %v268_v17 = vadd.f32 1.0, %v267_v56  ;;  %v275_v7 = vadd.f32 1.0, %v274_v37 }
 0x11c   :  { %v412_v25 = vsel %vm291_vm7, %v411_v23, %v410_v0  ;;  %v545_v42 = vshll.u32 %v6475_v18, 30  ;;  %v655_v61 = vmul.u32 %v651_v19, %v11157_v14  ;;  %v661_v2 = vsel %vm6470_vm9, 1, %v11134_v31 }
 0x11d   :  { %v6486_v4 = vsel %vm6421_vm4, %v11150_v53, %v412_v25  ;;  %vm6492_vm13 = vc.u32 %v662_v9, %v658_v55  ;;  %v276_v15 = vmul.f32 %v275_v7, %v6429_v22  ;;  %v285_v39 = vxor.u32 2147483648, %v268_v17 }
 0x11e   :  { %v417_v28 = vmul.f32 %v6486_v4, %v6486_v4  ;;  %v6499_v41 = vsub.s32 %v542_v46, %v545_v42  ;;  %v6501_v12 = vand.u32 3, %v433_v57  ;;  %v538_v19 = vadd.s32 %v6432_v16, %v6414_v50  ;;  %v11164_v16 = vld [vmem:[#allocation5_spill] sm:$0xff] }
 0x11f   :  { %v615_v26 = vshrl.u32 %v11115_v1, %v11163_v62  ;;  %v6508_v40 = vmul.u32 %v673_v20, %v11156_v49  ;;  %v282_v44 = vxor.u32 2147483648, %v276_v15  ;;  %v674_v0 = vmul.u32 %v672_v60, %v11156_v49 }
 0x120   :  { %v418_v5 = vmul.f32 -0.001358992, %v417_v28  ;;  %v425_v22 = vmul.f32 -0.00019511016, %v417_v28  ;;  %vm547_vm7 = vcmp.lt.s32.totalorder %v6499_v41, 0  ;;  %v548_v46 = vsub.s32 0, %v6499_v41 }
 0x121   :  { %v663_v45 = vadd.s32 %v661_v2, %v655_v61  ;;  %v665_v50 = vsel %vm6492_vm13, 1, %v11134_v31  ;;  %vm446_vm4 = vcmp.lt.s32.totalorder %v11164_v16, 0  ;;  %v283_v55 = vsel %vm281_vm14, %v268_v17, %v282_v44  ;;  %v11165_v61 = vld [vmem:[#allocation45_spill] sm:$0xff] }
 0x122   :  { %v286_v30 = vsel %vm284_vm5, %v285_v39, %v276_v15  ;;  %v419_v9 = vadd.f32 0.041655596, %v418_v5  ;;  %v426_v56 = vadd.f32 0.008332121, %v425_v22  ;;  %v549_v37 = vsel %vm547_vm7, %v548_v46, %v6499_v41 }
 0x123   :  { %v287_v49 = vsel %vm280_vm10, %v283_v55, %v286_v30  ;;  %v6525_v23 = vmul.u32 %v672_v60, %v11157_v14  ;;  %v678_v57 = vshll.u32 %v6508_v40, 16  ;;  %v550_v42 = vclz %v549_v37 }
 0x124   :  { %v288_v7 = vsel %vm277_vm12, nan, %v287_v49  ;;  %v420_v25 = vmul.f32 %v419_v9, %v417_v28  ;;  %v427_v17 = vmul.f32 %v426_v56, %v417_v28  ;;  %v635_v48 = vsel %vm631_vm11, %v615_v26, %v11165_v61 }
 0x125   :  { %5433 = vmatmul.msk.f32.vlgmr.msrb.gmra.mxu1 %vm1382_vm6, %v288_v7  ;;  %v636_v2 = vsel %vm634_vm0, %v6092_v24, 2102212464  ;;  %v667_v60 = vadd.s32 %v665_v50, %v663_v45  ;;  %v677_v43 = vmul.u32 %v673_v20, %v11157_v14  ;;  %v5416_v13 = vadd.s32 4294967294, %v550_v42  ;;  %v11169_v50 = vld [vmem:[#allocation46_spill] sm:$0xff] }
 0x126   :  { %v421_v15 = vadd.f32 -0.4999988, %v420_v25  ;;  %v428_v39 = vadd.f32 -0.16666654, %v427_v17  ;;  %vm682_vm14 = vc.u32 %v674_v0, %v678_v57  ;;  %vm436_vm5 = vcmp.eq.s32.totalorder %v6501_v12, 0 }
 0x127   :  { %v11166_v62 = vand.u32 2147483647, %v11164_v16  ;;  %v568_v26 = vsub.s32 4, %v6475_v18  ;;  %v657_v5 = vshrl.u32 %v6449_v47, 16  ;;  %v680_v24 = vshll.u32 %v6525_v23, 16 }
 0x128   :  { %v683_v14 = vsel %vm682_vm14, 1, %v11134_v31  ;;  %v422_v20 = vmul.f32 %v421_v15, %v417_v28  ;;  %v429_v22 = vmul.f32 %v428_v39, %v417_v28  ;;  %vm435_vm11 = vcmp.lt.s32.totalorder %v6501_v12, 2 }
 0x129   :  { %vm6541_vm9 = vcmp.le.f32.partialorder %v11166_v62, 0.7853982  ;;  %vm5417_vm0 = vcmp.lt.s32.totalorder %v5416_v13, 0  ;;  %v684_v46 = vadd.s32 %v678_v57, %v674_v0  ;;  %vm432_vm10 = vweird.f32 %v11150_v53  ;;  %v11175_v53 = vld [vmem:[#allocation42_spill] sm:$0xff] }
 0x12a   :  { %v553_v45 = vsel %vm5417_vm0, 0, %v5416_v13  ;;  %v637_v55 = vsel %vm633_vm8, %v11169_v50, %v636_v2  ;;  %v668_v30 = vadd.s32 %v667_v60, %v657_v5  ;;  %v685_v9 = vadd.s32 %v683_v14, %v677_v43  ;;  %v11170_v13 = vld [vmem:[#allocation16_spill] sm:$0xff]  ;;  %v11173_v50 = vld [vmem:[#allocation35_spill] sm:$0xff] }
 0x12b   :  { %v423_v47 = vadd.f32 1.0, %v422_v20  ;;  %v430_v56 = vadd.f32 1.0, %v429_v22  ;;  %v554_v49 = vsub.s32 32, %v553_v45  ;;  %v659_v37 = vshrl.u32 %v6452_v34, 16  ;;  %v11171_v22 = vld [vmem:[#allocation30_spill] sm:$0xff] }
 0x12c   :  { %vm1251_vm12 = vcmp.lt.s32.totalorder %v6210_v32, 1  ;;  %v555_v28 = vshll.u32 %v6499_v41, %v553_v45  ;;  %v558_v7 = vsub.s32 4294967266, %v553_v45  ;;  %v569_v0 = vsel %vm446_vm4, %v568_v26, %v6475_v18 }
 0x12d   :  { %vm686_vm13 = vc.u32 %v684_v46, %v680_v24  ;;  %v431_v57 = vmul.f32 %v430_v56, %v6486_v4  ;;  %v440_v25 = vxor.u32 2147483648, %v423_v47  ;;  %v556_v17 = vshrl.u32 %v538_v19, %v554_v49 }
 0x12e   :  { %v687_v42 = vsel %vm686_vm13, 1, %v11134_v31  ;;  %v559_v61 = vadd.s32 127, %v558_v7  ;;  %v6562_v2 = vadd.s32 %v668_v30, %v659_v37  ;;  %v679_v34 = vshrl.u32 %v6508_v40, 16 }
 0x12f   :  { %v689_v60 = vadd.s32 %v687_v42, %v685_v9  ;;  %v437_v43 = vxor.u32 2147483648, %v431_v57  ;;  %vm439_vm8 = vcmp.eq.s32.totalorder %v6501_v12, 2  ;;  %v557_v41 = vor.u32 %v556_v17, %v555_v28 }
 0x130   :  { %v681_v15 = vshrl.u32 %v6525_v23, 16  ;;  %v560_v18 = vshll.u32 %v559_v61, 23  ;;  %v6567_v39 = vadd.s32 %v684_v46, %v680_v24  ;;  %vm787_vm7 = vcmp.lt.s32.totalorder %v11170_v13, 2  ;;  %v11172_v46 = vld [vmem:[#allocation28_spill] sm:$0xff] }
 0x131   :  { %v690_v4 = vadd.s32 %v689_v60, %v679_v34  ;;  %v438_v19 = vsel %vm436_vm5, %v423_v47, %v437_v43  ;;  %v441_v62 = vsel %vm439_vm8, %v440_v25, %v431_v57  ;;  %v571_v40 = vsel %vm6541_vm9, 0, %v569_v0  ;;  %v11176_v0 = vld [vmem:[#allocation19_spill] sm:$0xff]  ;;  %v11177_v34 = vld [vmem:[#allocation20_spill] sm:$0xff] }
 0x132   :  { %v638_v26 = vsel %vm632_vm3, %v635_v48, %v637_v55  ;;  %v442_v5 = vsel %vm435_vm11, %v438_v19, %v441_v62  ;;  %v561_v23 = vor.u32 4788187, %v560_v18  ;;  %vm694_vm14 = vc.u32 %v6562_v2, %v6567_v39 }
 0x133   :  { %v691_v14 = vadd.s32 %v690_v4, %v681_v15  ;;  %v443_v24 = vsel %vm432_vm10, nan, %v442_v5  ;;  %v564_v20 = vcvt.s32.f32 %v557_v41  ;;  %v797_v45 = vsel %vm787_vm7, %v11172_v46, %v11171_v22 }
 0x134   :  { %v801_v12 = vsel %vm787_vm7, %v11174_v54, %v11173_v50  ;;  %5434 = vmatmul.msk.f32.gmra.mxu1 %vm1382_vm6, %v443_v24  ;;  %v562_v48 = vand.u32 2147483647, %v561_v23  ;;  %v588_v47 = vadd.s32 3, %v571_v40  ;;  %v692_v56 = vmul.u32 %v11175_v53, %v638_v26 }
 0x135   :  { %v695_v55 = vadd.s32 1, %v691_v14  ;;  %v805_v30 = vand.u32 65535, %v801_v12  ;;  %v806_v9 = vshrl.u32 %v801_v12, 16  ;;  %v827_v49 = vand.u32 65535, %v797_v45 }
 0x136   :  { %v828_v37 = vshrl.u32 %v797_v45, 16  ;;  %v565_v28 = vmul.f32 %v564_v20, %v562_v48  ;;  %v1250_v17 = vor.u32 %v6379_v63, %v6315_v52  ;;  %v6600_v42 = vsel %vm1251_vm12, %v6396_v59, %v6400_v6  ;;  %v11178_v45 = vld [vmem:[#allocation14_spill] sm:$0xff]  ;;  %v11179_v48 = vld [vmem:[#allocation24_spill] sm:$0xff] }
 0x137   :  { %v696_v7 = vsel %vm694_vm14, %v695_v55, %v691_v14  ;;  %v807_v57 = vmul.u32 %v805_v30, %v11176_v0  ;;  %v808_v25 = vmul.u32 %v806_v9, %v11176_v0  ;;  %v809_v60 = vmul.u32 %v805_v30, %v11177_v34 }
 0x138   :  { %v697_v61 = vadd.s32 %v696_v7, %v692_v56  ;;  %vm1254_vm3 = vcmp.lt.s32.totalorder %v6210_v32, 4  ;;  %v566_v43 = vxor.u32 2147483648, %v565_v28  ;;  %v810_v41 = vmul.u32 %v806_v9, %v11177_v34 }
 0x139   :  { %v811_v15 = vshll.u32 %v808_v25, 16  ;;  %v6606_v18 = vmul.u32 %v828_v37, %v11176_v0  ;;  %v6608_v4 = vand.u32 3, %v588_v47  ;;  %v813_v62 = vshll.u32 %v809_v60, 16 }
 0x13a   :  { %v698_v19 = vadd.s32 536870912, %v697_v61  ;;  %v829_v40 = vmul.u32 %v827_v49, %v11176_v0  ;;  %v567_v26 = vsel %vm446_vm4, %v566_v43, %v565_v28  ;;  %v831_v23 = vmul.u32 %v827_v49, %v11177_v34  ;;  %v11180_v43 = vld [vmem:[#allocation22_spill] sm:$0xff] }
 0x13b   :  { %vm815_vm5 = vc.u32 %v807_v57, %v811_v15  ;;  %v817_v5 = vadd.s32 %v811_v15, %v807_v57  ;;  %v6617_v14 = vsel %vm6541_vm9, %v11164_v16, %v567_v26  ;;  %v833_v22 = vshll.u32 %v6606_v18, 16  ;;  %v11183_v26 = vld [vmem:[#allocation23_spill] sm:$0xff] }
 0x13c   :  { %v6619_v24 = vshrl.u32 %v698_v19, 30  ;;  %v816_v20 = vsel %vm815_vm5, 1, %v11134_v31  ;;  %v572_v46 = vmul.f32 %v6617_v14, %v6617_v14  ;;  %v770_v50 = vshrl.u32 %v11115_v1, %v11178_v45 }
 0x13d   :  { %v818_v54 = vadd.s32 %v816_v20, %v810_v41  ;;  %vm819_vm4 = vc.u32 %v817_v5, %v813_v62  ;;  %v791_v44 = vsel %vm789_vm15, %v11179_v48, 2102212464  ;;  %v812_v55 = vshrl.u32 %v808_v25, 16 }
 0x13e   :  { %v700_v12 = vshll.u32 %v6619_v24, 30  ;;  %v820_v30 = vsel %vm819_vm4, 1, %v11134_v31  ;;  %v573_v9 = vmul.f32 -0.001358992, %v572_v46  ;;  %v580_v47 = vmul.f32 -0.00019511016, %v572_v46 }
 0x13f   :  { %v822_v53 = vadd.s32 %v820_v30, %v818_v54  ;;  %v832_v56 = vmul.u32 %v828_v37, %v11177_v34  ;;  %v835_v28 = vshll.u32 %v831_v23, 16  ;;  %vm837_vm9 = vc.u32 %v829_v40, %v833_v22  ;;  %v11182_v37 = vld [vmem:[#allocation18_spill] sm:$0xff] }
 0x140   :  { %v6633_v49 = vsub.s32 %v697_v61, %v700_v12  ;;  %v839_v7 = vadd.s32 %v833_v22, %v829_v40  ;;  %v574_v0 = vadd.f32 0.041655596, %v573_v9  ;;  %v581_v57 = vadd.f32 0.008332121, %v580_v47 }
 0x141   :  { %vm11181_vm11 = vcmp.lt.s32.totalorder %v11170_v13, 1  ;;  %v814_v15 = vshrl.u32 %v809_v60, 16  ;;  %v823_v19 = vadd.s32 %v822_v53, %v812_v55  ;;  %v838_v62 = vsel %vm837_vm9, 1, %v11134_v31 }
 0x142   :  { %v790_v41 = vsel %vm11181_vm11, %v770_v50, %v11180_v43  ;;  %vm702_vm15 = vcmp.lt.s32.totalorder %v6633_v49, 0  ;;  %v703_v25 = vsub.s32 0, %v6633_v49  ;;  %vm601_vm0 = vcmp.lt.s32.totalorder %v11182_v37, 0 }
 0x143   :  { %v575_v61 = vmul.f32 %v574_v0, %v572_v46  ;;  %v582_v34 = vmul.f32 %v581_v57, %v572_v46  ;;  %vm11184_vm10 = vcmp.lt.s32.totalorder %v11170_v13, 3  ;;  %v840_v5 = vadd.s32 %v838_v62, %v832_v56 }
 0x144   :  { %v792_v40 = vsel %vm11184_vm10, %v11183_v26, %v791_v44  ;;  %v6648_v60 = vsel %vm1254_vm3, %v6456_v58, 920167782  ;;  %v704_v20 = vsel %vm702_vm15, %v703_v25, %v6633_v49  ;;  %v834_v22 = vshrl.u32 %v6606_v18, 16 }
 0x145   :  { %vm841_vm13 = vc.u32 %v839_v7, %v835_v28  ;;  %v576_v45 = vadd.f32 -0.4999988, %v575_v61  ;;  %v583_v50 = vadd.f32 -0.16666654, %v582_v34  ;;  %v705_v54 = vclz %v704_v20 }
 0x146   :  { %v842_v12 = vsel %vm841_vm13, 1, %v11134_v31  ;;  %v793_v48 = vsel %vm787_vm7, %v790_v41, %v792_v40  ;;  %v6655_v44 = vadd.s32 %v823_v19, %v814_v15  ;;  %v836_v55 = vshrl.u32 %v831_v23, 16  ;;  %v11185_v41 = vld [vmem:[#allocation15_spill] sm:$0xff] }
 0x147   :  { %v844_v30 = vadd.s32 %v842_v12, %v840_v5  ;;  %v577_v9 = vmul.f32 %v576_v45, %v572_v46  ;;  %v584_v47 = vmul.f32 %v583_v50, %v572_v46  ;;  %vm590_vm8 = vcmp.lt.s32.totalorder %v6608_v4, 2 }
 0x148   :  { %v5419_v53 = vadd.s32 4294967294, %v705_v54  ;;  %v6658_v56 = vadd.s32 %v839_v7, %v835_v28  ;;  %vm587_vm14 = vweird.f32 %v11164_v16  ;;  %vm591_vm5 = vcmp.eq.s32.totalorder %v6608_v4, 0  ;;  %v11186_v54 = vld [vmem:[#allocation50_spill] sm:$0xff] }
 0x149   :  { %vm594_vm4 = vcmp.eq.s32.totalorder %v6608_v4, 2  ;;  %v723_v13 = vsub.s32 4, %v6619_v24  ;;  %v845_v18 = vadd.s32 %v844_v30, %v834_v22  ;;  %v578_v0 = vadd.f32 1.0, %v577_v9  ;;  %v11190_v9 = vld [vmem:[#allocation51_spill] sm:$0xff] }
 0x14a   :  { %v585_v57 = vadd.f32 1.0, %v584_v47  ;;  %v693_v23 = vadd.s32 %v6567_v39, %v6562_v2  ;;  %vm5420_vm7 = vcmp.lt.s32.totalorder %v5419_v53, 0  ;;  %v847_v28 = vmul.u32 %v11185_v41, %v793_v48 }
 0x14b   :  { %v708_v46 = vsel %vm5420_vm7, 0, %v5419_v53  ;;  %v846_v43 = vadd.s32 %v845_v18, %v836_v55  ;;  %vm942_vm9 = vcmp.lt.s32.totalorder %v6145_v33, 2  ;;  %v595_v15 = vxor.u32 2147483648, %v578_v0 }
 0x14c   :  { %v586_v7 = vmul.f32 %v585_v57, %v6617_v14  ;;  %v709_v25 = vsub.s32 32, %v708_v46  ;;  %vm849_vm11 = vc.u32 %v6655_v44, %v6658_v56  ;;  %v710_v19 = vshll.u32 %v6633_v49, %v708_v46 }
 0x14d   :  { %v713_v62 = vsub.s32 4294967266, %v708_v46  ;;  %v724_v2 = vsel %vm601_vm0, %v723_v13, %v6619_v24  ;;  %v850_v39 = vadd.s32 1, %v846_v43  ;;  %v952_v14 = vsel %vm942_vm9, %v6193_v3, %v6233_v11 }
 0x14e   :  { %v592_v61 = vxor.u32 2147483648, %v586_v7  ;;  %v711_v34 = vshrl.u32 %v693_v23, %v709_v25  ;;  %v956_v26 = vsel %vm942_vm9, %v6208_v8, %v6237_v51  ;;  %v596_v22 = vsel %vm594_vm4, %v595_v15, %v586_v7 }
 0x14f   :  { %v714_v40 = vadd.s32 127, %v713_v62  ;;  %v851_v49 = vsel %vm849_vm11, %v850_v39, %v846_v43  ;;  %v960_v5 = vand.u32 65535, %v956_v26  ;;  %v961_v20 = vshrl.u32 %v956_v26, 16 }
 0x150   :  { %v593_v24 = vsel %vm591_vm5, %v578_v0, %v592_v61  ;;  %v712_v45 = vor.u32 %v711_v34, %v710_v19  ;;  %v852_v50 = vadd.s32 %v851_v49, %v847_v28  ;;  %v11187_v48 = vand.u32 2147483647, %v11182_v37  ;;  %v11191_v49 = vld [vmem:[#allocation48_spill] sm:$0xff] }
 0x151   :  { %v597_v3 = vsel %vm590_vm8, %v593_v24, %v596_v22  ;;  %v715_v11 = vshll.u32 %v714_v40, 23  ;;  %v962_v12 = vmul.u32 %v960_v5, %v11186_v54  ;;  %v963_v8 = vmul.u32 %v961_v20, %v11186_v54 }
 0x152   :  { %v598_v51 = vsel %vm587_vm14, nan, %v597_v3  ;;  %vm6695_vm15 = vcmp.le.f32.partialorder %v11187_v48, 0.7853982  ;;  %v853_v30 = vadd.s32 536870912, %v852_v50  ;;  %v6700_v47 = vmul.u32 %v960_v5, %v11190_v9  ;;  %v11193_v48 = vld [vmem:[#allocation56_spill] sm:$0xff] }
 0x153   :  { %5435 = vmatmul.msk.f32.gmra.mxu1 %vm1382_vm6, %v598_v51  ;;  %v716_v4 = vor.u32 4788187, %v715_v11  ;;  %v726_v53 = vsel %vm6695_vm15, 0, %v724_v2  ;;  %v965_v13 = vmul.u32 %v961_v20, %v11190_v9  ;;  %v966_v16 = vshll.u32 %v963_v8, 16 }
 0x154   :  { %v6706_v18 = vshrl.u32 %v853_v30, 30  ;;  %v968_v0 = vshll.u32 %v6700_v47, 16  ;;  %v982_v57 = vand.u32 65535, %v952_v14  ;;  %v983_v23 = vshrl.u32 %v952_v14, 16 }
 0x155   :  { %v717_v46 = vand.u32 2147483647, %v716_v4  ;;  %v719_v43 = vcvt.s32.f32 %v712_v45  ;;  %vm970_vm10 = vc.u32 %v962_v12, %v966_v16  ;;  %v972_v41 = vadd.s32 %v966_v16, %v962_v12 }
 0x156   :  { %v6713_v28 = vsel %vm1251_vm12, %v6400_v6, %v6403_v35  ;;  %v855_v7 = vshll.u32 %v6706_v18, 30  ;;  %v971_v15 = vsel %vm970_vm10, 1, %v11134_v31  ;;  %v985_v25 = vmul.u32 %v983_v23, %v11186_v54 }
 0x157   :  { %v720_v19 = vmul.f32 %v719_v43, %v717_v46  ;;  %v743_v62 = vadd.s32 3, %v726_v53  ;;  %v973_v2 = vadd.s32 %v971_v15, %v965_v13  ;;  %vm974_vm13 = vc.u32 %v972_v41, %v968_v0  ;;  %v11195_v46 = vld [vmem:[#allocation55_spill] sm:$0xff] }
 0x158   :  { %v6718_v39 = vsub.s32 %v852_v50, %v855_v7  ;;  %v975_v61 = vsel %vm974_vm13, 1, %v11134_v31  ;;  %v984_v34 = vmul.u32 %v982_v57, %v11186_v54  ;;  %v986_v14 = vmul.u32 %v982_v57, %v11190_v9  ;;  %v11192_v50 = vld [vmem:[#allocation6_spill] sm:$0xff] }
 0x159   :  { %v6728_v26 = vsel %vm1254_vm3, %v1250_v17, 1326507024  ;;  %v721_v40 = vxor.u32 2147483648, %v720_v19  ;;  %v925_v5 = vshrl.u32 %v11115_v1, %v11191_v49  ;;  %v988_v20 = vshll.u32 %v985_v25, 16 }
 0x15a   :  { %vm857_vm8 = vcmp.lt.s32.totalorder %v6718_v39, 0  ;;  %v858_v24 = vsub.s32 0, %v6718_v39  ;;  %v967_v22 = vshrl.u32 %v963_v8, 16  ;;  %v977_v45 = vadd.s32 %v975_v61, %v973_v2 }
 0x15b   :  { %vm756_vm14 = vcmp.lt.s32.totalorder %v11192_v50, 0  ;;  %v722_v52 = vsel %vm601_vm0, %v721_v40, %v720_v19  ;;  %v6737_v63 = vand.u32 3, %v743_v62  ;;  %v848_v17 = vadd.s32 %v6658_v56, %v6655_v44  ;;  %v11194_v56 = vld [vmem:[#allocation53_spill] sm:$0xff] }
 0x15c   :  { %v987_v3 = vmul.u32 %v983_v23, %v11190_v9  ;;  %v6745_v11 = vsel %vm6695_vm15, %v11182_v37, %v722_v52  ;;  %v859_v54 = vsel %vm857_vm8, %v858_v24, %v6718_v39  ;;  %v990_v12 = vshll.u32 %v986_v14, 16 }
 0x15d   :  { %vm992_vm5 = vc.u32 %v984_v34, %v988_v20  ;;  %v727_v8 = vmul.f32 %v6745_v11, %v6745_v11  ;;  %v860_v51 = vclz %v859_v54  ;;  %v946_v30 = vsel %vm944_vm1, %v11193_v48, 2102212464 }
 0x15e   :  { %v993_v44 = vsel %vm992_vm5, 1, %v11134_v31  ;;  %v945_v55 = vsel %vm941_vm2, %v925_v5, %v11194_v56  ;;  %v969_v9 = vshrl.u32 %v6700_v47, 16  ;;  %v978_v4 = vadd.s32 %v977_v45, %v967_v22  ;;  %v11201_v56 = vld [vmem:[#allocation47_spill] sm:$0xff] }
 0x15f   :  { %v994_v53 = vadd.s32 %v988_v20, %v984_v34  ;;  %v728_v13 = vmul.f32 -0.001358992, %v727_v8  ;;  %v735_v16 = vmul.f32 -0.00019511016, %v727_v8  ;;  %v5422_v0 = vadd.s32 4294967294, %v860_v51 }
 0x160   :  { %v995_v57 = vadd.s32 %v993_v44, %v987_v3  ;;  %v878_v23 = vsub.s32 4, %v6706_v18  ;;  %vm11196_vm0 = vcmp.lt.s32.totalorder %v6145_v33, 3  ;;  %v989_v41 = vshrl.u32 %v985_v25, 16 }
 0x161   :  { %v947_v43 = vsel %vm11196_vm0, %v11195_v46, %v946_v30  ;;  %vm996_vm1 = vc.u32 %v994_v53, %v990_v12  ;;  %v729_v7 = vadd.f32 0.041655596, %v728_v13  ;;  %v736_v15 = vadd.f32 0.008332121, %v735_v16  ;;  %v11200_v30 = vld [vmem:[#allocation26_spill] sm:$0xff]  ;;  %v11202_v13 = vld [vmem:[#allocation37_spill] sm:$0xff] }
 0x162   :  { %vm5423_vm4 = vcmp.lt.s32.totalorder %v5422_v0, 0  ;;  %v997_v19 = vsel %vm996_vm1, 1, %v11134_v31  ;;  %v6763_v62 = vadd.s32 %v978_v4, %v969_v9  ;;  %v991_v2 = vshrl.u32 %v986_v14, 16  ;;  %v11203_v16 = vld [vmem:[#allocation36_spill] sm:$0xff] }
 0x163   :  { %v863_v47 = vsel %vm5423_vm4, 0, %v5422_v0  ;;  %v999_v61 = vadd.s32 %v997_v19, %v995_v57  ;;  %v730_v34 = vmul.f32 %v729_v7, %v727_v8  ;;  %v737_v40 = vmul.f32 %v736_v15, %v727_v8  ;;  %v11204_v0 = vld [vmem:[#allocation39_spill] sm:$0xff]  ;;  %v11205_v57 = vld [vmem:[#allocation38_spill] sm:$0xff] }
 0x164   :  { %v864_v49 = vsub.s32 32, %v863_v47  ;;  %v6765_v5 = vadd.s32 %v994_v53, %v990_v12  ;;  %v868_v20 = vsub.s32 4294967266, %v863_v47  ;;  %v879_v25 = vsel %vm756_vm14, %v878_v23, %v6706_v18 }
 0x165   :  { %v948_v24 = vsel %vm942_vm9, %v945_v55, %v947_v43  ;;  %v1000_v22 = vadd.s32 %v999_v61, %v989_v41  ;;  %v731_v45 = vadd.f32 -0.4999988, %v730_v34  ;;  %v738_v52 = vadd.f32 -0.16666654, %v737_v40  ;;  %v11206_v34 = vld [vmem:[#allocation25_spill] sm:$0xff] }
 0x166   :  { %v865_v3 = vshll.u32 %v6718_v39, %v863_v47  ;;  %v866_v14 = vshrl.u32 %v848_v17, %v864_v49  ;;  %v11197_v54 = vand.u32 2147483647, %v11192_v50  ;;  %v869_v12 = vadd.s32 127, %v868_v20  ;;  %v11207_v20 = vld [vmem:[#allocation27_spill] sm:$0xff] }
 0x167   :  { %v1001_v48 = vadd.s32 %v1000_v22, %v991_v2  ;;  %vm1097_vm7 = vcmp.lt.s32.totalorder %v11200_v30, 2  ;;  %vm1253_vm11 = vcmp.lt.s32.totalorder %v6210_v32, 3  ;;  %v732_v33 = vmul.f32 %v731_v45, %v727_v8 }
 0x168   :  { %vm6775_vm2 = vcmp.le.f32.partialorder %v11197_v54, 0.7853982  ;;  %v739_v18 = vmul.f32 %v738_v52, %v727_v8  ;;  %vm745_vm9 = vcmp.lt.s32.totalorder %v6737_v63, 2  ;;  %v867_v44 = vor.u32 %v866_v14, %v865_v3 }
 0x169   :  { %vm1004_vm15 = vc.u32 %v6763_v62, %v6765_v5  ;;  %vm742_vm10 = vweird.f32 %v11182_v37  ;;  %v870_v39 = vshll.u32 %v869_v12, 23  ;;  %v881_v17 = vsel %vm6775_vm2, 0, %v879_v25 }
 0x16a   :  { %v1002_v55 = vmul.u32 %v11201_v56, %v948_v24  ;;  %v1005_v9 = vadd.s32 1, %v1001_v48  ;;  %v733_v4 = vadd.f32 1.0, %v732_v33  ;;  %v740_v53 = vadd.f32 1.0, %v739_v18 }
 0x16b   :  { %v6792_v8 = vsel %vm1097_vm7, %v11203_v16, %v11202_v13  ;;  %v1111_v23 = vsel %vm1097_vm7, %v11205_v57, %v11204_v0  ;;  %v871_v46 = vor.u32 4788187, %v870_v39  ;;  %v874_v47 = vcvt.s32.f32 %v867_v44  ;;  %v11209_v57 = vld [vmem:[#allocation34_spill] sm:$0xff] }
 0x16c   :  { %v1006_v43 = vsel %vm1004_vm15, %v1005_v9, %v1001_v48  ;;  %v1115_v41 = vand.u32 65535, %v1111_v23  ;;  %v1116_v7 = vshrl.u32 %v1111_v23, 16  ;;  %v741_v15 = vmul.f32 %v740_v53, %v6745_v11 }
 0x16d   :  { %v750_v19 = vxor.u32 2147483648, %v733_v4  ;;  %v1007_v2 = vadd.s32 %v1006_v43, %v1002_v55  ;;  %v872_v61 = vand.u32 2147483647, %v871_v46  ;;  %vm746_vm13 = vcmp.eq.s32.totalorder %v6737_v63, 0 }
 0x16e   :  { %v1117_v40 = vmul.u32 %v1115_v41, %v11206_v34  ;;  %v6801_v49 = vmul.u32 %v1116_v7, %v11206_v34  ;;  %v6804_v25 = vmul.u32 %v1115_v41, %v11207_v20  ;;  %v747_v24 = vxor.u32 2147483648, %v741_v15 }
 0x16f   :  { %vm749_vm8 = vcmp.eq.s32.totalorder %v6737_v63, 2  ;;  %v1008_v22 = vadd.s32 536870912, %v1007_v2  ;;  %v875_v11 = vmul.f32 %v874_v47, %v872_v61  ;;  %v898_v52 = vadd.s32 3, %v881_v17 }
 0x170   :  { %v751_v45 = vsel %vm749_vm8, %v750_v19, %v741_v15  ;;  %v1121_v3 = vshll.u32 %v6801_v49, 16  ;;  %v748_v14 = vsel %vm746_vm13, %v733_v4, %v747_v24  ;;  %v1123_v12 = vshll.u32 %v6804_v25, 16  ;;  %v11208_v4 = vld [vmem:[#allocation21_spill] sm:$0xff] }
 0x171   :  { %v6809_v54 = vshrl.u32 %v1008_v22, 30  ;;  %v1138_v48 = vshrl.u32 %v6792_v8, 16  ;;  %v752_v33 = vsel %vm745_vm9, %v748_v14, %v751_v45  ;;  %v876_v18 = vxor.u32 2147483648, %v875_v11 }
 0x172   :  { %vm1125_vm5 = vc.u32 %v1117_v40, %v1121_v3  ;;  %v1127_v44 = vadd.s32 %v1121_v3, %v1117_v40  ;;  %v753_v39 = vsel %vm742_vm10, nan, %v752_v33  ;;  %v1120_v56 = vmul.u32 %v1116_v7, %v11207_v20  ;;  %v11211_v7 = vld [vmem:[#allocation32_spill] sm:$0xff] }
 0x173   :  { %v1010_v17 = vshll.u32 %v6809_v54, 30  ;;  %v1137_v55 = vand.u32 65535, %v6792_v8  ;;  %v6824_v9 = vsel %vm1253_vm11, %v6403_v35, %v6648_v60  ;;  %5436 = vmatmul.msk.f32.gmra.mxu1 %vm1382_vm6, %v753_v39  ;;  %v877_v63 = vsel %vm756_vm14, %v876_v18, %v875_v11  ;;  %v11215_v18 = vld [vmem:[#allocation31_spill] sm:$0xff] }
 0x174   :  { %v1080_v37 = vshrl.u32 %v11115_v1, %v11208_v4  ;;  %v1126_v53 = vsel %vm1125_vm5, 1, %v11134_v31  ;;  %v6836_v13 = vsel %vm1253_vm11, %v6456_v58, %v6728_v26  ;;  %v6841_v60 = vsel %vm6775_vm2, %v11192_v50, %v877_v63 }
 0x175   :  { %v6843_v16 = vsub.s32 %v1007_v2, %v1010_v17  ;;  %vm1129_vm0 = vc.u32 %v1127_v44, %v1123_v12  ;;  %v882_v8 = vmul.f32 %v6841_v60, %v6841_v60  ;;  %v6847_v0 = vand.u32 3, %v898_v52  ;;  %v11213_v2 = vld [vmem:[#allocation33_spill] sm:$0xff] }
 0x176   :  { %vm11210_vm14 = vcmp.lt.s32.totalorder %v11200_v30, 4  ;;  %v1140_v58 = vmul.u32 %v1138_v48, %v11206_v34  ;;  %v1128_v51 = vadd.s32 %v1126_v53, %v1120_v56  ;;  %v6856_v46 = vmul.u32 %v1137_v55, %v11207_v20 }
 0x177   :  { %v1101_v23 = vsel %vm11210_vm14, %v11209_v57, 2102212464  ;;  %vm1012_vm1 = vcmp.lt.s32.totalorder %v6843_v16, 0  ;;  %v1013_v26 = vsub.s32 0, %v6843_v16  ;;  %v883_v43 = vmul.f32 -0.001358992, %v882_v8 }
 0x178   :  { %v890_v41 = vmul.f32 -0.00019511016, %v882_v8  ;;  %vm11212_vm4 = vcmp.lt.s32.totalorder %v11200_v30, 1  ;;  %v1130_v19 = vsel %vm1129_vm0, 1, %v11134_v31  ;;  %vm11214_vm2 = vcmp.lt.s32.totalorder %v11200_v30, 3 }
 0x179   :  { %v1100_v15 = vsel %vm11212_vm4, %v1080_v37, %v11211_v7  ;;  %v1014_v47 = vsel %vm1012_vm1, %v1013_v26, %v6843_v16  ;;  %v1102_v61 = vsel %vm11214_vm2, %v11213_v2, %v1101_v23  ;;  %v1139_v40 = vmul.u32 %v1137_v55, %v11206_v34 }
 0x17a   :  { %v1143_v24 = vshll.u32 %v1140_v58, 16  ;;  %v884_v22 = vadd.f32 0.041655596, %v883_v43  ;;  %v891_v45 = vadd.f32 0.008332121, %v890_v41  ;;  %v1003_v11 = vadd.s32 %v6765_v5, %v6763_v62 }
 0x17b   :  { %v1015_v52 = vclz %v1014_v47  ;;  %v1122_v3 = vshrl.u32 %v6801_v49, 16  ;;  %v1132_v14 = vadd.s32 %v1130_v19, %v1128_v51  ;;  %v1142_v12 = vmul.u32 %v1138_v48, %v11207_v20 }
 0x17c   :  { %v1145_v33 = vshll.u32 %v6856_v46, 16  ;;  %vm911_vm9 = vcmp.lt.s32.totalorder %v11215_v18, 0  ;;  %v885_v44 = vmul.f32 %v884_v22, %v882_v8  ;;  %v892_v39 = vmul.f32 %v891_v45, %v882_v8 }
 0x17d   :  { %v5425_v17 = vadd.s32 4294967294, %v1015_v52  ;;  %v6875_v34 = vsel %vm1097_vm7, %v1100_v15, %v1102_v61  ;;  %v1033_v56 = vsub.s32 4, %v6809_v54  ;;  %v1124_v62 = vshrl.u32 %v6804_v25, 16  ;;  %v11219_v52 = vld [vmem:[#allocation17_spill] sm:$0xff] }
 0x17e   :  { %vm1147_vm15 = vc.u32 %v1139_v40, %v1143_v24  ;;  %v1149_v5 = vadd.s32 %v1143_v24, %v1139_v40  ;;  %v886_v49 = vadd.f32 -0.4999988, %v885_v44  ;;  %v893_v55 = vadd.f32 -0.16666654, %v892_v39 }
 0x17f   :  { %vm5426_vm10 = vcmp.lt.s32.totalorder %v5425_v17, 0  ;;  %v1148_v20 = vsel %vm1147_vm15, 1, %v11134_v31  ;;  %v1133_v63 = vadd.s32 %v1132_v14, %v1122_v3  ;;  %vm900_vm7 = vcmp.lt.s32.totalorder %v6847_v0, 2 }
 0x180   :  { %v1018_v48 = vsel %vm5426_vm10, 0, %v5425_v17  ;;  %v1150_v4 = vadd.s32 %v1148_v20, %v1142_v12  ;;  %vm1151_vm13 = vc.u32 %v1149_v5, %v1145_v33  ;;  %v887_v37 = vmul.f32 %v886_v49, %v882_v8  ;;  %v11220_v49 = vld [vmem:[#allocation58_spill] sm:$0xff] }
 0x181   :  { %v894_v53 = vmul.f32 %v893_v55, %v882_v8  ;;  %v1019_v30 = vsub.s32 32, %v1018_v48  ;;  %v1144_v57 = vshrl.u32 %v1140_v58, 16  ;;  %vm897_vm8 = vweird.f32 %v11192_v50 }
 0x182   :  { %v1020_v25 = vshll.u32 %v6843_v16, %v1018_v48  ;;  %v1023_v23 = vsub.s32 4294967266, %v1018_v48  ;;  %v1146_v26 = vshrl.u32 %v6856_v46, 16  ;;  %v1152_v51 = vsel %vm1151_vm13, 1, %v11134_v31  ;;  %v11221_v48 = vld [vmem:[#allocation57_spill] sm:$0xff] }
 0x183   :  { %v888_v43 = vadd.f32 1.0, %v887_v37  ;;  %v895_v41 = vadd.f32 1.0, %v894_v53  ;;  %v1021_v7 = vshrl.u32 %v1003_v11, %v1019_v30  ;;  %v1154_v15 = vadd.s32 %v1152_v51, %v1150_v4 }
 0x184   :  { %v11216_v19 = vand.u32 2147483647, %v11215_v18  ;;  %v1024_v58 = vadd.s32 127, %v1023_v23  ;;  %v6891_v47 = vadd.s32 %v1133_v63, %v1124_v62  ;;  %v6893_v2 = vadd.s32 %v1149_v5, %v1145_v33 }
 0x185   :  { %vm1252_vm0 = vcmp.lt.s32.totalorder %v6210_v32, 2  ;;  %v896_v16 = vmul.f32 %v895_v41, %v6841_v60  ;;  %v905_v46 = vxor.u32 2147483648, %v888_v43  ;;  %v1022_v61 = vor.u32 %v1021_v7, %v1020_v25 }
 0x186   :  { %vm6887_vm5 = vcmp.le.f32.partialorder %v11216_v19, 0.7853982  ;;  %v1155_v40 = vadd.s32 %v1154_v15, %v1144_v57  ;;  %vm901_vm14 = vcmp.eq.s32.totalorder %v6847_v0, 0  ;;  %vm904_vm1 = vcmp.eq.s32.totalorder %v6847_v0, 2 }
 0x187   :  { %v1025_v24 = vshll.u32 %v1024_v58, 23  ;;  %v6902_v22 = vsel %vm911_vm9, %v1033_v56, %v6809_v54  ;;  %v902_v45 = vxor.u32 2147483648, %v896_v16  ;;  %v1157_v3 = vmul.u32 %v11219_v52, %v6875_v34 }
 0x188   :  { %v1156_v11 = vadd.s32 %v1155_v40, %v1146_v26  ;;  %v1262_v60 = vsel %vm1252_vm0, %v6600_v42, %v6824_v9  ;;  %v906_v14 = vsel %vm904_vm1, %v905_v46, %v896_v16  ;;  %vm1159_vm4 = vc.u32 %v6891_v47, %v6893_v2 }
 0x189   :  { %v1026_v12 = vor.u32 4788187, %v1025_v24  ;;  %v1266_v54 = vsel %vm1252_vm0, %v6713_v28, %v6836_v13  ;;  %v903_v33 = vsel %vm901_vm14, %v888_v43, %v902_v45  ;;  %v1029_v44 = vcvt.s32.f32 %v1022_v61 }
 0x18a   :  { %v1160_v39 = vadd.s32 1, %v1156_v11  ;;  %v1270_v17 = vand.u32 65535, %v1266_v54  ;;  %v907_v34 = vsel %vm900_vm7, %v903_v33, %v906_v14  ;;  %v1271_v62 = vshrl.u32 %v1266_v54, 16 }
 0x18b   :  { %v1027_v56 = vand.u32 2147483647, %v1026_v12  ;;  %v1293_v42 = vshrl.u32 %v1262_v60, 16  ;;  %v908_v9 = vsel %vm897_vm8, nan, %v907_v34  ;;  %v1292_v20 = vand.u32 65535, %v1262_v60 }
 0x18c   :  { %v1161_v5 = vsel %vm1159_vm4, %v1160_v39, %v1156_v11  ;;  %v6921_v55 = vmul.u32 %v1270_v17, %v11220_v49  ;;  %5437 = vmatmul.msk.f32.gmra.mxu1 %vm1382_vm6, %v908_v9  ;;  %v1272_v63 = vmul.u32 %v1270_v17, %v11221_v48  ;;  %v1273_v0 = vmul.u32 %v1271_v62, %v11221_v48 }
 0x18d   :  { %v1030_v28 = vmul.f32 %v1029_v44, %v1027_v56  ;;  %v1162_v13 = vadd.s32 %v1161_v5, %v1157_v3  ;;  %v1036_v4 = vsel %vm6887_vm5, 0, %v6902_v22  ;;  %v1235_v50 = vshrl.u32 %v11115_v1, %v6240_v27 }
 0x18e   :  { %v1295_v37 = vmul.u32 %v1293_v42, %v11221_v48  ;;  %v1275_v57 = vmul.u32 %v1271_v62, %v11220_v49  ;;  %v1276_v25 = vshll.u32 %v1273_v0, 16  ;;  %v1278_v23 = vshll.u32 %v6921_v55, 16 }
 0x18f   :  { %v1031_v53 = vxor.u32 2147483648, %v1030_v28  ;;  %v1163_v30 = vadd.s32 536870912, %v1162_v13  ;;  %v1294_v26 = vmul.u32 %v1292_v20, %v11221_v48  ;;  %v1296_v51 = vmul.u32 %v1292_v20, %v11220_v49 }
 0x190   :  { %v1298_v43 = vshll.u32 %v1295_v37, 16  ;;  %vm1280_vm2 = vc.u32 %v1272_v63, %v1276_v25  ;;  %v1282_v27 = vadd.s32 %v1276_v25, %v1272_v63  ;;  %v1256_v19 = vsel %vm1254_vm3, %v6403_v35, 2102212464 }
 0x191   :  { %v1032_v41 = vsel %vm911_vm9, %v1031_v53, %v1030_v28  ;;  %v6938_v7 = vshrl.u32 %v1163_v30, 30  ;;  %v1281_v58 = vsel %vm1280_vm2, 1, %v11134_v31  ;;  %v1300_v16 = vshll.u32 %v1296_v51, 16 }
 0x192   :  { %v1035_v15 = vsel %vm6887_vm5, %v11215_v18, %v1032_v41  ;;  %v1255_v40 = vsel %vm1251_vm12, %v1235_v50, %v6396_v59  ;;  %v1297_v24 = vmul.u32 %v1293_v42, %v11220_v49  ;;  %v1283_v22 = vadd.s32 %v1281_v58, %v1275_v57  ;;  %v11222_v41 = vld [vmem:[#allocation54_spill] sm:$0xff] }
 0x193   :  { %v1037_v46 = vmul.f32 %v1035_v15, %v1035_v15  ;;  %v1165_v61 = vshll.u32 %v6938_v7, 30  ;;  %vm1284_vm9 = vc.u32 %v1282_v27, %v1278_v23  ;;  %vm1302_vm15 = vc.u32 %v1294_v26, %v1298_v43 }
 0x194   :  { %v1304_v8 = vadd.s32 %v1298_v43, %v1294_v26  ;;  %v1257_v35 = vsel %vm1253_vm11, %v6400_v6, %v1256_v19  ;;  %v1277_v3 = vshrl.u32 %v1273_v0, 16  ;;  %v1285_v60 = vsel %vm1284_vm9, 1, %v11134_v31 }
 0x195   :  { %v1038_v45 = vmul.f32 -0.001358992, %v1037_v46  ;;  %v1045_v11 = vmul.f32 -0.00019511016, %v1037_v46  ;;  %v1166_v52 = vsub.s32 %v1162_v13, %v1165_v61  ;;  %v1303_v14 = vsel %vm1302_vm15, 1, %v11134_v31 }
 0x196   :  { %vm1306_vm3 = vc.u32 %v1304_v8, %v1300_v16  ;;  %v1279_v33 = vshrl.u32 %v6921_v55, 16  ;;  %v1287_v44 = vadd.s32 %v1285_v60, %v1283_v22  ;;  %v1305_v39 = vadd.s32 %v1303_v14, %v1297_v24 }
 0x197   :  { %v1039_v59 = vadd.f32 0.041655596, %v1038_v45  ;;  %v1046_v12 = vadd.f32 0.008332121, %v1045_v11  ;;  %vm1167_vm12 = vcmp.lt.s32.totalorder %v1166_v52, 0  ;;  %v1168_v54 = vsub.s32 0, %v1166_v52 }
 0x198   :  { %v1307_v17 = vsel %vm1306_vm3, 1, %v11134_v31  ;;  %v1299_v6 = vshrl.u32 %v1295_v37, 16  ;;  %v1053_v42 = vadd.s32 3, %v1036_v4  ;;  %v1288_v5 = vadd.s32 %v1287_v44, %v1277_v3  ;;  %v11223_v44 = vld [vmem:[#allocation8_spill] sm:$0xff] }
 0x199   :  { %v1040_v34 = vmul.f32 %v1039_v59, %v1037_v46  ;;  %v1047_v56 = vmul.f32 %v1046_v12, %v1037_v46  ;;  %v1169_v62 = vsel %vm1167_vm12, %v1168_v54, %v1166_v52  ;;  %v1309_v49 = vadd.s32 %v1307_v17, %v1305_v39 }
 0x19a   :  { %v1170_v9 = vclz %v1169_v62  ;;  %v1301_v13 = vshrl.u32 %v1296_v51, 16  ;;  %v1258_v63 = vsel %vm1252_vm0, %v1255_v40, %v1257_v35  ;;  %v1308_v55 = vadd.s32 %v1304_v8, %v1300_v16 }
 0x19b   :  { %v1041_v20 = vadd.f32 -0.4999988, %v1040_v34  ;;  %v1048_v28 = vadd.f32 -0.16666654, %v1047_v56  ;;  %v1289_v53 = vadd.s32 %v1288_v5, %v1279_v33  ;;  %v1310_v30 = vadd.s32 %v1309_v49, %v1299_v6 }
 0x19c   :  { %v5428_v48 = vadd.s32 4294967294, %v1170_v9  ;;  %v1054_v57 = vand.u32 3, %v1053_v42  ;;  %v1158_v37 = vadd.s32 %v6893_v2, %v6891_v47  ;;  %v1312_v27 = vmul.u32 %v11222_v41, %v1258_v63 }
 0x19d   :  { %v1042_v0 = vmul.f32 %v1041_v20, %v1037_v46  ;;  %v1049_v50 = vmul.f32 %v1048_v28, %v1037_v46  ;;  %v1311_v26 = vadd.s32 %v1310_v30, %v1301_v13  ;;  %vm1314_vm10 = vc.u32 %v1289_v53, %v1308_v55 }
 0x19e   :  { %vm5429_vm11 = vcmp.lt.s32.totalorder %v5428_v48, 0  ;;  %vm1056_vm13 = vcmp.eq.s32.totalorder %v1054_v57, 0  ;;  %vm1059_vm7 = vcmp.eq.s32.totalorder %v1054_v57, 2  ;;  %vm1055_vm8 = vcmp.lt.s32.totalorder %v1054_v57, 2 }
 0x19f   :  { %v1043_v4 = vadd.f32 1.0, %v1042_v0  ;;  %v1050_v25 = vadd.f32 1.0, %v1049_v50  ;;  %v1173_v23 = vsel %vm5429_vm11, 0, %v5428_v48  ;;  %v1315_v58 = vadd.s32 1, %v1311_v26 }
 0x1a0   :  { %v1174_v43 = vsub.s32 32, %v1173_v23  ;;  %v1178_v51 = vsub.s32 4294967266, %v1173_v23  ;;  %v1175_v16 = vshll.u32 %v1166_v52, %v1173_v23  ;;  %vm1052_vm5 = vweird.f32 %v11215_v18 }
 0x1a1   :  { %v1051_v32 = vmul.f32 %v1050_v25, %v1035_v15  ;;  %v1060_v19 = vxor.u32 2147483648, %v1043_v4  ;;  %v1316_v24 = vsel %vm1314_vm10, %v1315_v58, %v1311_v26  ;;  %vm1066_vm0 = vcmp.lt.s32.totalorder %v11223_v44, 0 }
 0x1a2   :  { %v1176_v46 = vshrl.u32 %v1158_v37, %v1174_v43  ;;  %v1179_v61 = vadd.s32 127, %v1178_v51  ;;  %v1317_v22 = vadd.s32 %v1316_v24, %v1312_v27  ;;  %v11224_v39 = vand.u32 2147483647, %v11223_v44 }
 0x1a3   :  { %v1057_v40 = vxor.u32 2147483648, %v1051_v32  ;;  %v1061_v45 = vsel %vm1059_vm7, %v1060_v19, %v1051_v32  ;;  %v1188_v56 = vsub.s32 4, %v6938_v7  ;;  %v1313_v63 = vadd.s32 %v1308_v55, %v1289_v53 }
 0x1a4   :  { %v1177_v47 = vor.u32 %v1176_v46, %v1175_v16  ;;  %v1180_v2 = vshll.u32 %v1179_v61, 23  ;;  %v1318_v35 = vadd.s32 536870912, %v1317_v22  ;;  %vm6972_vm14 = vcmp.le.f32.partialorder %v11224_v39, 0.7853982 }
 0x1a5   :  { %v1058_v8 = vsel %vm1056_vm13, %v1043_v4, %v1057_v40  ;;  %v1189_v20 = vsel %vm1066_vm0, %v1188_v56, %v6938_v7  ;;  %vm1207_vm3 = vweird.f32 %v11223_v44 }
 0x1a6   :  { %v1062_v11 = vsel %vm1055_vm8, %v1058_v8, %v1061_v45  ;;  %v1181_v15 = vor.u32 4788187, %v1180_v2  ;;  %v1184_v60 = vcvt.s32.f32 %v1177_v47  ;;  %v6966_v14 = vshrl.u32 %v1318_v35, 30 }
 0x1a7   :  { %v1063_v3 = vsel %vm1052_vm5, nan, %v1062_v11  ;;  %v1191_v0 = vsel %vm6972_vm14, 0, %v1189_v20 }
 0x1a8   :  { %5438 = vmatmul.msk.f32.gmra.mxu1 %vm1382_vm6, %v1063_v3  ;;  %v1182_v52 = vand.u32 2147483647, %v1181_v15  ;;  %v1320_v12 = vshll.u32 %v6966_v14, 30  ;;  %v1208_v26 = vadd.s32 3, %v1191_v0  ;;  %v11227_v15 = vld [vmem:[#allocation40_spill] sm:$0xff] }
 0x1a9   :  { %vm1221_vm12 = vcmp.lt.s32.totalorder %v11227_v15, 0  ;;  %v11228_v3 = vand.u32 2147483647, %v11227_v15  ;;  %vm1362_vm8 = vweird.f32 %v11227_v15 }
 0x1aa   :  { %v1185_v59 = vmul.f32 %v1184_v60, %v1182_v52  ;;  %v1321_v33 = vsub.s32 %v1317_v22, %v1320_v12  ;;  %v1209_v58 = vand.u32 3, %v1208_v26  ;;  %v1343_v60 = vsub.s32 4, %v6966_v14 }
 0x1ab   :  { %vm1220_vm11 = vcmp.le.f32.partialorder %v11228_v3, 0.7853982 }
 0x1ac   :  { %v1186_v54 = vxor.u32 2147483648, %v1185_v59  ;;  %vm1322_vm1 = vcmp.lt.s32.totalorder %v1321_v33, 0  ;;  %v1323_v34 = vsub.s32 0, %v1321_v33  ;;  %vm1211_vm2 = vcmp.eq.s32.totalorder %v1209_v58, 0 }
 0x1ad   :  { %vm1214_vm9 = vcmp.eq.s32.totalorder %v1209_v58, 2  ;;  %vm1210_vm15 = vcmp.lt.s32.totalorder %v1209_v58, 2 }
 0x1ae   :  { %v1187_v17 = vsel %vm1066_vm0, %v1186_v54, %v1185_v59  ;;  %v1324_v42 = vsel %vm1322_vm1, %v1323_v34, %v1321_v33 }
 0x1af   :  { %v1190_v62 = vsel %vm6972_vm14, %v11223_v44, %v1187_v17  ;;  %v1325_v9 = vclz %v1324_v42  ;;  %v1344_v44 = vsel %vm1221_vm12, %v1343_v60, %v6966_v14 }
 0x1b0   :  { %v1192_v6 = vmul.f32 %v1190_v62, %v1190_v62  ;;  %v1346_v17 = vsel %vm1220_vm11, 0, %v1344_v44 }
 0x1b1   :  { %v5431_v28 = vadd.s32 4294967294, %v1325_v9  ;;  %v1363_v42 = vadd.s32 3, %v1346_v17 }
 0x1b2   :  { %v1193_v5 = vmul.f32 -0.001358992, %v1192_v6  ;;  %v1200_v49 = vmul.f32 -0.00019511016, %v1192_v6 }
 0x1b3   :  { %vm5432_vm4 = vcmp.lt.s32.totalorder %v5431_v28, 0 }
 0x1b4   :  { %v1194_v13 = vadd.f32 0.041655596, %v1193_v5  ;;  %v1201_v48 = vadd.f32 0.008332121, %v1200_v49  ;;  %v1328_v57 = vsel %vm5432_vm4, 0, %v5431_v28  ;;  %v1364_v28 = vand.u32 3, %v1363_v42 }
 0x1b5   :  { %v1329_v37 = vsub.s32 32, %v1328_v57  ;;  %v1333_v4 = vsub.s32 4294967266, %v1328_v57  ;;  %v1330_v43 = vshll.u32 %v1321_v33, %v1328_v57  ;;  %v6996_v57 = vld [vmem:[%s10801_s4] ss:$0 sm:$0xff] }
 0x1b6   :  { %v1195_v50 = vmul.f32 %v1194_v13, %v1192_v6  ;;  %v1202_v30 = vmul.f32 %v1201_v48, %v1192_v6  ;;  %vm1366_vm10 = vcmp.eq.s32.totalorder %v1364_v28, 0  ;;  %vm1369_vm13 = vcmp.eq.s32.totalorder %v1364_v28, 2 }
 0x1b7   :  { %v1331_v51 = vshrl.u32 %v1313_v63, %v1329_v37  ;;  %v1334_v41 = vadd.s32 127, %v1333_v4  ;;  %vm1365_vm7 = vcmp.lt.s32.totalorder %v1364_v28, 2  ;;  %v1424_v37 = vpop.f32.mrf.mxu1 }
 0x1b8   :  { %v1196_v25 = vadd.f32 -0.4999988, %v1195_v50  ;;  %v1203_v23 = vadd.f32 -0.16666654, %v1202_v30  ;;  %v6999_v4 = vadd.f32 %v6996_v57, %v1424_v37 }
 0x1b9   :  { %v1332_v32 = vor.u32 %v1331_v51, %v1330_v43  ;;  %v1335_v19 = vshll.u32 %v1334_v41, 23 }
 0x1ba   :  { %v1197_v7 = vmul.f32 %v1196_v25, %v1192_v6  ;;  %v1204_v27 = vmul.f32 %v1203_v23, %v1192_v6  ;;  %v1451_v25 = vand.u32 2139095040, %v6999_v4  ;;  %v10891_v58 = vand.u32 2147483647, %v6999_v4 }
 0x1bb   :  { %v1336_v16 = vor.u32 4788187, %v1335_v19  ;;  %v1339_v24 = vcvt.s32.f32 %v1332_v32 }
 0x1bc   :  { %v1198_v55 = vadd.f32 1.0, %v1197_v7  ;;  %v1205_v53 = vadd.f32 1.0, %v1204_v27  ;;  %v1452_v23 = vshrl.u32 %v1451_v25, 23 }
 0x1bd   :  { %v1337_v40 = vand.u32 2147483647, %v1336_v16 }
 0x1be   :  { %v1206_v46 = vmul.f32 %v1205_v53, %v1190_v62  ;;  %v1215_v61 = vxor.u32 2147483648, %v1198_v55  ;;  %v5441_v26 = vadd.s32 4294967169, %v1452_v23 }
 0x1bf   :  { %v1340_v2 = vmul.f32 %v1339_v24, %v1337_v40  ;;  %v1427_v51 = vpop.f32.mrf.mxu1 }
 0x1c0   :  { %v1212_v47 = vxor.u32 2147483648, %v1206_v46  ;;  %v1216_v8 = vsel %vm1214_vm9, %v1215_v61, %v1206_v46  ;;  %v1458_v43 = vadd.s32 1, %v5441_v26  ;;  %v7003_v32 = vadd.f32 %v6996_v57, %v1427_v51 }
 0x1c1   :  { %v1341_v11 = vxor.u32 2147483648, %v1340_v2 }
 0x1c2   :  { %v1213_v22 = vsel %vm1211_vm2, %v1198_v55, %v1212_v47  ;;  %vm1459_vm5 = vcmp.gt.s32.totalorder %v1458_v43, 0  ;;  %11229 = vst [vmem:[#allocation9_spill] sm:$0xff] %v7003_v32  ;;  %v1606_v53 = vand.u32 2139095040, %v7003_v32  ;;  %v10890_v42 = vand.u32 2147483647, %v7003_v32 }
 0x1c3   :  { %v1217_v45 = vsel %vm1210_vm15, %v1213_v22, %v1216_v8  ;;  %v1342_v52 = vsel %vm1221_vm12, %v1341_v11, %v1340_v2  ;;  %v1460_v41 = vsel %vm1459_vm5, %v1458_v43, 0 }
 0x1c4   :  { %v1218_v35 = vsel %vm1207_vm3, nan, %v1217_v45  ;;  %v1345_v59 = vsel %vm1220_vm11, %v11227_v15, %v1342_v52  ;;  %v1462_v7 = vand.u32 31, %v1460_v41  ;;  %v1461_v46 = vshrl.u32 %v1460_v41, 5 }
 0x1c5   :  { %5439 = vmatmul.msk.f32.gmra.mxu1 %vm1382_vm6, %v1218_v35  ;;  %v1347_v12 = vmul.f32 %v1345_v59, %v1345_v59  ;;  %v1607_v2 = vshrl.u32 %v1606_v53, 23  ;;  %v1455_v15 = vand.u32 8388607, %v10891_v58 }
 0x1c6   :  { %v1463_v27 = vsub.s32 32, %v1462_v7  ;;  %v1477_v16 = vshll.u32 %v11117_v10, %v1462_v7  ;;  %v1468_v8 = vshll.u32 %v11114_v21, %v1462_v7  ;;  %v1471_v45 = vshll.u32 %v11116_v36, %v1462_v7 }
 0x1c7   :  { %v1348_v54 = vmul.f32 -0.001358992, %v1347_v12  ;;  %v1355_v33 = vmul.f32 -0.00019511016, %v1347_v12  ;;  %v1474_v11 = vshll.u32 %v11100_v29, %v1462_v7  ;;  %vm1483_vm0 = vcmp.lt.s32.totalorder %v1461_v46, 4 }
 0x1c8   :  { %v1478_v55 = vshrl.u32 %v11118_v38, %v1463_v27  ;;  %v1469_v61 = vshrl.u32 %v11116_v36, %v1463_v27  ;;  %v1472_v40 = vshrl.u32 %v11100_v29, %v1463_v27  ;;  %v1475_v24 = vshrl.u32 %v11117_v10, %v1463_v27 }
 0x1c9   :  { %v1349_v39 = vadd.f32 0.041655596, %v1348_v54  ;;  %v1356_v18 = vadd.f32 0.008332121, %v1355_v33  ;;  %v1466_v60 = vshrl.u32 %v11114_v21, %v1463_v27  ;;  %v1465_v44 = vshll.u32 %v11115_v1, %v1462_v7 }
 0x1ca   :  { %v1479_v47 = vor.u32 %v1478_v55, %v1477_v16  ;;  %v1470_v35 = vor.u32 %v1469_v61, %v1468_v8  ;;  %v1473_v3 = vor.u32 %v1472_v40, %v1471_v45  ;;  %v1476_v52 = vor.u32 %v1475_v24, %v1474_v11 }
 0x1cb   :  { %v1350_v34 = vmul.f32 %v1349_v39, %v1347_v12  ;;  %v1357_v56 = vmul.f32 %v1356_v18, %v1347_v12  ;;  %vm1480_vm14 = vcmp.lt.s32.totalorder %v1461_v46, 1  ;;  %vm1482_vm1 = vcmp.lt.s32.totalorder %v1461_v46, 3 }
 0x1cc   :  { %v1456_v39 = vor.u32 8388608, %v1455_v15  ;;  %v1492_v18 = vsel %vm1480_vm14, %v1470_v35, %v1473_v3  ;;  %vm1481_vm4 = vcmp.lt.s32.totalorder %v1461_v46, 2 }
 0x1cd   :  { %v1351_v62 = vadd.f32 -0.4999988, %v1350_v34  ;;  %v1358_v6 = vadd.f32 -0.16666654, %v1357_v56  ;;  %v1467_v34 = vor.u32 %v1466_v60, %v1465_v44 }
 0x1cf   :  { %v1352_v9 = vmul.f32 %v1351_v62, %v1347_v12  ;;  %v1359_v5 = vmul.f32 %v1358_v6, %v1347_v12  ;;  %v5444_v12 = vadd.s32 4294967169, %v1607_v2  ;;  %v1489_v6 = vsel %vm1483_vm0, %v1476_v52, 920167782 }
 0x1d0   :  { %v1430_v19 = vpop.f32.mrf.mxu1  ;;  %v1490_v28 = vsel %vm1482_vm1, %v1473_v3, %v1489_v6 }
 0x1d1   :  { %v1353_v49 = vadd.f32 1.0, %v1352_v9  ;;  %v1360_v20 = vadd.f32 1.0, %v1359_v5  ;;  %v7013_v22 = vadd.f32 %v6996_v57, %v1430_v19  ;;  %v1613_v56 = vadd.s32 1, %v5444_v12 }
 0x1d2   :  { %v7029_v5 = vshll.u32 %v1456_v39, 8 }
 0x1d3   :  { %v1361_v13 = vmul.f32 %v1360_v20, %v1345_v59  ;;  %v1370_v48 = vxor.u32 2147483648, %v1353_v49  ;;  %11230 = vst [vmem:[#allocation13_spill] sm:$0xff] %v7013_v22  ;;  %v1493_v59 = vsel %vm1483_vm0, %v1479_v47, 1326507024  ;;  %v1761_v54 = vand.u32 2139095040, %v7013_v22 }
 0x1d4   :  { %v1494_v17 = vsel %vm1482_vm1, %v1476_v52, %v1493_v59  ;;  %v1488_v20 = vsel %vm1480_vm14, %v1467_v34, %v1470_v35  ;;  %vm1614_vm2 = vcmp.gt.s32.totalorder %v1613_v56, 0  ;;  %v1497_v37 = vand.u32 65535, %v7029_v5 }
 0x1d5   :  { %v1367_v63 = vxor.u32 2147483648, %v1361_v13  ;;  %v1371_v0 = vsel %vm1369_vm13, %v1370_v48, %v1361_v13  ;;  %v1762_v62 = vshrl.u32 %v1761_v54, 23  ;;  %v1495_v9 = vsel %vm1481_vm4, %v1492_v18, %v1494_v17 }
 0x1d6   :  { %v1485_v48 = vsel %vm1483_vm0, %v1473_v3, 2102212464  ;;  %v1615_v25 = vsel %vm1614_vm2, %v1613_v56, 0  ;;  %v1499_v16 = vand.u32 65535, %v1495_v9  ;;  %v1498_v24 = vshrl.u32 %v7029_v5, 16 }
 0x1d7   :  { %v1368_v14 = vsel %vm1366_vm10, %v1353_v49, %v1367_v63  ;;  %v5447_v13 = vadd.s32 4294967169, %v1762_v62  ;;  %v1500_v63 = vshrl.u32 %v1495_v9, 16  ;;  %v1486_v43 = vsel %vm1482_vm1, %v1470_v35, %v1485_v48 }
 0x1d8   :  { %v1372_v50 = vsel %vm1365_vm7, %v1368_v14, %v1371_v0  ;;  %v1610_v14 = vand.u32 8388607, %v10890_v42  ;;  %v1464_v0 = vshrl.u32 %v11115_v1, %v1463_v27  ;;  %v1617_v55 = vand.u32 31, %v1615_v25 }
 0x1d9   :  { %v1373_v30 = vsel %vm1362_vm8, nan, %v1372_v50  ;;  %v1768_v51 = vadd.s32 1, %v5447_v13  ;;  %v7045_v41 = vmul.u32 %v1500_v63, %v1497_v37  ;;  %v1501_v15 = vmul.u32 %v1499_v16, %v1497_v37 }
 0x1da   :  { %5440 = vmatmul.msk.f32.gmra.mxu1 %vm1382_vm6, %v1373_v30  ;;  %v1491_v30 = vsel %vm1481_vm4, %v1488_v20, %v1490_v28  ;;  %v1484_v26 = vsel %vm1480_vm14, %v1464_v0, %v1467_v34  ;;  %v1611_v7 = vor.u32 8388608, %v1610_v14  ;;  %v7062_v46 = vsub.s32 32, %v1617_v55 }
 0x1db   :  { %v1521_v27 = vand.u32 65535, %v1491_v30  ;;  %v7051_v53 = vsel %vm1481_vm4, %v1484_v26, %v1486_v43  ;;  %v1522_v40 = vshrl.u32 %v1491_v30, 16  ;;  %vm1769_vm9 = vcmp.gt.s32.totalorder %v1768_v51, 0 }
 0x1dc   :  { %v1505_v47 = vshll.u32 %v7045_v41, 16  ;;  %v7055_v2 = vshll.u32 %v1611_v7, 8  ;;  %v7064_v35 = vmul.u32 %v1499_v16, %v1498_v24  ;;  %v1770_v3 = vsel %vm1769_vm9, %v1768_v51, 0 }
 0x1dd   :  { %v7058_v45 = vmul.u32 %v1521_v27, %v1497_v37  ;;  %v1504_v60 = vmul.u32 %v1500_v63, %v1498_v24  ;;  %v7066_v59 = vmul.u32 %v1522_v40, %v1497_v37  ;;  %v7068_v12 = vmul.u32 %v1521_v27, %v1498_v24 }
 0x1de   :  { %v7070_v54 = vmul.u32 %v1522_v40, %v1498_v24  ;;  %vm1509_vm15 = vc.u32 %v1501_v15, %v1505_v47  ;;  %v7076_v44 = vshrl.u32 %v7055_v2, 16  ;;  %v1621_v18 = vshrl.u32 %v11114_v21, %v7062_v46 }
 0x1df   :  { %v1624_v17 = vshrl.u32 %v11116_v36, %v7062_v46  ;;  %v10889_v34 = vand.u32 2147483647, %v7013_v22  ;;  %v1772_v56 = vand.u32 31, %v1770_v3  ;;  %v7084_v6 = vshrl.u32 %v1615_v25, 5 }
 0x1e0   :  { %v1627_v9 = vshrl.u32 %v11100_v29, %v7062_v46  ;;  %v1510_v28 = vsel %vm1509_vm15, 1, %v11134_v31  ;;  %v1620_v13 = vshll.u32 %v11115_v1, %v1617_v55  ;;  %v1623_v48 = vshll.u32 %v11114_v21, %v1617_v55 }
 0x1e1   :  { %v1630_v63 = vshrl.u32 %v11117_v10, %v7062_v46  ;;  %v1626_v14 = vshll.u32 %v11116_v36, %v1617_v55  ;;  %v1629_v0 = vshll.u32 %v11100_v29, %v1617_v55  ;;  %v7103_v26 = vsub.s32 32, %v1772_v56 }
 0x1e2   :  { %v7097_v37 = vor.u32 %v1621_v18, %v1620_v13  ;;  %v7099_v25 = vor.u32 %v1624_v17, %v1623_v48  ;;  %v7105_v51 = vadd.s32 %v1505_v47, %v1501_v15  ;;  %v1632_v27 = vshll.u32 %v11117_v10, %v1617_v55 }
 0x1e3   :  { %11233 = vst [vmem:[#allocation10_spill] sm:$0xff] %v7103_v26  ;;  %v7107_v7 = vor.u32 %v1627_v9, %v1626_v14  ;;  %v7110_v16 = vadd.s32 %v1510_v28, %v1504_v60  ;;  %vm1635_vm12 = vcmp.lt.s32.totalorder %v7084_v6, 1  ;;  %vm1637_vm11 = vcmp.lt.s32.totalorder %v7084_v6, 3 }
 0x1e4   :  { %vm1638_vm10 = vcmp.lt.s32.totalorder %v7084_v6, 4  ;;  %v7123_v55 = vsel %vm1635_vm12, %v7097_v37, %v7099_v25  ;;  %v7133_v18 = vshrl.u32 %v1770_v3, 5  ;;  %v1784_v17 = vshll.u32 %v11100_v29, %v1772_v56 }
 0x1e5   :  { %v1788_v9 = vshrl.u32 %v11118_v38, %v7103_v26  ;;  %v1776_v28 = vshrl.u32 %v11114_v21, %v7103_v26  ;;  %v1779_v13 = vshrl.u32 %v11116_v36, %v7103_v26  ;;  %v1782_v3 = vshrl.u32 %v11100_v29, %v7103_v26 }
 0x1e6   :  { %vm1793_vm7 = vcmp.lt.s32.totalorder %v7133_v18, 4  ;;  %vm1790_vm8 = vcmp.lt.s32.totalorder %v7133_v18, 1  ;;  %vm1792_vm5 = vcmp.lt.s32.totalorder %v7133_v18, 3 }
 0x1f0   :  { %v1433_v33 = vpop.f32.mrf.mxu1 }
 0x1f1   :  { %v7032_v49 = vadd.f32 %v6996_v57, %v1433_v33  ;;  %v7073_v33 = vand.u32 65535, %v7055_v2 }
 0x1f3   :  { %11231 = vst [vmem:[#allocation11_spill] sm:$0xff] %v7032_v49  ;;  %v1916_v23 = vand.u32 2139095040, %v7032_v49  ;;  %v10888_v40 = vand.u32 2147483647, %v7032_v49 }
 0x1f5   :  { %v1917_v61 = vshrl.u32 %v1916_v23, 23  ;;  %v1765_v23 = vand.u32 8388607, %v10889_v34  ;;  %v1920_v48 = vand.u32 8388607, %v10888_v40  ;;  %v1781_v40 = vshll.u32 %v11116_v36, %v1772_v56 }
 0x1f7   :  { %v5450_v52 = vadd.s32 4294967169, %v1917_v61  ;;  %v1631_v61 = vor.u32 %v1630_v63, %v1629_v0  ;;  %v1766_v15 = vor.u32 8388608, %v1765_v23  ;;  %v1775_v0 = vshll.u32 %v11115_v1, %v1772_v56 }
 0x1f8   :  { %v1921_v11 = vor.u32 8388608, %v1920_v48  ;;  %v7161_v49 = vor.u32 %v1782_v3, %v1781_v40 }
 0x1f9   :  { %v1923_v20 = vadd.s32 1, %v5450_v52  ;;  %v1785_v52 = vshrl.u32 %v11117_v10, %v7103_v26  ;;  %v7150_v23 = vshll.u32 %v1766_v15, 8  ;;  %v7157_v42 = vor.u32 %v1776_v28, %v1775_v0 }
 0x1fa   :  { %11238 = vst [vmem:[#allocation49_spill] sm:$0xff] %v7161_v49 }
 0x1fb   :  { %vm1924_vm3 = vcmp.gt.s32.totalorder %v1923_v20, 0  ;;  %11235 = vst [vmem:[#allocation7_spill] sm:$0xff] %v7150_v23  ;;  %v7178_v40 = vand.u32 65535, %v7150_v23 }
 0x1fc   :  { %v1925_v60 = vsel %vm1924_vm3, %v1923_v20, 0  ;;  %v1787_v20 = vshll.u32 %v11117_v10, %v1772_v56  ;;  %11236 = vst [vmem:[#allocation43_spill] sm:$0xff] %v7157_v42 }
 0x1fd   :  { %v1927_v63 = vand.u32 31, %v1925_v60  ;;  %11240 = vst [vmem:[#allocation5_spill] sm:$0xff] %v7178_v40 }
 0x1fe   :  { %v1789_v34 = vor.u32 %v1788_v9, %v1787_v20  ;;  %v7194_v20 = vshll.u32 %v1921_v11, 8 }
 0x1ff   :  { %v7164_v15 = vsub.s32 32, %v1927_v63  ;;  %v1939_v32 = vshll.u32 %v11100_v29, %v1927_v63 }
 0x200   :  { %11242 = vst [vmem:[#allocation46_spill] sm:$0xff] %v7194_v20 }
 0x201   :  { %11239 = vst [vmem:[#allocation41_spill] sm:$0xff] %v7164_v15  ;;  %v1931_v48 = vshrl.u32 %v11114_v21, %v7164_v15  ;;  %v1934_v3 = vshrl.u32 %v11116_v36, %v7164_v15 }
 0x209   :  { %v1436_v50 = vpop.f32.mrf.mxu1 }
 0x20a   :  { %v7048_v19 = vadd.f32 %v6996_v57, %v1436_v50  ;;  %v1633_v50 = vshrl.u32 %v11118_v38, %v7062_v46 }
 0x20c   :  { %11232 = vst [vmem:[#allocation12_spill] sm:$0xff] %v7048_v19  ;;  %v2071_v8 = vand.u32 2139095040, %v7048_v19  ;;  %v1634_v24 = vor.u32 %v1633_v50, %v1632_v27  ;;  %v1778_v50 = vshll.u32 %v11114_v21, %v1772_v56  ;;  %v10900_v9 = vand.u32 2147483647, %v7048_v19 }
 0x20e   :  { %v2072_v39 = vshrl.u32 %v2071_v8, 23  ;;  %v1648_v27 = vsel %vm1638_vm10, %v1634_v24, 1326507024  ;;  %v7159_v58 = vor.u32 %v1779_v13, %v1778_v50  ;;  %v7192_v13 = vshrl.u32 %v7150_v23, 16 }
 0x20f   :  { %v7173_v56 = vsel %vm1637_vm11, %v1631_v61, %v1648_v27  ;;  %v7215_v50 = vshrl.u32 %v1925_v60, 5  ;;  %v1933_v27 = vshll.u32 %v11114_v21, %v1927_v63  ;;  %v2075_v22 = vand.u32 8388607, %v10900_v9 }
 0x210   :  { %v5453_v30 = vadd.s32 4294967169, %v2072_v39  ;;  %v7131_v39 = vsel %vm1635_vm12, %v7099_v25, %v7107_v7  ;;  %11237 = vst [vmem:[#allocation44_spill] sm:$0xff] %v7159_v58  ;;  %v1943_v60 = vshrl.u32 %v11118_v38, %v7164_v15  ;;  %v7238_v9 = vshrl.u32 %v7194_v20, 16 }
 0x211   :  { %11241 = vst [vmem:[#allocation45_spill] sm:$0xff] %v7192_v13  ;;  %v7235_v19 = vor.u32 %v1934_v3, %v1933_v27  ;;  %vm1945_vm0 = vcmp.lt.s32.totalorder %v7215_v50, 1  ;;  %vm1947_vm14 = vcmp.lt.s32.totalorder %v7215_v50, 3  ;;  %vm1948_vm1 = vcmp.lt.s32.totalorder %v7215_v50, 4 }
 0x212   :  { %v2078_v8 = vadd.s32 1, %v5453_v30  ;;  %v1786_v30 = vor.u32 %v1785_v52, %v1784_v17  ;;  %11247 = vst [vmem:[#allocation29_spill] sm:$0xff] %v7238_v9 }
 0x213   :  { %11246 = vst [vmem:[#allocation35_spill] sm:$0xff] %v7235_v19 }
 0x214   :  { %vm2079_vm13 = vcmp.gt.s32.totalorder %v2078_v8, 0  ;;  %v1799_v17 = vsel %vm1793_vm7, %v1786_v30, 920167782 }
 0x215   :  { %v2080_v62 = vsel %vm2079_vm13, %v2078_v8, 0  ;;  %v1803_v8 = vsel %vm1793_vm7, %v1789_v34, 1326507024  ;;  %v7200_v34 = vsel %vm1790_vm8, %v7159_v58, %v7161_v49  ;;  %v7209_v0 = vsel %vm1792_vm5, %v7161_v49, %v1799_v17 }
 0x216   :  { %v2082_v28 = vand.u32 31, %v2080_v62  ;;  %v7213_v11 = vsel %vm1792_vm5, %v1786_v30, %v1803_v8  ;;  %v1937_v17 = vshrl.u32 %v11100_v29, %v7164_v15  ;;  %v1940_v30 = vshrl.u32 %v11117_v10, %v7164_v15 }
 0x217   :  { %v7231_v8 = vand.u32 65535, %v7194_v20  ;;  %v1942_v49 = vshll.u32 %v11117_v10, %v1927_v63 }
 0x218   :  { %v7221_v23 = vsub.s32 32, %v2082_v28  ;;  %v1941_v20 = vor.u32 %v1940_v30, %v1939_v32  ;;  %v2094_v15 = vshll.u32 %v11100_v29, %v2082_v28  ;;  %v2085_v30 = vshll.u32 %v11115_v1, %v2082_v28 }
 0x219   :  { %11244 = vst [vmem:[#allocation30_spill] sm:$0xff] %v7231_v8  ;;  %v1944_v9 = vor.u32 %v1943_v60, %v1942_v49 }
 0x21a   :  { %11243 = vst [vmem:[#allocation16_spill] sm:$0xff] %v7221_v23  ;;  %v2095_v3 = vshrl.u32 %v11117_v10, %v7221_v23  ;;  %v2089_v32 = vshrl.u32 %v11116_v36, %v7221_v23  ;;  %v2092_v49 = vshrl.u32 %v11100_v29, %v7221_v23  ;;  %v1954_v40 = vsel %vm1948_vm1, %v1941_v20, 920167782 }
 0x21c   :  { %v2096_v60 = vor.u32 %v2095_v3, %v2094_v15  ;;  %v1958_v15 = vsel %vm1948_vm1, %v1944_v9, 1326507024 }
 0x225   :  { %v1439_v43 = vpop.f32.mrf.mxu1 }
 0x226   :  { %v7117_v47 = vadd.f32 %v6996_v57, %v1439_v43  ;;  %v1644_v43 = vsel %vm1638_vm10, %v1631_v61, 920167782  ;;  %v7189_v61 = vsel %vm1790_vm8, %v7157_v42, %v7159_v58  ;;  %v1936_v42 = vshll.u32 %v11116_v36, %v1927_v63 }
 0x227   :  { %v7169_v24 = vsel %vm1637_vm11, %v7107_v7, %v1644_v43  ;;  %v1930_v43 = vshll.u32 %v11115_v1, %v1927_v63  ;;  %v2098_v63 = vshrl.u32 %v11118_v38, %v7221_v23 }
 0x228   :  { %11234 = vst [vmem:[#allocation52_spill] sm:$0xff] %v7117_v47  ;;  %v2226_v14 = vand.u32 2139095040, %v7117_v47 }
 0x229   :  { %v7233_v58 = vor.u32 %v1931_v48, %v1930_v43  ;;  %v2076_v48 = vor.u32 8388608, %v2075_v22  ;;  %v11248_v43 = vand.u32 2147483647, %v7117_v47  ;;  %v7260_v22 = vshrl.u32 %v2080_v62, 5 }
 0x22a   :  { %v2227_v52 = vshrl.u32 %v2226_v14, 23  ;;  %v2088_v47 = vshll.u32 %v11114_v21, %v2082_v28 }
 0x22b   :  { %11245 = vst [vmem:[#allocation28_spill] sm:$0xff] %v7233_v58  ;;  %v2230_v27 = vand.u32 8388607, %v11248_v43  ;;  %v7258_v8 = vsel %vm1945_vm0, %v7233_v58, %v7235_v19  ;;  %v7271_v43 = vshll.u32 %v2076_v48, 8  ;;  %v2091_v58 = vshll.u32 %v11116_v36, %v2082_v28 }
 0x22c   :  { %v5456_v14 = vadd.s32 4294967169, %v2227_v52  ;;  %11250 = vst [vmem:[#allocation19_spill] sm:$0xff] %v7258_v8  ;;  %vm10933_vm2 = vcmp.lt.s32.totalorder %v7260_v22, 4  ;;  %vm10934_vm9 = vcmp.lt.s32.totalorder %v7260_v22, 1  ;;  %vm10932_vm15 = vcmp.lt.s32.totalorder %v7260_v22, 3 }
 0x22d   :  { %11251 = vst [vmem:[#allocation20_spill] sm:$0xff] %v7260_v22  ;;  %v2231_v62 = vor.u32 8388608, %v2230_v27  ;;  %v2109_v27 = vsel %vm10933_vm2, %v2096_v60, 920167782 }
 0x22e   :  { %v2233_v52 = vadd.s32 1, %v5456_v14  ;;  %v7250_v14 = vor.u32 %v1937_v17, %v1936_v42  ;;  %v2086_v42 = vshrl.u32 %v11114_v21, %v7221_v23  ;;  %v2097_v17 = vshll.u32 %v11117_v10, %v2082_v28  ;;  %11252 = vst [vmem:[#allocation14_spill] sm:$0xff] %v7271_v43 }
 0x22f   :  { %v7290_v28 = vor.u32 %v2089_v32, %v2088_v47  ;;  %v7307_v47 = vsel %vm1947_vm14, %v1941_v20, %v1958_v15 }
 0x230   :  { %11249 = vst [vmem:[#allocation42_spill] sm:$0xff] %v7250_v14  ;;  %vm2234_vm4 = vcmp.gt.s32.totalorder %v2233_v52, 0  ;;  %v2099_v8 = vor.u32 %v2098_v63, %v2097_v17  ;;  %v7281_v23 = vsel %vm1945_vm0, %v7235_v19, %v7250_v14  ;;  %v7288_v3 = vor.u32 %v2086_v42, %v2085_v30 }
 0x231   :  { %v2235_v26 = vsel %vm2234_vm4, %v2233_v52, 0  ;;  %11255 = vst [vmem:[#allocation18_spill] sm:$0xff] %v7290_v28  ;;  %v7292_v52 = vor.u32 %v2092_v49, %v2091_v58  ;;  %v7297_v17 = vshll.u32 %v2231_v62, 8  ;;  %v7303_v9 = vsel %vm1947_vm14, %v7250_v14, %v1954_v40 }
 0x232   :  { %11254 = vst [vmem:[#allocation22_spill] sm:$0xff] %v7288_v3  ;;  %v2237_v63 = vand.u32 31, %v2235_v26  ;;  %v2113_v58 = vsel %vm10933_vm2, %v2099_v8, 1326507024  ;;  %v7317_v42 = vshrl.u32 %v7271_v43, 16  ;;  %v7323_v40 = vsel %vm10934_vm9, %v7288_v3, %v7290_v28 }
 0x233   :  { %11256 = vst [vmem:[#allocation23_spill] sm:$0xff] %v7292_v52  ;;  %v7328_v20 = vsel %vm10932_vm15, %v7292_v52, %v2109_v27  ;;  %v7334_v8 = vsel %vm10934_vm9, %v7290_v28, %v7292_v52  ;;  %v1527_v49 = vshll.u32 %v7066_v59, 16  ;;  %v7344_v62 = vand.u32 65535, %v7297_v17 }
 0x234   :  { %11257 = vst [vmem:[#allocation15_spill] sm:$0xff] %v7297_v17  ;;  %v7341_v30 = vsub.s32 32, %v2237_v63  ;;  %v7347_v15 = vshrl.u32 %v7297_v17, 16  ;;  %v7349_v27 = vshrl.u32 %v2235_v26, 5  ;;  %v2240_v52 = vshll.u32 %v11115_v1, %v2237_v63 }
 0x235   :  { %11259 = vst [vmem:[#allocation51_spill] sm:$0xff] %v7317_v42  ;;  %vm1531_vm3 = vc.u32 %v7058_v45, %v1527_v49  ;;  %v1533_v28 = vadd.s32 %v1527_v49, %v7058_v45  ;;  %v11267_v17 = vshll.u32 %v7064_v35, 16  ;;  %v1506_v42 = vshrl.u32 %v7045_v41, 16  ;;  %v2691_v41 = vld [vmem:[%s10802_s5 + $0x18] sm:$0xff] }
 0x236   :  { %11260 = vst [vmem:[#allocation48_spill] sm:$0xff] %v7323_v40  ;;  %v1532_v3 = vsel %vm1531_vm3, 1, %v11134_v31  ;;  %v2244_v45 = vshrl.u32 %v11116_v36, %v7341_v30  ;;  %v2246_v40 = vshll.u32 %v11116_v36, %v2237_v63  ;;  %vm2255_vm3 = vcmp.lt.s32.totalorder %v7349_v27, 1  ;;  %2732 = vmatpush.msrb.mxu2 %v2691_v41 }
 0x237   :  { %11261 = vst [vmem:[#allocation6_spill] sm:$0xff] %v7328_v20  ;;  %vm1513_vm13 = vc.u32 %v7105_v51, %v11267_v17  ;;  %v1534_v26 = vadd.s32 %v1532_v3, %v7070_v54  ;;  %v2249_v3 = vshll.u32 %v11100_v29, %v2237_v63  ;;  %v2253_v17 = vshrl.u32 %v11118_v38, %v7341_v30 }
 0x238   :  { %11262 = vst [vmem:[#allocation56_spill] sm:$0xff] %v7334_v8  ;;  %v1514_v49 = vsel %vm1513_vm13, 1, %v11134_v31  ;;  %v2252_v20 = vshll.u32 %v11117_v10, %v2237_v63  ;;  %vm10942_vm13 = vcmp.lt.s32.totalorder %v7349_v27, 3  ;;  %vm1636_vm2 = vcmp.lt.s32.totalorder %v7084_v6, 2 }
 0x239   :  { %11264 = vst [vmem:[#allocation55_spill] sm:$0xff] %v7341_v30  ;;  %v1516_v51 = vadd.s32 %v1514_v49, %v7110_v16  ;;  %v2690_v16 = vld [vmem:[%s10802_s5 + $0x10] sm:$0xff] }
 0x23a   :  { %11265 = vst [vmem:[#allocation26_spill] sm:$0xff] %v7344_v62  ;;  %v2243_v62 = vshll.u32 %v11114_v21, %v2237_v63  ;;  %v2689_v63 = vld [vmem:[%s10802_s5 + $0x8] sm:$0xff]  ;;  %2733 = vmatpush.msrb.mxu2 %v2690_v16 }
 0x23b   :  { %11266 = vst [vmem:[#allocation47_spill] sm:$0xff] %v7347_v15  ;;  %v2241_v15 = vshrl.u32 %v11114_v21, %v7341_v30  ;;  %v1517_v49 = vadd.s32 %v1516_v51, %v1506_v42  ;;  %v1528_v42 = vshrl.u32 %v7066_v59, 16 }
 0x23c   :  { %2734 = vmatpush.msrb.mxu2 %v2689_v63 }
 0x23d   :  { %v7387_v14 = vor.u32 %v2241_v15, %v2240_v52  ;;  %v2254_v52 = vor.u32 %v2253_v17, %v2252_v20 }
 0x23f   :  { %11269 = vst [vmem:[#allocation37_spill] sm:$0xff] %v7387_v14 }
 0x242   :  { %v1442_v13 = vpop.f32.mrf.mxu1 }
 0x243   :  { %v7286_v48 = vadd.f32 %v6996_v57, %v1442_v13  ;;  %v7312_v13 = vand.u32 65535, %v7271_v43  ;;  %v1529_v43 = vshll.u32 %v7068_v12, 16 }
 0x245   :  { %11253 = vst [vmem:[#allocation24_spill] sm:$0xff] %v7286_v48  ;;  %v2381_v19 = vand.u32 2139095040, %v7286_v48  ;;  %vm1535_vm4 = vc.u32 %v1533_v28, %v1529_v43  ;;  %v7416_v20 = vadd.s32 %v1533_v28, %v1529_v43 }
 0x246   :  { %11258 = vst [vmem:[#allocation50_spill] sm:$0xff] %v7312_v13  ;;  %v1536_v54 = vsel %vm1535_vm4, 1, %v11134_v31  ;;  %v11268_v13 = vand.u32 2147483647, %v7286_v48  ;;  %v1508_v48 = vshrl.u32 %v7064_v35, 16  ;;  %vm10945_vm4 = vcmp.lt.s32.totalorder %v7349_v27, 4 }
 0x247   :  { %v2382_v32 = vshrl.u32 %v2381_v19, 23  ;;  %v7339_v19 = vsel %vm10932_vm15, %v2096_v60, %v2113_v58  ;;  %v2247_v60 = vshrl.u32 %v11100_v29, %v7341_v30  ;;  %v1538_v22 = vadd.s32 %v1536_v54, %v1534_v26 }
 0x248   :  { %11263 = vst [vmem:[#allocation53_spill] sm:$0xff] %v7339_v19  ;;  %v2385_v8 = vand.u32 8388607, %v11268_v13  ;;  %v7404_v15 = vadd.s32 %v1517_v49, %v1508_v48 }
 0x249   :  { %v5459_v58 = vadd.s32 4294967169, %v2382_v32  ;;  %v2250_v32 = vshrl.u32 %v11117_v10, %v7341_v30  ;;  %v7389_v30 = vor.u32 %v2244_v45, %v2243_v62  ;;  %v1539_v26 = vadd.s32 %v1538_v22, %v1528_v42 }
 0x24a   :  { %v2386_v62 = vor.u32 8388608, %v2385_v8  ;;  %v1640_v45 = vsel %vm1638_vm10, %v7107_v7, 2102212464  ;;  %vm1543_vm9 = vc.u32 %v7404_v15, %v7416_v20  ;;  %v2268_v7 = vsel %vm10945_vm4, %v2254_v52, 1326507024 }
 0x24b   :  { %v2388_v19 = vadd.s32 1, %v5459_v58  ;;  %11270 = vst [vmem:[#allocation36_spill] sm:$0xff] %v7389_v30  ;;  %v2251_v13 = vor.u32 %v2250_v32, %v2249_v3  ;;  %v7392_v58 = vor.u32 %v2247_v60, %v2246_v40  ;;  %v2688_v40 = vld [vmem:[%s10802_s5] sm:$0xff]  ;;  %v1530_v60 = vshrl.u32 %v7068_v12, 16 }
 0x24c   :  { %v7412_v35 = vsel %vm2255_vm3, %v7387_v14, %v7389_v30  ;;  %v1650_v12 = vsel %vm1636_vm2, %v7131_v39, %v7173_v56  ;;  %v7431_v32 = vshll.u32 %v2386_v62, 8  ;;  %2735 = vmatpush.msrb.mxu2 %v2688_v40  ;;  %v1619_v39 = vshrl.u32 %v11115_v1, %v7062_v46 }
 0x24d   :  { %11271 = vst [vmem:[#allocation39_spill] sm:$0xff] %v7392_v58  ;;  %vm2389_vm15 = vcmp.gt.s32.totalorder %v2388_v19, 0  ;;  %v2264_v59 = vsel %vm10945_vm4, %v2251_v13, 920167782  ;;  %v7426_v22 = vsel %vm2255_vm3, %v7389_v30, %v7392_v58  ;;  %v1540_v8 = vadd.s32 %v1539_v26, %v1530_v60 }
 0x24e   :  { %v2390_v48 = vsel %vm2389_vm15, %v2388_v19, 0  ;;  %11272 = vst [vmem:[#allocation38_spill] sm:$0xff] %v7431_v32  ;;  %v7441_v56 = vsel %vm1636_vm2, %v7123_v55, %v7169_v24  ;;  %v7446_v43 = vsel %vm10942_vm13, %v7392_v58, %v2264_v59  ;;  %v1655_v19 = vshrl.u32 %v1650_v12, 16 }
 0x24f   :  { %v1544_v28 = vadd.s32 1, %v1540_v8  ;;  %v2392_v51 = vand.u32 31, %v2390_v48  ;;  %v1639_v46 = vsel %vm1635_vm12, %v1619_v39, %v7097_v37  ;;  %v1641_v55 = vsel %vm1637_vm11, %v7099_v25, %v1640_v45 }
 0x250   :  { %v1654_v24 = vand.u32 65535, %v1650_v12  ;;  %v7460_v41 = vmul.u32 %v1655_v19, %v7073_v33  ;;  %v10935_v16 = vshrl.u32 %v7441_v56, 16  ;;  %v7465_v49 = vsel %vm10942_vm13, %v2251_v13, %v2268_v7 }
 0x251   :  { %v1545_v17 = vsel %vm1543_vm9, %v1544_v28, %v1540_v8  ;;  %v7468_v37 = vand.u32 65535, %v7431_v32  ;;  %v7471_v63 = vshrl.u32 %v7431_v32, 16  ;;  %v7476_v42 = vshrl.u32 %v2390_v48, 5 }
 0x252   :  { %v7481_v62 = vsel %vm1636_vm2, %v1639_v46, %v1641_v55  ;;  %v1660_v13 = vshll.u32 %v7460_v41, 16  ;;  %v7484_v40 = vsub.s32 32, %v2392_v51  ;;  %v1656_v26 = vmul.u32 %v1654_v24, %v7073_v33 }
 0x253   :  { %11274 = vst [vmem:[#allocation27_spill] sm:$0xff] %v7468_v37  ;;  %v7488_v59 = vmul.u32 %v1654_v24, %v7076_v44  ;;  %v1676_v12 = vand.u32 65535, %v7441_v56  ;;  %v7495_v6 = vmul.u32 %v10935_v16, %v7073_v33  ;;  %vm1450_vm12 = vcmp.lt.s32.totalorder %v6999_v4, 0 }
 0x254   :  { %11275 = vst [vmem:[#allocation21_spill] sm:$0xff] %v7471_v63  ;;  %v2398_v48 = vshll.u32 %v11114_v21, %v2392_v51  ;;  %vm1664_vm11 = vc.u32 %v1656_v26, %v1660_v13  ;;  %v1666_v45 = vadd.s32 %v1660_v13, %v1656_v26  ;;  %v2401_v39 = vshll.u32 %v11116_v36, %v2392_v51 }
 0x255   :  { %v2404_v7 = vshll.u32 %v11100_v29, %v2392_v51  ;;  %v2407_v28 = vshll.u32 %v11117_v10, %v2392_v51  ;;  %v2396_v46 = vshrl.u32 %v11114_v21, %v7484_v40  ;;  %v2405_v55 = vshrl.u32 %v11117_v10, %v7484_v40 }
 0x256   :  { %v11277_v13 = vand.u32 2147483647, %v6999_v4  ;;  %v1682_v26 = vshll.u32 %v7495_v6, 16  ;;  %v2408_v16 = vshrl.u32 %v11118_v38, %v7484_v40  ;;  %vm2410_vm2 = vcmp.lt.s32.totalorder %v7476_v42, 1 }
 0x257   :  { %v1445_v54 = vpop.f32.mrf.mxu1  ;;  %v1659_v32 = vmul.u32 %v1655_v19, %v7076_v44  ;;  %v1678_v30 = vmul.u32 %v1676_v12, %v7073_v33  ;;  %v2406_v58 = vor.u32 %v2405_v55, %v2404_v7  ;;  %vm2412_vm15 = vcmp.lt.s32.totalorder %v7476_v42, 3 }
 0x258   :  { %v7457_v3 = vadd.f32 %v6996_v57, %v1445_v54  ;;  %v11276_v57 = vmul.u32 %v7029_v5, %v7051_v53  ;;  %v2395_v5 = vshll.u32 %v11115_v1, %v2392_v51  ;;  %vm7512_vm10 = vcmp.le.f32.partialorder %v11277_v13, 0.7853982 }
 0x259   :  { %v1665_v51 = vsel %vm1664_vm11, 1, %v11134_v31  ;;  %vm1686_vm13 = vc.u32 %v1678_v30, %v1682_v26  ;;  %vm2413_vm4 = vcmp.lt.s32.totalorder %v7476_v42, 4 }
 0x25a   :  { %11273 = vst [vmem:[#allocation25_spill] sm:$0xff] %v7457_v3  ;;  %v1546_v25 = vadd.s32 %v1545_v17, %v11276_v57  ;;  %v2536_v52 = vand.u32 2139095040, %v7457_v3  ;;  %v1662_v17 = vshll.u32 %v7488_v59, 16  ;;  %v2399_v57 = vshrl.u32 %v11116_v36, %v7484_v40 }
 0x25b   :  { %v11280_v13 = vand.u32 2147483647, %v7457_v3  ;;  %v2409_v3 = vor.u32 %v2408_v16, %v2407_v28  ;;  %v2419_v16 = vsel %vm2413_vm4, %v2406_v58, 920167782 }
 0x25c   :  { %v1547_v60 = vadd.s32 536870912, %v1546_v25  ;;  %v2537_v53 = vshrl.u32 %v2536_v52, 23  ;;  %vm1668_vm9 = vc.u32 %v1666_v45, %v1662_v17  ;;  %v1680_v45 = vmul.u32 %v1676_v12, %v7076_v44 }
 0x25d   :  { %v2540_v63 = vand.u32 8388607, %v11280_v13  ;;  %v1669_v19 = vsel %vm1668_vm9, 1, %v11134_v31  ;;  %v7534_v17 = vor.u32 %v2396_v46, %v2395_v5  ;;  %v7536_v13 = vor.u32 %v2399_v57, %v2398_v48 }
 0x25e   :  { %v1548_v8 = vshrl.u32 %v1547_v60, 30  ;;  %v5462_v52 = vadd.s32 4294967169, %v2537_v53  ;;  %v2402_v53 = vshrl.u32 %v11100_v29, %v7484_v40  ;;  %v1542_v12 = vadd.s32 %v7416_v20, %v7404_v15 }
 0x25f   :  { %11281 = vst [vmem:[#allocation34_spill] sm:$0xff] %v7534_v17  ;;  %v2541_v33 = vor.u32 8388608, %v2540_v63  ;;  %v1687_v5 = vsel %vm1686_vm13, 1, %v11134_v31  ;;  %v11284_v63 = vshrl.u32 %v7441_v56, 16  ;;  %v1684_v28 = vshll.u32 %v1680_v45, 16 }
 0x260   :  { %v1549_v24 = vshll.u32 %v1548_v8, 30  ;;  %v1572_v37 = vsub.s32 4, %v1548_v8  ;;  %v2543_v14 = vadd.s32 1, %v5462_v52  ;;  %11282 = vst [vmem:[#allocation32_spill] sm:$0xff] %v7536_v13  ;;  %v7542_v52 = vor.u32 %v2402_v53, %v2401_v39 }
 0x261   :  { %v1681_v48 = vmul.u32 %v11284_v63, %v7076_v44  ;;  %v1661_v15 = vshrl.u32 %v7460_v41, 16  ;;  %v7561_v20 = vsel %vm2410_vm2, %v7534_v17, %v7536_v13  ;;  %v7563_v39 = vshll.u32 %v2541_v33, 8 }
 0x262   :  { %v7521_v54 = vsub.s32 %v1546_v25, %v1549_v24  ;;  %v1667_v24 = vadd.s32 %v1665_v51, %v1659_v32  ;;  %v1573_v55 = vsel %vm1450_vm12, %v1572_v37, %v1548_v8  ;;  %v1688_v32 = vadd.s32 %v1682_v26, %v1678_v30  ;;  %11283 = vst [vmem:[#allocation33_spill] sm:$0xff] %v7542_v52 }
 0x263   :  { %vm2544_vm9 = vcmp.gt.s32.totalorder %v2543_v14, 0  ;;  %v2423_v30 = vsel %vm2413_vm4, %v2409_v3, 1326507024  ;;  %v1575_v8 = vsel %vm7512_vm10, 0, %v1573_v55  ;;  %11285 = vst [vmem:[#allocation31_spill] sm:$0xff] %v7563_v39  ;;  %v1689_v56 = vadd.s32 %v1687_v5, %v1681_v48 }
 0x264   :  { %vm1551_vm11 = vcmp.lt.s32.totalorder %v7521_v54, 0  ;;  %v1552_v25 = vsub.s32 0, %v7521_v54  ;;  %v1671_v51 = vadd.s32 %v1669_v19, %v1667_v24  ;;  %vm1690_vm13 = vc.u32 %v1688_v32, %v1684_v28 }
 0x265   :  { %v7569_v44 = vsel %vm2410_vm2, %v7536_v13, %v7542_v52  ;;  %v2545_v3 = vsel %vm2544_vm9, %v2543_v14, 0  ;;  %v7574_v41 = vsel %vm2412_vm15, %v7542_v52, %v2419_v16  ;;  %v7578_v26 = vsel %vm2412_vm15, %v2406_v58, %v2423_v30 }
 0x266   :  { %v1553_v7 = vsel %vm1551_vm11, %v1552_v25, %v7521_v54  ;;  %v1672_v57 = vadd.s32 %v1671_v51, %v1661_v15  ;;  %v1592_v53 = vadd.s32 3, %v1575_v8  ;;  %v1663_v25 = vshrl.u32 %v7488_v59, 16 }
 0x267   :  { %v1554_v37 = vclz %v1553_v7  ;;  %v1683_v24 = vshrl.u32 %v7495_v6, 16  ;;  %v1685_v19 = vshrl.u32 %v1680_v45, 16  ;;  %v1691_v14 = vsel %vm1690_vm13, 1, %v11134_v31 }
 0x268   :  { %v2547_v33 = vand.u32 31, %v2545_v3  ;;  %v7584_v7 = vand.u32 65535, %v7563_v39  ;;  %v1693_v51 = vadd.s32 %v1691_v14, %v1689_v56  ;;  %v7587_v5 = vshrl.u32 %v7563_v39, 16 }
 0x269   :  { %v5442_v46 = vadd.s32 4294967294, %v1554_v37  ;;  %v7589_v63 = vadd.s32 %v1672_v57, %v1663_v25  ;;  %v7591_v59 = vshrl.u32 %v2545_v3, 5  ;;  %v7593_v48 = vand.u32 3, %v1592_v53 }
 0x26a   :  { %11286 = vst [vmem:[#allocation17_spill] sm:$0xff] %v7584_v7  ;;  %v7595_v6 = vadd.s32 %v1688_v32, %v1684_v28  ;;  %v1694_v45 = vadd.s32 %v1693_v51, %v1683_v24  ;;  %vm1791_vm9 = vcmp.lt.s32.totalorder %v7133_v18, 2  ;;  %v7599_v15 = vsub.s32 32, %v2547_v33  ;;  %v11288_v51 = vld [vmem:[#allocation5_spill] sm:$0xff] }
 0x26b   :  { %vm5443_vm11 = vcmp.lt.s32.totalorder %v5442_v46, 0  ;;  %11287 = vst [vmem:[#allocation58_spill] sm:$0xff] %v7587_v5  ;;  %v7602_v56 = vshll.u32 %v11115_v1, %v2547_v33  ;;  %v1801_v3 = vsel %vm1791_vm9, %v7189_v61, %v7209_v0  ;;  %v7618_v24 = vshll.u32 %v11116_v36, %v2547_v33  ;;  %v11290_v5 = vld [vmem:[#allocation10_spill] sm:$0xff] }
 0x26c   :  { %v1557_v55 = vsel %vm5443_vm11, 0, %v5442_v46  ;;  %v1695_v46 = vadd.s32 %v1694_v45, %v1685_v19  ;;  %vm1698_vm13 = vc.u32 %v7589_v63, %v7595_v6  ;;  %v1696_v0 = vmul.u32 %v7055_v2, %v7481_v62 }
 0x26d   :  { %v1558_v58 = vsub.s32 32, %v1557_v55  ;;  %v1562_v16 = vsub.s32 4294967266, %v1557_v55  ;;  %v1559_v30 = vshll.u32 %v7521_v54, %v1557_v55  ;;  %v1805_v54 = vsel %vm1791_vm9, %v7200_v34, %v7213_v11  ;;  %v11289_v11 = vld [vmem:[#allocation45_spill] sm:$0xff] }
 0x26e   :  { %v1699_v57 = vadd.s32 1, %v1695_v46  ;;  %v1809_v53 = vand.u32 65535, %v1805_v54  ;;  %v1810_v25 = vshrl.u32 %v1805_v54, 16  ;;  %v1832_v19 = vshrl.u32 %v1801_v3, 16 }
 0x26f   :  { %v1560_v37 = vshrl.u32 %v1542_v12, %v1558_v58  ;;  %v1563_v8 = vadd.s32 127, %v1562_v16  ;;  %v7615_v12 = vshll.u32 %v11114_v21, %v2547_v33  ;;  %v7623_v14 = vshll.u32 %v11100_v29, %v2547_v33 }
 0x270   :  { %v1700_v55 = vsel %vm1698_vm13, %v1699_v57, %v1695_v46  ;;  %v1812_v34 = vmul.u32 %v1810_v25, %v11288_v51  ;;  %v7627_v58 = vmul.u32 %v1809_v53, %v11289_v11  ;;  %v7630_v16 = vshll.u32 %v11117_v10, %v2547_v33 }
 0x271   :  { %v1561_v32 = vor.u32 %v1560_v37, %v1559_v30  ;;  %v1564_v28 = vshll.u32 %v1563_v8, 23  ;;  %v1701_v37 = vadd.s32 %v1700_v55, %v1696_v0  ;;  %v7634_v8 = vshrl.u32 %v11114_v21, %v7599_v15 }
 0x272   :  { %v1811_v2 = vmul.u32 %v1809_v53, %v11288_v51  ;;  %v1815_v62 = vshll.u32 %v1812_v34, 16  ;;  %v7639_v46 = vshrl.u32 %v11116_v36, %v7599_v15  ;;  %v1834_v33 = vmul.u32 %v1832_v19, %v11288_v51 }
 0x273   :  { %v1565_v61 = vor.u32 4788187, %v1564_v28  ;;  %v1568_v30 = vcvt.s32.f32 %v1561_v32  ;;  %v1831_v28 = vand.u32 65535, %v1801_v3  ;;  %v1702_v57 = vadd.s32 536870912, %v1701_v37 }
 0x274   :  { %v1817_v32 = vshll.u32 %v7627_v58, 16  ;;  %vm1819_vm11 = vc.u32 %v1811_v2, %v1815_v62  ;;  %v1821_v0 = vadd.s32 %v1815_v62, %v1811_v2  ;;  %v1837_v3 = vshll.u32 %v1834_v33, 16 }
 0x275   :  { %v1566_v45 = vand.u32 2147483647, %v1565_v61  ;;  %v1814_v61 = vmul.u32 %v1810_v25, %v11289_v11  ;;  %v7644_v21 = vshrl.u32 %v1702_v57, 30  ;;  %v1820_v53 = vsel %vm1819_vm11, 1, %v11134_v31 }
 0x276   :  { %vm1823_vm13 = vc.u32 %v1821_v0, %v1817_v32  ;;  %v1833_v36 = vmul.u32 %v1831_v28, %v11288_v51  ;;  %v1774_v2 = vshrl.u32 %v11115_v1, %v11290_v5  ;;  %v1836_v51 = vmul.u32 %v1832_v19, %v11289_v11  ;;  %v11291_v32 = vld [vmem:[#allocation49_spill] sm:$0xff] }
 0x277   :  { %v1569_v54 = vmul.f32 %v1568_v30, %v1566_v45  ;;  %v1822_v39 = vadd.s32 %v1820_v53, %v1814_v61  ;;  %v1835_v45 = vmul.u32 %v1831_v28, %v11289_v11  ;;  %v1704_v25 = vshll.u32 %v7644_v21, 30  ;;  %v11292_v11 = vld [vmem:[#allocation9_spill] sm:$0xff] }
 0x278   :  { %v1824_v62 = vsel %vm1823_vm13, 1, %v11134_v31  ;;  %vm1841_vm11 = vc.u32 %v1833_v36, %v1837_v3  ;;  %v1795_v5 = vsel %vm1793_vm7, %v11291_v32, 2102212464  ;;  %v1843_v60 = vadd.s32 %v1837_v3, %v1833_v36 }
 0x279   :  { %v1570_v55 = vxor.u32 2147483648, %v1569_v54  ;;  %v1826_v61 = vadd.s32 %v1824_v62, %v1822_v39  ;;  %v1842_v0 = vsel %vm1841_vm11, 1, %v11134_v31  ;;  %v1839_v53 = vshll.u32 %v1835_v45, 16  ;;  %v11294_v62 = vld [vmem:[#allocation44_spill] sm:$0xff] }
 0x27a   :  { %v1796_v32 = vsel %vm1792_vm5, %v11294_v62, %v1795_v5  ;;  %v7682_v13 = vshrl.u32 %v11100_v29, %v7599_v15  ;;  %v1818_v52 = vshrl.u32 %v7627_v58, 16  ;;  %v1727_v62 = vsub.s32 4, %v7644_v21 }
 0x27b   :  { %v1571_v30 = vsel %vm1450_vm12, %v1570_v55, %v1569_v54  ;;  %v7663_v54 = vsub.s32 %v1701_v37, %v1704_v25  ;;  %v1816_v55 = vshrl.u32 %v1812_v34, 16  ;;  %v11293_v37 = vld [vmem:[#allocation43_spill] sm:$0xff]  ;;  %vm1845_vm7 = vc.u32 %v1843_v60, %v1839_v53 }
 0x27c   :  { %v7658_v57 = vsel %vm7512_vm10, %v6999_v4, %v1571_v30  ;;  %v1844_v30 = vadd.s32 %v1842_v0, %v1836_v51  ;;  %vm1605_vm10 = vcmp.lt.s32.totalorder %v11292_v11, 0  ;;  %v1794_v25 = vsel %vm1790_vm8, %v1774_v2, %v11293_v37 }
 0x27d   :  { %v1576_v28 = vmul.f32 %v7658_v57, %v7658_v57  ;;  %vm1706_vm12 = vcmp.lt.s32.totalorder %v7663_v54, 0  ;;  %v1707_v19 = vsub.s32 0, %v7663_v54  ;;  %v1827_v34 = vadd.s32 %v1826_v61, %v1816_v55 }
 0x27e   :  { %v1846_v0 = vsel %vm1845_vm7, 1, %v11134_v31  ;;  %v7687_v37 = vshrl.u32 %v11117_v10, %v7599_v15  ;;  %v11295_v55 = vand.u32 2147483647, %v11292_v11  ;;  %v1797_v58 = vsel %vm1791_vm9, %v1794_v25, %v1796_v32  ;;  %v11298_v32 = vld [vmem:[#allocation7_spill] sm:$0xff] }
 0x27f   :  { %v1577_v7 = vmul.f32 -0.001358992, %v1576_v28  ;;  %v1584_v39 = vmul.f32 -0.00019511016, %v1576_v28  ;;  %v1708_v51 = vsel %vm1706_vm12, %v1707_v19, %v7663_v54  ;;  %v1848_v2 = vadd.s32 %v1846_v0, %v1844_v30 }
 0x280   :  { %v1709_v17 = vclz %v1708_v51  ;;  %vm7691_vm8 = vcmp.le.f32.partialorder %v11295_v55, 0.7853982  ;;  %v7698_v30 = vadd.s32 %v1827_v34, %v1818_v52  ;;  %v1840_v29 = vshrl.u32 %v1835_v45, 16 }
 0x281   :  { %v1578_v36 = vadd.f32 0.041655596, %v1577_v7  ;;  %v1585_v3 = vadd.f32 0.008332121, %v1584_v39  ;;  %v1838_v7 = vshrl.u32 %v1834_v33, 16  ;;  %vm1595_vm5 = vcmp.eq.s32.totalorder %v7593_v48, 0 }
 0x282   :  { %v5445_v19 = vadd.s32 4294967294, %v1709_v17  ;;  %vm1598_vm13 = vcmp.eq.s32.totalorder %v7593_v48, 2  ;;  %v1697_v33 = vadd.s32 %v7595_v6, %v7589_v63  ;;  %v7704_v17 = vadd.s32 %v1843_v60, %v1839_v53 }
 0x283   :  { %v1579_v61 = vmul.f32 %v1578_v36, %v1576_v28  ;;  %v1586_v5 = vmul.f32 %v1585_v3, %v1576_v28  ;;  %v1849_v36 = vadd.s32 %v1848_v2, %v1838_v7  ;;  %vm1594_vm9 = vcmp.lt.s32.totalorder %v7593_v48, 2 }
 0x284   :  { %vm5446_vm11 = vcmp.lt.s32.totalorder %v5445_v19, 0  ;;  %vm1591_vm12 = vweird.f32 %v6999_v4  ;;  %v1851_v34 = vmul.u32 %v11298_v32, %v1797_v58  ;;  %vm1853_vm7 = vc.u32 %v7698_v30, %v7704_v17 }
 0x285   :  { %v1580_v51 = vadd.f32 -0.4999988, %v1579_v61  ;;  %v1587_v0 = vadd.f32 -0.16666654, %v1586_v5  ;;  %v1712_v18 = vsel %vm5446_vm11, 0, %v5445_v19  ;;  %v1850_v52 = vadd.s32 %v1849_v36, %v1840_v29  ;;  %v11299_v36 = vld [vmem:[#allocation19_spill] sm:$0xff] }
 0x286   :  { %v1713_v45 = vsub.s32 32, %v1712_v18  ;;  %v1717_v25 = vsub.s32 4294967266, %v1712_v18  ;;  %v1728_v6 = vsel %vm1605_vm10, %v1727_v62, %v7644_v21  ;;  %v1714_v53 = vshll.u32 %v7663_v54, %v1712_v18 }
 0x287   :  { %v1581_v3 = vmul.f32 %v1580_v51, %v1576_v28  ;;  %v1588_v55 = vmul.f32 %v1587_v0, %v1576_v28  ;;  %v1854_v28 = vadd.s32 1, %v1850_v52  ;;  %vm1946_vm11 = vcmp.lt.s32.totalorder %v7215_v50, 2 }
 0x288   :  { %v1715_v60 = vshrl.u32 %v1697_v33, %v1713_v45  ;;  %v1718_v29 = vadd.s32 127, %v1717_v25  ;;  %v1960_v19 = vsel %vm1946_vm11, %v7281_v23, %v7307_v47  ;;  %v1730_v54 = vsel %vm7691_vm8, 0, %v1728_v6  ;;  %v11300_v23 = vld [vmem:[#allocation41_spill] sm:$0xff]  ;;  %v11301_v25 = vld [vmem:[#allocation30_spill] sm:$0xff] }
 0x289   :  { %v1582_v2 = vadd.f32 1.0, %v1581_v3  ;;  %v1589_v63 = vadd.f32 1.0, %v1588_v55  ;;  %v1855_v7 = vsel %vm1853_vm7, %v1854_v28, %v1850_v52  ;;  %v1964_v21 = vand.u32 65535, %v1960_v19 }
 0x28a   :  { %v1716_v58 = vor.u32 %v1715_v60, %v1714_v53  ;;  %v1719_v51 = vshll.u32 %v1718_v29, 23  ;;  %v1856_v0 = vadd.s32 %v1855_v7, %v1851_v34  ;;  %v1965_v33 = vshrl.u32 %v1960_v19, 16  ;;  %v11302_v34 = vld [vmem:[#allocation29_spill] sm:$0xff]  ;;  %v11303_v29 = vld [vmem:[#allocation42_spill] sm:$0xff] }
 0x28b   :  { %v1590_v61 = vmul.f32 %v1589_v63, %v7658_v57  ;;  %v1599_v5 = vxor.u32 2147483648, %v1582_v2  ;;  %v1956_v57 = vsel %vm1946_vm11, %v11299_v36, %v7303_v9  ;;  %v1929_v47 = vshrl.u32 %v11115_v1, %v11300_v23  ;;  %v11304_v23 = vld [vmem:[#allocation28_spill] sm:$0xff] }
 0x28c   :  { %v1720_v55 = vor.u32 4788187, %v1719_v51  ;;  %v1857_v18 = vadd.s32 536870912, %v1856_v0  ;;  %v1723_v45 = vcvt.s32.f32 %v1716_v58  ;;  %v1967_v32 = vmul.u32 %v1965_v33, %v11301_v25 }
 0x28d   :  { %v1596_v62 = vxor.u32 2147483648, %v1590_v61  ;;  %v1600_v3 = vsel %vm1598_vm13, %v1599_v5, %v1590_v61  ;;  %v7735_v63 = vmul.u32 %v1964_v21, %v11302_v34  ;;  %v1987_v53 = vshrl.u32 %v1956_v57, 16 }
 0x28e   :  { %v1721_v6 = vand.u32 2147483647, %v1720_v55  ;;  %v7739_v28 = vshrl.u32 %v1857_v18, 30  ;;  %v1966_v61 = vmul.u32 %v1964_v21, %v11301_v25  ;;  %v1970_v5 = vshll.u32 %v1967_v32, 16 }
 0x28f   :  { %v1597_v52 = vsel %vm1595_vm5, %v1582_v2, %v1596_v62  ;;  %v1950_v2 = vsel %vm1948_vm1, %v11303_v29, 2102212464  ;;  %v1969_v19 = vmul.u32 %v1965_v33, %v11302_v34  ;;  %v1986_v58 = vand.u32 65535, %v1956_v57 }
 0x290   :  { %v1601_v9 = vsel %vm1594_vm9, %v1597_v52, %v1600_v3  ;;  %v1724_v7 = vmul.f32 %v1723_v45, %v1721_v6  ;;  %v1859_v48 = vshll.u32 %v7739_v28, 30  ;;  %v1972_v51 = vshll.u32 %v7735_v63, 16  ;;  %v11305_v52 = vld [vmem:[#allocation13_spill] sm:$0xff] }
 0x291   :  { %v1602_v60 = vsel %vm1591_vm12, nan, %v1601_v9  ;;  %vm1974_vm5 = vc.u32 %v1966_v61, %v1970_v5  ;;  %v1976_v4 = vadd.s32 %v1970_v5, %v1966_v61  ;;  %v7752_v62 = vmul.u32 %v1987_v53, %v11301_v25 }
 0x292   :  { %5465 = vmatmul.msk.f32.vlgmr.msrb.gmra.mxu2 %vm1382_vm6, %v1602_v60  ;;  %v1725_v36 = vxor.u32 2147483648, %v1724_v7  ;;  %v1747_v3 = vadd.s32 3, %v1730_v54  ;;  %v7754_v55 = vsub.s32 %v1856_v0, %v1859_v48  ;;  %v1975_v21 = vsel %vm1974_vm5, 1, %v11134_v31  ;;  %v11306_v54 = vld [vmem:[#allocation35_spill] sm:$0xff] }
 0x293   :  { %v7759_v18 = vshrl.u32 %v11118_v38, %v7599_v15  ;;  %v1949_v57 = vsel %vm1945_vm0, %v1929_v47, %v11304_v23  ;;  %v1977_v33 = vadd.s32 %v1975_v21, %v1969_v19  ;;  %vm1978_vm1 = vc.u32 %v1976_v4, %v1972_v51 }
 0x294   :  { %vm1760_vm13 = vcmp.lt.s32.totalorder %v11305_v52, 0  ;;  %v1726_v45 = vsel %vm1605_vm10, %v1725_v36, %v1724_v7  ;;  %vm1861_vm9 = vcmp.lt.s32.totalorder %v7754_v55, 0  ;;  %v1862_v0 = vsub.s32 0, %v7754_v55 }
 0x295   :  { %v1951_v9 = vsel %vm1947_vm14, %v11306_v54, %v1950_v2  ;;  %v1729_v6 = vsel %vm7691_vm8, %v11292_v11, %v1726_v45  ;;  %v1979_v47 = vsel %vm1978_vm1, 1, %v11134_v31  ;;  %v1990_v60 = vmul.u32 %v1986_v58, %v11302_v34 }
 0x296   :  { %v1992_v29 = vshll.u32 %v7752_v62, 16  ;;  %v1731_v61 = vmul.f32 %v1729_v6, %v1729_v6  ;;  %v7778_v5 = vand.u32 3, %v1747_v3  ;;  %v1852_v7 = vadd.s32 %v7704_v17, %v7698_v30 }
 0x297   :  { %v1863_v48 = vsel %vm1861_vm9, %v1862_v0, %v7754_v55  ;;  %v7785_v2 = vsel %vm1946_vm11, %v1949_v57, %v1951_v9  ;;  %v1981_v39 = vadd.s32 %v1979_v47, %v1977_v33  ;;  %v1988_v51 = vmul.u32 %v1986_v58, %v11301_v25 }
 0x298   :  { %v1864_v19 = vclz %v1863_v48  ;;  %v1732_v4 = vmul.f32 -0.001358992, %v1731_v61  ;;  %v1739_v36 = vmul.f32 -0.00019511016, %v1731_v61  ;;  %v1882_v21 = vsub.s32 4, %v7739_v28 }
 0x299   :  { %v1971_v23 = vshrl.u32 %v1967_v32, 16  ;;  %v1991_v45 = vmul.u32 %v1987_v53, %v11302_v34  ;;  %v1994_v54 = vshll.u32 %v1990_v60, 16  ;;  %vm1996_vm0 = vc.u32 %v1988_v51, %v1992_v29 }
 0x29a   :  { %v5448_v3 = vadd.s32 4294967294, %v1864_v19  ;;  %v1733_v30 = vadd.f32 0.041655596, %v1732_v4  ;;  %v1740_v17 = vadd.f32 0.008332121, %v1739_v36  ;;  %v1997_v25 = vsel %vm1996_vm0, 1, %v11134_v31 }
 0x29b   :  { %v11307_v0 = vand.u32 2147483647, %v11305_v52  ;;  %v1998_v58 = vadd.s32 %v1992_v29, %v1988_v51  ;;  %v1973_v57 = vshrl.u32 %v7735_v63, 16  ;;  %v1982_v32 = vadd.s32 %v1981_v39, %v1971_v23 }
 0x29c   :  { %vm5449_vm10 = vcmp.lt.s32.totalorder %v5448_v3, 0  ;;  %v1999_v33 = vadd.s32 %v1997_v25, %v1991_v45  ;;  %v1734_v9 = vmul.f32 %v1733_v30, %v1731_v61  ;;  %v1741_v34 = vmul.f32 %v1740_v17, %v1731_v61 }
 0x29d   :  { %vm7792_vm14 = vcmp.le.f32.partialorder %v11307_v0, 0.7853982  ;;  %v1867_v53 = vsel %vm5449_vm10, 0, %v5448_v3  ;;  %vm2000_vm8 = vc.u32 %v1998_v58, %v1994_v54  ;;  %v1883_v19 = vsel %vm1760_vm13, %v1882_v21, %v7739_v28 }
 0x29e   :  { %v1868_v47 = vsub.s32 32, %v1867_v53  ;;  %v1872_v48 = vsub.s32 4294967266, %v1867_v53  ;;  %v2001_v4 = vsel %vm2000_vm8, 1, %v11134_v31  ;;  %v1735_v36 = vadd.f32 -0.4999988, %v1734_v9 }
 0x29f   :  { %v1742_v0 = vadd.f32 -0.16666654, %v1741_v34  ;;  %v1993_v29 = vshrl.u32 %v7752_v62, 16  ;;  %v2003_v51 = vadd.s32 %v2001_v4, %v1999_v33  ;;  %v1869_v63 = vshll.u32 %v7754_v55, %v1867_v53 }
 0x2a0   :  { %v1870_v39 = vshrl.u32 %v1852_v7, %v1868_v47  ;;  %v1873_v23 = vadd.s32 127, %v1872_v48  ;;  %v7804_v45 = vadd.s32 %v1982_v32, %v1973_v57  ;;  %v1736_v3 = vmul.f32 %v1735_v36, %v1731_v61  ;;  %v11312_v47 = vld [vmem:[#allocation6_spill] sm:$0xff]  ;;  %v11313_v48 = vld [vmem:[#allocation48_spill] sm:$0xff]  ;;  %v11314_v36 = vld [vmem:[#allocation53_spill] sm:$0xff] }
 0x2a1   :  { %v1743_v30 = vmul.f32 %v1742_v0, %v1731_v61  ;;  %v1995_v17 = vshrl.u32 %v1990_v60, 16  ;;  %v2004_v25 = vadd.s32 %v2003_v51, %v1993_v29  ;;  %v7808_v28 = vor.u32 %v7634_v8, %v7602_v56  ;;  %v11310_v61 = vld [vmem:[#allocation46_spill] sm:$0xff] }
 0x2a2   :  { %vm1746_vm12 = vweird.f32 %v11292_v11  ;;  %v1871_v21 = vor.u32 %v1870_v39, %v1869_v63  ;;  %v1874_v9 = vshll.u32 %v1873_v23, 23  ;;  %v7811_v62 = vadd.s32 %v1998_v58, %v1994_v54  ;;  %v11311_v54 = vld [vmem:[#allocation20_spill] sm:$0xff] }
 0x2a3   :  { %v1737_v33 = vadd.f32 1.0, %v1736_v3  ;;  %v1744_v55 = vadd.f32 1.0, %v1743_v30  ;;  %vm1750_vm7 = vcmp.eq.s32.totalorder %v7778_v5, 0  ;;  %v2005_v7 = vadd.s32 %v2004_v25, %v1995_v17 }
 0x2a4   :  { %v1875_v57 = vor.u32 4788187, %v1874_v9  ;;  %v1885_v60 = vsel %vm7792_vm14, 0, %v1883_v19  ;;  %v2006_v32 = vmul.u32 %v11310_v61, %v7785_v2  ;;  %vm2008_vm11 = vc.u32 %v7804_v45, %v7811_v62  ;;  %v11315_v19 = vld [vmem:[#allocation56_spill] sm:$0xff] }
 0x2a5   :  { %v1745_v56 = vmul.f32 %v1744_v55, %v1729_v6  ;;  %v1754_v8 = vxor.u32 2147483648, %v1737_v33  ;;  %v2009_v34 = vadd.s32 1, %v2005_v7  ;;  %vm2101_vm5 = vcmp.lt.s32.totalorder %v11311_v54, 2  ;;  %v11316_v55 = vld [vmem:[#allocation50_spill] sm:$0xff]  ;;  %v11317_v61 = vld [vmem:[#allocation16_spill] sm:$0xff] }
 0x2a6   :  { %v1876_v58 = vand.u32 2147483647, %v1875_v57  ;;  %v1878_v53 = vcvt.s32.f32 %v1871_v21  ;;  %v2111_v4 = vsel %vm2101_vm5, %v11313_v48, %v11312_v47  ;;  %v2115_v2 = vsel %vm2101_vm5, %v11315_v19, %v11314_v36 }
 0x2a7   :  { %v1751_v0 = vxor.u32 2147483648, %v1745_v56  ;;  %v1902_v29 = vadd.s32 3, %v1885_v60  ;;  %v2010_v51 = vsel %vm2008_vm11, %v2009_v34, %v2005_v7  ;;  %v2119_v6 = vand.u32 65535, %v2115_v2  ;;  %v11318_v34 = vld [vmem:[#allocation51_spill] sm:$0xff] }
 0x2a8   :  { %vm1753_vm1 = vcmp.eq.s32.totalorder %v7778_v5, 2  ;;  %v1879_v63 = vmul.f32 %v1878_v53, %v1876_v58  ;;  %v2011_v39 = vadd.s32 %v2010_v51, %v2006_v32  ;;  %v2120_v23 = vshrl.u32 %v2115_v2, 16  ;;  %v11319_v53 = vld [vmem:[#allocation22_spill] sm:$0xff] }
 0x2a9   :  { %vm1749_vm9 = vcmp.lt.s32.totalorder %v7778_v5, 2  ;;  %v1752_v3 = vsel %vm1750_vm7, %v1737_v33, %v1751_v0  ;;  %v1755_v30 = vsel %vm1753_vm1, %v1754_v8, %v1745_v56  ;;  %v2142_v17 = vshrl.u32 %v2111_v4, 16 }
 0x2aa   :  { %v1756_v25 = vsel %vm1749_vm9, %v1752_v3, %v1755_v30  ;;  %v1880_v21 = vxor.u32 2147483648, %v1879_v63  ;;  %v2012_v9 = vadd.s32 536870912, %v2011_v39  ;;  %v2122_v57 = vmul.u32 %v2120_v23, %v11316_v55  ;;  %v11321_v30 = vld [vmem:[#allocation23_spill] sm:$0xff] }
 0x2ab   :  { %v1757_v7 = vsel %vm1746_vm12, nan, %v1756_v25  ;;  %v7836_v60 = vand.u32 3, %v1902_v29  ;;  %v2084_v32 = vshrl.u32 %v11115_v1, %v11317_v61  ;;  %v7841_v58 = vmul.u32 %v2119_v6, %v11318_v34 }
 0x2ac   :  { %5466 = vmatmul.msk.f32.gmra.mxu2 %vm1382_vm6, %v1757_v7  ;;  %v1881_v5 = vsel %vm1760_vm13, %v1880_v21, %v1879_v63  ;;  %v7846_v33 = vshrl.u32 %v2012_v9, 30  ;;  %v2121_v56 = vmul.u32 %v2119_v6, %v11316_v55  ;;  %v2125_v8 = vshll.u32 %v2122_v57, 16  ;;  %v11323_v7 = vld [vmem:[#allocation11_spill] sm:$0xff] }
 0x2ad   :  { %v7852_v11 = vsel %vm7792_vm14, %v11305_v52, %v1881_v5  ;;  %vm11320_vm0 = vcmp.lt.s32.totalorder %v11311_v54, 1  ;;  %v2141_v48 = vand.u32 65535, %v2111_v4  ;;  %v7858_v36 = vmul.u32 %v2142_v17, %v11316_v55 }
 0x2ae   :  { %v2104_v47 = vsel %vm11320_vm0, %v2084_v32, %v11319_v53  ;;  %v1886_v19 = vmul.f32 %v7852_v11, %v7852_v11  ;;  %v2014_v2 = vshll.u32 %v7846_v33, 30  ;;  %v2124_v0 = vmul.u32 %v2120_v23, %v11318_v34 }
 0x2af   :  { %vm2129_vm13 = vc.u32 %v2121_v56, %v2125_v8  ;;  %v2127_v50 = vshll.u32 %v7841_v58, 16  ;;  %v2131_v51 = vadd.s32 %v2125_v8, %v2121_v56  ;;  %v2147_v6 = vshll.u32 %v7858_v36, 16 }
 0x2b0   :  { %v2130_v29 = vsel %vm2129_vm13, 1, %v11134_v31  ;;  %v1887_v63 = vmul.f32 -0.001358992, %v1886_v19  ;;  %v1894_v4 = vmul.f32 -0.00019511016, %v1886_v19  ;;  %v7867_v3 = vsub.s32 %v2011_v39, %v2014_v2  ;;  %v11324_v39 = vld [vmem:[#allocation18_spill] sm:$0xff] }
 0x2b1   :  { %vm11322_vm14 = vcmp.lt.s32.totalorder %v11311_v54, 4  ;;  %v2132_v21 = vadd.s32 %v2130_v29, %v2124_v0  ;;  %vm2133_vm10 = vc.u32 %v2131_v51, %v2127_v50  ;;  %v2143_v23 = vmul.u32 %v2141_v48, %v11316_v55 }
 0x2b2   :  { %v2105_v25 = vsel %vm11322_vm14, %v11321_v30, 2102212464  ;;  %v2145_v9 = vmul.u32 %v2141_v48, %v11318_v34  ;;  %vm1915_vm8 = vcmp.lt.s32.totalorder %v11323_v7, 0  ;;  %v1888_v61 = vadd.f32 0.041655596, %v1887_v63 }
 0x2b3   :  { %v1895_v32 = vadd.f32 0.008332121, %v1894_v4  ;;  %vm2016_vm12 = vcmp.lt.s32.totalorder %v7867_v3, 0  ;;  %v2017_v5 = vsub.s32 0, %v7867_v3  ;;  %vm11325_vm7 = vcmp.lt.s32.totalorder %v11311_v54, 3 }
 0x2b4   :  { %v2106_v56 = vsel %vm11325_vm7, %v11324_v39, %v2105_v25  ;;  %v2134_v8 = vsel %vm2133_vm10, 1, %v11134_v31  ;;  %v2146_v53 = vmul.u32 %v2142_v17, %v11318_v34  ;;  %vm2151_vm11 = vc.u32 %v2143_v23, %v2147_v6 }
 0x2b5   :  { %v1889_v55 = vmul.f32 %v1888_v61, %v1886_v19  ;;  %v1896_v2 = vmul.f32 %v1895_v32, %v1886_v19  ;;  %v2018_v48 = vsel %vm2016_vm12, %v2017_v5, %v7867_v3  ;;  %v2136_v0 = vadd.s32 %v2134_v8, %v2132_v21 }
 0x2b6   :  { %v2019_v50 = vclz %v2018_v48  ;;  %v2126_v29 = vshrl.u32 %v2122_v57, 16  ;;  %v2152_v51 = vsel %vm2151_vm11, 1, %v11134_v31  ;;  %v2153_v63 = vadd.s32 %v2147_v6, %v2143_v23 }
 0x2b7   :  { %v1890_v4 = vadd.f32 -0.4999988, %v1889_v55  ;;  %v1897_v30 = vadd.f32 -0.16666654, %v1896_v2  ;;  %v11326_v10 = vand.u32 2147483647, %v11323_v7  ;;  %v2154_v34 = vadd.s32 %v2152_v51, %v2146_v53 }
 0x2b8   :  { %v2149_v17 = vshll.u32 %v2145_v9, 16  ;;  %v2007_v61 = vadd.s32 %v7811_v62, %v7804_v45  ;;  %v5451_v32 = vadd.s32 4294967294, %v2019_v50  ;;  %v2037_v21 = vsub.s32 4, %v7846_v33 }
 0x2b9   :  { %vm7886_vm1 = vcmp.le.f32.partialorder %v11326_v10, 0.7853982  ;;  %v2137_v57 = vadd.s32 %v2136_v0, %v2126_v29  ;;  %v1891_v5 = vmul.f32 %v1890_v4, %v1886_v19  ;;  %v1898_v39 = vmul.f32 %v1897_v30, %v1886_v19 }
 0x2ba   :  { %vm1904_vm9 = vcmp.lt.s32.totalorder %v7836_v60, 2  ;;  %v2107_v6 = vsel %vm2101_vm5, %v2104_v47, %v2106_v56  ;;  %vm2155_vm0 = vc.u32 %v2153_v63, %v2149_v17  ;;  %vm1901_vm13 = vweird.f32 %v11305_v52 }
 0x2bb   :  { %vm5452_vm14 = vcmp.lt.s32.totalorder %v5451_v32, 0  ;;  %v2128_v10 = vshrl.u32 %v7841_v58, 16  ;;  %v2148_v23 = vshrl.u32 %v7858_v36, 16  ;;  %v2156_v45 = vsel %vm2155_vm0, 1, %v11134_v31 }
 0x2bc   :  { %v1892_v62 = vadd.f32 1.0, %v1891_v5  ;;  %v1899_v8 = vadd.f32 1.0, %v1898_v39  ;;  %v2022_v53 = vsel %vm5452_vm14, 0, %v5451_v32  ;;  %v2158_v55 = vadd.s32 %v2156_v45, %v2154_v34 }
 0x2bd   :  { %v2023_v19 = vsub.s32 32, %v2022_v53  ;;  %v2027_v2 = vsub.s32 4294967266, %v2022_v53  ;;  %v2038_v54 = vsel %vm1915_vm8, %v2037_v21, %v7846_v33  ;;  %v7903_v47 = vadd.s32 %v2137_v57, %v2128_v10 }
 0x2be   :  { %v1900_v56 = vmul.f32 %v1899_v8, %v7852_v11  ;;  %v1909_v48 = vxor.u32 2147483648, %v1892_v62  ;;  %v2150_v58 = vshrl.u32 %v2145_v9, 16  ;;  %v2159_v0 = vadd.s32 %v2158_v55, %v2148_v23 }
 0x2bf   :  { %v2024_v36 = vshll.u32 %v7867_v3, %v2022_v53  ;;  %v2025_v50 = vshrl.u32 %v2007_v61, %v2023_v19  ;;  %v2028_v29 = vadd.s32 127, %v2027_v2  ;;  %v7907_v51 = vadd.s32 %v2153_v63, %v2149_v17  ;;  %v11329_v61 = vld [vmem:[#allocation14_spill] sm:$0xff] }
 0x2c0   :  { %vm1905_vm5 = vcmp.eq.s32.totalorder %v7836_v60, 0  ;;  %v1906_v4 = vxor.u32 2147483648, %v1900_v56  ;;  %vm1908_vm10 = vcmp.eq.s32.totalorder %v7836_v60, 2  ;;  %v2160_v30 = vadd.s32 %v2159_v0, %v2150_v58  ;;  %v11330_v19 = vld [vmem:[#allocation26_spill] sm:$0xff] }
 0x2c1   :  { %v2026_v33 = vor.u32 %v2025_v50, %v2024_v36  ;;  %v2029_v34 = vshll.u32 %v2028_v29, 23  ;;  %v2040_v11 = vsel %vm7886_vm1, 0, %v2038_v54  ;;  %vm2163_vm12 = vc.u32 %v7903_v47, %v7907_v51  ;;  %v11332_v36 = vld [vmem:[#allocation55_spill] sm:$0xff] }
 0x2c2   :  { %v1907_v9 = vsel %vm1905_vm5, %v1892_v62, %v1906_v4  ;;  %v1910_v3 = vsel %vm1908_vm10, %v1909_v48, %v1900_v56  ;;  %v2161_v32 = vmul.u32 %v11329_v61, %v2107_v6  ;;  %v2164_v63 = vadd.s32 1, %v2160_v30 }
 0x2c3   :  { %v1911_v17 = vsel %vm1904_vm9, %v1907_v9, %v1910_v3  ;;  %v2030_v21 = vor.u32 4788187, %v2029_v34  ;;  %v2033_v57 = vcvt.s32.f32 %v2026_v33  ;;  %vm2256_vm7 = vcmp.lt.s32.totalorder %v7349_v27, 2 }
 0x2c4   :  { %v1912_v5 = vsel %vm1901_vm13, nan, %v1911_v17  ;;  %v2165_v39 = vsel %vm2163_vm12, %v2164_v63, %v2160_v30  ;;  %v2266_v10 = vsel %vm2256_vm7, %v7412_v35, %v7446_v43  ;;  %v2270_v6 = vsel %vm2256_vm7, %v7426_v22, %v7465_v49  ;;  %v11334_v17 = vld [vmem:[#allocation39_spill] sm:$0xff] }
 0x2c5   :  { %5467 = vmatmul.msk.f32.gmra.mxu2 %vm1382_vm6, %v1912_v5  ;;  %v2031_v60 = vand.u32 2147483647, %v2030_v21  ;;  %v2166_v23 = vadd.s32 %v2165_v39, %v2161_v32  ;;  %v2274_v45 = vand.u32 65535, %v2270_v6  ;;  %v2275_v62 = vshrl.u32 %v2270_v6, 16  ;;  %v11333_v32 = vld [vmem:[#allocation37_spill] sm:$0xff] }
 0x2c6   :  { %v7932_v52 = vor.u32 %v7639_v46, %v7615_v12  ;;  %v7936_v8 = vor.u32 %v7682_v13, %v7618_v24  ;;  %v2057_v35 = vadd.s32 3, %v2040_v11  ;;  %v2297_v43 = vshrl.u32 %v2266_v10, 16  ;;  %v11331_v12 = vld [vmem:[#allocation47_spill] sm:$0xff] }
 0x2c7   :  { %v2034_v53 = vmul.f32 %v2033_v57, %v2031_v60  ;;  %v2167_v55 = vadd.s32 536870912, %v2166_v23  ;;  %v2277_v22 = vmul.u32 %v2275_v62, %v11330_v19  ;;  %v2296_v49 = vand.u32 65535, %v2266_v10 }
 0x2c8   :  { %v7941_v2 = vor.u32 %v7687_v37, %v7623_v14  ;;  %v2564_v54 = vor.u32 %v7759_v18, %v7630_v16  ;;  %v7946_v46 = vmul.u32 %v2274_v45, %v11331_v12  ;;  %v7949_v13 = vmul.u32 %v2297_v43, %v11330_v19 }
 0x2c9   :  { %v2035_v24 = vxor.u32 2147483648, %v2034_v53  ;;  %v7951_v56 = vshrl.u32 %v2167_v55, 30  ;;  %v2276_v48 = vmul.u32 %v2274_v45, %v11330_v19  ;;  %v2280_v58 = vshll.u32 %v2277_v22, 16 }
 0x2ca   :  { %v7954_v0 = vand.u32 3, %v2057_v35  ;;  %v2239_v14 = vshrl.u32 %v11115_v1, %v11332_v36  ;;  %v2279_v37 = vmul.u32 %v2275_v62, %v11331_v12  ;;  %v2282_v50 = vshll.u32 %v7946_v46, 16 }
 0x2cb   :  { %vm2568_vm11 = vcmp.lt.s32.totalorder %v7591_v59, 4  ;;  %v2036_v29 = vsel %vm1915_vm8, %v2035_v24, %v2034_v53  ;;  %v2169_v4 = vshll.u32 %v7951_v56, 30  ;;  %vm2284_vm9 = vc.u32 %v2276_v48, %v2280_v58 }
 0x2cc   :  { %v7965_v30 = vmul.u32 %v2296_v49, %v11331_v12  ;;  %v7970_v33 = vsel %vm7886_vm1, %v11323_v7, %v2036_v29  ;;  %v2285_v34 = vsel %vm2284_vm9, 1, %v11134_v31  ;;  %v2286_v11 = vadd.s32 %v2280_v58, %v2276_v48  ;;  %v11336_v58 = vld [vmem:[#allocation36_spill] sm:$0xff] }
 0x2cd   :  { %v2302_v9 = vshll.u32 %v7949_v13, 16  ;;  %v2041_v3 = vmul.f32 %v7970_v33, %v7970_v33  ;;  %v7976_v61 = vsub.s32 %v2166_v23, %v2169_v4  ;;  %v2259_v63 = vsel %vm2255_vm3, %v2239_v14, %v11333_v32 }
 0x2ce   :  { %vm11335_vm8 = vcmp.lt.s32.totalorder %v7349_v27, 4  ;;  %v2281_v21 = vshrl.u32 %v2277_v22, 16  ;;  %v2287_v57 = vadd.s32 %v2285_v34, %v2279_v37  ;;  %vm2288_vm1 = vc.u32 %v2286_v11, %v2282_v50  ;;  %v11338_v37 = vld [vmem:[#allocation12_spill] sm:$0xff] }
 0x2cf   :  { %v2260_v25 = vsel %vm11335_vm8, %v11334_v17, 2102212464  ;;  %v2298_v5 = vmul.u32 %v2296_v49, %v11330_v19  ;;  %v2042_v39 = vmul.f32 -0.001358992, %v2041_v3  ;;  %v2049_v10 = vmul.f32 -0.00019511016, %v2041_v3 }
 0x2d0   :  { %vm2171_vm0 = vcmp.lt.s32.totalorder %v7976_v61, 0  ;;  %v2172_v6 = vsub.s32 0, %v7976_v61  ;;  %v2289_v60 = vsel %vm2288_vm1, 1, %v11134_v31  ;;  %v2304_v23 = vshll.u32 %v7965_v30, 16 }
 0x2d1   :  { %vm2306_vm3 = vc.u32 %v2298_v5, %v2302_v9  ;;  %v2308_v45 = vadd.s32 %v2302_v9, %v2298_v5  ;;  %v2043_v62 = vadd.f32 0.041655596, %v2042_v39  ;;  %v2050_v35 = vadd.f32 0.008332121, %v2049_v10 }
 0x2d2   :  { %v2173_v53 = vsel %vm2171_vm0, %v2172_v6, %v7976_v61  ;;  %v2301_v55 = vmul.u32 %v2297_v43, %v11331_v12  ;;  %v2291_v19 = vadd.s32 %v2289_v60, %v2287_v57  ;;  %v2307_v49 = vsel %vm2306_vm3, 1, %v11134_v31 }
 0x2d3   :  { %v2174_v22 = vclz %v2173_v53  ;;  %vm2310_vm13 = vc.u32 %v2308_v45, %v2304_v23  ;;  %v2044_v24 = vmul.f32 %v2043_v62, %v2041_v3  ;;  %v2051_v48 = vmul.f32 %v2050_v35, %v2041_v3 }
 0x2d4   :  { %vm11337_vm14 = vcmp.lt.s32.totalorder %v7349_v27, 3  ;;  %v2309_v14 = vadd.s32 %v2307_v49, %v2301_v55  ;;  %vm2070_vm5 = vcmp.lt.s32.totalorder %v11338_v37, 0  ;;  %v7999_v50 = vsel %vm2568_vm11, %v7941_v2, 920167782 }
 0x2d5   :  { %v2261_v36 = vsel %vm11337_vm14, %v11336_v58, %v2260_v25  ;;  %v5454_v43 = vadd.s32 4294967294, %v2174_v22  ;;  %v2292_v12 = vadd.s32 %v2291_v19, %v2281_v21  ;;  %v2311_v29 = vsel %vm2310_vm13, 1, %v11134_v31 }
 0x2d6   :  { %v2045_v4 = vadd.f32 -0.4999988, %v2044_v24  ;;  %v2052_v34 = vadd.f32 -0.16666654, %v2051_v48  ;;  %v2162_v11 = vadd.s32 %v7907_v51, %v7903_v47  ;;  %v2283_v9 = vshrl.u32 %v7946_v46, 16  ;;  %v11342_v24 = vld [vmem:[#allocation15_spill] sm:$0xff] }
 0x2d7   :  { %vm5455_vm10 = vcmp.lt.s32.totalorder %v5454_v43, 0  ;;  %v2262_v32 = vsel %vm2256_vm7, %v2259_v63, %v2261_v36  ;;  %v2303_v17 = vshrl.u32 %v7949_v13, 16  ;;  %v2313_v25 = vadd.s32 %v2311_v29, %v2309_v14 }
 0x2d8   :  { %v2046_v57 = vmul.f32 %v2045_v4, %v2041_v3  ;;  %v2053_v5 = vmul.f32 %v2052_v34, %v2041_v3  ;;  %vm2059_vm12 = vcmp.lt.s32.totalorder %v7954_v0, 2  ;;  %v2177_v21 = vsel %vm5455_vm10, 0, %v5454_v43 }
 0x2d9   :  { %v8009_v39 = vadd.s32 %v2292_v12, %v2283_v9  ;;  %vm2056_vm9 = vweird.f32 %v11323_v7  ;;  %v11339_v47 = vand.u32 2147483647, %v11338_v37  ;;  %v2178_v27 = vsub.s32 32, %v2177_v21 }
 0x2da   :  { %v2182_v46 = vsub.s32 4294967266, %v2177_v21  ;;  %v2305_v13 = vshrl.u32 %v7965_v30, 16  ;;  %v2314_v63 = vadd.s32 %v2313_v25, %v2303_v17  ;;  %v2047_v10 = vadd.f32 1.0, %v2046_v57  ;;  %v11344_v57 = vld [vmem:[#allocation21_spill] sm:$0xff] }
 0x2db   :  { %vm8014_vm8 = vcmp.le.f32.partialorder %v11339_v47, 0.7853982  ;;  %v2054_v3 = vadd.f32 1.0, %v2053_v5  ;;  %v2192_v6 = vsub.s32 4, %v7951_v56  ;;  %v8020_v60 = vadd.s32 %v2308_v45, %v2304_v23 }
 0x2dc   :  { %vm2565_vm7 = vcmp.lt.s32.totalorder %v7591_v59, 1  ;;  %vm2567_vm1 = vcmp.lt.s32.totalorder %v7591_v59, 3  ;;  %v2179_v62 = vshll.u32 %v7976_v61, %v2177_v21  ;;  %v2180_v35 = vshrl.u32 %v2162_v11, %v2178_v27 }
 0x2dd   :  { %v2183_v53 = vadd.s32 127, %v2182_v46  ;;  %v2315_v55 = vadd.s32 %v2314_v63, %v2305_v13  ;;  %v2055_v22 = vmul.f32 %v2054_v3, %v7970_v33  ;;  %vm2060_vm0 = vcmp.eq.s32.totalorder %v7954_v0, 0 }
 0x2de   :  { %v2064_v30 = vxor.u32 2147483648, %v2047_v10  ;;  %vm2318_vm3 = vc.u32 %v8009_v39, %v8020_v60  ;;  %vm2063_vm13 = vcmp.eq.s32.totalorder %v7954_v0, 2  ;;  %v2181_v23 = vor.u32 %v2180_v35, %v2179_v62  ;;  %v11343_v0 = vld [vmem:[#allocation27_spill] sm:$0xff] }
 0x2df   :  { %v2184_v45 = vshll.u32 %v2183_v53, 23  ;;  %v2319_v19 = vadd.s32 1, %v2315_v55  ;;  %v2061_v49 = vxor.u32 2147483648, %v2055_v22  ;;  %v2193_v61 = vsel %vm2070_vm5, %v2192_v6, %v7951_v56 }
 0x2e0   :  { %v2316_v48 = vmul.u32 %v11342_v24, %v2262_v32  ;;  %vm2411_vm14 = vcmp.lt.s32.totalorder %v7476_v42, 2  ;;  %v2065_v33 = vsel %vm2063_vm13, %v2064_v30, %v2055_v22  ;;  %v2188_v12 = vcvt.s32.f32 %v2181_v23 }
 0x2e1   :  { %v2185_v58 = vor.u32 4788187, %v2184_v45  ;;  %v2320_v36 = vsel %vm2318_vm3, %v2319_v19, %v2315_v55  ;;  %v8039_v14 = vsel %vm2411_vm14, %v7561_v20, %v7574_v41  ;;  %v2062_v43 = vsel %vm2060_vm0, %v2047_v10, %v2061_v49 }
 0x2e2   :  { %v2321_v29 = vadd.s32 %v2320_v36, %v2316_v48  ;;  %v2425_v56 = vsel %vm2411_vm14, %v7569_v44, %v7578_v26  ;;  %v2066_v4 = vsel %vm2059_vm12, %v2062_v43, %v2065_v33  ;;  %v2195_v20 = vsel %vm8014_vm8, 0, %v2193_v61  ;;  %v11345_v48 = vld [vmem:[#allocation33_spill] sm:$0xff] }
 0x2e3   :  { %v2186_v34 = vand.u32 2147483647, %v2185_v58  ;;  %v2429_v11 = vand.u32 65535, %v2425_v56  ;;  %v2430_v9 = vshrl.u32 %v2425_v56, 16  ;;  %v2067_v32 = vsel %vm2056_vm9, nan, %v2066_v4 }
 0x2e4   :  { %v2322_v41 = vadd.s32 536870912, %v2321_v29  ;;  %v2452_v17 = vshrl.u32 %v8039_v14, 16  ;;  %v2578_v44 = vsel %vm2568_vm11, %v2564_v54, 1326507024  ;;  %5468 = vmatmul.msk.f32.gmra.mxu2 %vm1382_vm6, %v2067_v32  ;;  %v8066_v5 = vsel %vm2565_vm7, %v7808_v28, %v7932_v52 }
 0x2e5   :  { %v2189_v26 = vmul.f32 %v2188_v12, %v2186_v34  ;;  %v2432_v25 = vmul.u32 %v2430_v9, %v11343_v0  ;;  %v8060_v7 = vmul.u32 %v2429_v11, %v11344_v57  ;;  %v8072_v16 = vsel %vm2567_vm1, %v7936_v8, %v7999_v50  ;;  %v11346_v34 = vld [vmem:[#allocation34_spill] sm:$0xff] }
 0x2e6   :  { %v8078_v18 = vsel %vm2565_vm7, %v7932_v52, %v7936_v8  ;;  %v8080_v54 = vshrl.u32 %v2322_v41, 30  ;;  %v2212_v47 = vadd.s32 3, %v2195_v20  ;;  %v2431_v27 = vmul.u32 %v2429_v11, %v11343_v0  ;;  %v11347_v11 = vld [vmem:[#allocation32_spill] sm:$0xff] }
 0x2e7   :  { %v2190_v21 = vxor.u32 2147483648, %v2189_v26  ;;  %v2435_v46 = vshll.u32 %v2432_v25, 16  ;;  %v8086_v13 = vsel %vm2567_vm1, %v7941_v2, %v2578_v44  ;;  %v2434_v63 = vmul.u32 %v2430_v9, %v11344_v57 }
 0x2e8   :  { %v2324_v50 = vshll.u32 %v8080_v54, 30  ;;  %v8091_v10 = vmul.u32 %v2452_v17, %v11343_v0  ;;  %v2437_v6 = vshll.u32 %v8060_v7, 16  ;;  %v2451_v55 = vand.u32 65535, %v8039_v14 }
 0x2e9   :  { %v2191_v3 = vsel %vm2070_vm5, %v2190_v21, %v2189_v26  ;;  %vm2439_vm10 = vc.u32 %v2431_v27, %v2435_v46  ;;  %v2441_v62 = vadd.s32 %v2435_v46, %v2431_v27  ;;  %v8107_v30 = vand.u32 3, %v2212_v47 }
 0x2ea   :  { %v8099_v35 = vsel %vm8014_vm8, %v11338_v37, %v2191_v3  ;;  %v8101_v2 = vsub.s32 %v2321_v29, %v2324_v50  ;;  %v2440_v53 = vsel %vm2439_vm10, 1, %v11134_v31  ;;  %v2457_v19 = vshll.u32 %v8091_v10, 16 }
 0x2eb   :  { %v2196_v22 = vmul.f32 %v8099_v35, %v8099_v35  ;;  %v2442_v23 = vadd.s32 %v2440_v53, %v2434_v63  ;;  %vm2443_vm5 = vc.u32 %v2441_v62, %v2437_v6  ;;  %v2394_v24 = vshrl.u32 %v11115_v1, %v7484_v40 }
 0x2ec   :  { %vm2326_vm12 = vcmp.lt.s32.totalorder %v8101_v2, 0  ;;  %v2327_v45 = vsub.s32 0, %v8101_v2  ;;  %v2444_v51 = vsel %vm2443_vm5, 1, %v11134_v31  ;;  %v2415_v33 = vsel %vm2413_vm4, %v11345_v48, 2102212464 }
 0x2ed   :  { %v2197_v49 = vmul.f32 -0.001358992, %v2196_v22  ;;  %v2204_v61 = vmul.f32 -0.00019511016, %v2196_v22  ;;  %v2446_v36 = vadd.s32 %v2444_v51, %v2442_v23  ;;  %v2453_v14 = vmul.u32 %v2451_v55, %v11343_v0 }
 0x2ee   :  { %v2328_v58 = vsel %vm2326_vm12, %v2327_v45, %v8101_v2  ;;  %v2455_v43 = vmul.u32 %v2451_v55, %v11344_v57  ;;  %v2317_v56 = vadd.s32 %v8020_v60, %v8009_v39  ;;  %v2414_v40 = vsel %vm2410_vm2, %v2394_v24, %v11346_v34 }
 0x2ef   :  { %v2198_v12 = vadd.f32 0.041655596, %v2197_v49  ;;  %v2205_v29 = vadd.f32 0.008332121, %v2204_v61  ;;  %v2329_v4 = vclz %v2328_v58  ;;  %v2416_v9 = vsel %vm2412_vm15, %v11347_v11, %v2415_v33  ;;  %v11348_v58 = vld [vmem:[#allocation38_spill] sm:$0xff] }
 0x2f0   :  { %v2436_v32 = vshrl.u32 %v2432_v25, 16  ;;  %vm2461_vm4 = vc.u32 %v2453_v14, %v2457_v19  ;;  %v2456_v26 = vmul.u32 %v2452_v17, %v11344_v57  ;;  %v2459_v21 = vshll.u32 %v2455_v43, 16 }
 0x2f1   :  { %v2199_v20 = vmul.f32 %v2198_v12, %v2196_v22  ;;  %v2206_v41 = vmul.f32 %v2205_v29, %v2196_v22  ;;  %v5457_v44 = vadd.s32 4294967294, %v2329_v4  ;;  %v2462_v39 = vsel %vm2461_vm4, 1, %v11134_v31 }
 0x2f2   :  { %v2447_v0 = vadd.s32 %v2446_v36, %v2436_v32  ;;  %v2463_v60 = vadd.s32 %v2457_v19, %v2453_v14  ;;  %v2464_v46 = vadd.s32 %v2462_v39, %v2456_v26  ;;  %vm2215_vm2 = vcmp.eq.s32.totalorder %v8107_v30, 0  ;;  %v11349_v26 = vld [vmem:[#allocation17_spill] sm:$0xff]  ;;  %v11351_v39 = vld [vmem:[#allocation58_spill] sm:$0xff] }
 0x2f3   :  { %v2200_v47 = vadd.f32 -0.4999988, %v2199_v20  ;;  %v2207_v27 = vadd.f32 -0.16666654, %v2206_v41  ;;  %vm5458_vm9 = vcmp.lt.s32.totalorder %v5457_v44, 0  ;;  %v2417_v25 = vsel %vm2411_vm14, %v2414_v40, %v2416_v9 }
 0x2f4   :  { %v2332_v50 = vsel %vm5458_vm9, 0, %v5457_v44  ;;  %v2438_v63 = vshrl.u32 %v8060_v7, 16  ;;  %vm2465_vm15 = vc.u32 %v2463_v60, %v2459_v21  ;;  %vm2214_vm8 = vcmp.lt.s32.totalorder %v8107_v30, 2 }
 0x2f5   :  { %v2201_v3 = vmul.f32 %v2200_v47, %v2196_v22  ;;  %v2208_v17 = vmul.f32 %v2207_v27, %v2196_v22  ;;  %v2333_v57 = vsub.s32 32, %v2332_v50  ;;  %v2458_v6 = vshrl.u32 %v8091_v10, 16 }
 0x2f6   :  { %vm2211_vm0 = vweird.f32 %v11338_v37  ;;  %v2334_v62 = vshll.u32 %v8101_v2, %v2332_v50  ;;  %v2337_v53 = vsub.s32 4294967266, %v2332_v50  ;;  %v8139_v55 = vadd.s32 %v2447_v0, %v2438_v63 }
 0x2f7   :  { %v2466_v42 = vsel %vm2465_vm15, 1, %v11134_v31  ;;  %v2202_v23 = vadd.f32 1.0, %v2201_v3  ;;  %v2209_v45 = vadd.f32 1.0, %v2208_v17  ;;  %v2335_v7 = vshrl.u32 %v2317_v56, %v2333_v57 }
 0x2f8   :  { %v2468_v51 = vadd.s32 %v2466_v42, %v2464_v46  ;;  %vm2218_vm3 = vcmp.eq.s32.totalorder %v8107_v30, 2  ;;  %v2338_v22 = vadd.s32 127, %v2337_v53  ;;  %v2460_v19 = vshrl.u32 %v2455_v43, 16 }
 0x2f9   :  { %v8143_v49 = vadd.s32 %v2463_v60, %v2459_v21  ;;  %v2210_v10 = vmul.f32 %v2209_v45, %v8099_v35  ;;  %v2219_v61 = vxor.u32 2147483648, %v2202_v23  ;;  %v2336_v24 = vor.u32 %v2335_v7, %v2334_v62  ;;  %v11350_v21 = vld [vmem:[#allocation52_spill] sm:$0xff] }
 0x2fa   :  { %v2469_v2 = vadd.s32 %v2468_v51, %v2458_v6  ;;  %v2339_v48 = vshll.u32 %v2338_v22, 23  ;;  %v2347_v33 = vsub.s32 4, %v8080_v54  ;;  %v2471_v36 = vmul.u32 %v11348_v58, %v2417_v25 }
 0x2fb   :  { %vm2566_vm13 = vcmp.lt.s32.totalorder %v7591_v59, 2  ;;  %v2216_v14 = vxor.u32 2147483648, %v2210_v10  ;;  %vm2473_vm14 = vc.u32 %v8139_v55, %v8143_v49  ;;  %v2220_v43 = vsel %vm2218_vm3, %v2219_v61, %v2210_v10  ;;  %v11355_v59 = vld [vmem:[#allocation31_spill] sm:$0xff] }
 0x2fc   :  { %v2470_v12 = vadd.s32 %v2469_v2, %v2460_v19  ;;  %v2576_v35 = vsel %vm2566_vm13, %v8066_v5, %v8072_v16  ;;  %v2340_v29 = vor.u32 4788187, %v2339_v48  ;;  %v2343_v56 = vcvt.s32.f32 %v2336_v24 }
 0x2fd   :  { %v2580_v4 = vsel %vm2566_vm13, %v8078_v18, %v8086_v13  ;;  %v2217_v34 = vsel %vm2215_vm2, %v2202_v23, %v2216_v14  ;;  %v2606_v16 = vand.u32 65535, %v2576_v35  ;;  %v2607_v20 = vshrl.u32 %v2576_v35, 16 }
 0x2fe   :  { %v2474_v40 = vadd.s32 1, %v2470_v12  ;;  %v2584_v11 = vand.u32 65535, %v2580_v4  ;;  %v2585_v9 = vshrl.u32 %v2580_v4, 16  ;;  %v2221_v32 = vsel %vm2214_vm8, %v2217_v34, %v2220_v43 }
 0x2ff   :  { %v2341_v5 = vand.u32 2147483647, %v2340_v29  ;;  %v2222_v41 = vsel %vm2211_vm0, nan, %v2221_v32  ;;  %vm2225_vm10 = vcmp.lt.s32.totalorder %v11350_v21, 0  ;;  %v2609_v37 = vmul.u32 %v2607_v20, %v11349_v26 }
 0x300   :  { %v2475_v44 = vsel %vm2473_vm14, %v2474_v40, %v2470_v12  ;;  %v2587_v0 = vmul.u32 %v2585_v9, %v11349_v26  ;;  %5469 = vmatmul.msk.f32.gmra.mxu2 %vm1382_vm6, %v2222_v41  ;;  %v2588_v60 = vmul.u32 %v2584_v11, %v11351_v39  ;;  %v2348_v30 = vsel %vm2225_vm10, %v2347_v33, %v8080_v54 }
 0x301   :  { %v2344_v18 = vmul.f32 %v2343_v56, %v2341_v5  ;;  %v2476_v13 = vadd.s32 %v2475_v44, %v2471_v36  ;;  %v2586_v47 = vmul.u32 %v2584_v11, %v11349_v26  ;;  %v2589_v25 = vmul.u32 %v2585_v9, %v11351_v39 }
 0x302   :  { %v2590_v27 = vshll.u32 %v2587_v0, 16  ;;  %v8178_v63 = vmul.u32 %v2606_v16, %v11351_v39  ;;  %v2592_v3 = vshll.u32 %v2588_v60, 16  ;;  %v2612_v57 = vshll.u32 %v2609_v37, 16 }
 0x303   :  { %v2345_v46 = vxor.u32 2147483648, %v2344_v18  ;;  %v2477_v50 = vadd.s32 536870912, %v2476_v13  ;;  %v11352_v6 = vand.u32 2147483647, %v11350_v21  ;;  %v2608_v7 = vmul.u32 %v2606_v16, %v11349_v26 }
 0x304   :  { %vm2594_vm5 = vc.u32 %v2586_v47, %v2590_v27  ;;  %v2596_v17 = vadd.s32 %v2590_v27, %v2586_v47  ;;  %v2614_v24 = vshll.u32 %v8178_v63, 16  ;;  %v2549_v36 = vshrl.u32 %v11115_v1, %v7599_v15 }
 0x305   :  { %vm8182_vm12 = vcmp.le.f32.partialorder %v11352_v6, 0.7853982  ;;  %v2346_v62 = vsel %vm2225_vm10, %v2345_v46, %v2344_v18  ;;  %v8188_v53 = vshrl.u32 %v2477_v50, 30  ;;  %v2595_v42 = vsel %vm2594_vm5, 1, %v11134_v31 }
 0x306   :  { %v2349_v23 = vsel %vm8182_vm12, %v11350_v21, %v2346_v62  ;;  %v2597_v45 = vadd.s32 %v2595_v42, %v2589_v25  ;;  %vm2598_vm4 = vc.u32 %v2596_v17, %v2592_v3  ;;  %v2350_v51 = vsel %vm8182_vm12, 0, %v2348_v30 }
 0x307   :  { %v2351_v22 = vmul.f32 %v2349_v23, %v2349_v23  ;;  %v2479_v19 = vshll.u32 %v8188_v53, 30  ;;  %v2599_v10 = vsel %vm2598_vm4, 1, %v11134_v31  ;;  %vm2616_vm9 = vc.u32 %v2608_v7, %v2612_v57 }
 0x308   :  { %v2601_v61 = vadd.s32 %v2599_v10, %v2597_v45  ;;  %v2618_v2 = vadd.s32 %v2612_v57, %v2608_v7  ;;  %v2591_v14 = vshrl.u32 %v2587_v0, 16  ;;  %v2611_v12 = vmul.u32 %v2607_v20, %v11351_v39 }
 0x309   :  { %v2352_v48 = vmul.f32 -0.001358992, %v2351_v22  ;;  %v2359_v33 = vmul.f32 -0.00019511016, %v2351_v22  ;;  %v2480_v58 = vsub.s32 %v2476_v13, %v2479_v19  ;;  %v2617_v35 = vsel %vm2616_vm9, 1, %v11134_v31 }
 0x30a   :  { %vm2620_vm2 = vc.u32 %v2618_v2, %v2614_v24  ;;  %v2570_v4 = vsel %vm2568_vm11, %v7936_v8, 2102212464  ;;  %v2602_v34 = vadd.s32 %v2601_v61, %v2591_v14  ;;  %v2619_v40 = vadd.s32 %v2617_v35, %v2611_v12 }
 0x30b   :  { %v2353_v43 = vadd.f32 0.041655596, %v2352_v48  ;;  %v2360_v29 = vadd.f32 0.008332121, %v2359_v33  ;;  %vm2481_vm15 = vcmp.lt.s32.totalorder %v2480_v58, 0  ;;  %v2482_v56 = vsub.s32 0, %v2480_v58 }
 0x30c   :  { %v2621_v11 = vsel %vm2620_vm2, 1, %v11134_v31  ;;  %v2367_v32 = vadd.s32 3, %v2350_v51  ;;  %v2569_v20 = vsel %vm2565_vm7, %v2549_v36, %v7808_v28  ;;  %v2593_v41 = vshrl.u32 %v2588_v60, 16 }
 0x30d   :  { %v2354_v9 = vmul.f32 %v2353_v43, %v2351_v22  ;;  %v2361_v15 = vmul.f32 %v2360_v29, %v2351_v22  ;;  %v2483_v5 = vsel %vm2481_vm15, %v2482_v56, %v2480_v58  ;;  %v2623_v44 = vadd.s32 %v2621_v11, %v2619_v40  ;;  %v11356_v56 = vld [vmem:[#allocation24_spill] sm:$0xff] }
 0x30e   :  { %v2484_v16 = vclz %v2483_v5  ;;  %v2571_v8 = vsel %vm2567_vm1, %v7932_v52, %v2570_v4  ;;  %v2613_v18 = vshrl.u32 %v2609_v37, 16  ;;  %v8214_v39 = vadd.s32 %v2602_v34, %v2593_v41 }
 0x30f   :  { %v2355_v26 = vadd.f32 -0.4999988, %v2354_v9  ;;  %v2362_v0 = vadd.f32 -0.16666654, %v2361_v15  ;;  %v2615_v27 = vshrl.u32 %v8178_v63, 16  ;;  %v2368_v50 = vand.u32 3, %v2367_v32 }
 0x310   :  { %v5460_v13 = vadd.s32 4294967294, %v2484_v16  ;;  %v2624_v46 = vadd.s32 %v2623_v44, %v2613_v18  ;;  %v2572_v28 = vsel %vm2566_vm13, %v2569_v20, %v2571_v8  ;;  %v2622_v60 = vadd.s32 %v2618_v2, %v2614_v24 }
 0x311   :  { %v2356_v30 = vmul.f32 %v2355_v26, %v2351_v22  ;;  %v2363_v47 = vmul.f32 %v2362_v0, %v2351_v22  ;;  %v2472_v52 = vadd.s32 %v8143_v49, %v8139_v55  ;;  %v2626_v51 = vmul.u32 %v11355_v59, %v2572_v28 }
 0x312   :  { %vm5461_vm11 = vcmp.lt.s32.totalorder %v5460_v13, 0  ;;  %v2625_v57 = vadd.s32 %v2624_v46, %v2615_v27  ;;  %vm2628_vm7 = vc.u32 %v8214_v39, %v2622_v60  ;;  %vm2370_vm1 = vcmp.eq.s32.totalorder %v2368_v50, 0 }
 0x313   :  { %v2357_v25 = vadd.f32 1.0, %v2356_v30  ;;  %v2364_v3 = vadd.f32 1.0, %v2363_v47  ;;  %v2487_v17 = vsel %vm5461_vm11, 0, %v5460_v13  ;;  %vm2373_vm8 = vcmp.eq.s32.totalorder %v2368_v50, 2 }
 0x314   :  { %v2488_v37 = vsub.s32 32, %v2487_v17  ;;  %v2492_v6 = vsub.s32 4294967266, %v2487_v17  ;;  %v2629_v62 = vadd.s32 1, %v2625_v57  ;;  %v2489_v42 = vshll.u32 %v2480_v58, %v2487_v17 }
 0x315   :  { %v2365_v54 = vmul.f32 %v2364_v3, %v2349_v23  ;;  %v2374_v63 = vxor.u32 2147483648, %v2357_v25  ;;  %vm2369_vm0 = vcmp.lt.s32.totalorder %v2368_v50, 2  ;;  %vm2366_vm3 = vweird.f32 %v11350_v21 }
 0x316   :  { %v2490_v45 = vshrl.u32 %v2472_v52, %v2488_v37  ;;  %v2493_v7 = vadd.s32 127, %v2492_v6  ;;  %v2630_v19 = vsel %vm2628_vm7, %v2629_v62, %v2625_v57  ;;  %vm2380_vm13 = vcmp.lt.s32.totalorder %v11356_v56, 0 }
 0x317   :  { %v2371_v22 = vxor.u32 2147483648, %v2365_v54  ;;  %v2631_v24 = vadd.s32 %v2630_v19, %v2626_v51  ;;  %v2375_v49 = vsel %vm2373_vm8, %v2374_v63, %v2365_v54  ;;  %v11357_v4 = vand.u32 2147483647, %v11356_v56 }
 0x318   :  { %v2491_v10 = vor.u32 %v2490_v45, %v2489_v42  ;;  %v2494_v61 = vshll.u32 %v2493_v7, 23  ;;  %v2502_v11 = vsub.s32 4, %v8188_v53  ;;  %v2627_v47 = vadd.s32 %v2622_v60, %v8214_v39 }
 0x319   :  { %v2372_v55 = vsel %vm2370_vm1, %v2357_v25, %v2371_v22  ;;  %v2632_v48 = vadd.s32 536870912, %v2631_v24  ;;  %vm8231_vm14 = vcmp.le.f32.partialorder %v11357_v4, 0.7853982  ;;  %vm2521_vm2 = vweird.f32 %v11356_v56 }
 0x31a   :  { %v2376_v23 = vsel %vm2369_vm0, %v2372_v55, %v2375_v49  ;;  %v2495_v2 = vor.u32 4788187, %v2494_v61  ;;  %v2498_v36 = vcvt.s32.f32 %v2491_v10  ;;  %v2503_v41 = vsel %vm2380_vm13, %v2502_v11, %v8188_v53 }
 0x31b   :  { %v2377_v33 = vsel %vm2366_vm3, nan, %v2376_v23  ;;  %v8225_v14 = vshrl.u32 %v2632_v48, 30  ;;  %v2505_v8 = vsel %vm8231_vm14, 0, %v2503_v41 }
 0x31c   :  { %5470 = vmatmul.msk.f32.gmra.mxu2 %vm1382_vm6, %v2377_v33  ;;  %v2496_v58 = vand.u32 2147483647, %v2495_v2  ;;  %v2522_v25 = vadd.s32 3, %v2505_v8  ;;  %v8256_v8 = vld [vmem:[%s10803_s6] ss:$0 sm:$0xff] }
 0x31d   :  { %v2634_v35 = vshll.u32 %v8225_v14, 30  ;;  %v2657_v2 = vsub.s32 4, %v8225_v14 }
 0x31e   :  { %v2499_v12 = vmul.f32 %v2498_v36, %v2496_v58  ;;  %v2523_v62 = vand.u32 3, %v2522_v25 }
 0x31f   :  { %v2635_v29 = vsub.s32 %v2631_v24, %v2634_v35  ;;  %v11360_v24 = vld [vmem:[#allocation25_spill] sm:$0xff] }
 0x320   :  { %v2500_v43 = vxor.u32 2147483648, %v2499_v12  ;;  %vm2525_vm12 = vcmp.eq.s32.totalorder %v2523_v62, 0  ;;  %vm2528_vm4 = vcmp.eq.s32.totalorder %v2523_v62, 2  ;;  %vm2524_vm9 = vcmp.lt.s32.totalorder %v2523_v62, 2 }
 0x321   :  { %vm2636_vm10 = vcmp.lt.s32.totalorder %v2635_v29, 0  ;;  %v2637_v40 = vsub.s32 0, %v2635_v29  ;;  %vm2535_vm15 = vcmp.lt.s32.totalorder %v11360_v24, 0  ;;  %v11361_v49 = vand.u32 2147483647, %v11360_v24 }
 0x322   :  { %v2501_v34 = vsel %vm2380_vm13, %v2500_v43, %v2499_v12  ;;  %v2658_v12 = vsel %vm2535_vm15, %v2657_v2, %v8225_v14  ;;  %vm2676_vm0 = vweird.f32 %v11360_v24  ;;  %v11364_v62 = vmov 2131351028  }
 0x323   :  { %v2504_v9 = vsel %vm8231_vm14, %v11356_v56, %v2501_v34  ;;  %v2638_v32 = vsel %vm2636_vm10, %v2637_v40, %v2635_v29  ;;  %vm2534_vm11 = vcmp.le.f32.partialorder %v11361_v49, 0.7853982 }
 0x324   :  { %v2506_v15 = vmul.f32 %v2504_v9, %v2504_v9  ;;  %v2639_v5 = vclz %v2638_v32 }
 0x326   :  { %v2507_v16 = vmul.f32 -0.001358992, %v2506_v15  ;;  %v2514_v20 = vmul.f32 -0.00019511016, %v2506_v15  ;;  %v5463_v44 = vadd.s32 4294967294, %v2639_v5 }
 0x328   :  { %v2508_v26 = vadd.f32 0.041655596, %v2507_v16  ;;  %v2515_v0 = vadd.f32 0.008332121, %v2514_v20  ;;  %vm5464_vm5 = vcmp.lt.s32.totalorder %v5463_v44, 0 }
 0x329   :  { %v2642_v30 = vsel %vm5464_vm5, 0, %v5463_v44 }
 0x32a   :  { %v2509_v18 = vmul.f32 %v2508_v26, %v2506_v15  ;;  %v2516_v13 = vmul.f32 %v2515_v0, %v2506_v15  ;;  %v2643_v27 = vsub.s32 32, %v2642_v30  ;;  %v2647_v46 = vsub.s32 4294967266, %v2642_v30 }
 0x32b   :  { %v2644_v3 = vshll.u32 %v2635_v29, %v2642_v30  ;;  %v2660_v29 = vsel %vm2534_vm11, 0, %v2658_v12 }
 0x32c   :  { %v2510_v50 = vadd.f32 -0.4999988, %v2509_v18  ;;  %v2517_v28 = vadd.f32 -0.16666654, %v2516_v13  ;;  %v2645_v17 = vshrl.u32 %v2627_v47, %v2643_v27  ;;  %v2648_v53 = vadd.s32 127, %v2647_v46  ;;  %v2737_v18 = vpop.f32.mrf.mxu2 }
 0x32d   :  { %v2677_v40 = vadd.s32 3, %v2660_v29  ;;  %v8259_v13 = vadd.f32 %v8256_v8, %v2737_v18 }
 0x32e   :  { %v2511_v57 = vmul.f32 %v2510_v50, %v2506_v15  ;;  %v2518_v52 = vmul.f32 %v2517_v28, %v2506_v15  ;;  %v2646_v37 = vor.u32 %v2645_v17, %v2644_v3  ;;  %v2649_v6 = vshll.u32 %v2648_v53, 23 }
 0x32f   :  { %v2678_v5 = vand.u32 3, %v2677_v40  ;;  %v2764_v30 = vand.u32 2139095040, %v8259_v13 }
 0x330   :  { %v2512_v54 = vadd.f32 1.0, %v2511_v57  ;;  %v2519_v63 = vadd.f32 1.0, %v2518_v52  ;;  %v2650_v42 = vor.u32 4788187, %v2649_v6  ;;  %v2653_v39 = vcvt.s32.f32 %v2646_v37 }
 0x331   :  { %vm2680_vm7 = vcmp.eq.s32.totalorder %v2678_v5, 0  ;;  %vm2683_vm1 = vcmp.eq.s32.totalorder %v2678_v5, 2  ;;  %vm2679_vm8 = vcmp.lt.s32.totalorder %v2678_v5, 2  ;;  %v2765_v47 = vshrl.u32 %v2764_v30, 23 }
 0x332   :  { %v2520_v45 = vmul.f32 %v2519_v63, %v2504_v9  ;;  %v2529_v7 = vxor.u32 2147483648, %v2512_v54  ;;  %v2651_v59 = vand.u32 2147483647, %v2650_v42  ;;  %v10959_v37 = vand.u32 2147483647, %v8259_v13 }
 0x333   :  { %v5473_v27 = vadd.s32 4294967169, %v2765_v47  ;;  %v11363_v6 = vmov 920167782  }
 0x334   :  { %v2526_v60 = vxor.u32 2147483648, %v2520_v45  ;;  %v2654_v51 = vmul.f32 %v2653_v39, %v2651_v59  ;;  %v2530_v19 = vsel %vm2528_vm4, %v2529_v7, %v2520_v45  ;;  %v2740_v28 = vpop.f32.mrf.mxu2  ;;  %v11365_v45 = vmov 2102212464  }
 0x335   :  { %v2771_v46 = vadd.s32 1, %v5473_v27  ;;  %v8263_v17 = vadd.f32 %v8256_v8, %v2740_v28 }
 0x336   :  { %v2527_v22 = vsel %vm2525_vm12, %v2512_v54, %v2526_v60  ;;  %v2655_v61 = vxor.u32 2147483648, %v2654_v51 }
 0x337   :  { %v2531_v10 = vsel %vm2524_vm9, %v2527_v22, %v2530_v19  ;;  %vm2772_vm3 = vcmp.gt.s32.totalorder %v2771_v46, 0  ;;  %11362 = vst [vmem:[#allocation57_spill] sm:$0xff] %v8263_v17  ;;  %v2919_v52 = vand.u32 2139095040, %v8263_v17 }
 0x338   :  { %v2532_v55 = vsel %vm2521_vm2, nan, %v2531_v10  ;;  %v2656_v23 = vsel %vm2535_vm15, %v2655_v61, %v2654_v51  ;;  %v2773_v50 = vsel %vm2772_vm3, %v2771_v46, 0  ;;  %v11366_v51 = vmov 2475754826  }
 0x339   :  { %5471 = vmatmul.msk.f32.gmra.mxu2 %vm1382_vm6, %v2532_v55  ;;  %v2659_v48 = vsel %vm2534_vm11, %v11360_v24, %v2656_v23  ;;  %v2775_v25 = vand.u32 31, %v2773_v50  ;;  %v2774_v63 = vshrl.u32 %v2773_v50, 5  ;;  %v2920_v60 = vshrl.u32 %v2919_v52, 23 }
 0x33a   :  { %v2661_v33 = vmul.f32 %v2659_v48, %v2659_v48  ;;  %v2768_v24 = vand.u32 8388607, %v10959_v37 }
 0x33b   :  { %v2776_v3 = vsub.s32 32, %v2775_v25  ;;  %v2790_v54 = vshll.u32 %v11363_v6, %v2775_v25  ;;  %v2781_v22 = vshll.u32 %v11366_v51, %v2775_v25  ;;  %v2784_v19 = vshll.u32 %v11364_v62, %v2775_v25 }
 0x33c   :  { %v2662_v58 = vmul.f32 -0.001358992, %v2661_v33  ;;  %v2669_v36 = vmul.f32 -0.00019511016, %v2661_v33  ;;  %v2787_v10 = vshll.u32 %v11365_v45, %v2775_v25  ;;  %vm2796_vm13 = vcmp.lt.s32.totalorder %v2774_v63, 4 }
 0x33d   :  { %v2791_v57 = vshrl.u32 %v11118_v38, %v2776_v3  ;;  %v2782_v42 = vshrl.u32 %v11364_v62, %v2776_v3  ;;  %v2785_v7 = vshrl.u32 %v11365_v45, %v2776_v3  ;;  %v2788_v59 = vshrl.u32 %v11363_v6, %v2776_v3 }
 0x33e   :  { %v2663_v35 = vadd.f32 0.041655596, %v2662_v58  ;;  %v2670_v43 = vadd.f32 0.008332121, %v2669_v36  ;;  %v2779_v2 = vshrl.u32 %v11366_v51, %v2776_v3  ;;  %v2778_v12 = vshll.u32 %v11115_v1, %v2775_v25 }
 0x33f   :  { %v2792_v39 = vor.u32 %v2791_v57, %v2790_v54  ;;  %v2783_v55 = vor.u32 %v2782_v42, %v2781_v22  ;;  %v2786_v49 = vor.u32 %v2785_v7, %v2784_v19  ;;  %v2789_v23 = vor.u32 %v2788_v59, %v2787_v10 }
 0x340   :  { %v2664_v56 = vmul.f32 %v2663_v35, %v2661_v33  ;;  %v2671_v4 = vmul.f32 %v2670_v43, %v2661_v33  ;;  %vm2793_vm14 = vcmp.lt.s32.totalorder %v2774_v63, 1  ;;  %vm2795_vm10 = vcmp.lt.s32.totalorder %v2774_v63, 3 }
 0x341   :  { %v2769_v35 = vor.u32 8388608, %v2768_v24  ;;  %v2805_v43 = vsel %vm2793_vm14, %v2783_v55, %v2786_v49  ;;  %vm2794_vm5 = vcmp.lt.s32.totalorder %v2774_v63, 2  ;;  %v2802_v40 = vsel %vm2796_vm13, %v2789_v23, 920167782 }
 0x342   :  { %v2665_v21 = vadd.f32 -0.4999988, %v2664_v56  ;;  %v2672_v34 = vadd.f32 -0.16666654, %v2671_v4  ;;  %v2780_v56 = vor.u32 %v2779_v2, %v2778_v12  ;;  %v10958_v4 = vand.u32 2147483647, %v8263_v17 }
 0x343   :  { %v2803_v5 = vsel %vm2795_vm10, %v2786_v49, %v2802_v40 }
 0x344   :  { %v2666_v11 = vmul.f32 %v2665_v21, %v2661_v33  ;;  %v2673_v9 = vmul.f32 %v2672_v34, %v2661_v33  ;;  %v5476_v33 = vadd.s32 4294967169, %v2920_v60 }
 0x346   :  { %v2667_v15 = vadd.f32 1.0, %v2666_v11  ;;  %v2674_v32 = vadd.f32 1.0, %v2673_v9  ;;  %v2926_v21 = vadd.s32 1, %v5476_v33  ;;  %v8289_v9 = vshll.u32 %v2769_v35, 8 }
 0x348   :  { %v2675_v16 = vmul.f32 %v2674_v32, %v2659_v48  ;;  %v2684_v20 = vxor.u32 2147483648, %v2667_v15  ;;  %v2743_v53 = vpop.f32.mrf.mxu2  ;;  %v2806_v48 = vsel %vm2796_vm13, %v2792_v39, 1326507024  ;;  %v2923_v32 = vand.u32 8388607, %v10958_v4 }
 0x349   :  { %v8276_v61 = vadd.f32 %v8256_v8, %v2743_v53  ;;  %v2807_v29 = vsel %vm2795_vm10, %v2789_v23, %v2806_v48  ;;  %vm2927_vm12 = vcmp.gt.s32.totalorder %v2926_v21, 0  ;;  %v2811_v39 = vshrl.u32 %v8289_v9, 16 }
 0x34a   :  { %v2681_v41 = vxor.u32 2147483648, %v2675_v16  ;;  %v2685_v44 = vsel %vm2683_vm1, %v2684_v20, %v2675_v16  ;;  %v2808_v11 = vsel %vm2794_vm5, %v2805_v43, %v2807_v29  ;;  %v2924_v30 = vor.u32 8388608, %v2923_v32 }
 0x34b   :  { %11367 = vst [vmem:[#allocation54_spill] sm:$0xff] %v8276_v61  ;;  %v3074_v58 = vand.u32 2139095040, %v8276_v61  ;;  %v2813_v16 = vshrl.u32 %v2808_v11, 16  ;;  %v2928_v47 = vsel %vm2927_vm12, %v2926_v21, 0  ;;  %v10957_v32 = vand.u32 2147483647, %v8276_v61 }
 0x34c   :  { %v2682_v14 = vsel %vm2680_vm7, %v2667_v15, %v2681_v41  ;;  %v2801_v15 = vsel %vm2793_vm14, %v2780_v56, %v2783_v55  ;;  %v2798_v41 = vsel %vm2796_vm13, %v2786_v49, 2102212464  ;;  %v2930_v52 = vand.u32 31, %v2928_v47 }
 0x34d   :  { %v2686_v26 = vsel %vm2679_vm8, %v2682_v14, %v2685_v44  ;;  %v3075_v34 = vshrl.u32 %v3074_v58, 23  ;;  %v2777_v44 = vshrl.u32 %v11115_v1, %v2776_v3  ;;  %v2804_v18 = vsel %vm2794_vm5, %v2801_v15, %v2803_v5 }
 0x34e   :  { %v2687_v0 = vsel %vm2676_vm0, nan, %v2686_v26  ;;  %v2810_v26 = vand.u32 65535, %v8289_v9  ;;  %v2799_v46 = vsel %vm2795_vm10, %v2783_v55, %v2798_v41  ;;  %v2812_v3 = vand.u32 65535, %v2808_v11 }
 0x34f   :  { %5472 = vmatmul.msk.f32.gmra.mxu2 %vm1382_vm6, %v2687_v0  ;;  %v5479_v20 = vadd.s32 4294967169, %v3075_v34  ;;  %v2797_v27 = vsel %vm2793_vm14, %v2777_v44, %v2780_v56  ;;  %v2834_v57 = vand.u32 65535, %v2804_v18  ;;  %v2835_v42 = vshrl.u32 %v2804_v18, 16 }
 0x350   :  { %v8304_v50 = vmul.u32 %v2813_v16, %v2810_v26  ;;  %v8311_v54 = vsel %vm2794_vm5, %v2797_v27, %v2799_v46  ;;  %v8314_v59 = vshll.u32 %v2924_v30, 8  ;;  %v2814_v19 = vmul.u32 %v2812_v3, %v2810_v26 }
 0x351   :  { %v3081_v28 = vadd.s32 1, %v5479_v20  ;;  %v8318_v10 = vmul.u32 %v2834_v57, %v2810_v26  ;;  %v8322_v63 = vsub.s32 32, %v2930_v52  ;;  %v8324_v55 = vmul.u32 %v2835_v42, %v2810_v26 }
 0x352   :  { %v2818_v7 = vshll.u32 %v8304_v50, 16  ;;  %11370 = vst [vmem:[#allocation5_spill] sm:$0xff] %v8314_v59  ;;  %v8326_v49 = vmul.u32 %v2834_v57, %v2811_v39  ;;  %v8328_v23 = vmul.u32 %v2835_v42, %v2811_v39  ;;  %v8330_v48 = vmul.u32 %v2812_v3, %v2811_v39 }
 0x353   :  { %vm3082_vm4 = vcmp.gt.s32.totalorder %v3081_v28, 0  ;;  %v2817_v33 = vmul.u32 %v2813_v16, %v2811_v39  ;;  %v8333_v58 = vand.u32 65535, %v8314_v59  ;;  %v8338_v12 = vshrl.u32 %v8314_v59, 16 }
 0x354   :  { %v3083_v2 = vsel %vm3082_vm4, %v3081_v28, 0  ;;  %vm2822_vm9 = vc.u32 %v2814_v19, %v2818_v7  ;;  %v2934_v29 = vshrl.u32 %v11366_v51, %v8322_v63  ;;  %v2937_v56 = vshrl.u32 %v11364_v62, %v8322_v63 }
 0x355   :  { %v2943_v21 = vshrl.u32 %v11363_v6, %v8322_v63  ;;  %v3085_v34 = vand.u32 31, %v3083_v2  ;;  %v2823_v40 = vsel %vm2822_vm9, 1, %v11134_v31  ;;  %v2933_v11 = vshll.u32 %v11115_v1, %v2930_v52 }
 0x356   :  { %v2946_v15 = vshrl.u32 %v11118_v38, %v8322_v63  ;;  %v2936_v5 = vshll.u32 %v11366_v51, %v2930_v52  ;;  %v2939_v16 = vshll.u32 %v11364_v62, %v2930_v52  ;;  %v2940_v20 = vshrl.u32 %v11365_v45, %v8322_v63 }
 0x357   :  { %v2942_v41 = vshll.u32 %v11365_v45, %v2930_v52  ;;  %v2945_v44 = vshll.u32 %v11363_v6, %v2930_v52  ;;  %v8358_v30 = vor.u32 %v2934_v29, %v2933_v11  ;;  %v8362_v46 = vsub.s32 32, %v3085_v34 }
 0x358   :  { %v3078_v57 = vand.u32 8388607, %v10957_v32  ;;  %v8369_v52 = vadd.s32 %v2823_v40, %v2817_v33  ;;  %v8371_v42 = vor.u32 %v2940_v20, %v2939_v16  ;;  %v8392_v29 = vshrl.u32 %v3083_v2, 5 }
 0x359   :  { %v2944_v27 = vor.u32 %v2943_v21, %v2942_v41  ;;  %v2947_v3 = vor.u32 %v2946_v15, %v2945_v44  ;;  %v3101_v33 = vshrl.u32 %v11118_v38, %v8362_v46  ;;  %v3089_v21 = vshrl.u32 %v11366_v51, %v8362_v46 }
 0x35a   :  { %v3092_v40 = vshrl.u32 %v11364_v62, %v8362_v46  ;;  %v3100_v11 = vshll.u32 %v11363_v6, %v3085_v34  ;;  %v3095_v16 = vshrl.u32 %v11365_v45, %v8362_v46  ;;  %v3088_v41 = vshll.u32 %v11115_v1, %v3085_v34 }
 0x35b   :  { %v3091_v44 = vshll.u32 %v11366_v51, %v3085_v34  ;;  %vm3106_vm8 = vcmp.lt.s32.totalorder %v8392_v29, 4  ;;  %vm3103_vm0 = vcmp.lt.s32.totalorder %v8392_v29, 1  ;;  %vm3105_vm3 = vcmp.lt.s32.totalorder %v8392_v29, 3 }
 0x35d   :  { %v8419_v4 = vor.u32 %v3092_v40, %v3091_v44 }
 0x35f   :  { %11374 = vst [vmem:[#allocation9_spill] sm:$0xff] %v8419_v4 }
 0x367   :  { %v2746_v36 = vpop.f32.mrf.mxu2 }
 0x368   :  { %v8297_v14 = vadd.f32 %v8256_v8, %v2746_v36  ;;  %v8335_v36 = vshrl.u32 %v2928_v47, 5  ;;  %v8360_v47 = vor.u32 %v2937_v56, %v2936_v5  ;;  %v3097_v56 = vshll.u32 %v11365_v45, %v3085_v34 }
 0x36a   :  { %11368 = vst [vmem:[#allocation8_spill] sm:$0xff] %v8297_v14  ;;  %v3229_v25 = vand.u32 2139095040, %v8297_v14  ;;  %v10956_v26 = vand.u32 2147483647, %v8297_v14  ;;  %vm2948_vm2 = vcmp.lt.s32.totalorder %v8335_v36, 1  ;;  %vm2950_vm15 = vcmp.lt.s32.totalorder %v8335_v36, 3 }
 0x36b   :  { %vm2951_vm11 = vcmp.lt.s32.totalorder %v8335_v36, 4 }
 0x36c   :  { %v3230_v60 = vshrl.u32 %v3229_v25, 23  ;;  %v8365_v25 = vadd.s32 %v2818_v7, %v2814_v19  ;;  %v3233_v39 = vand.u32 8388607, %v10956_v26  ;;  %v3098_v19 = vshrl.u32 %v11363_v6, %v8362_v46 }
 0x36e   :  { %v5482_v35 = vadd.s32 4294967169, %v3230_v60  ;;  %v8382_v60 = vsel %vm2948_vm2, %v8358_v30, %v8360_v47  ;;  %v3234_v20 = vor.u32 8388608, %v3233_v39  ;;  %v8415_v39 = vsel %vm2948_vm2, %v8360_v47, %v8371_v42 }
 0x383   :  { %v2749_v0 = vpop.f32.mrf.mxu2 }
 0x384   :  { %v8308_v53 = vadd.f32 %v8256_v8, %v2749_v0  ;;  %v3236_v0 = vadd.s32 1, %v5482_v35  ;;  %v2961_v35 = vsel %vm2951_vm11, %v2947_v3, 1326507024  ;;  %v3102_v3 = vor.u32 %v3101_v33, %v3100_v11 }
 0x385   :  { %v8429_v33 = vshll.u32 %v3234_v20, 8 }
 0x386   :  { %11369 = vst [vmem:[#allocation40_spill] sm:$0xff] %v8308_v53  ;;  %v3384_v22 = vand.u32 2139095040, %v8308_v53  ;;  %vm3237_vm7 = vcmp.gt.s32.totalorder %v3236_v0, 0 }
 0x387   :  { %v3238_v15 = vsel %vm3237_vm7, %v3236_v0, 0  ;;  %11375 = vst [vmem:[#allocation43_spill] sm:$0xff] %v8429_v33  ;;  %v8472_v44 = vand.u32 65535, %v8429_v33 }
 0x388   :  { %v3385_v43 = vshrl.u32 %v3384_v22, 23  ;;  %v2957_v22 = vsel %vm2951_vm11, %v2944_v27, 920167782  ;;  %v3240_v0 = vand.u32 31, %v3238_v15 }
 0x389   :  { %11381 = vst [vmem:[#allocation29_spill] sm:$0xff] %v8472_v44 }
 0x38a   :  { %v5485_v18 = vadd.s32 4294967169, %v3385_v43  ;;  %v3079_v43 = vor.u32 8388608, %v3078_v57  ;;  %v3094_v57 = vshll.u32 %v11364_v62, %v3085_v34  ;;  %v8424_v34 = vsel %vm2950_vm15, %v8371_v42, %v2957_v22 }
 0x38b   :  { %v8443_v40 = vsub.s32 32, %v3240_v0  ;;  %v3243_v28 = vshll.u32 %v11115_v1, %v3240_v0  ;;  %v3246_v61 = vshll.u32 %v11366_v51, %v3240_v0  ;;  %v3252_v44 = vshll.u32 %v11365_v45, %v3240_v0 }
 0x38c   :  { %v3391_v7 = vadd.s32 1, %v5485_v18  ;;  %v3099_v18 = vor.u32 %v3098_v19, %v3097_v56  ;;  %v8408_v26 = vshll.u32 %v3079_v43, 8  ;;  %v8426_v19 = vor.u32 %v3095_v16, %v3094_v57 }
 0x38d   :  { %v8433_v43 = vsel %vm2950_vm15, %v2944_v27, %v2961_v35  ;;  %11377 = vst [vmem:[#allocation7_spill] sm:$0xff] %v8443_v40  ;;  %v8477_v57 = vshrl.u32 %v8429_v33, 16  ;;  %v3253_v14 = vshrl.u32 %v11363_v6, %v8443_v40 }
 0x38e   :  { %vm3392_vm1 = vcmp.gt.s32.totalorder %v3391_v7, 0  ;;  %11372 = vst [vmem:[#allocation10_spill] sm:$0xff] %v8408_v26  ;;  %v3112_v56 = vsel %vm3106_vm8, %v3099_v18, 920167782  ;;  %v8441_v22 = vand.u32 65535, %v8408_v26  ;;  %v8453_v35 = vshrl.u32 %v8408_v26, 16 }
 0x38f   :  { %v3393_v37 = vsel %vm3392_vm1, %v3391_v7, 0  ;;  %v3116_v7 = vsel %vm3106_vm8, %v3102_v3, 1326507024  ;;  %v8459_v16 = vsel %vm3105_vm3, %v8426_v19, %v3112_v56  ;;  %v8465_v20 = vsel %vm3103_vm0, %v8419_v4, %v8426_v19  ;;  %11382 = vst [vmem:[#allocation42_spill] sm:$0xff] %v8477_v57 }
 0x390   :  { %11376 = vst [vmem:[#allocation44_spill] sm:$0xff] %v8441_v22  ;;  %v3395_v11 = vand.u32 31, %v3393_v37  ;;  %v8474_v3 = vshrl.u32 %v3238_v15, 5  ;;  %v3250_v15 = vshrl.u32 %v11365_v45, %v8443_v40  ;;  %v3256_v56 = vshrl.u32 %v11118_v38, %v8443_v40 }
 0x391   :  { %11379 = vst [vmem:[#allocation41_spill] sm:$0xff] %v8453_v35  ;;  %v3249_v57 = vshll.u32 %v11364_v62, %v3240_v0  ;;  %v3255_v26 = vshll.u32 %v11363_v6, %v3240_v0  ;;  %v3254_v0 = vor.u32 %v3253_v14, %v3252_v44  ;;  %vm2949_vm1 = vcmp.lt.s32.totalorder %v8335_v36, 2 }
 0x392   :  { %11380 = vst [vmem:[#allocation30_spill] sm:$0xff] %v8459_v16  ;;  %vm3258_vm13 = vcmp.lt.s32.totalorder %v8474_v3, 1  ;;  %vm3261_vm14 = vcmp.lt.s32.totalorder %v8474_v3, 4  ;;  %v3398_v14 = vshll.u32 %v11115_v1, %v3395_v11  ;;  %vm3260_vm5 = vcmp.lt.s32.totalorder %v8474_v3, 3 }
 0x393   :  { %v8511_v16 = vor.u32 %v3250_v15, %v3249_v57 }
 0x39f   :  { %v2752_v5 = vpop.f32.mrf.mxu2 }
 0x3a0   :  { %v8403_v2 = vadd.f32 %v8256_v8, %v2752_v5  ;;  %v8417_v5 = vor.u32 %v3089_v21, %v3088_v41  ;;  %v8469_v41 = vsel %vm3105_vm3, %v3099_v18, %v3116_v7  ;;  %v3247_v18 = vshrl.u32 %v11364_v62, %v8443_v40 }
 0x3a1   :  { %v8485_v7 = vsub.s32 32, %v3395_v11 }
 0x3a2   :  { %11371 = vst [vmem:[#allocation45_spill] sm:$0xff] %v8403_v2  ;;  %v3539_v32 = vand.u32 2139095040, %v8403_v2  ;;  %v8450_v27 = vsel %vm3103_vm0, %v8417_v5, %v8419_v4  ;;  %v11385_v17 = vand.u32 2147483647, %v8403_v2  ;;  %v3257_v4 = vor.u32 %v3256_v56, %v3255_v26 }
 0x3a3   :  { %11373 = vst [vmem:[#allocation49_spill] sm:$0xff] %v8417_v5  ;;  %v3399_v2 = vshrl.u32 %v11366_v51, %v8485_v7  ;;  %v3401_v26 = vshll.u32 %v11366_v51, %v3395_v11  ;;  %v3267_v56 = vsel %vm3261_vm14, %v3254_v0, 920167782 }
 0x3a4   :  { %v3540_v21 = vshrl.u32 %v3539_v32, 23  ;;  %11378 = vst [vmem:[#allocation19_spill] sm:$0xff] %v8450_v27  ;;  %v3244_v32 = vshrl.u32 %v11366_v51, %v8443_v40  ;;  %v3543_v35 = vand.u32 8388607, %v11385_v17  ;;  %v3411_v27 = vshrl.u32 %v11118_v38, %v8485_v7 }
 0x3a5   :  { %11383 = vst [vmem:[#allocation28_spill] sm:$0xff] %v8485_v7  ;;  %v3402_v17 = vshrl.u32 %v11364_v62, %v8485_v7  ;;  %v3271_v15 = vsel %vm3261_vm14, %v3257_v4, 1326507024  ;;  %v8551_v4 = vsel %vm3260_vm5, %v8511_v16, %v3267_v56 }
 0x3a6   :  { %v5488_v24 = vadd.s32 4294967169, %v3540_v21  ;;  %v11384_v21 = vand.u32 2147483647, %v8308_v53  ;;  %v8503_v40 = vor.u32 %v3244_v32, %v3243_v28  ;;  %v8505_v53 = vor.u32 %v3247_v18, %v3246_v61 }
 0x3a7   :  { %v3407_v61 = vshll.u32 %v11365_v45, %v3395_v11  ;;  %v8519_v28 = vshrl.u32 %v3393_v37, 5  ;;  %v3405_v32 = vshrl.u32 %v11365_v45, %v8485_v7  ;;  %v3544_v57 = vor.u32 8388608, %v3543_v35 }
 0x3a8   :  { %v3388_v33 = vand.u32 8388607, %v11384_v21  ;;  %v3546_v22 = vadd.s32 1, %v5488_v24  ;;  %v3408_v21 = vshrl.u32 %v11363_v6, %v8485_v7  ;;  %v3410_v24 = vshll.u32 %v11363_v6, %v3395_v11 }
 0x3a9   :  { %v3404_v18 = vshll.u32 %v11364_v62, %v3395_v11  ;;  %v8533_v35 = vor.u32 %v3399_v2, %v3398_v14  ;;  %v8535_v7 = vor.u32 %v3402_v17, %v3401_v26  ;;  %vm10993_vm12 = vcmp.lt.s32.totalorder %v8519_v28, 4 }
 0x3aa   :  { %v3389_v5 = vor.u32 8388608, %v3388_v33  ;;  %vm3547_vm10 = vcmp.gt.s32.totalorder %v3546_v22, 0  ;;  %v3409_v33 = vor.u32 %v3408_v21, %v3407_v61  ;;  %v3412_v44 = vor.u32 %v3411_v27, %v3410_v24 }
 0x3ab   :  { %11387 = vst [vmem:[#allocation35_spill] sm:$0xff] %v8533_v35  ;;  %v3548_v59 = vsel %vm3547_vm10, %v3546_v22, 0  ;;  %v8541_v27 = vsel %vm3258_vm13, %v8503_v40, %v8505_v53  ;;  %v8543_v21 = vor.u32 %v3405_v32, %v3404_v18  ;;  %v8557_v2 = vsel %vm3258_vm13, %v8505_v53, %v8511_v16 }
 0x3ac   :  { %v8529_v37 = vshll.u32 %v3389_v5, 8  ;;  %11388 = vst [vmem:[#allocation46_spill] sm:$0xff] %v8535_v7  ;;  %v8546_v5 = vshll.u32 %v3544_v57, 8  ;;  %v3422_v22 = vsel %vm10993_vm12, %v3409_v33, 920167782  ;;  %v8565_v17 = vsel %vm3260_vm5, %v3254_v0, %v3271_v15 }
 0x3ad   :  { %11389 = vst [vmem:[#allocation20_spill] sm:$0xff] %v8543_v21  ;;  %v3426_v11 = vsel %vm10993_vm12, %v3412_v44, 1326507024  ;;  %vm10991_vm4 = vcmp.lt.s32.totalorder %v8519_v28, 1  ;;  %v3550_v24 = vand.u32 31, %v3548_v59  ;;  %vm10985_vm9 = vcmp.lt.s32.totalorder %v8519_v28, 3 }
 0x3ae   :  { %11386 = vst [vmem:[#allocation13_spill] sm:$0xff] %v8529_v37  ;;  %v8569_v61 = vand.u32 65535, %v8529_v37  ;;  %v8576_v32 = vsel %vm10991_vm4, %v8533_v35, %v8535_v7  ;;  %v8579_v57 = vshrl.u32 %v8529_v37, 16  ;;  %v2840_v0 = vshll.u32 %v8324_v55, 16 }
 0x3af   :  { %11390 = vst [vmem:[#allocation6_spill] sm:$0xff] %v8546_v5  ;;  %v8585_v14 = vsel %vm10985_vm9, %v8543_v21, %v3422_v22  ;;  %v8591_v26 = vsel %vm10991_vm4, %v8535_v7, %v8543_v21  ;;  %v8595_v44 = vsel %vm10985_vm9, %v3409_v33, %v3426_v11  ;;  %v8598_v56 = vand.u32 65535, %v8546_v5 }
 0x3b0   :  { %11391 = vst [vmem:[#allocation48_spill] sm:$0xff] %v8569_v61  ;;  %v8601_v18 = vshrl.u32 %v8546_v5, 16  ;;  %v2842_v15 = vshll.u32 %v8326_v49, 16  ;;  %vm2844_vm7 = vc.u32 %v8318_v10, %v2840_v0  ;;  %v2846_v22 = vadd.s32 %v2840_v0, %v8318_v10 }
 0x3b1   :  { %11392 = vst [vmem:[#allocation53_spill] sm:$0xff] %v8576_v32  ;;  %v8606_v37 = vshrl.u32 %v3548_v59, 5  ;;  %v8608_v7 = vsub.s32 32, %v3550_v24  ;;  %v2845_v35 = vsel %vm2844_vm7, 1, %v11134_v31  ;;  %v11399_v11 = vshll.u32 %v8330_v48, 16 }
 0x3b2   :  { %11393 = vst [vmem:[#allocation56_spill] sm:$0xff] %v8579_v57  ;;  %v2847_v5 = vadd.s32 %v2845_v35, %v8328_v23  ;;  %vm2848_vm9 = vc.u32 %v2846_v22, %v2842_v15  ;;  %v8620_v59 = vsel %vm2949_vm1, %v8415_v39, %v8433_v43  ;;  %v3553_v10 = vshll.u32 %v11115_v1, %v3550_v24 }
 0x3b3   :  { %11394 = vst [vmem:[#allocation50_spill] sm:$0xff] %v8591_v26  ;;  %vm2826_vm10 = vc.u32 %v8365_v25, %v11399_v11  ;;  %v2819_v25 = vshrl.u32 %v8304_v50, 16  ;;  %v2841_v35 = vshrl.u32 %v8324_v55, 16  ;;  %v3556_v21 = vshll.u32 %v11366_v51, %v3550_v24 }
 0x3b4   :  { %11395 = vst [vmem:[#allocation16_spill] sm:$0xff] %v8595_v44  ;;  %v3559_v39 = vshll.u32 %v11364_v62, %v3550_v24  ;;  %v2821_v57 = vshrl.u32 %v8330_v48, 16  ;;  %v2843_v26 = vshrl.u32 %v8326_v49, 16  ;;  %v3554_v50 = vshrl.u32 %v11366_v51, %v8608_v7 }
 0x3b5   :  { %11396 = vst [vmem:[#allocation51_spill] sm:$0xff] %v8598_v56  ;;  %v2849_v56 = vsel %vm2848_vm9, 1, %v11134_v31  ;;  %v3562_v55 = vshll.u32 %v11365_v45, %v3550_v24  ;;  %v3557_v49 = vshrl.u32 %v11364_v62, %v8608_v7  ;;  %vm3568_vm7 = vcmp.lt.s32.totalorder %v8606_v37, 1 }
 0x3b6   :  { %11397 = vst [vmem:[#allocation22_spill] sm:$0xff] %v8601_v18  ;;  %v2827_v18 = vsel %vm2826_vm10, 1, %v11134_v31  ;;  %v2851_v11 = vadd.s32 %v2849_v56, %v2847_v5  ;;  %vm11004_vm10 = vcmp.lt.s32.totalorder %v8606_v37, 3  ;;  %vm3571_vm4 = vcmp.lt.s32.totalorder %v8606_v37, 4 }
 0x3b7   :  { %11398 = vst [vmem:[#allocation23_spill] sm:$0xff] %v8608_v7  ;;  %v2829_v23 = vadd.s32 %v2827_v18, %v8369_v52  ;;  %v3563_v52 = vshrl.u32 %v11363_v6, %v8608_v7 }
 0x3b8   :  { %v2852_v44 = vadd.s32 %v2851_v11, %v2841_v35  ;;  %v11401_v35 = vshrl.u32 %v8620_v59, 16 }
 0x3b9   :  { %v2830_v61 = vadd.s32 %v2829_v23, %v2819_v25  ;;  %v3560_v25 = vshrl.u32 %v11365_v45, %v8608_v7 }
 0x3ba   :  { %v2853_v48 = vadd.s32 %v2852_v44, %v2843_v26  ;;  %v8654_v11 = vmul.u32 %v11401_v35, %v8333_v58  ;;  %v3564_v26 = vor.u32 %v3563_v52, %v3562_v55  ;;  %v3565_v44 = vshll.u32 %v11363_v6, %v3550_v24 }
 0x3bb   :  { %v8643_v18 = vadd.s32 %v2830_v61, %v2821_v57  ;;  %v8664_v57 = vsel %vm2949_vm1, %v8382_v60, %v8424_v34  ;;  %v11402_v60 = vmul.u32 %v8289_v9, %v8311_v54  ;;  %v8678_v52 = vor.u32 %v3554_v50, %v3553_v10  ;;  %v4004_v10 = vld [vmem:[%s10804_s7 + $0x18] sm:$0xff] }
 0x3bc   :  { %v2755_v33 = vpop.f32.mrf.mxu2  ;;  %v2857_v61 = vadd.s32 1, %v2853_v48  ;;  %v2973_v55 = vshll.u32 %v8654_v11, 16  ;;  %v2990_v24 = vshrl.u32 %v8664_v57, 16  ;;  %v2932_v50 = vshrl.u32 %v11115_v1, %v8322_v63  ;;  %4045 = vmatpush.msrb.mxu3 %v4004_v10 }
 0x3bd   :  { %v8624_v0 = vadd.f32 %v8256_v8, %v2755_v33  ;;  %v8645_v33 = vadd.s32 %v2846_v22, %v2842_v15  ;;  %v2967_v22 = vand.u32 65535, %v8620_v59  ;;  %11403 = vst [vmem:[#allocation18_spill] sm:$0xff] %v8678_v52 }
 0x3bf   :  { %11400 = vst [vmem:[#allocation11_spill] sm:$0xff] %v8624_v0  ;;  %v3694_v43 = vand.u32 2139095040, %v8624_v0  ;;  %v10994_v56 = vand.u32 2147483647, %v8624_v0  ;;  %vm2856_vm9 = vc.u32 %v8643_v18, %v8645_v33  ;;  %v8688_v9 = vmul.u32 %v2967_v22, %v8338_v12 }
 0x3c0   :  { %v2858_v35 = vsel %vm2856_vm9, %v2857_v61, %v2853_v48  ;;  %v3577_v48 = vsel %vm3571_vm4, %v3564_v26, 920167782  ;;  %v2969_v61 = vmul.u32 %v2967_v22, %v8333_v58  ;;  %v8707_v22 = vmul.u32 %v2990_v24, %v8333_v58 }
 0x3c1   :  { %v3695_v5 = vshrl.u32 %v3694_v43, 23  ;;  %v3566_v43 = vshrl.u32 %v11118_v38, %v8608_v7  ;;  %v2859_v34 = vadd.s32 %v2858_v35, %v11402_v60  ;;  %v8682_v7 = vor.u32 %v3560_v25, %v3559_v39  ;;  %v4002_v35 = vld [vmem:[%s10804_s7 + $0x8] sm:$0xff] }
 0x3c2   :  { %vm8701_vm12 = vc.u32 %v2969_v61, %v2973_v55  ;;  %v2974_v25 = vshrl.u32 %v8654_v11, 16 }
 0x3c3   :  { %v5491_v23 = vadd.s32 4294967169, %v3695_v5  ;;  %v3698_v5 = vand.u32 8388607, %v10994_v56  ;;  %11405 = vst [vmem:[#allocation26_spill] sm:$0xff] %v8682_v7  ;;  %v3567_v32 = vor.u32 %v3566_v43, %v3565_v44  ;;  %v2860_v39 = vadd.s32 536870912, %v2859_v34 }
 0x3c4   :  { %v2979_v43 = vadd.s32 %v2973_v55, %v2969_v61  ;;  %v2989_v44 = vand.u32 65535, %v8664_v57  ;;  %v2952_v55 = vsel %vm2948_vm2, %v2932_v50, %v8358_v30  ;;  %v2975_v61 = vshll.u32 %v8688_v9, 16 }
 0x3c5   :  { %v3701_v15 = vadd.s32 1, %v5491_v23  ;;  %v8680_v23 = vor.u32 %v3557_v49, %v3556_v21  ;;  %v3699_v54 = vor.u32 8388608, %v3698_v5  ;;  %v4003_v21 = vld [vmem:[%s10804_s7 + $0x10] sm:$0xff]  ;;  %v2953_v49 = vsel %vm2951_vm11, %v8371_v42, 2102212464 }
 0x3c6   :  { %v8718_v42 = vsel %vm11004_vm10, %v8682_v7, %v3577_v48  ;;  %v3581_v60 = vsel %vm3571_vm4, %v3567_v32, 1326507024  ;;  %4046 = vmatpush.msrb.mxu3 %v4003_v21  ;;  %v2954_v48 = vsel %vm2950_vm15, %v8360_v47, %v2953_v49  ;;  %v8744_v56 = vshrl.u32 %v2860_v39, 30 }
 0x3c7   :  { %11404 = vst [vmem:[#allocation14_spill] sm:$0xff] %v8680_v23  ;;  %vm3702_vm9 = vcmp.gt.s32.totalorder %v3701_v15, 0  ;;  %v8713_v63 = vsel %vm3568_vm7, %v8678_v52, %v8680_v23  ;;  %v8724_v5 = vsel %vm3568_vm7, %v8680_v23, %v8682_v7  ;;  %v8739_v10 = vshll.u32 %v3699_v54, 8 }
 0x3c8   :  { %11408 = vst [vmem:[#allocation47_spill] sm:$0xff] %v8713_v63  ;;  %v3703_v57 = vsel %vm3702_vm9, %v3701_v15, 0  ;;  %v4001_v15 = vld [vmem:[%s10804_s7] sm:$0xff]  ;;  %v11412_v32 = vshrl.u32 %v8620_v59, 16  ;;  %v2978_v30 = vsel %vm8701_vm12, 1, %v11134_v31  ;;  %4047 = vmatpush.msrb.mxu3 %v4002_v35  ;;  %vm2981_vm2 = vc.u32 %v2979_v43, %v2975_v61 }
 0x3c9   :  { %11409 = vst [vmem:[#allocation55_spill] sm:$0xff] %v8718_v42  ;;  %v3705_v50 = vand.u32 31, %v3703_v57  ;;  %v8753_v47 = vmul.u32 %v2989_v44, %v8338_v12  ;;  %v2995_v54 = vshll.u32 %v8707_v22, 16  ;;  %v8758_v39 = vsel %vm11004_vm10, %v3564_v26, %v3581_v60 }
 0x3ca   :  { %11410 = vst [vmem:[#allocation37_spill] sm:$0xff] %v8724_v5  ;;  %v2972_v21 = vmul.u32 %v11412_v32, %v8338_v12  ;;  %v2862_v49 = vshll.u32 %v8744_v56, 30  ;;  %v8763_v59 = vsel %vm2949_vm1, %v2952_v55, %v2954_v48  ;;  %4048 = vmatpush.msrb.mxu3 %v4001_v15  ;;  %v2855_v43 = vadd.s32 %v8645_v33, %v8643_v18 }
 0x3cb   :  { %11411 = vst [vmem:[#allocation39_spill] sm:$0xff] %v8739_v10  ;;  %v2991_v32 = vmul.u32 %v2989_v44, %v8333_v58  ;;  %v8771_v26 = vand.u32 65535, %v8739_v10  ;;  %v8774_v60 = vshrl.u32 %v8739_v10, 16  ;;  %v2982_v55 = vsel %vm2981_vm2, 1, %v11134_v31 }
 0x3cc   :  { %11413 = vst [vmem:[#allocation36_spill] sm:$0xff] %v8758_v39  ;;  %v2980_v61 = vadd.s32 %v2978_v30, %v2972_v21  ;;  %v8776_v36 = vsub.s32 %v2859_v34, %v2862_v49  ;;  %v8779_v11 = vsub.s32 32, %v3705_v50  ;;  %v10995_v33 = vshll.u32 %v8753_v47, 16 }
 0x3cd   :  { %11414 = vst [vmem:[#allocation12_spill] sm:$0xff] %v8771_v26  ;;  %vm2999_vm15 = vc.u32 %v2991_v32, %v2995_v54  ;;  %v3001_v18 = vadd.s32 %v2995_v54, %v2991_v32  ;;  %vm2763_vm11 = vcmp.lt.s32.totalorder %v8259_v13, 0  ;;  %v2994_v34 = vmul.u32 %v2990_v24, %v8338_v12 }
 0x3ce   :  { %11415 = vst [vmem:[#allocation15_spill] sm:$0xff] %v8774_v60  ;;  %vm2864_vm12 = vcmp.lt.s32.totalorder %v8776_v36, 0  ;;  %v2865_v44 = vsub.s32 0, %v8776_v36  ;;  %v8789_v15 = vshrl.u32 %v3703_v57, 5  ;;  %v2984_v21 = vadd.s32 %v2982_v55, %v2980_v61 }
 0x3cf   :  { %11416 = vst [vmem:[#allocation27_spill] sm:$0xff] %v8779_v11  ;;  %v3000_v30 = vsel %vm2999_vm15, 1, %v11134_v31  ;;  %vm3003_vm1 = vc.u32 %v3001_v18, %v10995_v33  ;;  %v3708_v54 = vshll.u32 %v11115_v1, %v3705_v50  ;;  %v2996_v32 = vshrl.u32 %v8707_v22, 16 }
 0x3d0   :  { %v11418_v12 = vand.u32 2147483647, %v8259_v13  ;;  %v3002_v61 = vadd.s32 %v3000_v30, %v2994_v34  ;;  %v3004_v55 = vsel %vm3003_vm1, 1, %v11134_v31  ;;  %v3711_v33 = vshll.u32 %v11366_v51, %v3705_v50 }
 0x3d1   :  { %v3714_v22 = vshll.u32 %v11364_v62, %v3705_v50  ;;  %v3717_v0 = vshll.u32 %v11365_v45, %v3705_v50  ;;  %v3720_v10 = vshll.u32 %v11363_v6, %v3705_v50  ;;  %v2885_v60 = vsub.s32 4, %v8744_v56 }
 0x3d2   :  { %v2758_v48 = vpop.f32.mrf.mxu2  ;;  %vm8802_vm9 = vcmp.le.f32.partialorder %v11418_v12, 0.7853982  ;;  %v3715_v34 = vshrl.u32 %v11365_v45, %v8779_v11  ;;  %v3718_v30 = vshrl.u32 %v11363_v6, %v8779_v11  ;;  %v3006_v26 = vadd.s32 %v3004_v55, %v3002_v61 }
 0x3d3   :  { %v8784_v58 = vadd.f32 %v8256_v8, %v2758_v48  ;;  %v2866_v8 = vsel %vm2864_vm12, %v2865_v44, %v8776_v36  ;;  %v3709_v48 = vshrl.u32 %v11366_v51, %v8779_v11  ;;  %v3712_v44 = vshrl.u32 %v11364_v62, %v8779_v11 }
 0x3d4   :  { %v2867_v57 = vclz %v2866_v8  ;;  %v2985_v52 = vadd.s32 %v2984_v21, %v2974_v25  ;;  %v3007_v63 = vadd.s32 %v3006_v26, %v2996_v32  ;;  %vm11005_vm15 = vcmp.lt.s32.totalorder %v8789_v15, 1 }
 0x3d5   :  { %11417 = vst [vmem:[#allocation21_spill] sm:$0xff] %v8784_v58  ;;  %v3849_v49 = vand.u32 2139095040, %v8784_v58  ;;  %v8818_v23 = vor.u32 %v3709_v48, %v3708_v54  ;;  %v8822_v7 = vor.u32 %v3712_v44, %v3711_v33  ;;  %v8828_v54 = vor.u32 %v3715_v34, %v3714_v22 }
 0x3d6   :  { %v5474_v12 = vadd.s32 4294967294, %v2867_v57  ;;  %v2998_v57 = vshrl.u32 %v8753_v47, 16  ;;  %v3719_v48 = vor.u32 %v3718_v30, %v3717_v0  ;;  %v11006_v25 = vand.u32 2147483647, %v8784_v58 }
 0x3d7   :  { %v3850_v35 = vshrl.u32 %v3849_v49, 23  ;;  %11421 = vst [vmem:[#allocation33_spill] sm:$0xff] %v8818_v23  ;;  %v3721_v49 = vshrl.u32 %v11118_v38, %v8779_v11  ;;  %vm11020_vm12 = vcmp.lt.s32.totalorder %v8789_v15, 3  ;;  %vm3726_vm1 = vcmp.lt.s32.totalorder %v8789_v15, 4 }
 0x3d8   :  { %vm5475_vm2 = vcmp.lt.s32.totalorder %v5474_v12, 0  ;;  %11422 = vst [vmem:[#allocation34_spill] sm:$0xff] %v8822_v7  ;;  %v3008_v61 = vadd.s32 %v3007_v63, %v2998_v57  ;;  %v8842_v0 = vsel %vm11005_vm15, %v8818_v23, %v8822_v7  ;;  %v3732_v63 = vsel %vm3726_vm1, %v3719_v48, 920167782  ;;  %v11429_v57 = vld [vmem:[#allocation9_spill] sm:$0xff] }
 0x3d9   :  { %v5494_v8 = vadd.s32 4294967169, %v3850_v35  ;;  %v2870_v50 = vsel %vm5475_vm2, 0, %v5474_v12  ;;  %v2886_v35 = vsel %vm2763_vm11, %v2885_v60, %v8744_v56  ;;  %11423 = vst [vmem:[#allocation32_spill] sm:$0xff] %v8828_v54  ;;  %v3722_v26 = vor.u32 %v3721_v49, %v3720_v10  ;;  %v11428_v49 = vld [vmem:[#allocation49_spill] sm:$0xff] }
 0x3da   :  { %v2871_v5 = vsub.s32 32, %v2870_v50  ;;  %v2875_v39 = vsub.s32 4294967266, %v2870_v50  ;;  %v2888_v32 = vsel %vm8802_vm9, 0, %v2886_v35  ;;  %v11424_v56 = vshrl.u32 %v8688_v9, 16 }
 0x3db   :  { %v3856_v42 = vadd.s32 1, %v5494_v8  ;;  %v8851_v10 = vsel %vm11005_vm15, %v8822_v7, %v8828_v54  ;;  %v11426_v9 = vshll.u32 %v8753_v47, 16  ;;  %v2905_v44 = vadd.s32 3, %v2888_v32  ;;  %v11427_v8 = vld [vmem:[#allocation5_spill] sm:$0xff] }
 0x3dc   :  { %v2873_v33 = vshrl.u32 %v2855_v43, %v2871_v5  ;;  %v2876_v21 = vadd.s32 127, %v2875_v39  ;;  %v2986_v60 = vadd.s32 %v2985_v52, %v11424_v56  ;;  %v2872_v5 = vshll.u32 %v8776_v36, %v2870_v50  ;;  %11425 = vst [vmem:[#allocation38_spill] sm:$0xff] %v8851_v10 }
 0x3dd   :  { %vm3857_vm2 = vcmp.gt.s32.totalorder %v3856_v42, 0  ;;  %v3853_v52 = vand.u32 8388607, %v11006_v25  ;;  %v3005_v43 = vadd.s32 %v3001_v18, %v11426_v9  ;;  %v3012_v22 = vadd.s32 1, %v3008_v61 }
 0x3de   :  { %v2877_v39 = vshll.u32 %v2876_v21, 23  ;;  %v2874_v55 = vor.u32 %v2873_v33, %v2872_v5  ;;  %v3108_v36 = vsel %vm3106_vm8, %v8426_v19, 2102212464  ;;  %v3858_v12 = vsel %vm3857_vm2, %v3856_v42, 0 }
 0x3df   :  { %vm3011_vm10 = vc.u32 %v2986_v60, %v3005_v43  ;;  %v3087_v34 = vshrl.u32 %v11115_v1, %v8362_v46  ;;  %vm3104_vm15 = vcmp.lt.s32.totalorder %v8392_v29, 2  ;;  %v8866_v30 = vsel %vm11020_vm12, %v8828_v54, %v3732_v63  ;;  %v11430_v63 = vld [vmem:[#allocation30_spill] sm:$0xff] }
 0x3e0   :  { %v3736_v47 = vsel %vm3726_vm1, %v3722_v26, 1326507024  ;;  %v2878_v18 = vor.u32 4788187, %v2877_v39  ;;  %v3118_v19 = vsel %vm3104_vm15, %v8465_v20, %v8469_v41  ;;  %v3854_v42 = vor.u32 8388608, %v3853_v52  ;;  %v11431_v52 = vld [vmem:[#allocation19_spill] sm:$0xff] }
 0x3e1   :  { %v3009_v46 = vmul.u32 %v11427_v8, %v8763_v59  ;;  %v3107_v50 = vsel %vm3103_vm0, %v3087_v34, %v11428_v49  ;;  %v3109_v35 = vsel %vm3105_vm3, %v11429_v57, %v3108_v36  ;;  %v3860_v33 = vand.u32 31, %v3858_v12  ;;  %v11434_v34 = vld [vmem:[#allocation44_spill] sm:$0xff] }
 0x3e2   :  { %v2879_v21 = vand.u32 2147483647, %v2878_v18  ;;  %v2881_v26 = vcvt.s32.f32 %v2874_v55  ;;  %v3013_v32 = vsel %vm3011_vm10, %v3012_v22, %v3008_v61  ;;  %v8884_v56 = vsel %vm11020_vm12, %v3719_v48, %v3736_v47 }
 0x3e3   :  { %v8886_v20 = vand.u32 3, %v2905_v44  ;;  %v3014_v41 = vadd.s32 %v3013_v32, %v3009_v46  ;;  %v3122_v59 = vand.u32 65535, %v3118_v19  ;;  %v8888_v39 = vadd.s32 %v3005_v43, %v2986_v60 }
 0x3e4   :  { %v2882_v5 = vmul.f32 %v2881_v26, %v2879_v21  ;;  %v8894_v9 = vsel %vm3104_vm15, %v11431_v52, %v11430_v63  ;;  %v3123_v36 = vshrl.u32 %v3118_v19, 16  ;;  %v8896_v55 = vshrl.u32 %v3858_v12, 5  ;;  %v11435_v19 = vld [vmem:[#allocation41_spill] sm:$0xff] }
 0x3e5   :  { %v8898_v61 = vshll.u32 %v3854_v42, 8  ;;  %v3015_v48 = vadd.s32 536870912, %v3014_v41  ;;  %v8902_v44 = vsel %vm3104_vm15, %v3107_v50, %v3109_v35  ;;  %v8904_v22 = vsub.s32 32, %v3860_v33 }
 0x3e6   :  { %v8907_v60 = vshll.u32 %v11115_v1, %v3860_v33  ;;  %v2883_v43 = vxor.u32 2147483648, %v2882_v5  ;;  %v8910_v47 = vmul.u32 %v3123_v36, %v11434_v34  ;;  %v8913_v18 = vshll.u32 %v11366_v51, %v3860_v33 }
 0x3e7   :  { %11432 = vst [vmem:[#allocation17_spill] sm:$0xff] %v8898_v61  ;;  %v8915_v12 = vshrl.u32 %v3015_v48, 30  ;;  %v8918_v42 = vmul.u32 %v3122_v59, %v11435_v19  ;;  %v3145_v29 = vshrl.u32 %v8894_v9, 16  ;;  %v8922_v8 = vshll.u32 %v11364_v62, %v3860_v33 }
 0x3e8   :  { %11433 = vst [vmem:[#allocation52_spill] sm:$0xff] %v8904_v22  ;;  %v2884_v46 = vsel %vm2763_vm11, %v2883_v43, %v2882_v5  ;;  %v3124_v49 = vmul.u32 %v3122_v59, %v11434_v34  ;;  %v3128_v50 = vshll.u32 %v8910_v47, 16  ;;  %v8929_v57 = vshll.u32 %v11365_v45, %v3860_v33 }
 0x3e9   :  { %v8934_v35 = vsel %vm8802_vm9, %v8259_v13, %v2884_v46  ;;  %v3017_v21 = vshll.u32 %v8915_v12, 30  ;;  %v3127_v26 = vmul.u32 %v3123_v36, %v11435_v19  ;;  %v3144_v59 = vand.u32 65535, %v8894_v9 }
 0x3ea   :  { %v2889_v32 = vmul.f32 %v8934_v35, %v8934_v35  ;;  %vm3132_vm8 = vc.u32 %v3124_v49, %v3128_v50  ;;  %v3134_v5 = vadd.s32 %v3128_v50, %v3124_v49  ;;  %v3130_v52 = vshll.u32 %v8918_v42, 16  ;;  %v11436_v49 = vld [vmem:[#allocation57_spill] sm:$0xff] }
 0x3eb   :  { %v8941_v63 = vsub.s32 %v3014_v41, %v3017_v21  ;;  %v3133_v48 = vsel %vm3132_vm8, 1, %v11134_v31  ;;  %v8946_v24 = vmul.u32 %v3145_v29, %v11434_v34  ;;  %v3864_v43 = vshrl.u32 %v11366_v51, %v8904_v22 }
 0x3ec   :  { %v8951_v36 = vshll.u32 %v11363_v6, %v3860_v33  ;;  %v2890_v46 = vmul.f32 -0.001358992, %v2889_v32  ;;  %v2897_v25 = vmul.f32 -0.00019511016, %v2889_v32  ;;  %v3135_v9 = vadd.s32 %v3133_v48, %v3127_v26 }
 0x3ed   :  { %vm3019_vm0 = vcmp.lt.s32.totalorder %v8941_v63, 0  ;;  %v3020_v41 = vsub.s32 0, %v8941_v63  ;;  %vm3136_vm3 = vc.u32 %v3134_v5, %v3130_v52  ;;  %vm2918_vm10 = vcmp.lt.s32.totalorder %v11436_v49, 0 }
 0x3ee   :  { %v8958_v50 = vshrl.u32 %v11364_v62, %v8904_v22  ;;  %v2891_v21 = vadd.f32 0.041655596, %v2890_v46  ;;  %v2898_v58 = vadd.f32 0.008332121, %v2897_v25  ;;  %v3137_v51 = vsel %vm3136_vm3, 1, %v11134_v31 }
 0x3ef   :  { %v8963_v33 = vshrl.u32 %v11365_v45, %v8904_v22  ;;  %v3021_v61 = vsel %vm3019_vm0, %v3020_v41, %v8941_v63  ;;  %v3148_v7 = vmul.u32 %v3144_v59, %v11435_v19  ;;  %v3150_v26 = vshll.u32 %v8946_v24, 16 }
 0x3f0   :  { %v8970_v5 = vshrl.u32 %v11363_v6, %v8904_v22  ;;  %v2892_v52 = vmul.f32 %v2891_v21, %v2889_v32  ;;  %v2899_v48 = vmul.f32 %v2898_v58, %v2889_v32  ;;  %v3022_v46 = vclz %v3021_v61 }
 0x3f1   :  { %v8974_v25 = vshrl.u32 %v11118_v38, %v8904_v22  ;;  %v11437_v45 = vand.u32 2147483647, %v11436_v49  ;;  %v3129_v41 = vshrl.u32 %v8910_v47, 16  ;;  %v3139_v23 = vadd.s32 %v3137_v51, %v3135_v9 }
 0x3f2   :  { %v3146_v54 = vmul.u32 %v3144_v59, %v11434_v34  ;;  %v2893_v6 = vadd.f32 -0.4999988, %v2892_v52  ;;  %v2900_v11 = vadd.f32 -0.16666654, %v2899_v48  ;;  %v5477_v21 = vadd.s32 4294967294, %v3022_v46 }
 0x3f3   :  { %vm8978_vm11 = vcmp.le.f32.partialorder %v11437_v45, 0.7853982  ;;  %v3040_v58 = vsub.s32 4, %v8915_v12  ;;  %vm2908_vm9 = vcmp.eq.s32.totalorder %v8886_v20, 0  ;;  %vm2911_vm15 = vcmp.eq.s32.totalorder %v8886_v20, 2 }
 0x3f4   :  { %v3149_v61 = vmul.u32 %v3145_v29, %v11435_v19  ;;  %v3152_v45 = vshll.u32 %v3148_v7, 16  ;;  %vm3154_vm2 = vc.u32 %v3146_v54, %v3150_v26  ;;  %v3156_v38 = vadd.s32 %v3150_v26, %v3146_v54 }
 0x3f5   :  { %v2894_v22 = vmul.f32 %v2893_v6, %v2889_v32  ;;  %v2901_v10 = vmul.f32 %v2900_v11, %v2889_v32  ;;  %vm2907_vm8 = vcmp.lt.s32.totalorder %v8886_v20, 2  ;;  %vm5478_vm0 = vcmp.lt.s32.totalorder %v5477_v21, 0  ;;  %v11440_v20 = vld [vmem:[#allocation10_spill] sm:$0xff] }
 0x3f6   :  { %v3155_v51 = vsel %vm3154_vm2, 1, %v11134_v31  ;;  %vm2904_vm3 = vweird.f32 %v8259_v13  ;;  %v3025_v34 = vsel %vm5478_vm0, 0, %v5477_v21  ;;  %v3140_v47 = vadd.s32 %v3139_v23, %v3129_v41 }
 0x3f7   :  { %v3157_v59 = vadd.s32 %v3155_v51, %v3149_v61  ;;  %vm3158_vm12 = vc.u32 %v3156_v38, %v3152_v45  ;;  %v2895_v9 = vadd.f32 1.0, %v2894_v22  ;;  %v2902_v52 = vadd.f32 1.0, %v2901_v10 }
 0x3f8   :  { %v3026_v48 = vsub.s32 32, %v3025_v34  ;;  %v3131_v19 = vshrl.u32 %v8918_v42, 16  ;;  %v3030_v29 = vsub.s32 4294967266, %v3025_v34  ;;  %v3041_v6 = vsel %vm2918_vm10, %v3040_v58, %v8915_v12 }
 0x3f9   :  { %v3151_v11 = vshrl.u32 %v8946_v24, 16  ;;  %v3159_v54 = vsel %vm3158_vm12, 1, %v11134_v31  ;;  %v2903_v32 = vmul.f32 %v2902_v52, %v8934_v35  ;;  %v2912_v26 = vxor.u32 2147483648, %v2895_v9 }
 0x3fa   :  { %v3028_v23 = vshrl.u32 %v8888_v39, %v3026_v48  ;;  %v3161_v46 = vadd.s32 %v3159_v54, %v3157_v59  ;;  %v9000_v10 = vor.u32 %v3864_v43, %v8907_v60  ;;  %v3027_v22 = vshll.u32 %v8941_v63, %v3025_v34 }
 0x3fb   :  { %v3031_v42 = vadd.s32 127, %v3030_v29  ;;  %v9003_v41 = vadd.s32 %v3140_v47, %v3131_v19  ;;  %v2909_v21 = vxor.u32 2147483648, %v2903_v32  ;;  %v3043_v12 = vsel %vm8978_vm11, 0, %v3041_v6  ;;  %v11441_v29 = vld [vmem:[#allocation29_spill] sm:$0xff] }
 0x3fc   :  { %v3153_v24 = vshrl.u32 %v3148_v7, 16  ;;  %v3162_v58 = vadd.s32 %v3161_v46, %v3151_v11  ;;  %v3029_v61 = vor.u32 %v3028_v23, %v3027_v22  ;;  %v9007_v51 = vadd.s32 %v3156_v38, %v3152_v45  ;;  %v11442_v11 = vld [vmem:[#allocation42_spill] sm:$0xff] }
 0x3fd   :  { %v3032_v35 = vshll.u32 %v3031_v42, 23  ;;  %vm3259_vm12 = vcmp.lt.s32.totalorder %v8474_v3, 2  ;;  %v2910_v39 = vsel %vm2908_vm9, %v2895_v9, %v2909_v21  ;;  %v2913_v60 = vsel %vm2911_vm15, %v2912_v26, %v2903_v32 }
 0x3fe   :  { %v3163_v63 = vadd.s32 %v3162_v58, %v3153_v24  ;;  %v3269_v43 = vsel %vm3259_vm12, %v8541_v27, %v8551_v4  ;;  %v2914_v7 = vsel %vm2907_vm8, %v2910_v39, %v2913_v60  ;;  %vm3166_vm2 = vc.u32 %v9003_v41, %v9007_v51 }
 0x3ff   :  { %v3033_v34 = vor.u32 4788187, %v3032_v35  ;;  %v3273_v38 = vsel %vm3259_vm12, %v8557_v2, %v8565_v17  ;;  %v2915_v45 = vsel %vm2904_vm3, nan, %v2914_v7  ;;  %v3036_v4 = vcvt.s32.f32 %v3029_v61 }
 0x400   :  { %v3167_v47 = vadd.s32 1, %v3163_v63  ;;  %v3277_v59 = vand.u32 65535, %v3273_v38  ;;  %v3278_v9 = vshrl.u32 %v3273_v38, 16  ;;  %5497 = vmatmul.msk.f32.vlgmr.msrb.gmra.mxu3 %vm1382_vm6, %v2915_v45  ;;  %v3164_v52 = vmul.u32 %v11440_v20, %v8902_v44  ;;  %v11443_v44 = vld [vmem:[#allocation7_spill] sm:$0xff] }
 0x401   :  { %v3034_v27 = vand.u32 2147483647, %v3033_v34  ;;  %v3300_v48 = vshrl.u32 %v3269_v43, 16  ;;  %v3299_v2 = vand.u32 65535, %v3269_v43  ;;  %v9037_v13 = vor.u32 %v8958_v50, %v8913_v18 }
 0x402   :  { %v3168_v19 = vsel %vm3166_vm2, %v3167_v47, %v3163_v63  ;;  %v3280_v6 = vmul.u32 %v3278_v9, %v11441_v29  ;;  %v9033_v54 = vmul.u32 %v3277_v59, %v11442_v11  ;;  %v9041_v17 = vor.u32 %v8963_v33, %v8922_v8 }
 0x403   :  { %v3037_v32 = vmul.f32 %v3036_v4, %v3034_v27  ;;  %v3169_v26 = vadd.s32 %v3168_v19, %v3164_v52  ;;  %v3060_v23 = vadd.s32 3, %v3043_v12  ;;  %v3242_v46 = vshrl.u32 %v11115_v1, %v11443_v44 }
 0x404   :  { %v3279_v22 = vmul.u32 %v3277_v59, %v11441_v29  ;;  %v3283_v42 = vshll.u32 %v3280_v6, 16  ;;  %v3282_v58 = vmul.u32 %v3278_v9, %v11442_v11  ;;  %v3302_v18 = vmul.u32 %v3300_v48, %v11441_v29  ;;  %v11444_v9 = vld [vmem:[#allocation54_spill] sm:$0xff] }
 0x405   :  { %v3038_v21 = vxor.u32 2147483648, %v3037_v32  ;;  %v3170_v24 = vadd.s32 536870912, %v3169_v26  ;;  %v3285_v50 = vshll.u32 %v9033_v54, 16  ;;  %v3301_v33 = vmul.u32 %v3299_v2, %v11441_v29 }
 0x406   :  { %vm3287_vm9 = vc.u32 %v3279_v22, %v3283_v42  ;;  %v3289_v8 = vadd.s32 %v3283_v42, %v3279_v22  ;;  %v3305_v39 = vshll.u32 %v3302_v18, 16  ;;  %v3303_v43 = vmul.u32 %v3299_v2, %v11442_v11 }
 0x407   :  { %v3039_v12 = vsel %vm2918_vm10, %v3038_v21, %v3037_v32  ;;  %v3171_v61 = vshrl.u32 %v3170_v24, 30  ;;  %v3288_v35 = vsel %vm3287_vm9, 1, %v11134_v31  ;;  %v9061_v34 = vand.u32 3, %v3060_v23 }
 0x408   :  { %v9056_v60 = vsel %vm8978_vm11, %v11436_v49, %v3039_v12  ;;  %v3290_v63 = vadd.s32 %v3288_v35, %v3282_v58  ;;  %vm3291_vm15 = vc.u32 %v3289_v8, %v3285_v50  ;;  %v3262_v47 = vsel %vm3258_vm13, %v3242_v46, %v8503_v40 }
 0x409   :  { %v3044_v7 = vmul.f32 %v9056_v60, %v9056_v60  ;;  %v3172_v38 = vshll.u32 %v3171_v61, 30  ;;  %v3292_v45 = vsel %vm3291_vm15, 1, %v11134_v31  ;;  %v3263_v62 = vsel %vm3261_vm14, %v8511_v16, 2102212464 }
 0x40a   :  { %v3294_v59 = vadd.s32 %v3292_v45, %v3290_v63  ;;  %vm3309_vm10 = vc.u32 %v3301_v33, %v3305_v39  ;;  %vm3073_vm11 = vcmp.lt.s32.totalorder %v11444_v9, 0  ;;  %v3284_v52 = vshrl.u32 %v3280_v6, 16 }
 0x40b   :  { %v3045_v27 = vmul.f32 -0.001358992, %v3044_v7  ;;  %v3052_v4 = vmul.f32 -0.00019511016, %v3044_v7  ;;  %v9071_v20 = vsub.s32 %v3169_v26, %v3172_v38  ;;  %v3304_v19 = vmul.u32 %v3300_v48, %v11442_v11 }
 0x40c   :  { %v3307_v29 = vshll.u32 %v3303_v43, 16  ;;  %v3310_v2 = vsel %vm3309_vm10, 1, %v11134_v31  ;;  %v3311_v32 = vadd.s32 %v3305_v39, %v3301_v33  ;;  %v11445_v44 = vand.u32 2147483647, %v11444_v9 }
 0x40d   :  { %v3046_v40 = vadd.f32 0.041655596, %v3045_v27  ;;  %v3053_v23 = vadd.f32 0.008332121, %v3052_v4  ;;  %vm3174_vm13 = vcmp.lt.s32.totalorder %v9071_v20, 0  ;;  %v3175_v16 = vsub.s32 0, %v9071_v20 }
 0x40e   :  { %vm9079_vm14 = vcmp.le.f32.partialorder %v11445_v44, 0.7853982  ;;  %v3264_v48 = vsel %vm3260_vm5, %v8505_v53, %v3263_v62  ;;  %v3295_v6 = vadd.s32 %v3294_v59, %v3284_v52  ;;  %v3312_v11 = vadd.s32 %v3310_v2, %v3304_v19  ;;  %v11449_v44 = vld [vmem:[#allocation53_spill] sm:$0xff] }
 0x40f   :  { %vm3313_vm8 = vc.u32 %v3311_v32, %v3307_v29  ;;  %v3047_v26 = vmul.f32 %v3046_v40, %v3044_v7  ;;  %v3054_v22 = vmul.f32 %v3053_v23, %v3044_v7  ;;  %v3176_v42 = vsel %vm3174_vm13, %v3175_v16, %v9071_v20 }
 0x410   :  { %v3314_v21 = vsel %vm3313_vm8, 1, %v11134_v31  ;;  %v3177_v24 = vclz %v3176_v42  ;;  %v3195_v58 = vsub.s32 4, %v3171_v61  ;;  %v3286_v50 = vshrl.u32 %v9033_v54, 16 }
 0x411   :  { %v3316_v8 = vadd.s32 %v3314_v21, %v3312_v11  ;;  %v9091_v33 = vor.u32 %v8970_v5, %v8929_v57  ;;  %v3048_v12 = vadd.f32 -0.4999988, %v3047_v26  ;;  %v3055_v53 = vadd.f32 -0.16666654, %v3054_v22 }
 0x412   :  { %v3306_v35 = vshrl.u32 %v3302_v18, 16  ;;  %vm3063_vm5 = vcmp.eq.s32.totalorder %v9061_v34, 0  ;;  %vm3066_vm0 = vcmp.eq.s32.totalorder %v9061_v34, 2  ;;  %v5480_v39 = vadd.s32 4294967294, %v3177_v24 }
 0x413   :  { %v3265_v63 = vsel %vm3259_vm12, %v3262_v47, %v3264_v48  ;;  %v9097_v38 = vadd.s32 %v3295_v6, %v3286_v50  ;;  %v3049_v45 = vmul.f32 %v3048_v12, %v3044_v7  ;;  %v3056_v54 = vmul.f32 %v3055_v53, %v3044_v7  ;;  %v11451_v6 = vld [vmem:[#allocation50_spill] sm:$0xff] }
 0x414   :  { %vm3062_vm3 = vcmp.lt.s32.totalorder %v9061_v34, 2  ;;  %v3308_v62 = vshrl.u32 %v3303_v43, 16  ;;  %v3317_v57 = vadd.s32 %v3316_v8, %v3306_v35  ;;  %vm3059_vm2 = vweird.f32 %v11436_v49  ;;  %v11448_v43 = vld [vmem:[#allocation43_spill] sm:$0xff]  ;;  %v11454_v49 = vld [vmem:[#allocation28_spill] sm:$0xff] }
 0x415   :  { %v3165_v5 = vadd.s32 %v9007_v51, %v9003_v41  ;;  %vm5481_vm9 = vcmp.lt.s32.totalorder %v5480_v39, 0  ;;  %v3196_v18 = vsel %vm3073_vm11, %v3195_v58, %v3171_v61  ;;  %v3315_v59 = vadd.s32 %v3311_v32, %v3307_v29 }
 0x416   :  { %vm3878_vm12 = vcmp.lt.s32.totalorder %v8896_v55, 1  ;;  %v3050_v3 = vadd.f32 1.0, %v3049_v45  ;;  %v3057_v47 = vadd.f32 1.0, %v3056_v54  ;;  %v3180_v27 = vsel %vm5481_vm9, 0, %v5480_v39  ;;  %v11453_v54 = vld [vmem:[#allocation56_spill] sm:$0xff] }
 0x417   :  { %v3318_v7 = vadd.s32 %v3317_v57, %v3308_v62  ;;  %v3181_v4 = vsub.s32 32, %v3180_v27  ;;  %v3185_v52 = vsub.s32 4294967266, %v3180_v27  ;;  %v3319_v19 = vmul.u32 %v11448_v43, %v3265_v63  ;;  %v11452_v63 = vld [vmem:[#allocation48_spill] sm:$0xff] }
 0x418   :  { %vm3321_vm15 = vc.u32 %v9097_v38, %v3315_v59  ;;  %v3058_v2 = vmul.f32 %v3057_v47, %v9056_v60  ;;  %v3067_v41 = vxor.u32 2147483648, %v3050_v3  ;;  %v3198_v51 = vsel %vm9079_vm14, 0, %v3196_v18  ;;  %v11450_v60 = vld [vmem:[#allocation16_spill] sm:$0xff] }
 0x419   :  { %v3322_v61 = vadd.s32 1, %v3318_v7  ;;  %v3182_v29 = vshll.u32 %v9071_v20, %v3180_v27  ;;  %v3183_v32 = vshrl.u32 %v3165_v5, %v3181_v4  ;;  %v3186_v40 = vadd.s32 127, %v3185_v52 }
 0x41a   :  { %vm3414_vm10 = vcmp.lt.s32.totalorder %v8519_v28, 2  ;;  %v3064_v23 = vxor.u32 2147483648, %v3058_v2  ;;  %v3068_v24 = vsel %vm3066_vm0, %v3067_v41, %v3058_v2  ;;  %v3215_v58 = vadd.s32 3, %v3198_v51 }
 0x41b   :  { %v3323_v16 = vsel %vm3321_vm15, %v3322_v61, %v3318_v7  ;;  %v9117_v48 = vsel %vm3414_vm10, %v11449_v44, %v8585_v14  ;;  %v3428_v11 = vsel %vm3414_vm10, %v11451_v6, %v11450_v60  ;;  %v3184_v26 = vor.u32 %v3183_v32, %v3182_v29 }
 0x41c   :  { %v3187_v22 = vshll.u32 %v3186_v40, 23  ;;  %v3324_v20 = vadd.s32 %v3323_v16, %v3319_v19  ;;  %v3432_v42 = vand.u32 65535, %v3428_v11  ;;  %v3065_v21 = vsel %vm3063_vm5, %v3050_v3, %v3064_v23  ;;  %v11455_v23 = vld [vmem:[#allocation20_spill] sm:$0xff] }
 0x41d   :  { %v3433_v50 = vshrl.u32 %v3428_v11, 16  ;;  %v3069_v14 = vsel %vm3062_vm3, %v3065_v21, %v3068_v24  ;;  %v3455_v53 = vshrl.u32 %v9117_v48, 16  ;;  %v3877_v35 = vor.u32 %v8974_v25, %v8951_v36  ;;  %v11457_v11 = vld [vmem:[#allocation35_spill] sm:$0xff]  ;;  %v11459_v24 = vld [vmem:[#allocation46_spill] sm:$0xff] }
 0x41e   :  { %v3188_v8 = vor.u32 4788187, %v3187_v22  ;;  %v3325_v12 = vadd.s32 536870912, %v3324_v20  ;;  %v3070_v39 = vsel %vm3059_vm2, nan, %v3069_v14  ;;  %v9136_v62 = vmul.u32 %v3432_v42, %v11453_v54 }
 0x41f   :  { %v3435_v45 = vmul.u32 %v3433_v50, %v11452_v63  ;;  %v9142_v34 = vsel %vm3878_vm12, %v9000_v10, %v9037_v13  ;;  %5498 = vmatmul.msk.f32.gmra.mxu3 %vm1382_vm6, %v3070_v39  ;;  %v3191_v5 = vcvt.s32.f32 %v3184_v26  ;;  %v9147_v3 = vand.u32 3, %v3215_v58 }
 0x420   :  { %v3189_v57 = vand.u32 2147483647, %v3188_v8  ;;  %v9145_v18 = vshrl.u32 %v3325_v12, 30  ;;  %v3397_v47 = vshrl.u32 %v11115_v1, %v11454_v49  ;;  %v3434_v27 = vmul.u32 %v3432_v42, %v11452_v63 }
 0x421   :  { %v3438_v7 = vshll.u32 %v3435_v45, 16  ;;  %v3454_v43 = vand.u32 65535, %v9117_v48  ;;  %v3457_v19 = vmul.u32 %v3455_v53, %v11452_v63  ;;  %v3437_v2 = vmul.u32 %v3433_v50, %v11453_v54  ;;  %v11461_v50 = vld [vmem:[#allocation8_spill] sm:$0xff] }
 0x422   :  { %v3192_v4 = vmul.f32 %v3191_v5, %v3189_v57  ;;  %v3327_v52 = vshll.u32 %v9145_v18, 30  ;;  %v3440_v41 = vshll.u32 %v9136_v62, 16  ;;  %v3320_v29 = vadd.s32 %v3315_v59, %v9097_v38 }
 0x423   :  { %vm3442_vm13 = vc.u32 %v3434_v27, %v3438_v7  ;;  %v3444_v51 = vadd.s32 %v3438_v7, %v3434_v27  ;;  %vm11456_vm8 = vcmp.lt.s32.totalorder %v8519_v28, 4  ;;  %v3460_v48 = vshll.u32 %v3457_v19, 16 }
 0x424   :  { %v3193_v61 = vxor.u32 2147483648, %v3192_v4  ;;  %v9158_v32 = vsub.s32 %v3324_v20, %v3327_v52  ;;  %v3443_v40 = vsel %vm3442_vm13, 1, %v11134_v31  ;;  %v3418_v16 = vsel %vm11456_vm8, %v11455_v23, 2102212464 }
 0x425   :  { %v3445_v44 = vadd.s32 %v3443_v40, %v3437_v2  ;;  %vm3446_vm5 = vc.u32 %v3444_v51, %v3440_v41  ;;  %v3458_v38 = vmul.u32 %v3454_v43, %v11453_v54  ;;  %vm11458_vm3 = vcmp.lt.s32.totalorder %v8519_v28, 1 }
 0x426   :  { %v3194_v60 = vsel %vm3073_vm11, %v3193_v61, %v3192_v4  ;;  %vm3329_vm0 = vcmp.lt.s32.totalorder %v9158_v32, 0  ;;  %v3330_v6 = vsub.s32 0, %v9158_v32  ;;  %v3417_v26 = vsel %vm11458_vm3, %v3397_v47, %v11457_v11 }
 0x427   :  { %v9172_v59 = vsel %vm9079_vm14, %v11444_v9, %v3194_v60  ;;  %v3447_v22 = vsel %vm3446_vm5, 1, %v11134_v31  ;;  %v3456_v20 = vmul.u32 %v3454_v43, %v11452_v63  ;;  %vm11460_vm11 = vcmp.lt.s32.totalorder %v8519_v28, 3 }
 0x428   :  { %v3199_v42 = vmul.f32 %v9172_v59, %v9172_v59  ;;  %v3331_v21 = vsel %vm3329_vm0, %v3330_v6, %v9158_v32  ;;  %v3419_v58 = vsel %vm11460_vm11, %v11459_v24, %v3418_v16  ;;  %v3449_v46 = vadd.s32 %v3447_v22, %v3445_v44 }
 0x429   :  { %vm3228_vm14 = vcmp.lt.s32.totalorder %v11461_v50, 0  ;;  %v3332_v14 = vclz %v3331_v21  ;;  %v3439_v8 = vshrl.u32 %v3435_v45, 16  ;;  %vm3464_vm2 = vc.u32 %v3456_v20, %v3460_v48 }
 0x42a   :  { %v3466_v12 = vadd.s32 %v3460_v48, %v3456_v20  ;;  %v3200_v39 = vmul.f32 -0.001358992, %v3199_v42  ;;  %v3207_v57 = vmul.f32 -0.00019511016, %v3199_v42  ;;  %v3459_v63 = vmul.u32 %v3455_v53, %v11453_v54 }
 0x42b   :  { %v3462_v5 = vshll.u32 %v3458_v38, 16  ;;  %v5483_v49 = vadd.s32 4294967294, %v3332_v14  ;;  %v3441_v47 = vshrl.u32 %v9136_v62, 16  ;;  %v3450_v27 = vadd.s32 %v3449_v46, %v3439_v8 }
 0x42c   :  { %v3465_v7 = vsel %vm3464_vm2, 1, %v11134_v31  ;;  %v3201_v4 = vadd.f32 0.041655596, %v3200_v39  ;;  %v3208_v52 = vadd.f32 0.008332121, %v3207_v57  ;;  %v3350_v45 = vsub.s32 4, %v9145_v18 }
 0x42d   :  { %v3467_v43 = vadd.s32 %v3465_v7, %v3459_v63  ;;  %vm3468_vm9 = vc.u32 %v3466_v12, %v3462_v5  ;;  %vm5484_vm15 = vcmp.lt.s32.totalorder %v5483_v49, 0  ;;  %v3461_v2 = vshrl.u32 %v3457_v19, 16  ;;  %v11466_v7 = vld [vmem:[#allocation36_spill] sm:$0xff] }
 0x42e   :  { %v3469_v41 = vsel %vm3468_vm9, 1, %v11134_v31  ;;  %v3202_v51 = vmul.f32 %v3201_v4, %v3199_v42  ;;  %v3209_v61 = vmul.f32 %v3208_v52, %v3199_v42  ;;  %v3335_v53 = vsel %vm5484_vm15, 0, %v5483_v49  ;;  %v11467_v4 = vld [vmem:[#allocation37_spill] sm:$0xff] }
 0x42f   :  { %v3471_v54 = vadd.s32 %v3469_v41, %v3467_v43  ;;  %v3336_v40 = vsub.s32 32, %v3335_v53  ;;  %v3340_v23 = vsub.s32 4294967266, %v3335_v53  ;;  %v3420_v62 = vsel %vm3414_vm10, %v3417_v26, %v3419_v58 }
 0x430   :  { %v9193_v16 = vadd.s32 %v3450_v27, %v3441_v47  ;;  %v3203_v44 = vadd.f32 -0.4999988, %v3202_v51  ;;  %v3210_v48 = vadd.f32 -0.16666654, %v3209_v61  ;;  %v3463_v60 = vshrl.u32 %v3458_v38, 16  ;;  %v11468_v61 = vld [vmem:[#allocation55_spill] sm:$0xff] }
 0x431   :  { %v3472_v6 = vadd.s32 %v3471_v54, %v3461_v2  ;;  %v3337_v11 = vshll.u32 %v9158_v32, %v3335_v53  ;;  %v3338_v19 = vshrl.u32 %v3320_v29, %v3336_v40  ;;  %v3341_v22 = vadd.s32 127, %v3340_v23  ;;  %v11469_v53 = vld [vmem:[#allocation47_spill] sm:$0xff] }
 0x432   :  { %v9196_v20 = vadd.s32 %v3466_v12, %v3462_v5  ;;  %vm3881_vm13 = vcmp.lt.s32.totalorder %v8896_v55, 4  ;;  %v3204_v21 = vmul.f32 %v3203_v44, %v3199_v42  ;;  %v3211_v24 = vmul.f32 %v3210_v48, %v3199_v42  ;;  %v11465_v12 = vld [vmem:[#allocation13_spill] sm:$0xff]  ;;  %v11471_v48 = vld [vmem:[#allocation22_spill] sm:$0xff] }
 0x433   :  { %v3351_v28 = vsel %vm3228_vm14, %v3350_v45, %v9145_v18  ;;  %v3473_v26 = vadd.s32 %v3472_v6, %v3463_v60  ;;  %vm3214_vm10 = vweird.f32 %v11444_v9  ;;  %v11462_v38 = vand.u32 2147483647, %v11461_v50 }
 0x434   :  { %v3339_v29 = vor.u32 %v3338_v19, %v3337_v11  ;;  %v3342_v32 = vshll.u32 %v3341_v22, 23  ;;  %vm3476_vm5 = vc.u32 %v9193_v16, %v9196_v20  ;;  %v3205_v46 = vadd.f32 1.0, %v3204_v21 }
 0x435   :  { %vm9205_vm8 = vcmp.le.f32.partialorder %v11462_v38, 0.7853982  ;;  %v3212_v42 = vadd.f32 1.0, %v3211_v24  ;;  %vm3217_vm0 = vcmp.lt.s32.totalorder %v9147_v3, 2  ;;  %v3477_v14 = vadd.s32 1, %v3473_v26 }
 0x436   :  { %vm3218_vm3 = vcmp.eq.s32.totalorder %v9147_v3, 0  ;;  %v3343_v18 = vor.u32 4788187, %v3342_v32  ;;  %v3353_v8 = vsel %vm9205_vm8, 0, %v3351_v28  ;;  %v3474_v39 = vmul.u32 %v11465_v12, %v3420_v62  ;;  %v11470_v62 = vld [vmem:[#allocation51_spill] sm:$0xff] }
 0x437   :  { %v3213_v57 = vmul.f32 %v3212_v42, %v9172_v59  ;;  %v3222_v63 = vxor.u32 2147483648, %v3205_v46  ;;  %v3478_v5 = vsel %vm3476_vm5, %v3477_v14, %v3473_v26  ;;  %vm3569_vm11 = vcmp.lt.s32.totalorder %v8606_v37, 2 }
 0x438   :  { %v3344_v49 = vand.u32 2147483647, %v3343_v18  ;;  %v3346_v47 = vcvt.s32.f32 %v3339_v29  ;;  %v3479_v27 = vadd.s32 %v3478_v5, %v3474_v39  ;;  %v3583_v52 = vsel %vm3569_vm11, %v11467_v4, %v11466_v7  ;;  %v11473_v7 = vld [vmem:[#allocation26_spill] sm:$0xff] }
 0x439   :  { %v3219_v43 = vxor.u32 2147483648, %v3213_v57  ;;  %vm3221_vm2 = vcmp.eq.s32.totalorder %v9147_v3, 2  ;;  %v3587_v45 = vand.u32 65535, %v3583_v52  ;;  %v3588_v2 = vshrl.u32 %v3583_v52, 16 }
 0x43a   :  { %v3347_v41 = vmul.f32 %v3346_v47, %v3344_v49  ;;  %v3370_v51 = vadd.s32 3, %v3353_v8  ;;  %v3480_v59 = vadd.s32 536870912, %v3479_v27  ;;  %v3579_v54 = vsel %vm3569_vm11, %v11469_v53, %v11468_v61  ;;  %v11472_v8 = vld [vmem:[#allocation23_spill] sm:$0xff] }
 0x43b   :  { %v3220_v40 = vsel %vm3218_vm3, %v3205_v46, %v3219_v43  ;;  %v3223_v23 = vsel %vm3221_vm2, %v3222_v63, %v3213_v57  ;;  %v3590_v44 = vmul.u32 %v3588_v2, %v11470_v62  ;;  %v9231_v60 = vmul.u32 %v3587_v45, %v11471_v48 }
 0x43c   :  { %v9236_v6 = vsel %vm3881_vm13, %v9091_v33, 920167782  ;;  %v3224_v11 = vsel %vm3217_vm0, %v3220_v40, %v3223_v23  ;;  %v3348_v19 = vxor.u32 2147483648, %v3347_v41  ;;  %v9240_v22 = vshrl.u32 %v3480_v59, 30  ;;  %v11475_v23 = vld [vmem:[#allocation14_spill] sm:$0xff] }
 0x43d   :  { %v3225_v21 = vsel %vm3214_vm10, nan, %v3224_v11  ;;  %v3589_v24 = vmul.u32 %v3587_v45, %v11470_v62  ;;  %v3593_v28 = vshll.u32 %v3590_v44, 16  ;;  %v3610_v26 = vshrl.u32 %v3579_v54, 16 }
 0x43e   :  { %5499 = vmatmul.msk.f32.gmra.mxu3 %vm1382_vm6, %v3225_v21  ;;  %v3349_v38 = vsel %vm3228_vm14, %v3348_v19, %v3347_v41  ;;  %v9248_v29 = vand.u32 3, %v3370_v51  ;;  %v3482_v3 = vshll.u32 %v9240_v22, 30  ;;  %v3592_v32 = vmul.u32 %v3588_v2, %v11471_v48  ;;  %v11474_v51 = vld [vmem:[#allocation18_spill] sm:$0xff] }
 0x43f   :  { %v9255_v9 = vsel %vm9205_vm8, %v11461_v50, %v3349_v38  ;;  %v3595_v46 = vshll.u32 %v9231_v60, 16  ;;  %vm3597_vm9 = vc.u32 %v3589_v24, %v3593_v28  ;;  %v3599_v42 = vadd.s32 %v3593_v28, %v3589_v24  ;;  %v11477_v38 = vld [vmem:[#allocation40_spill] sm:$0xff] }
 0x440   :  { %v3354_v14 = vmul.f32 %v9255_v9, %v9255_v9  ;;  %v9260_v18 = vsub.s32 %v3479_v27, %v3482_v3  ;;  %v3552_v12 = vshrl.u32 %v11115_v1, %v11472_v8  ;;  %v3598_v39 = vsel %vm3597_vm9, 1, %v11134_v31 }
 0x441   :  { %v3600_v57 = vadd.s32 %v3598_v39, %v3592_v32  ;;  %vm3601_vm14 = vc.u32 %v3599_v42, %v3595_v46  ;;  %v3609_v63 = vand.u32 65535, %v3579_v54  ;;  %v3612_v58 = vmul.u32 %v3610_v26, %v11470_v62 }
 0x442   :  { %v3355_v5 = vmul.f32 -0.001358992, %v3354_v14  ;;  %v3362_v49 = vmul.f32 -0.00019511016, %v3354_v14  ;;  %vm3484_vm15 = vcmp.lt.s32.totalorder %v9260_v18, 0  ;;  %v3485_v47 = vsub.s32 0, %v9260_v18 }
 0x443   :  { %v3475_v27 = vadd.s32 %v9196_v20, %v9193_v16  ;;  %v3573_v4 = vsel %vm3571_vm4, %v11473_v7, 2102212464  ;;  %v3602_v52 = vsel %vm3601_vm14, 1, %v11134_v31  ;;  %v3615_v43 = vshll.u32 %v3612_v58, 16 }
 0x444   :  { %v3356_v45 = vadd.f32 0.041655596, %v3355_v5  ;;  %v3363_v2 = vadd.f32 0.008332121, %v3362_v49  ;;  %v3486_v41 = vsel %vm3484_vm15, %v3485_v47, %v9260_v18  ;;  %v3572_v59 = vsel %vm3568_vm7, %v3552_v12, %v11474_v51 }
 0x445   :  { %v3487_v61 = vclz %v3486_v41  ;;  %v3604_v53 = vadd.s32 %v3602_v52, %v3600_v57  ;;  %v3611_v54 = vmul.u32 %v3609_v63, %v11470_v62  ;;  %v3613_v16 = vmul.u32 %v3609_v63, %v11471_v48 }
 0x446   :  { %v3357_v20 = vmul.f32 %v3356_v45, %v3354_v14  ;;  %v3364_v40 = vmul.f32 %v3363_v2, %v3354_v14  ;;  %vm11476_vm4 = vcmp.lt.s32.totalorder %v8606_v37, 3  ;;  %v3594_v19 = vshrl.u32 %v3590_v44, 16 }
 0x447   :  { %v3574_v11 = vsel %vm11476_vm4, %v11475_v23, %v3573_v4  ;;  %v5486_v21 = vadd.s32 4294967294, %v3487_v61  ;;  %v3505_v24 = vsub.s32 4, %v9240_v22  ;;  %vm3619_vm10 = vc.u32 %v3611_v54, %v3615_v43 }
 0x448   :  { %v3621_v28 = vadd.s32 %v3615_v43, %v3611_v54  ;;  %vm3383_vm7 = vcmp.lt.s32.totalorder %v11477_v38, 0  ;;  %v3358_v3 = vadd.f32 -0.4999988, %v3357_v20  ;;  %v3365_v32 = vadd.f32 -0.16666654, %v3364_v40 }
 0x449   :  { %v3605_v46 = vadd.s32 %v3604_v53, %v3594_v19  ;;  %v3614_v62 = vmul.u32 %v3610_v26, %v11471_v48  ;;  %vm5487_vm8 = vcmp.lt.s32.totalorder %v5486_v21, 0  ;;  %v3596_v42 = vshrl.u32 %v9231_v60, 16 }
 0x44a   :  { %v3617_v8 = vshll.u32 %v3613_v16, 16  ;;  %v3620_v12 = vsel %vm3619_vm10, 1, %v11134_v31  ;;  %v3359_v39 = vmul.f32 %v3358_v3, %v3354_v14  ;;  %v3366_v44 = vmul.f32 %v3365_v32, %v3354_v14 }
 0x44b   :  { %v3490_v57 = vsel %vm5487_vm8, 0, %v5486_v21  ;;  %v3622_v63 = vadd.s32 %v3620_v12, %v3614_v62  ;;  %vm3369_vm5 = vweird.f32 %v11461_v50  ;;  %v11478_v5 = vand.u32 2147483647, %v11477_v38 }
 0x44c   :  { %v3491_v47 = vsub.s32 32, %v3490_v57  ;;  %v3495_v48 = vsub.s32 4294967266, %v3490_v57  ;;  %v3616_v26 = vshrl.u32 %v3612_v58, 16  ;;  %vm3623_vm3 = vc.u32 %v3621_v28, %v3617_v8 }
 0x44d   :  { %vm9291_vm0 = vcmp.le.f32.partialorder %v11478_v5, 0.7853982  ;;  %v3360_v60 = vadd.f32 1.0, %v3359_v39  ;;  %v3367_v7 = vadd.f32 1.0, %v3366_v44  ;;  %v9295_v4 = vadd.s32 %v3605_v46, %v3596_v42  ;;  %v11482_v46 = vld [vmem:[#allocation38_spill] sm:$0xff]  ;;  %v11484_v5 = vld [vmem:[#allocation15_spill] sm:$0xff] }
 0x44e   :  { %v3624_v14 = vsel %vm3623_vm3, 1, %v11134_v31  ;;  %v3492_v52 = vshll.u32 %v9260_v18, %v3490_v57  ;;  %v3493_v43 = vshrl.u32 %v3475_v27, %v3491_v47  ;;  %v3496_v45 = vadd.s32 127, %v3495_v48  ;;  %v11483_v57 = vld [vmem:[#allocation12_spill] sm:$0xff] }
 0x44f   :  { %v3626_v2 = vadd.s32 %v3624_v14, %v3622_v63  ;;  %v3368_v41 = vmul.f32 %v3367_v7, %v9255_v9  ;;  %vm3372_vm2 = vcmp.lt.s32.totalorder %v9248_v29, 2  ;;  %v3377_v51 = vxor.u32 2147483648, %v3360_v60 }
 0x450   :  { %v3618_v61 = vshrl.u32 %v3613_v16, 16  ;;  %vm3880_vm9 = vcmp.lt.s32.totalorder %v8896_v55, 3  ;;  %v3494_v58 = vor.u32 %v3493_v43, %v3492_v52  ;;  %v3497_v53 = vshll.u32 %v3496_v45, 23 }
 0x451   :  { %v9302_v54 = vadd.s32 %v3621_v28, %v3617_v8  ;;  %v3627_v20 = vadd.s32 %v3626_v2, %v3616_v26  ;;  %vm3373_vm14 = vcmp.eq.s32.totalorder %v9248_v29, 0  ;;  %v3374_v40 = vxor.u32 2147483648, %v3368_v41 }
 0x452   :  { %vm3376_vm15 = vcmp.eq.s32.totalorder %v9248_v29, 2  ;;  %v3575_v18 = vsel %vm3569_vm11, %v3572_v59, %v3574_v11  ;;  %v3498_v9 = vor.u32 4788187, %v3497_v53  ;;  %v3506_v27 = vsel %vm3383_vm7, %v3505_v24, %v9240_v22  ;;  %v11481_v24 = vld [vmem:[#allocation6_spill] sm:$0xff] }
 0x453   :  { %v3628_v16 = vadd.s32 %v3627_v20, %v3618_v61  ;;  %vm3631_vm4 = vc.u32 %v9295_v4, %v9302_v54  ;;  %v3375_v23 = vsel %vm3373_vm14, %v3360_v60, %v3374_v40  ;;  %v3378_v19 = vsel %vm3376_vm15, %v3377_v51, %v3368_v41 }
 0x454   :  { %v3501_v21 = vcvt.s32.f32 %v3494_v58  ;;  %vm3724_vm10 = vcmp.lt.s32.totalorder %v8789_v15, 2  ;;  %v3379_v28 = vsel %vm3372_vm2, %v3375_v23, %v3378_v19  ;;  %v3499_v3 = vand.u32 2147483647, %v3498_v9  ;;  %v11485_v9 = vld [vmem:[#allocation27_spill] sm:$0xff] }
 0x455   :  { %v3632_v37 = vadd.s32 1, %v3628_v16  ;;  %v3734_v59 = vsel %vm3724_vm10, %v8842_v0, %v8866_v30  ;;  %v3380_v22 = vsel %vm3369_vm5, nan, %v3379_v28  ;;  %v3508_v11 = vsel %vm9291_vm0, 0, %v3506_v27 }
 0x456   :  { %v3629_v32 = vmul.u32 %v11481_v24, %v3575_v18  ;;  %v3738_v29 = vsel %vm3724_vm10, %v11482_v46, %v8884_v56  ;;  %5500 = vmatmul.msk.f32.gmra.mxu3 %vm1382_vm6, %v3380_v22  ;;  %v3502_v62 = vmul.f32 %v3501_v21, %v3499_v3  ;;  %v3891_v0 = vsel %vm3881_vm13, %v3877_v35, 1326507024  ;;  %v11486_v24 = vld [vmem:[#allocation32_spill] sm:$0xff] }
 0x457   :  { %v3633_v42 = vsel %vm3631_vm4, %v3632_v37, %v3628_v16  ;;  %v3742_v8 = vand.u32 65535, %v3738_v29  ;;  %v3743_v12 = vshrl.u32 %v3738_v29, 16  ;;  %v3764_v50 = vand.u32 65535, %v3734_v59 }
 0x458   :  { %v3634_v30 = vadd.s32 %v3633_v42, %v3629_v32  ;;  %v3765_v39 = vshrl.u32 %v3734_v59, 16  ;;  %v9339_v56 = vsel %vm3878_vm12, %v9037_v13, %v9041_v17  ;;  %v3503_v44 = vxor.u32 2147483648, %v3502_v62 }
 0x459   :  { %v3745_v63 = vmul.u32 %v3743_v12, %v11483_v57  ;;  %v9343_v47 = vmul.u32 %v3742_v8, %v11484_v5  ;;  %v9349_v36 = vsel %vm3880_vm9, %v9041_v17, %v9236_v6  ;;  %v3525_v25 = vadd.s32 3, %v3508_v11 }
 0x45a   :  { %v3635_v35 = vadd.s32 536870912, %v3634_v30  ;;  %v9352_v48 = vmul.u32 %v3765_v39, %v11483_v57  ;;  %v9357_v26 = vsel %vm3880_vm9, %v9091_v33, %v3891_v0  ;;  %v3504_v60 = vsel %vm3383_vm7, %v3503_v44, %v3502_v62 }
 0x45b   :  { %v3744_v7 = vmul.u32 %v3742_v8, %v11483_v57  ;;  %v3748_v14 = vshll.u32 %v3745_v63, 16  ;;  %v3507_v6 = vsel %vm9291_vm0, %v11477_v38, %v3504_v60  ;;  %v3747_v43 = vmul.u32 %v3743_v12, %v11484_v5 }
 0x45c   :  { %v9365_v52 = vshrl.u32 %v3635_v35, 30  ;;  %v9369_v45 = vmul.u32 %v3764_v50, %v11484_v5  ;;  %v3509_v2 = vmul.f32 %v3507_v6, %v3507_v6  ;;  %v3750_v33 = vshll.u32 %v9343_v47, 16 }
 0x45d   :  { %vm3752_vm11 = vc.u32 %v3744_v7, %v3748_v14  ;;  %v3754_v41 = vadd.s32 %v3748_v14, %v3744_v7  ;;  %v9372_v51 = vand.u32 3, %v3525_v25  ;;  %v3770_v49 = vshll.u32 %v9352_v48, 16 }
 0x45e   :  { %v3637_v61 = vshll.u32 %v9365_v52, 30  ;;  %v3753_v58 = vsel %vm3752_vm11, 1, %v11134_v31  ;;  %v3510_v53 = vmul.f32 -0.001358992, %v3509_v2  ;;  %v3517_v20 = vmul.f32 -0.00019511016, %v3509_v2 }
 0x45f   :  { %v3755_v40 = vadd.s32 %v3753_v58, %v3747_v43  ;;  %vm3756_vm7 = vc.u32 %v3754_v41, %v3750_v33  ;;  %v3707_v27 = vshrl.u32 %v11115_v1, %v11485_v9  ;;  %v3766_v23 = vmul.u32 %v3764_v50, %v11483_v57  ;;  %v11487_v50 = vld [vmem:[#allocation33_spill] sm:$0xff]  ;;  %v11489_v57 = vld [vmem:[#allocation34_spill] sm:$0xff] }
 0x460   :  { %v9377_v18 = vsub.s32 %v3634_v30, %v3637_v61  ;;  %v3757_v16 = vsel %vm3756_vm7, 1, %v11134_v31  ;;  %v3511_v19 = vadd.f32 0.041655596, %v3510_v53  ;;  %v3518_v21 = vadd.f32 0.008332121, %v3517_v20 }
 0x461   :  { %v3759_v28 = vadd.s32 %v3757_v16, %v3755_v40  ;;  %v3772_v3 = vshll.u32 %v9369_v45, 16  ;;  %vm3774_vm5 = vc.u32 %v3766_v23, %v3770_v49  ;;  %v3776_v59 = vadd.s32 %v3770_v49, %v3766_v23 }
 0x462   :  { %vm3639_vm8 = vcmp.lt.s32.totalorder %v9377_v18, 0  ;;  %v3640_v37 = vsub.s32 0, %v9377_v18  ;;  %v3512_v22 = vmul.f32 %v3511_v19, %v3509_v2  ;;  %v3519_v11 = vmul.f32 %v3518_v21, %v3509_v2 }
 0x463   :  { %v3728_v32 = vsel %vm3726_vm1, %v11486_v24, 2102212464  ;;  %v3749_v46 = vshrl.u32 %v3745_v63, 16  ;;  %v3769_v62 = vmul.u32 %v3765_v39, %v11484_v5  ;;  %v3775_v42 = vsel %vm3774_vm5, 1, %v11134_v31  ;;  %v11492_v24 = vld [vmem:[#allocation17_spill] sm:$0xff] }
 0x464   :  { %v3641_v29 = vsel %vm3639_vm8, %v3640_v37, %v9377_v18  ;;  %vm3778_vm0 = vc.u32 %v3776_v59, %v3772_v3  ;;  %v3513_v8 = vadd.f32 -0.4999988, %v3512_v22  ;;  %v3520_v12 = vadd.f32 -0.16666654, %v3519_v11 }
 0x465   :  { %v3642_v0 = vclz %v3641_v29  ;;  %v3760_v30 = vadd.s32 %v3759_v28, %v3749_v46  ;;  %vm11488_vm3 = vcmp.lt.s32.totalorder %v8789_v15, 1  ;;  %vm11490_vm2 = vcmp.lt.s32.totalorder %v8789_v15, 3 }
 0x466   :  { %v3727_v44 = vsel %vm11488_vm3, %v3707_v27, %v11487_v50  ;;  %v3729_v25 = vsel %vm11490_vm2, %v11489_v57, %v3728_v32  ;;  %v3777_v63 = vadd.s32 %v3775_v42, %v3769_v62  ;;  %v3779_v35 = vsel %vm3778_vm0, 1, %v11134_v31  ;;  %v11493_v57 = vld [vmem:[#allocation45_spill] sm:$0xff] }
 0x467   :  { %v3514_v60 = vmul.f32 %v3513_v8, %v3509_v2  ;;  %v3521_v39 = vmul.f32 %v3520_v12, %v3509_v2  ;;  %v5489_v5 = vadd.s32 4294967294, %v3642_v0  ;;  %v3751_v7 = vshrl.u32 %v9343_v47, 16 }
 0x468   :  { %vm3524_vm1 = vweird.f32 %v11477_v38  ;;  %vm3527_vm14 = vcmp.lt.s32.totalorder %v9372_v51, 2  ;;  %v3630_v14 = vadd.s32 %v9302_v54, %v9295_v4  ;;  %v3771_v43 = vshrl.u32 %v9352_v48, 16 }
 0x469   :  { %v3781_v33 = vadd.s32 %v3779_v35, %v3777_v63  ;;  %v3515_v41 = vadd.f32 1.0, %v3514_v60  ;;  %v3522_v61 = vadd.f32 1.0, %v3521_v39  ;;  %vm5490_vm15 = vcmp.lt.s32.totalorder %v5489_v5, 0 }
 0x46a   :  { %v9405_v58 = vadd.s32 %v3760_v30, %v3751_v7  ;;  %v3645_v49 = vsel %vm5490_vm15, 0, %v5489_v5  ;;  %v3730_v2 = vsel %vm3724_vm10, %v3727_v44, %v3729_v25  ;;  %v3773_v47 = vshrl.u32 %v9369_v45, 16  ;;  %v11491_v45 = vld [vmem:[#allocation39_spill] sm:$0xff] }
 0x46b   :  { %v3782_v53 = vadd.s32 %v3781_v33, %v3771_v43  ;;  %v3523_v20 = vmul.f32 %v3522_v61, %v3507_v6  ;;  %v3532_v40 = vxor.u32 2147483648, %v3515_v41  ;;  %v3646_v9 = vsub.s32 32, %v3645_v49 }
 0x46c   :  { %v9410_v27 = vadd.s32 %v3776_v59, %v3772_v3  ;;  %vm3528_vm4 = vcmp.eq.s32.totalorder %v9372_v51, 0  ;;  %vm3531_vm11 = vcmp.eq.s32.totalorder %v9372_v51, 2  ;;  %v3650_v4 = vsub.s32 4294967266, %v3645_v49 }
 0x46d   :  { %v3783_v54 = vadd.s32 %v3782_v53, %v3773_v47  ;;  %v3529_v48 = vxor.u32 2147483648, %v3523_v20  ;;  %v3647_v16 = vshll.u32 %v9377_v18, %v3645_v49  ;;  %v3648_v23 = vshrl.u32 %v3630_v14, %v3646_v9 }
 0x46e   :  { %vm3786_vm10 = vc.u32 %v9405_v58, %v9410_v27  ;;  %v3651_v15 = vadd.s32 127, %v3650_v4  ;;  %v3784_v6 = vmul.u32 %v11491_v45, %v3730_v2  ;;  %vm3879_vm7 = vcmp.lt.s32.totalorder %v8896_v55, 2 }
 0x46f   :  { %v3787_v19 = vadd.s32 1, %v3783_v54  ;;  %v3530_v21 = vsel %vm3528_vm4, %v3515_v41, %v3529_v48  ;;  %v3533_v28 = vsel %vm3531_vm11, %v3532_v40, %v3523_v20  ;;  %v3649_v3 = vor.u32 %v3648_v23, %v3647_v16  ;;  %v11497_v16 = vld [vmem:[#allocation52_spill] sm:$0xff] }
 0x470   :  { %v3889_v37 = vsel %vm3879_vm7, %v9142_v34, %v9349_v36  ;;  %v3534_v18 = vsel %vm3527_vm14, %v3530_v21, %v3533_v28  ;;  %v3652_v59 = vshll.u32 %v3651_v15, 23  ;;  %v3893_v11 = vsel %vm3879_vm7, %v9339_v56, %v9357_v26 }
 0x471   :  { %v3788_v22 = vsel %vm3786_vm10, %v3787_v19, %v3783_v54  ;;  %v3895_v32 = vand.u32 65535, %v11492_v24  ;;  %v3535_v46 = vsel %vm3524_vm1, nan, %v3534_v18  ;;  %v3897_v62 = vand.u32 65535, %v3893_v11 }
 0x472   :  { %v3789_v29 = vadd.s32 %v3788_v22, %v3784_v6  ;;  %v3896_v42 = vshrl.u32 %v11492_v24, 16  ;;  %5501 = vmatmul.msk.f32.gmra.mxu3 %vm1382_vm6, %v3535_v46  ;;  %v3653_v34 = vor.u32 4788187, %v3652_v59  ;;  %v3898_v36 = vshrl.u32 %v3893_v11, 16 }
 0x473   :  { %v3920_v51 = vshrl.u32 %v3889_v37, 16  ;;  %v3660_v8 = vsub.s32 4, %v9365_v52  ;;  %v3656_v30 = vcvt.s32.f32 %v3649_v3  ;;  %v3919_v38 = vand.u32 65535, %v3889_v37 }
 0x474   :  { %v3790_v12 = vadd.s32 536870912, %v3789_v29  ;;  %v3654_v0 = vand.u32 2147483647, %v3653_v34  ;;  %v3900_v56 = vmul.u32 %v3898_v36, %v3895_v32  ;;  %v9435_v26 = vmul.u32 %v3897_v62, %v3896_v42 }
 0x475   :  { %v9439_v44 = vmul.u32 %v3920_v51, %v3895_v32  ;;  %vm3538_vm8 = vcmp.lt.s32.totalorder %v11493_v57, 0  ;;  %v3899_v63 = vmul.u32 %v3897_v62, %v3895_v32  ;;  %v11494_v60 = vand.u32 2147483647, %v11493_v57 }
 0x476   :  { %v9437_v50 = vshrl.u32 %v3790_v12, 30  ;;  %v3657_v25 = vmul.f32 %v3656_v30, %v3654_v0  ;;  %v3903_v35 = vshll.u32 %v3900_v56, 16  ;;  %v3661_v5 = vsel %vm3538_vm8, %v3660_v8, %v9365_v52 }
 0x477   :  { %vm9444_vm5 = vcmp.le.f32.partialorder %v11494_v60, 0.7853982  ;;  %v3902_v14 = vmul.u32 %v3898_v36, %v3896_v42  ;;  %v3905_v33 = vshll.u32 %v9435_v26, 16  ;;  %v3923_v2 = vmul.u32 %v3919_v38, %v3896_v42 }
 0x478   :  { %v3792_v7 = vshll.u32 %v9437_v50, 30  ;;  %v3658_v43 = vxor.u32 2147483648, %v3657_v25  ;;  %vm3907_vm0 = vc.u32 %v3899_v63, %v3903_v35  ;;  %v3909_v41 = vadd.s32 %v3903_v35, %v3899_v63 }
 0x479   :  { %v3908_v49 = vsel %vm3907_vm0, 1, %v11134_v31  ;;  %v3925_v47 = vshll.u32 %v9439_v44, 16  ;;  %v3921_v52 = vmul.u32 %v3919_v38, %v3895_v32  ;;  %v3663_v54 = vsel %vm9444_vm5, 0, %v3661_v5 }
 0x47a   :  { %v9453_v61 = vsub.s32 %v3789_v29, %v3792_v7  ;;  %v3659_v53 = vsel %vm3538_vm8, %v3658_v43, %v3657_v25  ;;  %v3910_v20 = vadd.s32 %v3908_v49, %v3902_v14  ;;  %vm3911_vm3 = vc.u32 %v3909_v41, %v3905_v33 }
 0x47b   :  { %v3662_v40 = vsel %vm9444_vm5, %v11493_v57, %v3659_v53  ;;  %v3912_v4 = vsel %vm3911_vm3, 1, %v11134_v31  ;;  %v3862_v23 = vshrl.u32 %v11115_v1, %v11497_v16  ;;  %v3927_v6 = vshll.u32 %v3923_v2, 16 }
 0x47c   :  { %vm3794_vm2 = vcmp.lt.s32.totalorder %v9453_v61, 0  ;;  %v3795_v9 = vsub.s32 0, %v9453_v61  ;;  %v3664_v48 = vmul.f32 %v3662_v40, %v3662_v40  ;;  %v3914_v15 = vadd.s32 %v3912_v4, %v3910_v20 }
 0x47d   :  { %vm3929_vm1 = vc.u32 %v3921_v52, %v3925_v47  ;;  %v3931_v19 = vadd.s32 %v3925_v47, %v3921_v52  ;;  %v3904_v37 = vshrl.u32 %v3900_v56, 16  ;;  %v3883_v18 = vsel %vm3881_vm13, %v9041_v17, 2102212464 }
 0x47e   :  { %v3796_v45 = vsel %vm3794_vm2, %v3795_v9, %v9453_v61  ;;  %v3665_v21 = vmul.f32 -0.001358992, %v3664_v48  ;;  %v3672_v28 = vmul.f32 -0.00019511016, %v3664_v48  ;;  %v3924_v59 = vmul.u32 %v3920_v51, %v3896_v42 }
 0x47f   :  { %v3797_v3 = vclz %v3796_v45  ;;  %v3930_v22 = vsel %vm3929_vm1, 1, %v11134_v31  ;;  %vm3933_vm14 = vc.u32 %v3931_v19, %v3927_v6  ;;  %v3915_v29 = vadd.s32 %v3914_v15, %v3904_v37 }
 0x480   :  { %v3666_v11 = vadd.f32 0.041655596, %v3665_v21  ;;  %v3673_v32 = vadd.f32 0.008332121, %v3672_v28  ;;  %v3785_v62 = vadd.s32 %v9410_v27, %v9405_v58  ;;  %v3882_v34 = vsel %vm3878_vm12, %v3862_v23, %v9000_v10  ;;  %v11498_v28 = vld [vmem:[#allocation11_spill] sm:$0xff] }
 0x481   :  { %v5492_v46 = vadd.s32 4294967294, %v3797_v3  ;;  %v3906_v36 = vshrl.u32 %v9435_v26, 16  ;;  %v3932_v8 = vadd.s32 %v3930_v22, %v3924_v59  ;;  %v3934_v42 = vsel %vm3933_vm14, 1, %v11134_v31 }
 0x482   :  { %v3667_v12 = vmul.f32 %v3666_v11, %v3664_v48  ;;  %v3674_v17 = vmul.f32 %v3673_v32, %v3664_v48  ;;  %v3884_v0 = vsel %vm3880_vm9, %v9037_v13, %v3883_v18  ;;  %v3926_v30 = vshrl.u32 %v9439_v44, 16 }
 0x483   :  { %vm5493_vm13 = vcmp.lt.s32.totalorder %v5492_v46, 0  ;;  %v3936_v58 = vadd.s32 %v3934_v42, %v3932_v8  ;;  %v9485_v10 = vadd.s32 %v3915_v29, %v3906_v36  ;;  %v3680_v26 = vadd.s32 3, %v3663_v54 }
 0x484   :  { %v3800_v51 = vsel %vm5493_vm13, 0, %v5492_v46  ;;  %v3668_v27 = vadd.f32 -0.4999988, %v3667_v12  ;;  %v3675_v56 = vadd.f32 -0.16666654, %v3674_v17  ;;  %v3928_v63 = vshrl.u32 %v3923_v2, 16 }
 0x485   :  { %v3801_v38 = vsub.s32 32, %v3800_v51  ;;  %v3805_v25 = vsub.s32 4294967266, %v3800_v51  ;;  %v3937_v35 = vadd.s32 %v3936_v58, %v3926_v30  ;;  %v3935_v7 = vadd.s32 %v3931_v19, %v3927_v6 }
 0x486   :  { %v3669_v60 = vmul.f32 %v3668_v27, %v3664_v48  ;;  %v3676_v39 = vmul.f32 %v3675_v56, %v3664_v48  ;;  %v3802_v14 = vshll.u32 %v9453_v61, %v3800_v51  ;;  %v3885_v13 = vsel %vm3879_vm7, %v3882_v34, %v3884_v0 }
 0x487   :  { %v3803_v5 = vshrl.u32 %v3785_v62, %v3801_v38  ;;  %v3806_v43 = vadd.s32 127, %v3805_v25  ;;  %v3938_v44 = vadd.s32 %v3937_v35, %v3928_v63  ;;  %vm3941_vm12 = vc.u32 %v9485_v10, %v3935_v7 }
 0x488   :  { %v3670_v33 = vadd.f32 1.0, %v3669_v60  ;;  %v3677_v41 = vadd.f32 1.0, %v3676_v39  ;;  %v3681_v49 = vand.u32 3, %v3680_v26  ;;  %v3939_v9 = vmul.u32 %v11492_v24, %v3885_v13 }
 0x489   :  { %v3804_v47 = vor.u32 %v3803_v5, %v3802_v14  ;;  %v3807_v53 = vshll.u32 %v3806_v43, 23  ;;  %v3942_v2 = vadd.s32 1, %v3938_v44  ;;  %vm3679_vm11 = vweird.f32 %v11493_v57 }
 0x48a   :  { %v3678_v20 = vmul.f32 %v3677_v41, %v3662_v40  ;;  %v3687_v52 = vxor.u32 2147483648, %v3670_v33  ;;  %vm3683_vm9 = vcmp.eq.s32.totalorder %v3681_v49, 0  ;;  %vm3686_vm15 = vcmp.eq.s32.totalorder %v3681_v49, 2 }
 0x48b   :  { %v3808_v4 = vor.u32 4788187, %v3807_v53  ;;  %v3943_v54 = vsel %vm3941_vm12, %v3942_v2, %v3938_v44  ;;  %v3811_v16 = vcvt.s32.f32 %v3804_v47  ;;  %vm3682_vm4 = vcmp.lt.s32.totalorder %v3681_v49, 2 }
 0x48c   :  { %v3684_v61 = vxor.u32 2147483648, %v3678_v20  ;;  %v3944_v48 = vadd.s32 %v3943_v54, %v3939_v9  ;;  %v3688_v15 = vsel %vm3686_vm15, %v3687_v52, %v3678_v20  ;;  %vm3693_vm10 = vcmp.lt.s32.totalorder %v11498_v28, 0 }
 0x48d   :  { %v3809_v55 = vand.u32 2147483647, %v3808_v4  ;;  %v11499_v37 = vand.u32 2147483647, %v11498_v28  ;;  %v3815_v57 = vsub.s32 4, %v9437_v50  ;;  %v3940_v63 = vadd.s32 %v3935_v7, %v9485_v10 }
 0x48e   :  { %v3685_v23 = vsel %vm3683_vm9, %v3670_v33, %v3684_v61  ;;  %v3945_v45 = vadd.s32 536870912, %v3944_v48  ;;  %vm3834_vm1 = vweird.f32 %v11498_v28  ;;  %v11502_v61 = vld [vmem:[#allocation21_spill] sm:$0xff] }
 0x48f   :  { %v3689_v6 = vsel %vm3682_vm4, %v3685_v23, %v3688_v15  ;;  %v3812_v19 = vmul.f32 %v3811_v16, %v3809_v55  ;;  %vm9500_vm7 = vcmp.le.f32.partialorder %v11499_v37, 0.7853982  ;;  %v3816_v34 = vsel %vm3693_vm10, %v3815_v57, %v9437_v50 }
 0x490   :  { %v3690_v40 = vsel %vm3679_vm11, nan, %v3689_v6  ;;  %v9493_v21 = vshrl.u32 %v3945_v45, 30  ;;  %v3818_v42 = vsel %vm9500_vm7, 0, %v3816_v34  ;;  %vm3848_vm14 = vcmp.lt.s32.totalorder %v11502_v61, 0 }
 0x491   :  { %5502 = vmatmul.msk.f32.gmra.mxu3 %vm1382_vm6, %v3690_v40  ;;  %v3813_v24 = vxor.u32 2147483648, %v3812_v19  ;;  %v3835_v56 = vadd.s32 3, %v3818_v42  ;;  %vm3989_vm4 = vweird.f32 %v11502_v61  ;;  %v4050_v42 = vpop.f32.mrf.mxu3 }
 0x492   :  { %v3947_v3 = vshll.u32 %v9493_v21, 30  ;;  %v3970_v16 = vsub.s32 4, %v9493_v21 }
 0x493   :  { %v3814_v59 = vsel %vm3693_vm10, %v3813_v24, %v3812_v19  ;;  %v3836_v14 = vand.u32 3, %v3835_v56 }
 0x494   :  { %v3817_v22 = vsel %vm9500_vm7, %v11498_v28, %v3814_v59  ;;  %v3948_v11 = vsub.s32 %v3944_v48, %v3947_v3  ;;  %v11503_v48 = vand.u32 2147483647, %v11502_v61  ;;  %v3971_v19 = vsel %vm3848_vm14, %v3970_v16, %v9493_v21 }
 0x495   :  { %v3819_v32 = vmul.f32 %v3817_v22, %v3817_v22  ;;  %vm3838_vm0 = vcmp.eq.s32.totalorder %v3836_v14, 0  ;;  %vm3841_vm3 = vcmp.eq.s32.totalorder %v3836_v14, 2  ;;  %vm3837_vm2 = vcmp.lt.s32.totalorder %v3836_v14, 2 }
 0x496   :  { %vm3949_vm8 = vcmp.lt.s32.totalorder %v3948_v11, 0  ;;  %v3950_v46 = vsub.s32 0, %v3948_v11  ;;  %vm3847_vm13 = vcmp.le.f32.partialorder %v11503_v48, 0.7853982 }
 0x497   :  { %v3820_v29 = vmul.f32 -0.001358992, %v3819_v32  ;;  %v3827_v62 = vmul.f32 -0.00019511016, %v3819_v32  ;;  %v3973_v28 = vsel %vm3847_vm13, 0, %v3971_v19 }
 0x498   :  { %v3951_v36 = vsel %vm3949_vm8, %v3950_v46, %v3948_v11  ;;  %v3990_v57 = vadd.s32 3, %v3973_v28 }
 0x499   :  { %v3821_v8 = vadd.f32 0.041655596, %v3820_v29  ;;  %v3828_v12 = vadd.f32 0.008332121, %v3827_v62  ;;  %v3952_v17 = vclz %v3951_v36 }
 0x49a   :  { %v3991_v29 = vand.u32 3, %v3990_v57 }
 0x49b   :  { %v3822_v51 = vmul.f32 %v3821_v8, %v3819_v32  ;;  %v3829_v0 = vmul.f32 %v3828_v12, %v3819_v32  ;;  %v5495_v30 = vadd.s32 4294967294, %v3952_v17  ;;  %v9523_v12 = vld [vmem:[%s10805_s8] ss:$0 sm:$0xff] }
 0x49c   :  { %vm3993_vm12 = vcmp.eq.s32.totalorder %v3991_v29, 0  ;;  %vm3996_vm9 = vcmp.eq.s32.totalorder %v3991_v29, 2  ;;  %vm3992_vm15 = vcmp.lt.s32.totalorder %v3991_v29, 2 }
 0x49d   :  { %v3823_v58 = vadd.f32 -0.4999988, %v3822_v51  ;;  %v3830_v27 = vadd.f32 -0.16666654, %v3829_v0  ;;  %vm5496_vm5 = vcmp.lt.s32.totalorder %v5495_v30, 0  ;;  %v9528_v0 = vadd.f32 %v9523_v12, %v4050_v42 }
 0x49e   :  { %v3955_v38 = vsel %vm5496_vm5, 0, %v5495_v30 }
 0x49f   :  { %v3824_v26 = vmul.f32 %v3823_v58, %v3819_v32  ;;  %v3831_v25 = vmul.f32 %v3830_v27, %v3819_v32  ;;  %v3956_v50 = vsub.s32 32, %v3955_v38  ;;  %v3960_v35 = vsub.s32 4294967266, %v3955_v38 }
 0x4a0   :  { %v3957_v43 = vshll.u32 %v3948_v11, %v3955_v38  ;;  %v4077_v30 = vand.u32 2139095040, %v9528_v0  ;;  %v11024_v14 = vand.u32 2147483647, %v9528_v0 }
 0x4a1   :  { %v3825_v60 = vadd.f32 1.0, %v3824_v26  ;;  %v3832_v39 = vadd.f32 1.0, %v3831_v25  ;;  %v3958_v5 = vshrl.u32 %v3940_v63, %v3956_v50  ;;  %v3961_v13 = vadd.s32 127, %v3960_v35 }
 0x4a2   :  { %v4078_v58 = vshrl.u32 %v4077_v30, 23  ;;  %v4053_v38 = vpop.f32.mrf.mxu3 }
 0x4a3   :  { %v3833_v44 = vmul.f32 %v3832_v39, %v3817_v22  ;;  %v3842_v33 = vxor.u32 2147483648, %v3825_v60  ;;  %v3959_v41 = vor.u32 %v3958_v5, %v3957_v43  ;;  %v3962_v49 = vshll.u32 %v3961_v13, 23 }
 0x4a4   :  { %v5505_v27 = vadd.s32 4294967169, %v4078_v58  ;;  %v9532_v50 = vadd.f32 %v9523_v12, %v4053_v38  ;;  %v11506_v43 = vmov 920167782  }
 0x4a5   :  { %v3839_v47 = vxor.u32 2147483648, %v3833_v44  ;;  %v3963_v53 = vor.u32 4788187, %v3962_v49  ;;  %v3843_v20 = vsel %vm3841_vm3, %v3842_v33, %v3833_v44  ;;  %v3966_v52 = vcvt.s32.f32 %v3959_v41 }
 0x4a6   :  { %v4084_v56 = vadd.s32 1, %v5505_v27  ;;  %11504 = vst [vmem:[#allocation58_spill] sm:$0xff] %v9532_v50  ;;  %v4232_v5 = vand.u32 2139095040, %v9532_v50  ;;  %v11507_v33 = vmov 2131351028  }
 0x4a7   :  { %v3840_v2 = vsel %vm3838_vm0, %v3825_v60, %v3839_v47  ;;  %v3964_v7 = vand.u32 2147483647, %v3963_v53  ;;  %v11505_v60 = vmov 1326507024   ;;  %v11508_v49 = vmov 2102212464  }
 0x4a8   :  { %v3844_v10 = vsel %vm3837_vm2, %v3840_v2, %v3843_v20  ;;  %vm4085_vm11 = vcmp.gt.s32.totalorder %v4084_v56, 0  ;;  %v4233_v20 = vshrl.u32 %v4232_v5, 23  ;;  %v11023_v57 = vand.u32 2147483647, %v9532_v50 }
 0x4a9   :  { %v3845_v9 = vsel %vm3834_vm1, nan, %v3844_v10  ;;  %v3967_v4 = vmul.f32 %v3966_v52, %v3964_v7  ;;  %v4086_v26 = vsel %vm4085_vm11, %v4084_v56, 0  ;;  %v11510_v7 = vmov 2475754826  }
 0x4aa   :  { %5503 = vmatmul.msk.f32.gmra.mxu3 %vm1382_vm6, %v3845_v9  ;;  %v4088_v25 = vand.u32 31, %v4086_v26  ;;  %v4087_v44 = vshrl.u32 %v4086_v26, 5 }
 0x4ab   :  { %v3968_v54 = vxor.u32 2147483648, %v3967_v4 }
 0x4ac   :  { %v4089_v63 = vsub.s32 32, %v4088_v25  ;;  %v4103_v13 = vshll.u32 %v11506_v43, %v4088_v25  ;;  %v4094_v52 = vshll.u32 %v11510_v7, %v4088_v25  ;;  %v4097_v9 = vshll.u32 %v11507_v33, %v4088_v25 }
 0x4ad   :  { %v3969_v55 = vsel %vm3848_vm14, %v3968_v54, %v3967_v4  ;;  %v4100_v4 = vshll.u32 %v11508_v49, %v4088_v25  ;;  %v4081_v54 = vand.u32 8388607, %v11024_v14  ;;  %vm4109_vm10 = vcmp.lt.s32.totalorder %v4087_v44, 4 }
 0x4ae   :  { %v3972_v23 = vsel %vm3847_vm13, %v11502_v61, %v3969_v55  ;;  %v4104_v39 = vshrl.u32 %v11505_v60, %v4089_v63  ;;  %v4095_v41 = vshrl.u32 %v11507_v33, %v4089_v63  ;;  %v4098_v47 = vshrl.u32 %v11508_v49, %v4089_v63 }
 0x4af   :  { %v3974_v15 = vmul.f32 %v3972_v23, %v3972_v23  ;;  %v4101_v53 = vshrl.u32 %v11506_v43, %v4089_v63  ;;  %v4092_v16 = vshrl.u32 %v11510_v7, %v4089_v63  ;;  %v4091_v19 = vshll.u32 %v11115_v1, %v4088_v25 }
 0x4b0   :  { %v4105_v2 = vor.u32 %v4104_v39, %v4103_v13  ;;  %v4096_v61 = vor.u32 %v4095_v41, %v4094_v52  ;;  %v4099_v48 = vor.u32 %v4098_v47, %v4097_v9  ;;  %vm4106_vm7 = vcmp.lt.s32.totalorder %v4087_v44, 1 }
 0x4b1   :  { %v3975_v45 = vmul.f32 -0.001358992, %v3974_v15  ;;  %v3982_v6 = vmul.f32 -0.00019511016, %v3974_v15  ;;  %v4102_v55 = vor.u32 %v4101_v53, %v4100_v4  ;;  %vm4108_vm8 = vcmp.lt.s32.totalorder %v4087_v44, 3 }
 0x4b2   :  { %vm4107_vm5 = vcmp.lt.s32.totalorder %v4087_v44, 2 }
 0x4b3   :  { %v3976_v40 = vadd.f32 0.041655596, %v3975_v45  ;;  %v3983_v24 = vadd.f32 0.008332121, %v3982_v6 }
 0x4b5   :  { %v3977_v3 = vmul.f32 %v3976_v40, %v3974_v15  ;;  %v3984_v37 = vmul.f32 %v3983_v24, %v3974_v15  ;;  %v4082_v40 = vor.u32 8388608, %v4081_v54  ;;  %v4118_v24 = vsel %vm4106_vm7, %v4096_v61, %v4099_v48 }
 0x4b7   :  { %v3978_v18 = vadd.f32 -0.4999988, %v3977_v3  ;;  %v3985_v59 = vadd.f32 -0.16666654, %v3984_v37  ;;  %v4093_v3 = vor.u32 %v4092_v16, %v4091_v19 }
 0x4b9   :  { %v3979_v22 = vmul.f32 %v3978_v18, %v3974_v15  ;;  %v3986_v11 = vmul.f32 %v3985_v59, %v3974_v15  ;;  %v5508_v15 = vadd.s32 4294967169, %v4233_v20  ;;  %v4115_v59 = vsel %vm4109_vm10, %v4102_v55, 920167782 }
 0x4ba   :  { %v4116_v29 = vsel %vm4108_vm8, %v4099_v48, %v4115_v59 }
 0x4bb   :  { %v3980_v32 = vadd.f32 1.0, %v3979_v22  ;;  %v3987_v46 = vadd.f32 1.0, %v3986_v11  ;;  %v4239_v37 = vadd.s32 1, %v5508_v15 }
 0x4bd   :  { %v3988_v62 = vmul.f32 %v3987_v46, %v3972_v23  ;;  %v3997_v34 = vxor.u32 2147483648, %v3980_v32  ;;  %v4119_v23 = vsel %vm4109_vm10, %v4105_v2, 1326507024  ;;  %v4114_v46 = vsel %vm4106_vm7, %v4093_v3, %v4096_v61 }
 0x4be   :  { %v4120_v28 = vsel %vm4108_vm8, %v4102_v55, %v4119_v23  ;;  %vm4240_vm0 = vcmp.gt.s32.totalorder %v4239_v37, 0 }
 0x4bf   :  { %v3994_v36 = vxor.u32 2147483648, %v3988_v62  ;;  %v3998_v8 = vsel %vm3996_vm9, %v3997_v34, %v3988_v62  ;;  %v4121_v22 = vsel %vm4107_vm5, %v4118_v24, %v4120_v28  ;;  %v4111_v34 = vsel %vm4109_vm10, %v4099_v48, 2102212464 }
 0x4c0   :  { %v4241_v58 = vsel %vm4240_vm0, %v4239_v37, 0  ;;  %v4112_v56 = vsel %vm4108_vm8, %v4096_v61, %v4111_v34  ;;  %v4125_v38 = vand.u32 65535, %v4121_v22 }
 0x4c1   :  { %v3995_v21 = vsel %vm3993_vm12, %v3980_v32, %v3994_v36  ;;  %v4056_v35 = vpop.f32.mrf.mxu3  ;;  %v9561_v32 = vshll.u32 %v4082_v40, 8  ;;  %v4126_v36 = vshrl.u32 %v4121_v22, 16  ;;  %v4243_v13 = vand.u32 31, %v4241_v58 }
 0x4c2   :  { %v3999_v17 = vsel %vm3992_vm15, %v3995_v21, %v3998_v8  ;;  %v9542_v10 = vadd.f32 %v9523_v12, %v4056_v35  ;;  %v4236_v21 = vand.u32 8388607, %v11023_v57  ;;  %v4090_v8 = vshrl.u32 %v11115_v1, %v4089_v63 }
 0x4c3   :  { %v4000_v51 = vsel %vm3989_vm4, nan, %v3999_v17  ;;  %v4123_v30 = vand.u32 65535, %v9561_v32  ;;  %v4124_v63 = vshrl.u32 %v9561_v32, 16  ;;  %v9593_v61 = vsub.s32 32, %v4243_v13 }
 0x4c4   :  { %5504 = vmatmul.msk.f32.gmra.mxu3 %vm1382_vm6, %v4000_v51  ;;  %11509 = vst [vmem:[#allocation31_spill] sm:$0xff] %v9542_v10  ;;  %v4387_v45 = vand.u32 2139095040, %v9542_v10  ;;  %v4117_v51 = vsel %vm4107_vm5, %v4114_v46, %v4116_v29  ;;  %v4110_v27 = vsel %vm4106_vm7, %v4090_v8, %v4093_v3  ;;  %v4237_v35 = vor.u32 8388608, %v4236_v21 }
 0x4c5   :  { %v9574_v25 = vmul.u32 %v4126_v36, %v4123_v30  ;;  %v4147_v5 = vand.u32 65535, %v4117_v51  ;;  %v9581_v47 = vsel %vm4107_vm5, %v4110_v27, %v4112_v56  ;;  %v9583_v53 = vmul.u32 %v4125_v38, %v4124_v63 }
 0x4c6   :  { %v4388_v18 = vshrl.u32 %v4387_v45, 23  ;;  %v4148_v2 = vshrl.u32 %v4117_v51, 16  ;;  %v9586_v52 = vshll.u32 %v4237_v35, 8  ;;  %v4127_v48 = vmul.u32 %v4125_v38, %v4123_v30 }
 0x4c7   :  { %v4131_v20 = vshll.u32 %v9574_v25, 16  ;;  %v9589_v4 = vmul.u32 %v4147_v5, %v4123_v30  ;;  %v9595_v55 = vmul.u32 %v4147_v5, %v4124_v63  ;;  %v11022_v16 = vand.u32 2147483647, %v9542_v10 }
 0x4c8   :  { %v5511_v62 = vadd.s32 4294967169, %v4388_v18  ;;  %v4130_v15 = vmul.u32 %v4126_v36, %v4124_v63  ;;  %v9601_v19 = vmul.u32 %v4148_v2, %v4124_v63  ;;  %v9604_v40 = vand.u32 65535, %v9586_v52 }
 0x4c9   :  { %vm4135_vm2 = vc.u32 %v4127_v48, %v4131_v20  ;;  %v9607_v24 = vshrl.u32 %v9586_v52, 16  ;;  %v4247_v3 = vshrl.u32 %v11510_v7, %v9593_v61  ;;  %v4250_v37 = vshrl.u32 %v11507_v33, %v9593_v61 }
 0x4ca   :  { %v4394_v26 = vadd.s32 1, %v5511_v62  ;;  %v9613_v22 = vadd.s32 %v4131_v20, %v4127_v48  ;;  %v9615_v46 = vshrl.u32 %v4241_v58, 5  ;;  %v4256_v29 = vshrl.u32 %v11506_v43, %v9593_v61 }
 0x4cb   :  { %v4391_v62 = vand.u32 8388607, %v11022_v16  ;;  %v4136_v34 = vsel %vm4135_vm2, 1, %v11134_v31  ;;  %v4246_v36 = vshll.u32 %v11115_v1, %v4243_v13  ;;  %v4249_v21 = vshll.u32 %v11510_v7, %v4243_v13 }
 0x4cc   :  { %vm4395_vm3 = vcmp.gt.s32.totalorder %v4394_v26, 0  ;;  %v4255_v8 = vshll.u32 %v11508_v49, %v4243_v13  ;;  %v9636_v38 = vadd.s32 %v4136_v34, %v4130_v15  ;;  %v4258_v5 = vshll.u32 %v11506_v43, %v4243_v13 }
 0x4cd   :  { %v4396_v23 = vsel %vm4395_vm3, %v4394_v26, 0  ;;  %v9630_v58 = vor.u32 %v4247_v3, %v4246_v36  ;;  %v9632_v27 = vor.u32 %v4250_v37, %v4249_v21  ;;  %v4252_v26 = vshll.u32 %v11507_v33, %v4243_v13 }
 0x4ce   :  { %v4398_v18 = vand.u32 31, %v4396_v23  ;;  %v4257_v35 = vor.u32 %v4256_v29, %v4255_v8  ;;  %v4392_v63 = vor.u32 8388608, %v4391_v62  ;;  %vm4261_vm14 = vcmp.lt.s32.totalorder %v9615_v46, 1 }
 0x4cf   :  { %vm4263_vm13 = vcmp.lt.s32.totalorder %v9615_v46, 3  ;;  %vm4264_vm12 = vcmp.lt.s32.totalorder %v9615_v46, 4  ;;  %v9651_v48 = vsel %vm4261_vm14, %v9630_v58, %v9632_v27  ;;  %v9669_v21 = vshrl.u32 %v4396_v23, 5 }
 0x4d0   :  { %v9634_v56 = vsub.s32 32, %v4398_v18  ;;  %v4410_v37 = vshll.u32 %v11508_v49, %v4398_v18  ;;  %v4413_v34 = vshll.u32 %v11506_v43, %v4398_v18  ;;  %v4401_v8 = vshll.u32 %v11115_v1, %v4398_v18 }
 0x4d1   :  { %vm4419_vm15 = vcmp.lt.s32.totalorder %v9669_v21, 4  ;;  %vm4416_vm4 = vcmp.lt.s32.totalorder %v9669_v21, 1  ;;  %vm4418_vm11 = vcmp.lt.s32.totalorder %v9669_v21, 3 }
 0x4d2   :  { %v4411_v13 = vshrl.u32 %v11506_v43, %v9634_v56  ;;  %v4414_v15 = vshrl.u32 %v11505_v60, %v9634_v56  ;;  %v4402_v3 = vshrl.u32 %v11510_v7, %v9634_v56  ;;  %v4405_v29 = vshrl.u32 %v11507_v33, %v9634_v56 }
 0x4d3   :  { %v4408_v62 = vshrl.u32 %v11508_v49, %v9634_v56 }
 0x4d9   :  { %v4059_v6 = vpop.f32.mrf.mxu3 }
 0x4da   :  { %v9559_v11 = vadd.f32 %v9523_v12, %v4059_v6  ;;  %v9599_v6 = vmul.u32 %v4148_v2, %v4123_v30 }
 0x4dc   :  { %11511 = vst [vmem:[#allocation24_spill] sm:$0xff] %v9559_v11  ;;  %v4542_v17 = vand.u32 2139095040, %v9559_v11  ;;  %v11021_v51 = vand.u32 2147483647, %v9559_v11 }
 0x4de   :  { %v4543_v41 = vshrl.u32 %v4542_v17, 23  ;;  %v4253_v17 = vshrl.u32 %v11508_v49, %v9593_v61  ;;  %v4546_v2 = vand.u32 8388607, %v11021_v51  ;;  %v9687_v51 = vor.u32 %v4402_v3, %v4401_v8 }
 0x4e0   :  { %v5514_v44 = vadd.s32 4294967169, %v4543_v41  ;;  %v9643_v41 = vor.u32 %v4253_v17, %v4252_v26  ;;  %v4547_v17 = vor.u32 8388608, %v4546_v2  ;;  %v4412_v26 = vor.u32 %v4411_v13, %v4410_v37  ;;  %11514 = vst [vmem:[#allocation49_spill] sm:$0xff] %v9687_v51 }
 0x4e2   :  { %v4549_v59 = vadd.s32 1, %v5514_v44  ;;  %v9683_v23 = vsel %vm4261_vm14, %v9632_v27, %v9643_v41  ;;  %v4425_v3 = vsel %vm4419_vm15, %v4412_v26, 920167782 }
 0x4e4   :  { %vm4550_vm1 = vcmp.gt.s32.totalorder %v4549_v59, 0 }
 0x4e5   :  { %v4551_v20 = vsel %vm4550_vm1, %v4549_v59, 0  ;;  %v9662_v59 = vshll.u32 %v4392_v63, 8  ;;  %v4415_v63 = vor.u32 %v4414_v15, %v4413_v34  ;;  %v9699_v34 = vshll.u32 %v4547_v17, 8 }
 0x4e6   :  { %v4553_v36 = vand.u32 31, %v4551_v20  ;;  %v9745_v54 = vshrl.u32 %v4551_v20, 5 }
 0x4e7   :  { %11513 = vst [vmem:[#allocation5_spill] sm:$0xff] %v9662_v59  ;;  %v9697_v37 = vand.u32 65535, %v9662_v59 }
 0x4e8   :  { %v9693_v13 = vsub.s32 32, %v4553_v36  ;;  %11517 = vst [vmem:[#allocation19_spill] sm:$0xff] %v9699_v34  ;;  %v4565_v45 = vshll.u32 %v11508_v49, %v4553_v36  ;;  %v4559_v50 = vshll.u32 %v11510_v7, %v4553_v36  ;;  %vm4571_vm10 = vcmp.lt.s32.totalorder %v9745_v54, 1 }
 0x4e9   :  { %vm4573_vm7 = vcmp.lt.s32.totalorder %v9745_v54, 3  ;;  %vm4574_vm8 = vcmp.lt.s32.totalorder %v9745_v54, 4 }
 0x4ea   :  { %11516 = vst [vmem:[#allocation30_spill] sm:$0xff] %v9693_v13  ;;  %v4563_v20 = vshrl.u32 %v11508_v49, %v9693_v13 }
 0x4f5   :  { %v4062_v42 = vpop.f32.mrf.mxu3 }
 0x4f6   :  { %v9577_v39 = vadd.f32 %v9523_v12, %v4062_v42  ;;  %v4259_v42 = vshrl.u32 %v11505_v60, %v9593_v61 }
 0x4f8   :  { %11512 = vst [vmem:[#allocation25_spill] sm:$0xff] %v9577_v39  ;;  %v4697_v9 = vand.u32 2139095040, %v9577_v39  ;;  %v4260_v44 = vor.u32 %v4259_v42, %v4258_v5  ;;  %v4404_v42 = vshll.u32 %v11510_v7, %v4398_v18  ;;  %v11523_v11 = vand.u32 2147483647, %v9577_v39 }
 0x4fa   :  { %v4698_v28 = vshrl.u32 %v4697_v9, 23  ;;  %v4274_v2 = vsel %vm4264_vm12, %v4260_v44, 1326507024  ;;  %v9689_v16 = vor.u32 %v4405_v29, %v4404_v42  ;;  %v4569_v29 = vshrl.u32 %v11505_v60, %v9693_v13 }
 0x4fb   :  { %v9706_v44 = vsel %vm4263_vm13, %v4257_v35, %v4274_v2  ;;  %v4701_v10 = vand.u32 8388607, %v11523_v11  ;;  %v4556_v11 = vshll.u32 %v11115_v1, %v4553_v36 }
 0x4fc   :  { %v5517_v30 = vadd.s32 4294967169, %v4698_v28  ;;  %v4270_v28 = vsel %vm4264_vm12, %v4257_v35, 920167782  ;;  %11515 = vst [vmem:[#allocation9_spill] sm:$0xff] %v9689_v16  ;;  %v9723_v35 = vsel %vm4416_vm4, %v9687_v51, %v9689_v16 }
 0x4fd   :  { %v9677_v5 = vsel %vm4263_vm13, %v9643_v41, %v4270_v28  ;;  %11520 = vst [vmem:[#allocation57_spill] sm:$0xff] %v9723_v35 }
 0x4fe   :  { %v4704_v9 = vadd.s32 1, %v5517_v30  ;;  %v4407_v30 = vshll.u32 %v11507_v33, %v4398_v18 }
 0x500   :  { %vm4705_vm9 = vcmp.gt.s32.totalorder %v4704_v9, 0  ;;  %v9691_v18 = vor.u32 %v4408_v62, %v4407_v30  ;;  %v9715_v62 = vshrl.u32 %v9662_v59, 16  ;;  %v4566_v30 = vshrl.u32 %v11506_v43, %v9693_v13 }
 0x501   :  { %v4706_v15 = vsel %vm4705_vm9, %v4704_v9, 0  ;;  %v4429_v9 = vsel %vm4419_vm15, %v4415_v63, 1326507024  ;;  %v4568_v59 = vshll.u32 %v11506_v43, %v4553_v36 }
 0x502   :  { %11519 = vst [vmem:[#allocation41_spill] sm:$0xff] %v9715_v62  ;;  %v4708_v8 = vand.u32 31, %v4706_v15  ;;  %v9729_v42 = vsel %vm4416_vm4, %v9689_v16, %v9691_v18  ;;  %v9736_v63 = vsel %vm4418_vm11, %v9691_v18, %v4425_v3  ;;  %v9740_v2 = vsel %vm4418_vm11, %v4412_v26, %v4429_v9 }
 0x503   :  { %11521 = vst [vmem:[#allocation10_spill] sm:$0xff] %v9736_v63  ;;  %v4557_v3 = vshrl.u32 %v11510_v7, %v9693_v13  ;;  %v4560_v26 = vshrl.u32 %v11507_v33, %v9693_v13  ;;  %v9757_v9 = vshrl.u32 %v9699_v34, 16  ;;  %v4562_v62 = vshll.u32 %v11507_v33, %v4553_v36 }
 0x504   :  { %v4570_v63 = vor.u32 %v4569_v29, %v4568_v59  ;;  %v4720_v59 = vshll.u32 %v11508_v49, %v4708_v8  ;;  %v4714_v13 = vshll.u32 %v11510_v7, %v4708_v8  ;;  %v4723_v51 = vshll.u32 %v11506_v43, %v4708_v8 }
 0x505   :  { %11524 = vst [vmem:[#allocation42_spill] sm:$0xff] %v9757_v9  ;;  %v9770_v9 = vor.u32 %v4557_v3, %v4556_v11  ;;  %v9777_v39 = vor.u32 %v4563_v20, %v4562_v62  ;;  %v9792_v20 = vshrl.u32 %v4706_v15, 5 }
 0x506   :  { %v4584_v62 = vsel %vm4574_vm8, %v4570_v63, 1326507024 }
 0x507   :  { %11526 = vst [vmem:[#allocation54_spill] sm:$0xff] %v9770_v9  ;;  %vm4729_vm0 = vcmp.lt.s32.totalorder %v9792_v20, 4  ;;  %vm11059_vm3 = vcmp.lt.s32.totalorder %v9792_v20, 1  ;;  %vm11058_vm1 = vcmp.lt.s32.totalorder %v9792_v20, 3 }
 0x514   :  { %v4065_v28 = vpop.f32.mrf.mxu3 }
 0x515   :  { %v9702_v57 = vadd.f32 %v9523_v12, %v4065_v28  ;;  %v9743_v28 = vand.u32 65535, %v9699_v34  ;;  %v4702_v34 = vor.u32 8388608, %v4701_v10 }
 0x517   :  { %11518 = vst [vmem:[#allocation44_spill] sm:$0xff] %v9702_v57  ;;  %v4852_v17 = vand.u32 2139095040, %v9702_v57  ;;  %v11528_v36 = vand.u32 2147483647, %v9702_v57  ;;  %v9796_v57 = vshll.u32 %v4702_v34, 8  ;;  %v4717_v34 = vshll.u32 %v11507_v33, %v4708_v8 }
 0x518   :  { %11522 = vst [vmem:[#allocation29_spill] sm:$0xff] %v9743_v28  ;;  %v4567_v28 = vor.u32 %v4566_v30, %v4565_v45  ;;  %v9772_v45 = vor.u32 %v4560_v26, %v4559_v50 }
 0x519   :  { %v4853_v14 = vshrl.u32 %v4852_v17, 23  ;;  %v9759_v17 = vsub.s32 32, %v4708_v8  ;;  %v4856_v29 = vand.u32 8388607, %v11528_v36  ;;  %11529 = vst [vmem:[#allocation53_spill] sm:$0xff] %v9796_v57  ;;  %v4711_v36 = vshll.u32 %v11115_v1, %v4708_v8 }
 0x51a   :  { %11527 = vst [vmem:[#allocation43_spill] sm:$0xff] %v9772_v45  ;;  %v9811_v15 = vsel %vm4571_vm10, %v9772_v45, %v9777_v39  ;;  %v9837_v8 = vshrl.u32 %v9796_v57, 16 }
 0x51b   :  { %11525 = vst [vmem:[#allocation7_spill] sm:$0xff] %v9759_v17  ;;  %v5520_v35 = vadd.s32 4294967169, %v4853_v14  ;;  %v4721_v30 = vshrl.u32 %v11506_v43, %v9759_v17  ;;  %v4580_v14 = vsel %vm4574_vm8, %v4567_v28, 920167782  ;;  %v4712_v10 = vshrl.u32 %v11510_v7, %v9759_v17 }
 0x51c   :  { %v4715_v50 = vshrl.u32 %v11507_v33, %v9759_v17  ;;  %v4724_v3 = vshrl.u32 %v11505_v60, %v9759_v17  ;;  %v4718_v11 = vshrl.u32 %v11508_v49, %v9759_v17  ;;  %v4857_v63 = vor.u32 8388608, %v4856_v29  ;;  %11535 = vst [vmem:[#allocation20_spill] sm:$0xff] %v9837_v8 }
 0x51d   :  { %v4859_v26 = vadd.s32 1, %v5520_v35  ;;  %v4722_v16 = vor.u32 %v4721_v30, %v4720_v59  ;;  %v9805_v35 = vsel %vm4571_vm10, %v9770_v9, %v9772_v45  ;;  %v9814_v17 = vor.u32 %v4712_v10, %v4711_v36 }
 0x51e   :  { %11530 = vst [vmem:[#allocation16_spill] sm:$0xff] %v9805_v35  ;;  %v9816_v30 = vor.u32 %v4715_v50, %v4714_v13  ;;  %v4725_v59 = vor.u32 %v4724_v3, %v4723_v51  ;;  %v9821_v9 = vsel %vm4573_vm7, %v9777_v39, %v4580_v14  ;;  %v9825_v35 = vsel %vm4573_vm7, %v4567_v28, %v4584_v62 }
 0x51f   :  { %11531 = vst [vmem:[#allocation50_spill] sm:$0xff] %v9814_v17  ;;  %vm4860_vm5 = vcmp.gt.s32.totalorder %v4859_v26, 0  ;;  %v9827_v45 = vor.u32 %v4718_v11, %v4717_v34  ;;  %v4735_v13 = vsel %vm4729_vm0, %v4722_v16, 920167782  ;;  %v9834_v51 = vand.u32 65535, %v9796_v57 }
 0x520   :  { %11532 = vst [vmem:[#allocation48_spill] sm:$0xff] %v9816_v30  ;;  %v4861_v14 = vsel %vm4860_vm5, %v4859_v26, 0  ;;  %v9839_v29 = vshll.u32 %v4857_v63, 8  ;;  %v11537_v28 = vshll.u32 %v9583_v53, 16  ;;  %v4153_v10 = vshll.u32 %v9599_v6, 16 }
 0x521   :  { %11533 = vst [vmem:[#allocation56_spill] sm:$0xff] %v9827_v45  ;;  %v9850_v50 = vsel %vm11059_vm3, %v9814_v17, %v9816_v30  ;;  %v4739_v3 = vsel %vm4729_vm0, %v4725_v59, 1326507024  ;;  %v9858_v62 = vsel %vm11058_vm1, %v9827_v45, %v4735_v13  ;;  %v4132_v11 = vshrl.u32 %v9574_v25, 16 }
 0x522   :  { %11534 = vst [vmem:[#allocation28_spill] sm:$0xff] %v9834_v51  ;;  %vm4139_vm2 = vc.u32 %v9613_v22, %v11537_v28  ;;  %v9864_v22 = vsel %vm11059_vm3, %v9816_v30, %v9827_v45  ;;  %v4863_v34 = vand.u32 31, %v4861_v14  ;;  %v4155_v63 = vshll.u32 %v9595_v55, 16 }
 0x523   :  { %11536 = vst [vmem:[#allocation35_spill] sm:$0xff] %v9839_v29  ;;  %v4140_v26 = vsel %vm4139_vm2, 1, %v11134_v31  ;;  %vm4157_vm9 = vc.u32 %v9589_v4, %v4153_v10  ;;  %v4159_v59 = vadd.s32 %v4153_v10, %v9589_v4  ;;  %v9873_v13 = vsel %vm11058_vm1, %v4722_v16, %v4739_v3 }
 0x524   :  { %11538 = vst [vmem:[#allocation46_spill] sm:$0xff] %v9850_v50  ;;  %v4142_v36 = vadd.s32 %v4140_v26, %v9636_v38  ;;  %v9876_v28 = vand.u32 65535, %v9839_v29  ;;  %v4158_v30 = vsel %vm4157_vm9, 1, %v11134_v31  ;;  %v9880_v25 = vshrl.u32 %v9839_v29, 16 }
 0x525   :  { %11539 = vst [vmem:[#allocation8_spill] sm:$0xff] %v9864_v22  ;;  %v4160_v26 = vadd.s32 %v4158_v30, %v9601_v19  ;;  %vm4161_vm5 = vc.u32 %v4159_v59, %v4155_v63  ;;  %vm4262_vm2 = vcmp.lt.s32.totalorder %v9615_v46, 2  ;;  %v9884_v4 = vshrl.u32 %v4861_v14, 5 }
 0x526   :  { %11540 = vst [vmem:[#allocation13_spill] sm:$0xff] %v9873_v13  ;;  %v4143_v57 = vadd.s32 %v4142_v36, %v4132_v11  ;;  %v4134_v10 = vshrl.u32 %v9583_v53, 16  ;;  %v4162_v3 = vsel %vm4161_vm5, 1, %v11134_v31  ;;  %v9891_v11 = vsub.s32 32, %v4863_v34 }
 0x527   :  { %11541 = vst [vmem:[#allocation36_spill] sm:$0xff] %v9876_v28  ;;  %v4154_v36 = vshrl.u32 %v9599_v6, 16  ;;  %v4164_v29 = vadd.s32 %v4162_v3, %v4160_v26  ;;  %v4276_v19 = vsel %vm4262_vm2, %v9683_v23, %v9706_v44  ;;  %v4866_v30 = vshll.u32 %v11115_v1, %v4863_v34 }
 0x528   :  { %11542 = vst [vmem:[#allocation37_spill] sm:$0xff] %v9880_v25  ;;  %v4245_v53 = vshrl.u32 %v11115_v1, %v9593_v61  ;;  %v4869_v25 = vshll.u32 %v11510_v7, %v4863_v34  ;;  %v4156_v28 = vshrl.u32 %v9595_v55, 16  ;;  %v4281_v26 = vshrl.u32 %v4276_v19, 16 }
 0x529   :  { %11544 = vst [vmem:[#allocation47_spill] sm:$0xff] %v9891_v11  ;;  %v4165_v6 = vadd.s32 %v4164_v29, %v4154_v36  ;;  %v4872_v3 = vshll.u32 %v11507_v33, %v4863_v34  ;;  %v4875_v17 = vshll.u32 %v11508_v49, %v4863_v34  ;;  %v9908_v44 = vadd.s32 %v4159_v59, %v4155_v63 }
 0x52a   :  { %v9914_v61 = vmul.u32 %v4281_v26, %v9604_v40  ;;  %v4870_v55 = vshrl.u32 %v11507_v33, %v9891_v11  ;;  %v4280_v36 = vand.u32 65535, %v4276_v19  ;;  %v4876_v63 = vshrl.u32 %v11506_v43, %v9891_v11 }
 0x52b   :  { %v4166_v45 = vadd.s32 %v4165_v6, %v4156_v28  ;;  %v4879_v59 = vshrl.u32 %v11505_v60, %v9891_v11  ;;  %v9928_v28 = vsel %vm4262_vm2, %v9651_v48, %v9677_v5  ;;  %v4873_v6 = vshrl.u32 %v11508_v49, %v9891_v11 }
 0x52c   :  { %v4286_v19 = vshll.u32 %v9914_v61, 16  ;;  %vm11068_vm5 = vcmp.lt.s32.totalorder %v9884_v4, 1  ;;  %v4266_v13 = vsel %vm4264_vm12, %v9643_v41, 2102212464  ;;  %v11546_v48 = vmul.u32 %v9561_v32, %v9581_v47 }
 0x52d   :  { %v4068_v38 = vpop.f32.mrf.mxu3  ;;  %vm11067_vm1 = vcmp.lt.s32.totalorder %v9884_v4, 3  ;;  %vm4884_vm3 = vcmp.lt.s32.totalorder %v9884_v4, 4 }
 0x52e   :  { %v9887_v16 = vadd.f32 %v9523_v12, %v4068_v38  ;;  %v9900_v38 = vadd.s32 %v4143_v57, %v4134_v10  ;;  %v4867_v57 = vshrl.u32 %v11510_v7, %v9891_v11  ;;  %v4282_v11 = vmul.u32 %v4280_v36, %v9604_v40 }
 0x530   :  { %11543 = vst [vmem:[#allocation55_spill] sm:$0xff] %v9887_v16  ;;  %v5007_v14 = vand.u32 2139095040, %v9887_v16  ;;  %vm4169_vm9 = vc.u32 %v9900_v38, %v9908_v44  ;;  %v11545_v8 = vand.u32 2147483647, %v9887_v16  ;;  %v9948_v50 = vor.u32 %v4867_v57, %v4866_v30 }
 0x531   :  { %v9950_v16 = vor.u32 %v4870_v55, %v4869_v25  ;;  %v4292_v41 = vadd.s32 %v4286_v19, %v4282_v11  ;;  %v4267_v30 = vsel %vm4263_vm13, %v9632_v27, %v4266_v13  ;;  %v4285_v13 = vmul.u32 %v4281_v26, %v9607_v24  ;;  %v5317_v26 = vld [vmem:[%s10806_s9 + $0x18] sm:$0xff] }
 0x532   :  { %v5008_v23 = vshrl.u32 %v5007_v14, 23  ;;  %v4170_v14 = vadd.s32 1, %v4166_v45  ;;  %v5011_v51 = vand.u32 8388607, %v11545_v8  ;;  %11547 = vst [vmem:[#allocation51_spill] sm:$0xff] %v9948_v50  ;;  %v4302_v57 = vand.u32 65535, %v9928_v28  ;;  %5358 = vmatpush.msrb.mxu0 %v5317_v26 }
 0x533   :  { %11548 = vst [vmem:[#allocation22_spill] sm:$0xff] %v9950_v16  ;;  %v9985_v55 = vsel %vm11068_vm5, %v9948_v50, %v9950_v16 }
 0x534   :  { %v5523_v29 = vadd.s32 4294967169, %v5008_v23  ;;  %v4878_v23 = vshll.u32 %v11506_v43, %v4863_v34  ;;  %v4171_v22 = vsel %vm4169_vm9, %v4170_v14, %v4166_v45  ;;  %v9945_v34 = vmul.u32 %v4280_v36, %v9607_v24  ;;  %11552 = vst [vmem:[#allocation26_spill] sm:$0xff] %v9985_v55  ;;  %v5316_v36 = vld [vmem:[%s10806_s9 + $0x10] sm:$0xff] }
 0x535   :  { %v4172_v5 = vadd.s32 %v4171_v22, %v11546_v48  ;;  %v4877_v45 = vor.u32 %v4876_v63, %v4875_v17  ;;  %v9952_v14 = vor.u32 %v4873_v6, %v4872_v3  ;;  %vm4290_vm9 = vc.u32 %v4282_v11, %v4286_v19  ;;  %v5315_v48 = vld [vmem:[%s10806_s9 + $0x8] sm:$0xff]  ;;  %5359 = vmatpush.msrb.mxu0 %v5316_v36 }
 0x536   :  { %v5014_v10 = vadd.s32 1, %v5523_v29  ;;  %v4303_v29 = vshrl.u32 %v9928_v28, 16  ;;  %v4880_v8 = vor.u32 %v4879_v59, %v4878_v23  ;;  %v5012_v32 = vor.u32 8388608, %v5011_v51 }
 0x537   :  { %11549 = vst [vmem:[#allocation23_spill] sm:$0xff] %v9952_v14  ;;  %v4173_v47 = vadd.s32 536870912, %v4172_v5  ;;  %v4265_v22 = vsel %vm4261_vm14, %v4245_v53, %v9630_v58  ;;  %v4288_v17 = vshll.u32 %v9945_v34, 16  ;;  %v4890_v51 = vsel %vm4884_vm3, %v4877_v45, 920167782  ;;  %5360 = vmatpush.msrb.mxu0 %v5315_v48 }
 0x538   :  { %vm5015_vm12 = vcmp.gt.s32.totalorder %v5014_v10, 0  ;;  %v9964_v25 = vmul.u32 %v4303_v29, %v9604_v40  ;;  %v4894_v11 = vsel %vm4884_vm3, %v4880_v8, 1326507024  ;;  %v4291_v53 = vsel %vm4290_vm9, 1, %v11134_v31 }
 0x539   :  { %v5016_v58 = vsel %vm5015_vm12, %v5014_v10, 0  ;;  %v9973_v27 = vsel %vm4262_vm2, %v4265_v22, %v4267_v30  ;;  %vm9976_vm14 = vc.u32 %v4292_v41, %v4288_v17  ;;  %v9991_v46 = vsel %vm11068_vm5, %v9950_v16, %v9952_v14 }
 0x53a   :  { %11553 = vst [vmem:[#allocation18_spill] sm:$0xff] %v9991_v46  ;;  %v9993_v10 = vshll.u32 %v5012_v32, 8  ;;  %v10001_v63 = vshrl.u32 %v4173_v47, 30  ;;  %v10006_v59 = vsel %vm11067_vm1, %v9952_v14, %v4890_v51  ;;  %v5018_v28 = vand.u32 31, %v5016_v58 }
 0x53b   :  { %11555 = vst [vmem:[#allocation40_spill] sm:$0xff] %v10006_v59  ;;  %v4293_v6 = vadd.s32 %v4291_v53, %v4285_v13  ;;  %v4308_v23 = vshll.u32 %v9964_v25, 16  ;;  %v10011_v19 = vsel %vm11067_vm1, %v4877_v45, %v4894_v11  ;;  %v4295_v41 = vsel %vm9976_vm14, 1, %v11134_v31  ;;  %v5314_v11 = vld [vmem:[%s10806_s9] sm:$0xff] }
 0x53c   :  { %11554 = vst [vmem:[#allocation14_spill] sm:$0xff] %v9993_v10  ;;  %v4175_v8 = vshll.u32 %v10001_v63, 30  ;;  %v10024_v47 = vadd.s32 %v9908_v44, %v9900_v38  ;;  %v4287_v45 = vshrl.u32 %v9914_v61, 16  ;;  %v4304_v22 = vmul.u32 %v4302_v57, %v9604_v40  ;;  %5361 = vmatpush.msrb.mxu0 %v5314_v11 }
 0x53d   :  { %11556 = vst [vmem:[#allocation6_spill] sm:$0xff] %v10011_v19  ;;  %v4306_v30 = vmul.u32 %v4302_v57, %v9607_v24  ;;  %v10030_v17 = vand.u32 65535, %v9993_v10  ;;  %v10033_v51 = vshrl.u32 %v9993_v10, 16  ;;  %v4289_v38 = vshrl.u32 %v9945_v34, 16 }
 0x53e   :  { %v10038_v53 = vsub.s32 %v4172_v5, %v4175_v8  ;;  %v10041_v44 = vsub.s32 32, %v5018_v28  ;;  %v4297_v40 = vadd.s32 %v4295_v41, %v4293_v6  ;;  %v4307_v61 = vmul.u32 %v4303_v29, %v9607_v24 }
 0x53f   :  { %11557 = vst [vmem:[#allocation38_spill] sm:$0xff] %v10030_v17  ;;  %vm4312_vm13 = vc.u32 %v4304_v22, %v4308_v23  ;;  %v10044_v13 = vshrl.u32 %v5016_v58, 5  ;;  %vm4076_vm12 = vcmp.lt.s32.totalorder %v9528_v0, 0  ;;  %v5021_v5 = vshll.u32 %v11115_v1, %v5018_v28 }
 0x540   :  { %11558 = vst [vmem:[#allocation12_spill] sm:$0xff] %v10033_v51  ;;  %vm4177_vm2 = vcmp.lt.s32.totalorder %v10038_v53, 0  ;;  %v4178_v3 = vsub.s32 0, %v10038_v53  ;;  %v4313_v57 = vsel %vm4312_vm13, 1, %v11134_v31  ;;  %v4309_v34 = vshrl.u32 %v9964_v25, 16 }
 0x541   :  { %11559 = vst [vmem:[#allocation15_spill] sm:$0xff] %v10041_v44  ;;  %v4310_v26 = vshll.u32 %v4306_v30, 16  ;;  %v4314_v36 = vadd.s32 %v4308_v23, %v4304_v22  ;;  %v5024_v24 = vshll.u32 %v11510_v7, %v5018_v28  ;;  %v5027_v29 = vshll.u32 %v11507_v33, %v5018_v28 }
 0x542   :  { %v4179_v58 = vsel %vm4177_vm2, %v4178_v3, %v10038_v53  ;;  %v4315_v6 = vadd.s32 %v4313_v57, %v4307_v61  ;;  %v5022_v48 = vshrl.u32 %v11510_v7, %v10041_v44  ;;  %v4298_v32 = vadd.s32 %v4297_v40, %v4287_v45 }
 0x543   :  { %v4180_v41 = vclz %v4179_v58  ;;  %vm4316_vm9 = vc.u32 %v4314_v36, %v4310_v26  ;;  %v5025_v11 = vshrl.u32 %v11507_v33, %v10041_v44  ;;  %v5030_v25 = vshll.u32 %v11508_v49, %v5018_v28 }
 0x544   :  { %v5033_v23 = vshll.u32 %v11506_v43, %v5018_v28  ;;  %v5028_v61 = vshrl.u32 %v11508_v49, %v10041_v44  ;;  %v5031_v3 = vshrl.u32 %v11506_v43, %v10041_v44  ;;  %v11561_v57 = vand.u32 2147483647, %v9528_v0 }
 0x545   :  { %v5506_v40 = vadd.s32 4294967294, %v4180_v41  ;;  %v4317_v58 = vsel %vm4316_vm9, 1, %v11134_v31  ;;  %v5034_v28 = vshrl.u32 %v11505_v60, %v10041_v44  ;;  %v10079_v51 = vor.u32 %v5022_v48, %v5021_v5 }
 0x546   :  { %vm10070_vm14 = vcmp.le.f32.partialorder %v11561_v57, 0.7853982  ;;  %v4319_v10 = vadd.s32 %v4317_v58, %v4315_v6  ;;  %vm5036_vm13 = vcmp.lt.s32.totalorder %v10044_v13, 1  ;;  %v4299_v57 = vadd.s32 %v4298_v32, %v4289_v38 }
 0x547   :  { %v4071_v8 = vpop.f32.mrf.mxu3  ;;  %vm5507_vm2 = vcmp.lt.s32.totalorder %v5506_v40, 0  ;;  %v4311_v17 = vshrl.u32 %v4306_v30, 16  ;;  %v10083_v55 = vor.u32 %v5025_v11, %v5024_v24  ;;  %v4318_v46 = vadd.s32 %v4314_v36, %v4310_v26 }
 0x548   :  { %v10062_v22 = vadd.f32 %v9523_v12, %v4071_v8  ;;  %v4198_v8 = vsub.s32 4, %v10001_v63  ;;  %v4183_v50 = vsel %vm5507_vm2, 0, %v5506_v40  ;;  %v4320_v14 = vadd.s32 %v4319_v10, %v4309_v34 }
 0x549   :  { %11564 = vst [vmem:[#allocation32_spill] sm:$0xff] %v10083_v55  ;;  %v4184_v44 = vsub.s32 32, %v4183_v50  ;;  %v4188_v59 = vsub.s32 4294967266, %v4183_v50  ;;  %vm4417_vm9 = vcmp.lt.s32.totalorder %v9669_v21, 2  ;;  %vm4324_vm1 = vc.u32 %v4299_v57, %v4318_v46 }
 0x54a   :  { %11560 = vst [vmem:[#allocation27_spill] sm:$0xff] %v10062_v22  ;;  %v5162_v12 = vand.u32 2139095040, %v10062_v22  ;;  %v11069_v16 = vand.u32 2147483647, %v10062_v22  ;;  %v4199_v5 = vsel %vm4076_vm12, %v4198_v8, %v10001_v63  ;;  %v4321_v6 = vadd.s32 %v4320_v14, %v4311_v17 }
 0x54b   :  { %v4186_v32 = vshrl.u32 %v10024_v47, %v4184_v44  ;;  %v4189_v30 = vadd.s32 127, %v4188_v59  ;;  %v4431_v10 = vsel %vm4417_vm9, %v9729_v42, %v9740_v2  ;;  %v5032_v38 = vor.u32 %v5031_v3, %v5030_v25 }
 0x54c   :  { %v5163_v41 = vshrl.u32 %v5162_v12, 23  ;;  %v5166_v34 = vand.u32 8388607, %v11069_v16  ;;  %v4325_v36 = vadd.s32 1, %v4321_v6  ;;  %vm11075_vm2 = vcmp.lt.s32.totalorder %v10044_v13, 3 }
 0x54d   :  { %vm5039_vm5 = vcmp.lt.s32.totalorder %v10044_v13, 4  ;;  %v4185_v14 = vshll.u32 %v10038_v53, %v4183_v50  ;;  %v4190_v63 = vshll.u32 %v4189_v30, 23  ;;  %v5035_v59 = vor.u32 %v5034_v28, %v5033_v23  ;;  %v11570_v30 = vld [vmem:[#allocation57_spill] sm:$0xff] }
 0x54e   :  { %v5526_v19 = vadd.s32 4294967169, %v5163_v41  ;;  %v4201_v47 = vsel %vm10070_vm14, 0, %v4199_v5  ;;  %v4326_v17 = vsel %vm4324_vm1, %v4325_v36, %v4321_v6  ;;  %v4436_v44 = vshrl.u32 %v4431_v10, 16  ;;  %v11568_v5 = vld [vmem:[#allocation9_spill] sm:$0xff] }
 0x54f   :  { %v10101_v42 = vor.u32 %v5028_v61, %v5027_v29  ;;  %v4187_v2 = vor.u32 %v4186_v32, %v4185_v14  ;;  %v4191_v24 = vor.u32 4788187, %v4190_v63  ;;  %v10110_v50 = vsel %vm5036_vm13, %v10079_v51, %v10083_v55  ;;  %v11569_v32 = vld [vmem:[#allocation10_spill] sm:$0xff] }
 0x550   :  { %v5169_v26 = vadd.s32 1, %v5526_v19  ;;  %v11565_v19 = vmul.u32 %v9586_v52, %v9973_v27  ;;  %v5045_v53 = vsel %vm5039_vm5, %v5032_v38, 920167782  ;;  %v5167_v11 = vor.u32 8388608, %v5166_v34 }
 0x551   :  { %v4192_v25 = vand.u32 2147483647, %v4191_v24  ;;  %v4218_v29 = vadd.s32 3, %v4201_v47  ;;  %v4421_v61 = vsel %vm4419_vm15, %v9691_v18, 2102212464  ;;  %v4400_v27 = vshrl.u32 %v11115_v1, %v9634_v56  ;;  %v11567_v56 = vld [vmem:[#allocation49_spill] sm:$0xff] }
 0x552   :  { %v4327_v48 = vadd.s32 %v4326_v17, %v11565_v19  ;;  %vm5170_vm1 = vcmp.gt.s32.totalorder %v5169_v26, 0  ;;  %v5049_v52 = vsel %vm5039_vm5, %v5035_v59, 1326507024  ;;  %v4435_v3 = vand.u32 65535, %v4431_v10  ;;  %v11571_v47 = vld [vmem:[#allocation41_spill] sm:$0xff] }
 0x553   :  { %v10122_v40 = vmul.u32 %v4436_v44, %v9697_v37  ;;  %v10127_v58 = vsel %vm11075_vm2, %v10101_v42, %v5045_v53  ;;  %v10133_v18 = vsel %vm5036_vm13, %v10083_v55, %v10101_v42  ;;  %v5171_v28 = vsel %vm5170_vm1, %v5169_v26, 0 }
 0x554   :  { %v4328_v23 = vadd.s32 536870912, %v4327_v48  ;;  %v4194_v12 = vcvt.s32.f32 %v4187_v2  ;;  %v10135_v8 = vshll.u32 %v5167_v11, 8  ;;  %v4420_v41 = vsel %vm4416_vm4, %v4400_v27, %v11567_v56 }
 0x555   :  { %v4422_v6 = vsel %vm4418_vm11, %v11568_v5, %v4421_v61  ;;  %v4427_v10 = vsel %vm4417_vm9, %v11570_v30, %v11569_v32  ;;  %v10149_v34 = vsel %vm11075_vm2, %v5032_v38, %v5049_v52  ;;  %v10151_v36 = vand.u32 3, %v4218_v29 }
 0x556   :  { %11566 = vst [vmem:[#allocation33_spill] sm:$0xff] %v10135_v8  ;;  %v4195_v26 = vmul.f32 %v4194_v12, %v4192_v25  ;;  %v10153_v14 = vshrl.u32 %v4328_v23, 30  ;;  %v5173_v63 = vand.u32 31, %v5171_v28  ;;  %v10155_v59 = vadd.s32 %v4318_v46, %v4299_v57 }
 0x557   :  { %v10158_v17 = vmul.u32 %v4435_v3, %v11571_v47  ;;  %v4441_v2 = vshll.u32 %v10122_v40, 16  ;;  %v10164_v38 = vsel %vm4417_vm9, %v4420_v41, %v4422_v6  ;;  %v4457_v53 = vand.u32 65535, %v4427_v10 }
 0x558   :  { %v4196_v24 = vxor.u32 2147483648, %v4195_v26  ;;  %v4330_v19 = vshll.u32 %v10153_v14, 30  ;;  %v10166_v11 = vshrl.u32 %v5171_v28, 5  ;;  %v10169_v25 = vand.u32 65535, %v10135_v8 }
 0x559   :  { %v4437_v46 = vmul.u32 %v4435_v3, %v9697_v37  ;;  %v4458_v57 = vshrl.u32 %v4427_v10, 16  ;;  %v4440_v61 = vmul.u32 %v4436_v44, %v11571_v47  ;;  %v4442_v21 = vshrl.u32 %v10122_v40, 16 }
 0x55a   :  { %11572 = vst [vmem:[#allocation34_spill] sm:$0xff] %v10169_v25  ;;  %v4197_v29 = vsel %vm4076_vm12, %v4196_v24, %v4195_v26  ;;  %v10174_v23 = vsub.s32 %v4327_v48, %v4330_v19  ;;  %v10178_v52 = vsub.s32 32, %v5173_v63  ;;  %v4443_v28 = vshll.u32 %v10158_v17, 16 }
 0x55b   :  { %v10183_v27 = vsel %vm10070_vm14, %v9528_v0, %v4197_v29  ;;  %vm4445_vm15 = vc.u32 %v4437_v46, %v4441_v2  ;;  %v10187_v3 = vshll.u32 %v11115_v1, %v5173_v63  ;;  %v10194_v40 = vshll.u32 %v11510_v7, %v5173_v63 }
 0x55c   :  { %v4202_v48 = vmul.f32 %v10183_v27, %v10183_v27  ;;  %vm4332_vm4 = vcmp.lt.s32.totalorder %v10174_v23, 0  ;;  %v4333_v44 = vsub.s32 0, %v10174_v23  ;;  %v10197_v45 = vshll.u32 %v11507_v33, %v5173_v63 }
 0x55d   :  { %v4446_v12 = vsel %vm4445_vm15, 1, %v11134_v31  ;;  %v4447_v56 = vadd.s32 %v4441_v2, %v4437_v46  ;;  %v10202_v30 = vshll.u32 %v11508_v49, %v5173_v63  ;;  %v4460_v26 = vmul.u32 %v4458_v57, %v9697_v37  ;;  %v11573_v2 = vld [vmem:[#allocation58_spill] sm:$0xff] }
 0x55e   :  { %v4203_v41 = vmul.f32 -0.001358992, %v4202_v48  ;;  %v4210_v5 = vmul.f32 -0.00019511016, %v4202_v48  ;;  %v4334_v6 = vsel %vm4332_vm4, %v4333_v44, %v10174_v23  ;;  %v4448_v32 = vadd.s32 %v4446_v12, %v4440_v61 }
 0x55f   :  { %v4335_v10 = vclz %v4334_v6  ;;  %vm4449_vm11 = vc.u32 %v4447_v56, %v4443_v28  ;;  %v10206_v24 = vshll.u32 %v11506_v43, %v5173_v63  ;;  %vm4231_vm12 = vcmp.lt.s32.totalorder %v11573_v2, 0 }
 0x560   :  { %v4204_v19 = vadd.f32 0.041655596, %v4203_v41  ;;  %v4211_v29 = vadd.f32 0.008332121, %v4210_v5  ;;  %v4450_v16 = vsel %vm4449_vm11, 1, %v11134_v31  ;;  %v10212_v46 = vshrl.u32 %v11510_v7, %v10178_v52 }
 0x561   :  { %v10216_v61 = vshrl.u32 %v11507_v33, %v10178_v52  ;;  %v5509_v28 = vadd.s32 4294967294, %v4335_v10  ;;  %v4461_v44 = vmul.u32 %v4457_v53, %v11571_v47  ;;  %v10221_v63 = vshrl.u32 %v11508_v49, %v10178_v52 }
 0x562   :  { %v4205_v12 = vmul.f32 %v4204_v19, %v4202_v48  ;;  %v4212_v56 = vmul.f32 %v4211_v29, %v4202_v48  ;;  %v4452_v41 = vadd.s32 %v4450_v16, %v4448_v32  ;;  %v4353_v5 = vsub.s32 4, %v10153_v14 }
 0x563   :  { %vm5510_vm14 = vcmp.lt.s32.totalorder %v5509_v28, 0  ;;  %v4459_v7 = vmul.u32 %v4457_v53, %v9697_v37  ;;  %v4463_v6 = vshll.u32 %v4460_v26, 16  ;;  %v4462_v10 = vmul.u32 %v4458_v57, %v11571_v47 }
 0x564   :  { %v4206_v22 = vadd.f32 -0.4999988, %v4205_v12  ;;  %v4213_v25 = vadd.f32 -0.16666654, %v4212_v56  ;;  %v4338_v33 = vsel %vm5510_vm14, 0, %v5509_v28  ;;  %vm4221_vm9 = vcmp.eq.s32.totalorder %v10151_v36, 0 }
 0x565   :  { %vm4224_vm1 = vcmp.eq.s32.totalorder %v10151_v36, 2  ;;  %v11574_v49 = vand.u32 2147483647, %v11573_v2  ;;  %v4339_v16 = vsub.s32 32, %v4338_v33  ;;  %v4343_v32 = vsub.s32 4294967266, %v4338_v33 }
 0x566   :  { %v4453_v29 = vadd.s32 %v4452_v41, %v4442_v21  ;;  %v4465_v37 = vshll.u32 %v4461_v44, 16  ;;  %v4207_v53 = vmul.f32 %v4206_v22, %v4202_v48  ;;  %v4214_v12 = vmul.f32 %v4213_v25, %v4202_v48 }
 0x567   :  { %vm10230_vm15 = vcmp.le.f32.partialorder %v11574_v49, 0.7853982  ;;  %vm4220_vm4 = vcmp.lt.s32.totalorder %v10151_v36, 2  ;;  %v4340_v47 = vshll.u32 %v10174_v23, %v4338_v33  ;;  %vm4467_vm11 = vc.u32 %v4459_v7, %v4463_v6 }
 0x568   :  { %vm4217_vm14 = vweird.f32 %v9528_v0  ;;  %v4341_v57 = vshrl.u32 %v10155_v59, %v4339_v16  ;;  %v4344_v28 = vadd.s32 127, %v4343_v32  ;;  %v4468_v56 = vsel %vm4467_vm11, 1, %v11134_v31 }
 0x569   :  { %v4469_v49 = vadd.s32 %v4463_v6, %v4459_v7  ;;  %v10241_v8 = vshrl.u32 %v11506_v43, %v10178_v52  ;;  %v4208_v21 = vadd.f32 1.0, %v4207_v53  ;;  %v4215_v22 = vadd.f32 1.0, %v4214_v12 }
 0x56a   :  { %v4470_v25 = vadd.s32 %v4468_v56, %v4462_v10  ;;  %v4342_v48 = vor.u32 %v4341_v57, %v4340_v47  ;;  %v4345_v41 = vshll.u32 %v4344_v28, 23  ;;  %v4444_v23 = vshrl.u32 %v10158_v17, 16 }
 0x56b   :  { %vm4471_vm2 = vc.u32 %v4469_v49, %v4465_v37  ;;  %v4216_v33 = vmul.f32 %v4215_v22, %v10183_v27  ;;  %v4225_v55 = vxor.u32 2147483648, %v4208_v21  ;;  %v4354_v59 = vsel %vm4231_vm12, %v4353_v5, %v10153_v14 }
 0x56c   :  { %v4472_v7 = vsel %vm4471_vm2, 1, %v11134_v31  ;;  %v4346_v6 = vor.u32 4788187, %v4345_v41  ;;  %v10249_v43 = vadd.s32 %v4453_v29, %v4444_v23  ;;  %v4464_v16 = vshrl.u32 %v4460_v26, 16  ;;  %v11579_v41 = vld [vmem:[#allocation29_spill] sm:$0xff]  ;;  %v11580_v23 = vld [vmem:[#allocation42_spill] sm:$0xff] }
 0x56d   :  { %v4474_v32 = vadd.s32 %v4472_v7, %v4470_v25  ;;  %v10253_v10 = vshrl.u32 %v11505_v60, %v10178_v52  ;;  %v4222_v17 = vxor.u32 2147483648, %v4216_v33  ;;  %v4466_v53 = vshrl.u32 %v4461_v44, 16  ;;  %v11578_v25 = vld [vmem:[#allocation5_spill] sm:$0xff] }
 0x56e   :  { %v10255_v12 = vadd.s32 %v4469_v49, %v4465_v37  ;;  %v4347_v27 = vand.u32 2147483647, %v4346_v6  ;;  %v4349_v47 = vcvt.s32.f32 %v4342_v48  ;;  %vm4572_vm11 = vcmp.lt.s32.totalorder %v9745_v54, 2 }
 0x56f   :  { %v4475_v57 = vadd.s32 %v4474_v32, %v4464_v16  ;;  %v4223_v14 = vsel %vm4221_vm9, %v4208_v21, %v4222_v17  ;;  %v4226_v26 = vsel %vm4224_vm1, %v4225_v55, %v4216_v33  ;;  %v4356_v5 = vsel %vm10230_vm15, 0, %v4354_v59  ;;  %v11577_v55 = vld [vmem:[#allocation16_spill] sm:$0xff]  ;;  %v11581_v32 = vld [vmem:[#allocation30_spill] sm:$0xff] }
 0x570   :  { %v4586_v60 = vsel %vm4572_vm11, %v9811_v15, %v9825_v35  ;;  %v4227_v44 = vsel %vm4220_vm4, %v4223_v14, %v4226_v26  ;;  %v4350_v29 = vmul.f32 %v4349_v47, %v4347_v27  ;;  %vm4479_vm2 = vc.u32 %v10249_v43, %v10255_v12 }
 0x571   :  { %v4476_v37 = vadd.s32 %v4475_v57, %v4466_v53  ;;  %v4228_v28 = vsel %vm4217_vm14, nan, %v4227_v44  ;;  %v4582_v56 = vsel %vm4572_vm11, %v11577_v55, %v9821_v9  ;;  %v4590_v49 = vand.u32 65535, %v4586_v60 }
 0x572   :  { %v4591_v21 = vshrl.u32 %v4586_v60, 16  ;;  %v10280_v35 = vor.u32 %v10212_v46, %v10187_v3  ;;  %v10284_v15 = vor.u32 %v10216_v61, %v10194_v40  ;;  %5529 = vmatmul.msk.f32.vlgmr.msrb.gmra.mxu0 %vm1382_vm6, %v4228_v28  ;;  %v4351_v36 = vxor.u32 2147483648, %v4350_v29  ;;  %v11582_v28 = vld [vmem:[#allocation31_spill] sm:$0xff] }
 0x573   :  { %v4480_v0 = vadd.s32 1, %v4476_v37  ;;  %v4373_v22 = vadd.s32 3, %v4356_v5  ;;  %v4477_v48 = vmul.u32 %v11578_v25, %v10164_v38  ;;  %v10291_v33 = vmul.u32 %v4590_v49, %v11580_v23 }
 0x574   :  { %v4593_v9 = vmul.u32 %v4591_v21, %v11579_v41  ;;  %v4352_v3 = vsel %vm4231_vm12, %v4351_v36, %v4350_v29  ;;  %v4612_v59 = vand.u32 65535, %v4582_v56  ;;  %v4613_v40 = vshrl.u32 %v4582_v56, 16 }
 0x575   :  { %v4481_v46 = vsel %vm4479_vm2, %v4480_v0, %v4476_v37  ;;  %v10298_v61 = vsel %vm10230_vm15, %v11573_v2, %v4352_v3  ;;  %v4592_v6 = vmul.u32 %v4590_v49, %v11579_v41  ;;  %v4555_v17 = vshrl.u32 %v11115_v1, %v11581_v32 }
 0x576   :  { %v4482_v7 = vadd.s32 %v4481_v46, %v4477_v48  ;;  %v4596_v38 = vshll.u32 %v4593_v9, 16  ;;  %v4357_v16 = vmul.f32 %v10298_v61, %v10298_v61  ;;  %v4595_v53 = vmul.u32 %v4591_v21, %v11580_v23  ;;  %v11583_v46 = vld [vmem:[#allocation54_spill] sm:$0xff] }
 0x577   :  { %v4615_v27 = vmul.u32 %v4613_v40, %v11579_v41  ;;  %v4598_v57 = vshll.u32 %v10291_v33, 16  ;;  %v4614_v60 = vmul.u32 %v4612_v59, %v11579_v41  ;;  %vm4386_vm1 = vcmp.lt.s32.totalorder %v11582_v28, 0 }
 0x578   :  { %v4483_v47 = vadd.s32 536870912, %v4482_v7  ;;  %vm4600_vm12 = vc.u32 %v4592_v6, %v4596_v38  ;;  %v4602_v19 = vadd.s32 %v4596_v38, %v4592_v6  ;;  %v4358_v14 = vmul.f32 -0.001358992, %v4357_v16 }
 0x579   :  { %v4365_v26 = vmul.f32 -0.00019511016, %v4357_v16  ;;  %v4601_v5 = vsel %vm4600_vm12, 1, %v11134_v31  ;;  %v4618_v37 = vshll.u32 %v4615_v27, 16  ;;  %v4616_v21 = vmul.u32 %v4612_v59, %v11580_v23 }
 0x57a   :  { %v4484_v44 = vshrl.u32 %v4483_v47, 30  ;;  %v4603_v29 = vadd.s32 %v4601_v5, %v4595_v53  ;;  %vm4604_vm9 = vc.u32 %v4602_v19, %v4598_v57  ;;  %v4359_v55 = vadd.f32 0.041655596, %v4358_v14 }
 0x57b   :  { %v4366_v56 = vadd.f32 0.008332121, %v4365_v26  ;;  %v4605_v49 = vsel %vm4604_vm9, 1, %v11134_v31  ;;  %v4374_v36 = vand.u32 3, %v4373_v22  ;;  %v4576_v25 = vsel %vm4574_vm8, %v9777_v39, 2102212464 }
 0x57c   :  { %v4485_v0 = vshll.u32 %v4484_v44, 30  ;;  %v4607_v48 = vadd.s32 %v4605_v49, %v4603_v29  ;;  %v4360_v41 = vmul.f32 %v4359_v55, %v4357_v16  ;;  %v4575_v6 = vsel %vm4571_vm10, %v4555_v17, %v11583_v46 }
 0x57d   :  { %v4367_v3 = vmul.f32 %v4366_v56, %v4357_v16  ;;  %vm4622_vm15 = vc.u32 %v4614_v60, %v4618_v37  ;;  %v4597_v32 = vshrl.u32 %v4593_v9, 16  ;;  %v4617_v53 = vmul.u32 %v4613_v40, %v11580_v23 }
 0x57e   :  { %v10319_v38 = vsub.s32 %v4482_v7, %v4485_v0  ;;  %v4623_v22 = vsel %vm4622_vm15, 1, %v11134_v31  ;;  %v4361_v59 = vadd.f32 -0.4999988, %v4360_v41  ;;  %v11584_v57 = vand.u32 2147483647, %v11582_v28  ;;  %v11587_v41 = vld [vmem:[#allocation43_spill] sm:$0xff] }
 0x57f   :  { %v4368_v47 = vadd.f32 -0.16666654, %v4367_v3  ;;  %v4620_v19 = vshll.u32 %v4616_v21, 16  ;;  %v4624_v14 = vadd.s32 %v4618_v37, %v4614_v60  ;;  %v4508_v17 = vsub.s32 4, %v4484_v44 }
 0x580   :  { %vm10325_vm8 = vcmp.le.f32.partialorder %v11584_v57, 0.7853982  ;;  %vm4487_vm10 = vcmp.lt.s32.totalorder %v10319_v38, 0  ;;  %v4488_v7 = vsub.s32 0, %v10319_v38  ;;  %v4608_v9 = vadd.s32 %v4607_v48, %v4597_v32 }
 0x581   :  { %v4362_v26 = vmul.f32 %v4361_v59, %v4357_v16  ;;  %v4369_v23 = vmul.f32 %v4368_v47, %v4357_v16  ;;  %v4625_v40 = vadd.s32 %v4623_v22, %v4617_v53  ;;  %vm4626_vm4 = vc.u32 %v4624_v14, %v4620_v19 }
 0x582   :  { %vm4372_vm14 = vweird.f32 %v11573_v2  ;;  %v4489_v5 = vsel %vm4487_vm10, %v4488_v7, %v10319_v38  ;;  %v4599_v29 = vshrl.u32 %v10291_v33, 16  ;;  %v4619_v55 = vshrl.u32 %v4615_v27, 16 }
 0x583   :  { %v4627_v56 = vsel %vm4626_vm4, 1, %v11134_v31  ;;  %v4363_v60 = vadd.f32 1.0, %v4362_v26  ;;  %v4370_v37 = vadd.f32 1.0, %v4369_v23  ;;  %v4490_v49 = vclz %v4489_v5  ;;  %v11589_v5 = vld [vmem:[#allocation46_spill] sm:$0xff] }
 0x584   :  { %v4629_v0 = vadd.s32 %v4627_v56, %v4625_v40  ;;  %v4509_v48 = vsel %vm4386_vm1, %v4508_v17, %v4484_v44  ;;  %v4577_v16 = vsel %vm4573_vm7, %v11587_v41, %v4576_v25  ;;  %v10340_v3 = vadd.s32 %v4608_v9, %v4599_v29  ;;  %v11588_v9 = vld [vmem:[#allocation19_spill] sm:$0xff]  ;;  %v11591_v56 = vld [vmem:[#allocation8_spill] sm:$0xff] }
 0x585   :  { %v4621_v46 = vshrl.u32 %v4616_v21, 16  ;;  %v4371_v32 = vmul.f32 %v4370_v37, %v10298_v61  ;;  %v4380_v33 = vxor.u32 2147483648, %v4363_v60  ;;  %v5512_v27 = vadd.s32 4294967294, %v4490_v49 }
 0x586   :  { %v4630_v53 = vadd.s32 %v4629_v0, %v4619_v55  ;;  %vm5191_vm2 = vcmp.lt.s32.totalorder %v10166_v11, 1  ;;  %vm4375_vm12 = vcmp.lt.s32.totalorder %v4374_v36, 2  ;;  %vm4376_vm9 = vcmp.eq.s32.totalorder %v4374_v36, 0  ;;  %v11590_v55 = vld [vmem:[#allocation13_spill] sm:$0xff] }
 0x587   :  { %vm4379_vm15 = vcmp.eq.s32.totalorder %v4374_v36, 2  ;;  %v10344_v22 = vadd.s32 %v4624_v14, %v4620_v19  ;;  %vm5194_vm10 = vcmp.lt.s32.totalorder %v10166_v11, 4  ;;  %v4377_v44 = vxor.u32 2147483648, %v4371_v32 }
 0x588   :  { %vm5513_vm4 = vcmp.lt.s32.totalorder %v5512_v27, 0  ;;  %v4578_v25 = vsel %vm4572_vm11, %v4575_v6, %v4577_v16  ;;  %v4631_v21 = vadd.s32 %v4630_v53, %v4621_v46  ;;  %v4478_v61 = vadd.s32 %v10255_v12, %v10249_v43 }
 0x589   :  { %v4493_v59 = vsel %vm5513_vm4, 0, %v5512_v27  ;;  %v4511_v47 = vsel %vm10325_vm8, 0, %v4509_v48  ;;  %vm4634_vm7 = vc.u32 %v10340_v3, %v10344_v22  ;;  %v4378_v57 = vsel %vm4376_vm9, %v4363_v60, %v4377_v44 }
 0x58a   :  { %v4381_v19 = vsel %vm4379_vm15, %v4380_v33, %v4371_v32  ;;  %v4494_v14 = vsub.s32 32, %v4493_v59  ;;  %v4498_v7 = vsub.s32 4294967266, %v4493_v59  ;;  %v4632_v54 = vmul.u32 %v11588_v9, %v4578_v25  ;;  %v11593_v33 = vld [vmem:[#allocation20_spill] sm:$0xff] }
 0x58b   :  { %v4382_v17 = vsel %vm4375_vm12, %v4378_v57, %v4381_v19  ;;  %v4635_v6 = vadd.s32 1, %v4631_v21  ;;  %vm4727_vm11 = vcmp.lt.s32.totalorder %v9792_v20, 2  ;;  %v4495_v12 = vshll.u32 %v10319_v38, %v4493_v59 }
 0x58c   :  { %v4383_v43 = vsel %vm4372_vm14, nan, %v4382_v17  ;;  %v4496_v26 = vshrl.u32 %v4478_v61, %v4494_v14  ;;  %v4499_v23 = vadd.s32 127, %v4498_v7  ;;  %v10363_v40 = vor.u32 %v10241_v8, %v10202_v30  ;;  %v11594_v17 = vld [vmem:[#allocation56_spill] sm:$0xff] }
 0x58d   :  { %5530 = vmatmul.msk.f32.gmra.mxu0 %vm1382_vm6, %v4383_v43  ;;  %v4636_v36 = vsel %vm4634_vm7, %v4635_v6, %v4631_v21  ;;  %v4737_v29 = vsel %vm4727_vm11, %v11589_v5, %v9858_v62  ;;  %v4741_v2 = vsel %vm4727_vm11, %v11591_v56, %v11590_v55  ;;  %v10376_v8 = vor.u32 %v10221_v63, %v10197_v45  ;;  %v11592_v45 = vld [vmem:[#allocation28_spill] sm:$0xff] }
 0x58e   :  { %v4497_v38 = vor.u32 %v4496_v26, %v4495_v12  ;;  %v4500_v60 = vshll.u32 %v4499_v23, 23  ;;  %v4637_v37 = vadd.s32 %v4636_v36, %v4632_v54  ;;  %v4745_v49 = vand.u32 65535, %v4741_v2 }
 0x58f   :  { %v4528_v30 = vadd.s32 3, %v4511_v47  ;;  %v4746_v0 = vshrl.u32 %v4741_v2, 16  ;;  %v4768_v48 = vshrl.u32 %v4737_v29, 16  ;;  %v5190_v41 = vor.u32 %v10253_v10, %v10206_v24 }
 0x590   :  { %v10384_v62 = vsel %vm5191_vm2, %v10280_v35, %v10284_v15  ;;  %v4501_v16 = vor.u32 4788187, %v4500_v60  ;;  %v4638_v46 = vadd.s32 536870912, %v4637_v37  ;;  %v10389_v32 = vsel %vm5194_vm10, %v10363_v40, 920167782 }
 0x591   :  { %v4748_v63 = vmul.u32 %v4746_v0, %v11592_v45  ;;  %v10393_v27 = vmul.u32 %v4745_v49, %v11593_v33  ;;  %v4767_v53 = vand.u32 65535, %v4737_v29  ;;  %v4504_v25 = vcvt.s32.f32 %v4497_v38 }
 0x592   :  { %v4502_v44 = vand.u32 2147483647, %v4501_v16  ;;  %v10395_v21 = vshrl.u32 %v4638_v46, 30  ;;  %v10398_v61 = vmul.u32 %v4768_v48, %v11592_v45  ;;  %v10404_v59 = vsel %vm5191_vm2, %v10284_v15, %v10376_v8 }
 0x593   :  { %v10406_v47 = vand.u32 3, %v4528_v30  ;;  %v4747_v57 = vmul.u32 %v4745_v49, %v11592_v45  ;;  %v4751_v19 = vshll.u32 %v4748_v63, 16  ;;  %v4731_v9 = vsel %vm4729_vm0, %v11594_v17, 2102212464  ;;  %v11597_v17 = vld [vmem:[#allocation50_spill] sm:$0xff] }
 0x594   :  { %v4505_v14 = vmul.f32 %v4504_v25, %v4502_v44  ;;  %v4640_v7 = vshll.u32 %v10395_v21, 30  ;;  %v4750_v54 = vmul.u32 %v4746_v0, %v11593_v33  ;;  %v4753_v6 = vshll.u32 %v10393_v27, 16  ;;  %v11596_v44 = vld [vmem:[#allocation7_spill] sm:$0xff] }
 0x595   :  { %vm4755_vm14 = vc.u32 %v4747_v57, %v4751_v19  ;;  %v4757_v43 = vadd.s32 %v4751_v19, %v4747_v57  ;;  %v4771_v12 = vmul.u32 %v4767_v53, %v11593_v33  ;;  %v4773_v5 = vshll.u32 %v10398_v61, 16 }
 0x596   :  { %v4506_v26 = vxor.u32 2147483648, %v4505_v14  ;;  %v10416_v23 = vsub.s32 %v4637_v37, %v4640_v7  ;;  %v4756_v36 = vsel %vm4755_vm14, 1, %v11134_v31  ;;  %v4752_v29 = vshrl.u32 %v4748_v63, 16  ;;  %v11595_v63 = vld [vmem:[#allocation24_spill] sm:$0xff] }
 0x597   :  { %v4758_v55 = vadd.s32 %v4756_v36, %v4750_v54  ;;  %vm4759_vm12 = vc.u32 %v4757_v43, %v4753_v6  ;;  %v4769_v56 = vmul.u32 %v4767_v53, %v11592_v45  ;;  %v4772_v30 = vmul.u32 %v4768_v48, %v11593_v33  ;;  %v11599_v6 = vld [vmem:[#allocation48_spill] sm:$0xff] }
 0x598   :  { %v4507_v2 = vsel %vm4386_vm1, %v4506_v26, %v4505_v14  ;;  %vm4642_vm0 = vcmp.lt.s32.totalorder %v10416_v23, 0  ;;  %v4643_v38 = vsub.s32 0, %v10416_v23  ;;  %v4760_v60 = vsel %vm4759_vm12, 1, %v11134_v31 }
 0x599   :  { %v10429_v37 = vsel %vm10325_vm8, %v11582_v28, %v4507_v2  ;;  %v4762_v49 = vadd.s32 %v4760_v60, %v4758_v55  ;;  %v4775_v0 = vshll.u32 %v4771_v12, 16  ;;  %vm4777_vm1 = vc.u32 %v4769_v56, %v4773_v5 }
 0x59a   :  { %v4512_v16 = vmul.f32 %v10429_v37, %v10429_v37  ;;  %v4644_v46 = vsel %vm4642_vm0, %v4643_v38, %v10416_v23  ;;  %v4779_v45 = vadd.s32 %v4773_v5, %v4769_v56  ;;  %vm4541_vm9 = vcmp.lt.s32.totalorder %v11595_v63, 0 }
 0x59b   :  { %v4645_v53 = vclz %v4644_v46  ;;  %v4710_v25 = vshrl.u32 %v11115_v1, %v11596_v44  ;;  %v4763_v39 = vadd.s32 %v4762_v49, %v4752_v29  ;;  %v4778_v57 = vsel %vm4777_vm1, 1, %v11134_v31 }
 0x59c   :  { %v4513_v19 = vmul.f32 -0.001358992, %v4512_v16  ;;  %v4520_v14 = vmul.f32 -0.00019511016, %v4512_v16  ;;  %v4780_v48 = vadd.s32 %v4778_v57, %v4772_v30  ;;  %vm4781_vm8 = vc.u32 %v4779_v45, %v4775_v0 }
 0x59d   :  { %v4633_v33 = vadd.s32 %v10344_v22, %v10340_v3  ;;  %v5515_v7 = vadd.s32 4294967294, %v4645_v53  ;;  %vm11598_vm15 = vcmp.lt.s32.totalorder %v9792_v20, 1  ;;  %vm11600_vm4 = vcmp.lt.s32.totalorder %v9792_v20, 3 }
 0x59e   :  { %v4730_v54 = vsel %vm11598_vm15, %v4710_v25, %v11597_v17  ;;  %v4732_v43 = vsel %vm11600_vm4, %v11599_v6, %v4731_v9  ;;  %v4514_v26 = vadd.f32 0.041655596, %v4513_v19  ;;  %v4521_v36 = vadd.f32 0.008332121, %v4520_v14 }
 0x59f   :  { %v11601_v5 = vand.u32 2147483647, %v11595_v63  ;;  %v4754_v55 = vshrl.u32 %v10393_v27, 16  ;;  %v4782_v3 = vsel %vm4781_vm8, 1, %v11134_v31  ;;  %vm5516_vm14 = vcmp.lt.s32.totalorder %v5515_v7, 0 }
 0x5a0   :  { %v4663_v22 = vsub.s32 4, %v10395_v21  ;;  %v4774_v56 = vshrl.u32 %v10398_v61, 16  ;;  %v4784_v2 = vadd.s32 %v4782_v3, %v4780_v48  ;;  %v4515_v38 = vmul.f32 %v4514_v26, %v4512_v16  ;;  %v11605_v26 = vld [vmem:[#allocation6_spill] sm:$0xff] }
 0x5a1   :  { %vm10449_vm7 = vcmp.le.f32.partialorder %v11601_v5, 0.7853982  ;;  %v4522_v9 = vmul.f32 %v4521_v36, %v4512_v16  ;;  %v4648_v60 = vsel %vm5516_vm14, 0, %v5515_v7  ;;  %v10457_v49 = vadd.s32 %v4763_v39, %v4754_v55  ;;  %v11606_v36 = vld [vmem:[#allocation18_spill] sm:$0xff] }
 0x5a2   :  { %v4649_v30 = vsub.s32 32, %v4648_v60  ;;  %v4653_v46 = vsub.s32 4294967266, %v4648_v60  ;;  %v4776_v53 = vshrl.u32 %v4771_v12, 16  ;;  %v4785_v44 = vadd.s32 %v4784_v2, %v4774_v56 }
 0x5a3   :  { %v4516_v25 = vadd.f32 -0.4999988, %v4515_v38  ;;  %v4523_v57 = vadd.f32 -0.16666654, %v4522_v9  ;;  %v4733_v27 = vsel %vm4727_vm11, %v4730_v54, %v4732_v43  ;;  %v10461_v19 = vadd.s32 %v4779_v45, %v4775_v0  ;;  %v11607_v9 = vld [vmem:[#allocation40_spill] sm:$0xff] }
 0x5a4   :  { %v4650_v14 = vshll.u32 %v10416_v23, %v4648_v60  ;;  %v4651_v61 = vshrl.u32 %v4633_v33, %v4649_v30  ;;  %v4654_v48 = vadd.s32 127, %v4653_v46  ;;  %v4786_v17 = vadd.s32 %v4785_v44, %v4776_v53  ;;  %v11604_v33 = vld [vmem:[#allocation53_spill] sm:$0xff]  ;;  %v11608_v60 = vld [vmem:[#allocation26_spill] sm:$0xff] }
 0x5a5   :  { %v4517_v6 = vmul.f32 %v4516_v25, %v4512_v16  ;;  %v4524_v7 = vmul.f32 %v4523_v57, %v4512_v16  ;;  %v4664_v39 = vsel %vm4541_vm9, %v4663_v22, %v10395_v21  ;;  %vm4789_vm12 = vc.u32 %v10457_v49, %v10461_v19 }
 0x5a6   :  { %vm4527_vm0 = vweird.f32 %v11582_v28  ;;  %vm4530_vm11 = vcmp.lt.s32.totalorder %v10406_v47, 2  ;;  %v4652_v20 = vor.u32 %v4651_v61, %v4650_v14  ;;  %v4655_v12 = vshll.u32 %v4654_v48, 23  ;;  %v11610_v14 = vld [vmem:[#allocation37_spill] sm:$0xff] }
 0x5a7   :  { %v4790_v0 = vadd.s32 1, %v4786_v17  ;;  %v4518_v23 = vadd.f32 1.0, %v4517_v6  ;;  %v4525_v45 = vadd.f32 1.0, %v4524_v7  ;;  %v4787_v54 = vmul.u32 %v11604_v33, %v4733_v27 }
 0x5a8   :  { %vm4882_vm1 = vcmp.lt.s32.totalorder %v9884_v4, 2  ;;  %v4656_v16 = vor.u32 4788187, %v4655_v12  ;;  %v4666_v21 = vsel %vm10449_vm7, 0, %v4664_v39  ;;  %vm5193_vm8 = vcmp.lt.s32.totalorder %v10166_v11, 3 }
 0x5a9   :  { %v4791_v43 = vsel %vm4789_vm12, %v4790_v0, %v4786_v17  ;;  %v4896_v5 = vsel %vm4882_vm1, %v11606_v36, %v11605_v26  ;;  %v4526_v55 = vmul.f32 %v4525_v45, %v10429_v37  ;;  %v4535_v3 = vxor.u32 2147483648, %v4518_v23  ;;  %v11609_v37 = vld [vmem:[#allocation36_spill] sm:$0xff] }
 0x5aa   :  { %v4792_v22 = vadd.s32 %v4791_v43, %v4787_v54  ;;  %v4900_v56 = vand.u32 65535, %v4896_v5  ;;  %v4657_v2 = vand.u32 2147483647, %v4656_v16  ;;  %v4659_v38 = vcvt.s32.f32 %v4652_v20 }
 0x5ab   :  { %v4892_v30 = vsel %vm4882_vm1, %v11608_v60, %v11607_v9  ;;  %v4901_v46 = vshrl.u32 %v4896_v5, 16  ;;  %vm4531_vm15 = vcmp.eq.s32.totalorder %v10406_v47, 0  ;;  %v4532_v53 = vxor.u32 2147483648, %v4526_v55  ;;  %v11612_v60 = vld [vmem:[#allocation47_spill] sm:$0xff] }
 0x5ac   :  { %vm4534_vm4 = vcmp.eq.s32.totalorder %v10406_v47, 2  ;;  %v4793_v44 = vadd.s32 536870912, %v4792_v22  ;;  %v4660_v25 = vmul.f32 %v4659_v38, %v4657_v2  ;;  %v4683_v57 = vadd.s32 3, %v4666_v21 }
 0x5ad   :  { %v10488_v27 = vmul.u32 %v4901_v46, %v11609_v37  ;;  %v10491_v61 = vmul.u32 %v4900_v56, %v11610_v14  ;;  %v4533_v48 = vsel %vm4531_vm15, %v4518_v23, %v4532_v53  ;;  %v4536_v17 = vsel %vm4534_vm4, %v4535_v3, %v4526_v55 }
 0x5ae   :  { %v10493_v6 = vshrl.u32 %v4793_v44, 30  ;;  %v4923_v7 = vshrl.u32 %v4892_v30, 16  ;;  %v4537_v39 = vsel %vm4530_vm11, %v4533_v48, %v4536_v17  ;;  %v4661_v20 = vxor.u32 2147483648, %v4660_v25 }
 0x5af   :  { %v4902_v12 = vmul.u32 %v4900_v56, %v11609_v37  ;;  %v4906_v0 = vshll.u32 %v10488_v27, 16  ;;  %v4538_v45 = vsel %vm4527_vm0, nan, %v4537_v39  ;;  %v4905_v54 = vmul.u32 %v4901_v46, %v11610_v14  ;;  %v11613_v39 = vld [vmem:[#allocation51_spill] sm:$0xff] }
 0x5b0   :  { %v4795_v33 = vshll.u32 %v10493_v6, 30  ;;  %v4922_v23 = vand.u32 65535, %v4892_v30  ;;  %5531 = vmatmul.msk.f32.gmra.mxu0 %vm1382_vm6, %v4538_v45  ;;  %v4662_v16 = vsel %vm4541_vm9, %v4661_v20, %v4660_v25  ;;  %v4908_v47 = vshll.u32 %v10491_v61, 16 }
 0x5b1   :  { %vm4910_vm14 = vc.u32 %v4902_v12, %v4906_v0  ;;  %v4912_v21 = vadd.s32 %v4906_v0, %v4902_v12  ;;  %v10510_v43 = vsel %vm10449_vm7, %v11595_v63, %v4662_v16  ;;  %v10516_v36 = vmul.u32 %v4923_v7, %v11609_v37  ;;  %v11615_v12 = vld [vmem:[#allocation22_spill] sm:$0xff] }
 0x5b2   :  { %v10512_v28 = vsub.s32 %v4792_v22, %v4795_v33  ;;  %v4911_v26 = vsel %vm4910_vm14, 1, %v11134_v31  ;;  %v10522_v5 = vsel %vm5193_vm8, %v10376_v8, %v10389_v32  ;;  %v4667_v55 = vmul.f32 %v10510_v43, %v10510_v43  ;;  %v11611_v22 = vld [vmem:[#allocation23_spill] sm:$0xff]  ;;  %v11617_v33 = vld [vmem:[#allocation25_spill] sm:$0xff] }
 0x5b3   :  { %v10526_v3 = vand.u32 3, %v4683_v57  ;;  %vm4914_vm9 = vc.u32 %v4912_v21, %v4908_v47  ;;  %v4886_v56 = vsel %vm4884_vm3, %v11611_v22, 2102212464  ;;  %v4913_v2 = vadd.s32 %v4911_v26, %v4905_v54 }
 0x5b4   :  { %vm4797_vm7 = vcmp.lt.s32.totalorder %v10512_v28, 0  ;;  %v4798_v29 = vsub.s32 0, %v10512_v28  ;;  %v4668_v38 = vmul.f32 -0.001358992, %v4667_v55  ;;  %v4675_v9 = vmul.f32 -0.00019511016, %v4667_v55 }
 0x5b5   :  { %v4865_v32 = vshrl.u32 %v11115_v1, %v11612_v60  ;;  %v4915_v30 = vsel %vm4914_vm9, 1, %v11134_v31  ;;  %v4788_v46 = vadd.s32 %v10461_v19, %v10457_v49  ;;  %v4926_v44 = vmul.u32 %v4922_v23, %v11610_v14 }
 0x5b6   :  { %v4799_v53 = vsel %vm4797_vm7, %v4798_v29, %v10512_v28  ;;  %v4928_v25 = vshll.u32 %v10516_v36, 16  ;;  %v4669_v57 = vadd.f32 0.041655596, %v4668_v38  ;;  %v4676_v48 = vadd.f32 0.008332121, %v4675_v9 }
 0x5b7   :  { %v4800_v17 = vclz %v4799_v53  ;;  %vm11614_vm3 = vcmp.lt.s32.totalorder %v9884_v4, 1  ;;  %vm11616_vm12 = vcmp.lt.s32.totalorder %v9884_v4, 3  ;;  %v4907_v45 = vshrl.u32 %v10488_v27, 16 }
 0x5b8   :  { %v4885_v20 = vsel %vm11614_vm3, %v4865_v32, %v11613_v39  ;;  %v4887_v0 = vsel %vm11616_vm12, %v11615_v12, %v4886_v56  ;;  %v4917_v49 = vadd.s32 %v4915_v30, %v4913_v2  ;;  %v4924_v19 = vmul.u32 %v4922_v23, %v11609_v37 }
 0x5b9   :  { %vm4696_vm0 = vcmp.lt.s32.totalorder %v11617_v33, 0  ;;  %v4670_v54 = vmul.f32 %v4669_v57, %v4667_v55  ;;  %v4677_v16 = vmul.f32 %v4676_v48, %v4667_v55  ;;  %v5518_v47 = vadd.s32 4294967294, %v4800_v17 }
 0x5ba   :  { %v4818_v21 = vsub.s32 4, %v10493_v6  ;;  %v4927_v26 = vmul.u32 %v4923_v7, %v11610_v14  ;;  %v4930_v29 = vshll.u32 %v4926_v44, 16  ;;  %vm4932_vm11 = vc.u32 %v4924_v19, %v4928_v25 }
 0x5bb   :  { %v4934_v22 = vadd.s32 %v4928_v25, %v4924_v19  ;;  %v4671_v38 = vadd.f32 -0.4999988, %v4670_v54  ;;  %v4678_v9 = vadd.f32 -0.16666654, %v4677_v16  ;;  %vm5519_vm15 = vcmp.lt.s32.totalorder %v5518_v47, 0 }
 0x5bc   :  { %v4933_v27 = vsel %vm4932_vm11, 1, %v11134_v31  ;;  %vm4686_vm4 = vcmp.eq.s32.totalorder %v10526_v3, 0  ;;  %v4803_v37 = vsel %vm5519_vm15, 0, %v5518_v47  ;;  %v4918_v23 = vadd.s32 %v4917_v49, %v4907_v45 }
 0x5bd   :  { %v4935_v56 = vadd.s32 %v4933_v27, %v4927_v26  ;;  %vm4936_vm14 = vc.u32 %v4934_v22, %v4930_v29  ;;  %v4672_v2 = vmul.f32 %v4671_v38, %v4667_v55  ;;  %v4679_v60 = vmul.f32 %v4678_v9, %v4667_v55 }
 0x5be   :  { %vm4685_vm9 = vcmp.lt.s32.totalorder %v10526_v3, 2  ;;  %v4804_v32 = vsub.s32 32, %v4803_v37  ;;  %v4909_v14 = vshrl.u32 %v10491_v61, 16  ;;  %vm4682_vm7 = vweird.f32 %v11595_v63 }
 0x5bf   :  { %v4805_v7 = vshll.u32 %v10512_v28, %v4803_v37  ;;  %v4808_v30 = vsub.s32 4294967266, %v4803_v37  ;;  %v4929_v53 = vshrl.u32 %v10516_v36, 16  ;;  %v4937_v25 = vsel %vm4936_vm14, 1, %v11134_v31 }
 0x5c0   :  { %v4673_v57 = vadd.f32 1.0, %v4672_v2  ;;  %v4680_v48 = vadd.f32 1.0, %v4679_v60  ;;  %v4806_v17 = vshrl.u32 %v4788_v46, %v4804_v32  ;;  %v4939_v39 = vadd.s32 %v4937_v25, %v4935_v56 }
 0x5c1   :  { %v4809_v12 = vadd.s32 127, %v4808_v30  ;;  %v4888_v55 = vsel %vm4882_vm1, %v4885_v20, %v4887_v0  ;;  %v10562_v45 = vadd.s32 %v4918_v23, %v4909_v14  ;;  %v4931_v61 = vshrl.u32 %v4926_v44, 16  ;;  %v11618_v20 = vld [vmem:[#allocation35_spill] sm:$0xff] }
 0x5c2   :  { %v4681_v49 = vmul.f32 %v4680_v48, %v10510_v43  ;;  %v4690_v19 = vxor.u32 2147483648, %v4673_v57  ;;  %v4807_v28 = vor.u32 %v4806_v17, %v4805_v7  ;;  %v4940_v54 = vadd.s32 %v4939_v39, %v4929_v53  ;;  %v11623_v7 = vld [vmem:[#allocation12_spill] sm:$0xff]  ;;  %v11624_v39 = vld [vmem:[#allocation15_spill] sm:$0xff] }
 0x5c3   :  { %vm4689_vm3 = vcmp.eq.s32.totalorder %v10526_v3, 2  ;;  %v4810_v36 = vshll.u32 %v4809_v12, 23  ;;  %v4819_v46 = vsel %vm4696_vm0, %v4818_v21, %v10493_v6  ;;  %v10569_v16 = vadd.s32 %v4934_v22, %v4930_v29  ;;  %v11622_v3 = vld [vmem:[#allocation38_spill] sm:$0xff] }
 0x5c4   :  { %v4687_v47 = vxor.u32 2147483648, %v4681_v49  ;;  %v4941_v4 = vadd.s32 %v4940_v54, %v4931_v61  ;;  %v4942_v0 = vmul.u32 %v11618_v20, %v4888_v55  ;;  %vm5037_vm1 = vcmp.lt.s32.totalorder %v10044_v13, 2 }
 0x5c5   :  { %v4691_v44 = vsel %vm4689_vm3, %v4690_v19, %v4681_v49  ;;  %v4811_v43 = vor.u32 4788187, %v4810_v36  ;;  %vm4944_vm12 = vc.u32 %v10562_v45, %v10569_v16  ;;  %v5047_v26 = vsel %vm5037_vm1, %v10110_v50, %v10127_v58 }
 0x5c6   :  { %v4688_v6 = vsel %vm4686_vm4, %v4673_v57, %v4687_v47  ;;  %v4814_v21 = vcvt.s32.f32 %v4807_v28  ;;  %v4945_v29 = vadd.s32 1, %v4941_v4  ;;  %v5051_v22 = vsel %vm5037_vm1, %v10133_v18, %v10149_v34 }
 0x5c7   :  { %v4692_v38 = vsel %vm4685_vm9, %v4688_v6, %v4691_v44  ;;  %v4812_v9 = vand.u32 2147483647, %v4811_v43  ;;  %v5055_v27 = vand.u32 65535, %v5051_v22  ;;  %v5056_v37 = vshrl.u32 %v5051_v22, 16 }
 0x5c8   :  { %v4693_v23 = vsel %vm4682_vm7, nan, %v4692_v38  ;;  %v4946_v50 = vsel %vm4944_vm12, %v4945_v29, %v4941_v4  ;;  %v5077_v58 = vand.u32 65535, %v5047_v26  ;;  %v5078_v56 = vshrl.u32 %v5047_v26, 16 }
 0x5c9   :  { %5532 = vmatmul.msk.f32.gmra.mxu0 %vm1382_vm6, %v4693_v23  ;;  %v11619_v2 = vand.u32 2147483647, %v11617_v33  ;;  %v4815_v18 = vmul.f32 %v4814_v21, %v4812_v9  ;;  %v4947_v34 = vadd.s32 %v4946_v50, %v4942_v0  ;;  %v5058_v32 = vmul.u32 %v5056_v37, %v11622_v3 }
 0x5ca   :  { %v5204_v63 = vsel %vm5194_vm10, %v5190_v41, 1326507024  ;;  %v5059_v30 = vmul.u32 %v5055_v27, %v11623_v7  ;;  %v5080_v53 = vmul.u32 %v5078_v56, %v11622_v3  ;;  %v5057_v48 = vmul.u32 %v5055_v27, %v11622_v3 }
 0x5cb   :  { %vm10592_vm11 = vcmp.le.f32.partialorder %v11619_v2, 0.7853982  ;;  %v4816_v25 = vxor.u32 2147483648, %v4815_v18  ;;  %v4948_v57 = vadd.s32 536870912, %v4947_v34  ;;  %v5061_v17 = vshll.u32 %v5058_v32, 16 }
 0x5cc   :  { %v4821_v14 = vsel %vm10592_vm11, 0, %v4819_v46  ;;  %v5020_v12 = vshrl.u32 %v11115_v1, %v11624_v39  ;;  %v5060_v24 = vmul.u32 %v5056_v37, %v11623_v7  ;;  %v5063_v10 = vshll.u32 %v5059_v30, 16 }
 0x5cd   :  { %v5079_v41 = vmul.u32 %v5077_v58, %v11622_v3  ;;  %v4817_v55 = vsel %vm4696_vm0, %v4816_v25, %v4815_v18  ;;  %v10613_v61 = vshrl.u32 %v4948_v57, 30  ;;  %vm5065_vm15 = vc.u32 %v5057_v48, %v5061_v17 }
 0x5ce   :  { %v5067_v49 = vadd.s32 %v5061_v17, %v5057_v48  ;;  %v4820_v19 = vsel %vm10592_vm11, %v11617_v33, %v4817_v55  ;;  %v5066_v28 = vsel %vm5065_vm15, 1, %v11134_v31  ;;  %v5081_v54 = vmul.u32 %v5077_v58, %v11623_v7 }
 0x5cf   :  { %v5083_v36 = vshll.u32 %v5080_v53, 16  ;;  %v4822_v46 = vmul.f32 %v4820_v19, %v4820_v19  ;;  %v4838_v47 = vadd.s32 3, %v4821_v14  ;;  %v4950_v4 = vshll.u32 %v10613_v61, 30 }
 0x5d0   :  { %v5041_v20 = vsel %vm5039_vm5, %v10101_v42, 2102212464  ;;  %v5040_v0 = vsel %vm5036_vm13, %v5020_v12, %v10079_v51  ;;  %v5068_v44 = vadd.s32 %v5066_v28, %v5060_v24  ;;  %vm5069_vm0 = vc.u32 %v5067_v49, %v5063_v10  ;;  %v11627_v28 = vld [vmem:[#allocation44_spill] sm:$0xff] }
 0x5d1   :  { %vm5087_vm4 = vc.u32 %v5079_v41, %v5083_v36  ;;  %v4823_v43 = vmul.f32 -0.001358992, %v4822_v46  ;;  %v4830_v26 = vmul.f32 -0.00019511016, %v4822_v46  ;;  %v4951_v6 = vsub.s32 %v4947_v34, %v4950_v4  ;;  %v11625_v34 = vld [vmem:[#allocation32_spill] sm:$0xff] }
 0x5d2   :  { %v5082_v21 = vmul.u32 %v5078_v56, %v11623_v7  ;;  %v5070_v29 = vsel %vm5069_vm0, 1, %v11134_v31  ;;  %v5085_v22 = vshll.u32 %v5081_v54, 16  ;;  %v5088_v38 = vsel %vm5087_vm4, 1, %v11134_v31 }
 0x5d3   :  { %v5089_v9 = vadd.s32 %v5083_v36, %v5079_v41  ;;  %v4824_v27 = vadd.f32 0.041655596, %v4823_v43  ;;  %v4831_v42 = vadd.f32 0.008332121, %v4830_v26  ;;  %vm4952_vm5 = vcmp.lt.s32.totalorder %v4951_v6, 0 }
 0x5d4   :  { %v4953_v37 = vsub.s32 0, %v4951_v6  ;;  %v5062_v23 = vshrl.u32 %v5058_v32, 16  ;;  %v5072_v51 = vadd.s32 %v5070_v29, %v5068_v44  ;;  %v5090_v50 = vadd.s32 %v5088_v38, %v5082_v21  ;;  %v11628_v21 = vld [vmem:[#allocation14_spill] sm:$0xff] }
 0x5d5   :  { %vm5091_vm13 = vc.u32 %v5089_v9, %v5085_v22  ;;  %v4825_v58 = vmul.f32 %v4824_v27, %v4822_v46  ;;  %v4832_v2 = vmul.f32 %v4831_v42, %v4822_v46  ;;  %vm11626_vm14 = vcmp.lt.s32.totalorder %v10044_v13, 3 }
 0x5d6   :  { %v4954_v60 = vsel %vm4952_vm5, %v4953_v37, %v4951_v6  ;;  %v5092_v18 = vsel %vm5091_vm13, 1, %v11134_v31  ;;  %v5042_v3 = vsel %vm11626_vm14, %v11625_v34, %v5041_v20  ;;  %v5064_v14 = vshrl.u32 %v5059_v30, 16 }
 0x5d7   :  { %v4955_v56 = vclz %v4954_v60  ;;  %v5073_v7 = vadd.s32 %v5072_v51, %v5062_v23  ;;  %v4826_v25 = vadd.f32 -0.4999988, %v4825_v58  ;;  %v4833_v57 = vadd.f32 -0.16666654, %v4832_v2  ;;  %v11629_v58 = vld [vmem:[#allocation33_spill] sm:$0xff] }
 0x5d8   :  { %v5084_v48 = vshrl.u32 %v5080_v53, 16  ;;  %v5094_v17 = vadd.s32 %v5092_v18, %v5090_v50  ;;  %v5205_v32 = vsel %vm5193_vm8, %v10363_v40, %v5204_v63  ;;  %v4839_v39 = vand.u32 3, %v4838_v47 }
 0x5d9   :  { %v5521_v12 = vadd.s32 4294967294, %v4955_v56  ;;  %v5086_v24 = vshrl.u32 %v5081_v54, 16  ;;  %v4827_v10 = vmul.f32 %v4826_v25, %v4822_v46  ;;  %v4834_v41 = vmul.f32 %v4833_v57, %v4822_v46 }
 0x5da   :  { %v10637_v55 = vadd.s32 %v5073_v7, %v5064_v14  ;;  %v5095_v49 = vadd.s32 %v5094_v17, %v5084_v48  ;;  %vm4837_vm9 = vweird.f32 %v11617_v33  ;;  %v5043_v30 = vsel %vm5037_vm1, %v5040_v0, %v5042_v3  ;;  %v11630_v7 = vld [vmem:[#allocation34_spill] sm:$0xff] }
 0x5db   :  { %vm5522_vm7 = vcmp.lt.s32.totalorder %v5521_v12, 0  ;;  %v10642_v53 = vadd.s32 %v5089_v9, %v5085_v22  ;;  %vm4851_vm3 = vcmp.lt.s32.totalorder %v11627_v28, 0  ;;  %v4828_v36 = vadd.f32 1.0, %v4827_v10 }
 0x5dc   :  { %v4835_v40 = vadd.f32 1.0, %v4834_v41  ;;  %v4958_v63 = vsel %vm5522_vm7, 0, %v5521_v12  ;;  %v5096_v47 = vadd.s32 %v5095_v49, %v5086_v24  ;;  %vm4841_vm12 = vcmp.eq.s32.totalorder %v4839_v39, 0 }
 0x5dd   :  { %v4943_v54 = vadd.s32 %v10569_v16, %v10562_v45  ;;  %v4959_v46 = vsub.s32 32, %v4958_v63  ;;  %v4963_v4 = vsub.s32 4294967266, %v4958_v63  ;;  %v4845_v44 = vxor.u32 2147483648, %v4828_v36 }
 0x5de   :  { %v4836_v20 = vmul.f32 %v4835_v40, %v4820_v19  ;;  %vm5099_vm11 = vc.u32 %v10637_v55, %v10642_v53  ;;  %v5100_v13 = vadd.s32 1, %v5096_v47  ;;  %v4960_v0 = vshll.u32 %v4951_v6, %v4958_v63 }
 0x5df   :  { %v4961_v43 = vshrl.u32 %v4943_v54, %v4959_v46  ;;  %v4964_v26 = vadd.s32 127, %v4963_v4  ;;  %v5097_v29 = vmul.u32 %v11628_v21, %v5043_v30  ;;  %vm4844_vm1 = vcmp.eq.s32.totalorder %v4839_v39, 2 }
 0x5e0   :  { %v4842_v22 = vxor.u32 2147483648, %v4836_v20  ;;  %v4973_v38 = vsub.s32 4, %v10613_v61  ;;  %v5101_v9 = vsel %vm5099_vm11, %v5100_v13, %v5096_v47  ;;  %vm5192_vm15 = vcmp.lt.s32.totalorder %v10166_v11, 2 }
 0x5e1   :  { %v4962_v27 = vor.u32 %v4961_v43, %v4960_v0  ;;  %v4965_v45 = vshll.u32 %v4964_v26, 23  ;;  %v5102_v16 = vadd.s32 %v5101_v9, %v5097_v29  ;;  %vm4840_vm0 = vcmp.lt.s32.totalorder %v4839_v39, 2 }
 0x5e2   :  { %v4843_v19 = vsel %vm4841_vm12, %v4828_v36, %v4842_v22  ;;  %v4846_v42 = vsel %vm4844_vm1, %v4845_v44, %v4836_v20  ;;  %v5206_v6 = vsel %vm5192_vm15, %v10404_v59, %v5205_v32  ;;  %v5202_v50 = vsel %vm5192_vm15, %v10384_v62, %v10522_v5 }
 0x5e3   :  { %v4847_v37 = vsel %vm4840_vm0, %v4843_v19, %v4846_v42  ;;  %v4966_v23 = vor.u32 4788187, %v4965_v45  ;;  %v5103_v51 = vadd.s32 536870912, %v5102_v16  ;;  %v5209_v2 = vshrl.u32 %v11629_v58, 16 }
 0x5e4   :  { %v4848_v60 = vsel %vm4837_vm9, nan, %v4847_v37  ;;  %v5210_v18 = vand.u32 65535, %v5206_v6  ;;  %v5211_v56 = vshrl.u32 %v5206_v6, 16  ;;  %v4969_v3 = vcvt.s32.f32 %v4962_v27 }
 0x5e5   :  { %5533 = vmatmul.msk.f32.gmra.mxu0 %vm1382_vm6, %v4848_v60  ;;  %v4967_v34 = vand.u32 2147483647, %v4966_v23  ;;  %v4974_v59 = vsel %vm4851_vm3, %v4973_v38, %v10613_v61  ;;  %v10667_v14 = vshrl.u32 %v5103_v51, 30  ;;  %v5233_v5 = vshrl.u32 %v5202_v50, 16 }
 0x5e6   :  { %v5213_v25 = vmul.u32 %v5211_v56, %v11630_v7  ;;  %v10670_v62 = vmul.u32 %v5210_v18, %v5209_v2  ;;  %v11631_v33 = vand.u32 2147483647, %v11627_v28  ;;  %v5212_v61 = vmul.u32 %v5210_v18, %v11630_v7 }
 0x5e7   :  { %v4970_v48 = vmul.f32 %v4969_v3, %v4967_v34  ;;  %v5105_v17 = vshll.u32 %v10667_v14, 30  ;;  %v5215_v10 = vmul.u32 %v5211_v56, %v5209_v2  ;;  %v5232_v41 = vand.u32 65535, %v5202_v50 }
 0x5e8   :  { %vm10674_vm4 = vcmp.le.f32.partialorder %v11631_v33, 0.7853982  ;;  %v5216_v39 = vshll.u32 %v5213_v25, 16  ;;  %v5218_v49 = vshll.u32 %v10670_v62, 16  ;;  %v5235_v36 = vmul.u32 %v5233_v5, %v11630_v7 }
 0x5e9   :  { %v4976_v32 = vsel %vm10674_vm4, 0, %v4974_v59  ;;  %v4971_v12 = vxor.u32 2147483648, %v4970_v48  ;;  %v5106_v24 = vsub.s32 %v5102_v16, %v5105_v17  ;;  %v5234_v43 = vmul.u32 %v5232_v41, %v11630_v7 }
 0x5ea   :  { %vm5220_vm5 = vc.u32 %v5212_v61, %v5216_v39  ;;  %v5222_v30 = vadd.s32 %v5216_v39, %v5212_v61  ;;  %v4993_v20 = vadd.s32 3, %v4976_v32  ;;  %v5236_v26 = vmul.u32 %v5232_v41, %v5209_v2 }
 0x5eb   :  { %v4972_v40 = vsel %vm4851_vm3, %v4971_v12, %v4970_v48  ;;  %vm5107_vm13 = vcmp.lt.s32.totalorder %v5106_v24, 0  ;;  %v5108_v63 = vsub.s32 0, %v5106_v24  ;;  %v5221_v47 = vsel %vm5220_vm5, 1, %v11134_v31 }
 0x5ec   :  { %v4975_v54 = vsel %vm10674_vm4, %v11627_v28, %v4972_v40  ;;  %v5223_v46 = vadd.s32 %v5221_v47, %v5215_v10  ;;  %vm5224_vm14 = vc.u32 %v5222_v30, %v5218_v49  ;;  %v5238_v21 = vshll.u32 %v5235_v36, 16 }
 0x5ed   :  { %v4977_v4 = vmul.f32 %v4975_v54, %v4975_v54  ;;  %v5109_v44 = vsel %vm5107_vm13, %v5108_v63, %v5106_v24  ;;  %v5225_v13 = vsel %vm5224_vm14, 1, %v11134_v31  ;;  %v5098_v38 = vadd.s32 %v10642_v53, %v10637_v55 }
 0x5ee   :  { %v5110_v0 = vclz %v5109_v44  ;;  %v5175_v9 = vshrl.u32 %v11115_v1, %v10178_v52  ;;  %v5196_v45 = vsel %vm5194_vm10, %v10376_v8, 2102212464  ;;  %v5227_v16 = vadd.s32 %v5225_v13, %v5223_v46 }
 0x5ef   :  { %v4978_v29 = vmul.f32 -0.001358992, %v4977_v4  ;;  %v4985_v22 = vmul.f32 -0.00019511016, %v4977_v4  ;;  %vm5242_vm9 = vc.u32 %v5234_v43, %v5238_v21  ;;  %v5217_v37 = vshrl.u32 %v5213_v25, 16 }
 0x5f0   :  { %v5524_v27 = vadd.s32 4294967294, %v5110_v0  ;;  %v5195_v6 = vsel %vm5191_vm2, %v5175_v9, %v10280_v35  ;;  %v5237_v23 = vmul.u32 %v5233_v5, %v5209_v2  ;;  %v5240_v55 = vshll.u32 %v5236_v26, 16 }
 0x5f1   :  { %v4979_v19 = vadd.f32 0.041655596, %v4978_v29  ;;  %v4986_v42 = vadd.f32 0.008332121, %v4985_v22  ;;  %v5243_v53 = vsel %vm5242_vm9, 1, %v11134_v31  ;;  %v5244_v50 = vadd.s32 %v5238_v21, %v5234_v43  ;;  %v11634_v21 = vld [vmem:[#allocation55_spill] sm:$0xff] }
 0x5f2   :  { %vm5525_vm7 = vcmp.lt.s32.totalorder %v5524_v27, 0  ;;  %v5228_v18 = vadd.s32 %v5227_v16, %v5217_v37  ;;  %v5245_v56 = vadd.s32 %v5243_v53, %v5237_v23  ;;  %v5219_v59 = vshrl.u32 %v10670_v62, 16 }
 0x5f3   :  { %v4980_v1 = vmul.f32 %v4979_v19, %v4977_v4  ;;  %v4987_v52 = vmul.f32 %v4986_v42, %v4977_v4  ;;  %v5113_v51 = vsel %vm5525_vm7, 0, %v5524_v27  ;;  %vm5246_vm10 = vc.u32 %v5244_v50, %v5240_v55 }
 0x5f4   :  { %v5114_v60 = vsub.s32 32, %v5113_v51  ;;  %v5118_v8 = vsub.s32 4294967266, %v5113_v51  ;;  %v5115_v35 = vshll.u32 %v5106_v24, %v5113_v51  ;;  %v5247_v2 = vsel %vm5246_vm10, 1, %v11134_v31 }
 0x5f5   :  { %v4981_v34 = vadd.f32 -0.4999988, %v4980_v1  ;;  %v4988_v3 = vadd.f32 -0.16666654, %v4987_v52  ;;  %v5239_v57 = vshrl.u32 %v5235_v36, 16  ;;  %v5249_v48 = vadd.s32 %v5247_v2, %v5245_v56 }
 0x5f6   :  { %v5116_v7 = vshrl.u32 %v5098_v38, %v5114_v60  ;;  %v5119_v25 = vadd.s32 127, %v5118_v8  ;;  %v5197_v61 = vsel %vm5193_vm8, %v10284_v15, %v5196_v45  ;;  %v10708_v39 = vadd.s32 %v5228_v18, %v5219_v59 }
 0x5f7   :  { %v4982_v5 = vmul.f32 %v4981_v34, %v4977_v4  ;;  %v4989_v33 = vmul.f32 %v4988_v3, %v4977_v4  ;;  %v5241_v10 = vshrl.u32 %v5236_v26, 16  ;;  %v5250_v24 = vadd.s32 %v5249_v48, %v5239_v57 }
 0x5f8   :  { %v5117_v17 = vor.u32 %v5116_v7, %v5115_v35  ;;  %v5120_v32 = vshll.u32 %v5119_v25, 23  ;;  %v4994_v41 = vand.u32 3, %v4993_v20  ;;  %v5248_v30 = vadd.s32 %v5244_v50, %v5240_v55 }
 0x5f9   :  { %v4983_v12 = vadd.f32 1.0, %v4982_v5  ;;  %v4990_v62 = vadd.f32 1.0, %v4989_v33  ;;  %v5198_v36 = vsel %vm5192_vm15, %v5195_v6, %v5197_v61  ;;  %v5251_v63 = vadd.s32 %v5250_v24, %v5241_v10 }
 0x5fa   :  { %v5121_v49 = vor.u32 4788187, %v5120_v32  ;;  %v5124_v46 = vcvt.s32.f32 %v5117_v17  ;;  %vm5254_vm2 = vc.u32 %v10708_v39, %v5248_v30  ;;  %vm4996_vm8 = vcmp.eq.s32.totalorder %v4994_v41, 0 }
 0x5fb   :  { %v4991_v31 = vmul.f32 %v4990_v62, %v4975_v54  ;;  %v5000_v40 = vxor.u32 2147483648, %v4983_v12  ;;  %v5255_v4 = vadd.s32 1, %v5251_v63  ;;  %vm4999_vm3 = vcmp.eq.s32.totalorder %v4994_v41, 2 }
 0x5fc   :  { %v5122_v47 = vand.u32 2147483647, %v5121_v49  ;;  %v5252_v13 = vmul.u32 %v11629_v58, %v5198_v36  ;;  %vm4995_vm12 = vcmp.lt.s32.totalorder %v4994_v41, 2  ;;  %vm4992_vm11 = vweird.f32 %v11627_v28 }
 0x5fd   :  { %v4997_v15 = vxor.u32 2147483648, %v4991_v31  ;;  %v5001_v0 = vsel %vm4999_vm3, %v5000_v40, %v4991_v31  ;;  %v5256_v54 = vsel %vm5254_vm2, %v5255_v4, %v5251_v63  ;;  %vm5006_vm1 = vcmp.lt.s32.totalorder %v11634_v21, 0 }
 0x5fe   :  { %v5125_v44 = vmul.f32 %v5124_v46, %v5122_v47  ;;  %v5257_v26 = vadd.s32 %v5256_v54, %v5252_v13  ;;  %v11635_v22 = vand.u32 2147483647, %v11634_v21  ;;  %v5128_v9 = vsub.s32 4, %v10667_v14 }
 0x5ff   :  { %v4998_v20 = vsel %vm4996_vm8, %v4983_v12, %v4997_v15  ;;  %v5253_v57 = vadd.s32 %v5248_v30, %v10708_v39  ;;  %vm5147_vm9 = vweird.f32 %v11634_v21  ;;  %v10738_v39 = vld [vmem:[%s10807_s10] ss:$0 sm:$0xff]  ;;  %v5363_v30 = vpop.f32.mrf.mxu0  ;;  %vm5387_vm7 = vcmask 64512  }
 0x600   :  { %v5002_v11 = vsel %vm4995_vm12, %v4998_v20, %v5001_v0  ;;  %v5126_v43 = vxor.u32 2147483648, %v5125_v44  ;;  %vm10719_vm15 = vcmp.le.f32.partialorder %v11635_v22, 0.7853982  ;;  %v5258_v27 = vadd.s32 536870912, %v5257_v26 }
 0x601   :  { %v5003_v29 = vsel %vm4992_vm11, nan, %v5002_v11  ;;  %v5129_v19 = vsel %vm5006_vm1, %v5128_v9, %v10667_v14  ;;  %v5364_v63 = vadd.f32 %v10738_v39, %v5363_v30 }
 0x602   :  { %5534 = vmatmul.msk.f32.gmra.mxu0 %vm1382_vm6, %v5003_v29  ;;  %v5127_v58 = vsel %vm5006_vm1, %v5126_v43, %v5125_v44  ;;  %v10727_v16 = vshrl.u32 %v5258_v27, 30  ;;  %v5131_v1 = vsel %vm10719_vm15, 0, %v5129_v19  ;;  %v11638_v44 = vld [vmem:[#allocation27_spill] sm:$0xff] }
 0x603   :  { %v5130_v28 = vsel %vm10719_vm15, %v11634_v21, %v5127_v58  ;;  %v5148_v18 = vadd.s32 3, %v5131_v1  ;;  %5388 = vst.msk [vmem:[%s10808_s11] sm:$0xff] %vm5387_vm7, %v5364_v63  ;;  %vm5161_vm10 = vcmp.lt.s32.totalorder %v11638_v44, 0  ;;  %v11639_v20 = vand.u32 2147483647, %v11638_v44 }
 0x604   :  { %v5132_v45 = vmul.f32 %v5130_v28, %v5130_v28  ;;  %v5260_v37 = vshll.u32 %v10727_v16, 30  ;;  %v5283_v43 = vsub.s32 4, %v10727_v16  ;;  %vm5302_vm11 = vweird.f32 %v11638_v44 }
 0x605   :  { %v5149_v25 = vand.u32 3, %v5148_v18  ;;  %vm10749_vm2 = vcmp.le.f32.partialorder %v11639_v20, 0.7853982 }
 0x606   :  { %v5133_v42 = vmul.f32 -0.001358992, %v5132_v45  ;;  %v5140_v6 = vmul.f32 -0.00019511016, %v5132_v45  ;;  %v5261_v53 = vsub.s32 %v5257_v26, %v5260_v37  ;;  %v5284_v38 = vsel %vm5161_vm10, %v5283_v43, %v10727_v16 }
 0x607   :  { %vm5151_vm5 = vcmp.eq.s32.totalorder %v5149_v25, 0  ;;  %vm5154_vm13 = vcmp.eq.s32.totalorder %v5149_v25, 2  ;;  %vm5150_vm14 = vcmp.lt.s32.totalorder %v5149_v25, 2  ;;  %v5286_v27 = vsel %vm10749_vm2, 0, %v5284_v38 }
 0x608   :  { %v5134_v23 = vadd.f32 0.041655596, %v5133_v42  ;;  %v5141_v55 = vadd.f32 0.008332121, %v5140_v6  ;;  %vm5262_vm0 = vcmp.lt.s32.totalorder %v5261_v53, 0  ;;  %v5263_v50 = vsub.s32 0, %v5261_v53 }
 0x609   :  { %v5303_v6 = vadd.s32 3, %v5286_v27 }
 0x60a   :  { %v5135_v52 = vmul.f32 %v5134_v23, %v5132_v45  ;;  %v5142_v51 = vmul.f32 %v5141_v55, %v5132_v45  ;;  %v5264_v56 = vsel %vm5262_vm0, %v5263_v50, %v5261_v53  ;;  %v5366_v13 = vpop.f32.mrf.mxu0 }
 0x60b   :  { %v5265_v34 = vclz %v5264_v56  ;;  %v5367_v11 = vadd.f32 %v10738_v39, %v5366_v13  ;;  %v5304_v1 = vand.u32 3, %v5303_v6 }
 0x60c   :  { %v5136_v60 = vadd.f32 -0.4999988, %v5135_v52  ;;  %v5143_v8 = vadd.f32 -0.16666654, %v5142_v51 }
 0x60d   :  { %v5527_v59 = vadd.s32 4294967294, %v5265_v34  ;;  %5389 = vst.msk [vmem:[%s10808_s11 + $0x8] sm:$0xff] %vm5387_vm7, %v5367_v11  ;;  %vm5306_vm8 = vcmp.eq.s32.totalorder %v5304_v1, 0  ;;  %vm5309_vm3 = vcmp.eq.s32.totalorder %v5304_v1, 2  ;;  %vm5305_vm12 = vcmp.lt.s32.totalorder %v5304_v1, 2 }
 0x60e   :  { %v5137_v14 = vmul.f32 %v5136_v60, %v5132_v45  ;;  %v5144_v3 = vmul.f32 %v5143_v8, %v5132_v45 }
 0x60f   :  { %vm5528_vm4 = vcmp.lt.s32.totalorder %v5527_v59, 0 }
 0x610   :  { %v5138_v35 = vadd.f32 1.0, %v5137_v14  ;;  %v5145_v7 = vadd.f32 1.0, %v5144_v3  ;;  %v5268_v33 = vsel %vm5528_vm4, 0, %v5527_v59 }
 0x611   :  { %v5269_v48 = vsub.s32 32, %v5268_v33  ;;  %v5273_v17 = vsub.s32 4294967266, %v5268_v33  ;;  %v5270_v61 = vshll.u32 %v5261_v53, %v5268_v33 }
 0x612   :  { %v5146_v2 = vmul.f32 %v5145_v7, %v5130_v28  ;;  %v5155_v5 = vxor.u32 2147483648, %v5138_v35 }
 0x613   :  { %v5271_v12 = vshrl.u32 %v5253_v57, %v5269_v48  ;;  %v5274_v62 = vadd.s32 127, %v5273_v17 }
 0x614   :  { %v5152_v32 = vxor.u32 2147483648, %v5146_v2  ;;  %v5156_v24 = vsel %vm5154_vm13, %v5155_v5, %v5146_v2 }
 0x615   :  { %v5272_v49 = vor.u32 %v5271_v12, %v5270_v61  ;;  %v5275_v31 = vshll.u32 %v5274_v62, 23 }
 0x616   :  { %v5153_v10 = vsel %vm5151_vm5, %v5138_v35, %v5152_v32 }
 0x617   :  { %v5157_v41 = vsel %vm5150_vm14, %v5153_v10, %v5156_v24  ;;  %v5276_v36 = vor.u32 4788187, %v5275_v31  ;;  %v5279_v46 = vcvt.s32.f32 %v5272_v49 }
 0x618   :  { %v5158_v40 = vsel %vm5147_vm9, nan, %v5157_v41 }
 0x619   :  { %5535 = vmatmul.msk.f32.gmra.mxu0 %vm1382_vm6, %v5158_v40  ;;  %v5277_v47 = vand.u32 2147483647, %v5276_v36 }
 0x61b   :  { %v5280_v15 = vmul.f32 %v5279_v46, %v5277_v47 }
 0x61d   :  { %v5281_v4 = vxor.u32 2147483648, %v5280_v15 }
 0x61f   :  { %v5282_v54 = vsel %vm5161_vm10, %v5281_v4, %v5280_v15 }
 0x620   :  { %v5285_v26 = vsel %vm10749_vm2, %v11638_v44, %v5282_v54 }
 0x621   :  { %v5287_v21 = vmul.f32 %v5285_v26, %v5285_v26 }
 0x623   :  { %v5288_v29 = vmul.f32 -0.001358992, %v5287_v21  ;;  %v5295_v22 = vmul.f32 -0.00019511016, %v5287_v21 }
 0x625   :  { %v5289_v58 = vadd.f32 0.041655596, %v5288_v29  ;;  %v5296_v9 = vadd.f32 0.008332121, %v5295_v22 }
 0x627   :  { %v5290_v28 = vmul.f32 %v5289_v58, %v5287_v21  ;;  %v5297_v45 = vmul.f32 %v5296_v9, %v5287_v21 }
 0x629   :  { %v5291_v19 = vadd.f32 -0.4999988, %v5290_v28  ;;  %v5298_v42 = vadd.f32 -0.16666654, %v5297_v45 }
 0x62b   :  { %v5292_v37 = vmul.f32 %v5291_v19, %v5287_v21  ;;  %v5299_v23 = vmul.f32 %v5298_v42, %v5287_v21 }
 0x62d   :  { %v5293_v55 = vadd.f32 1.0, %v5292_v37  ;;  %v5300_v53 = vadd.f32 1.0, %v5299_v23  ;;  %v5369_v52 = vpop.f32.mrf.mxu0 }
 0x62e   :  { %v5370_v16 = vadd.f32 %v10738_v39, %v5369_v52 }
 0x62f   :  { %v5301_v51 = vmul.f32 %v5300_v53, %v5285_v26  ;;  %v5310_v50 = vxor.u32 2147483648, %v5293_v55 }
 0x630   :  { %5390 = vst.msk [vmem:[%s10808_s11 + $0x10] sm:$0xff] %vm5387_vm7, %v5370_v16 }
 0x631   :  { %v5307_v60 = vxor.u32 2147483648, %v5301_v51  ;;  %v5311_v18 = vsel %vm5309_vm3, %v5310_v50, %v5301_v51 }
 0x633   :  { %v5308_v8 = vsel %vm5306_vm8, %v5293_v55, %v5307_v60 }
 0x634   :  { %v5312_v56 = vsel %vm5305_vm12, %v5308_v8, %v5311_v18 }
 0x635   :  { %v5313_v34 = vsel %vm5302_vm11, nan, %v5312_v56 }
 0x636   :  { %5536 = vmatmul.msk.f32.gmra.mxu0 %vm1382_vm6, %v5313_v34 }
 0x646   :  { %v5372_v14 = vpop.f32.mrf.mxu0 }
 0x647   :  { %v5373_v3 = vadd.f32 %v10738_v39, %v5372_v14 }
 0x649   :  { %5391 = vst.msk [vmem:[%s10808_s11 + $0x18] sm:$0xff] %vm5387_vm7, %v5373_v3 }
 0x662   :  { %v5375_v59 = vpop.f32.mrf.mxu0 }
 0x663   :  { %v5376_v35 = vadd.f32 %v10738_v39, %v5375_v59 }
 0x665   :  { %5392 = vst.msk [vmem:[%s10808_s11 + $0x20] sm:$0xff] %vm5387_vm7, %v5376_v35 }
 0x67f   :  { %v5378_v7 = vpop.f32.mrf.mxu0 }
 0x680   :  { %v5379_v25 = vadd.f32 %v10738_v39, %v5378_v7 }
 0x682   :  { %5393 = vst.msk [vmem:[%s10808_s11 + $0x28] sm:$0xff] %vm5387_vm7, %v5379_v25 }
 0x696   :  { %v5381_v2 = vpop.f32.mrf.mxu0 }
 0x697   :  { %v5382_v5 = vadd.f32 %v10738_v39, %v5381_v2 }
 0x699   :  { %5394 = vst.msk [vmem:[%s10808_s11 + $0x30] sm:$0xff] %vm5387_vm7, %v5382_v5 }
 0x6b3   :  { %v5384_v33 = vpop.f32.mrf.mxu0 }
 0x6b4   :  { %v5385_v57 = vadd.f32 %v10738_v39, %v5384_v33 }
 0x6b6   :  { %5395 = vst.msk [vmem:[%s10808_s11 + $0x38] sm:$0xff] %vm5387_vm7, %v5385_v57 }
 0x6b7   :  { %5400 = vsyncpa [#allocation3], 1 }

</bundles_post_ra>
